<compile_context>
chip_gen: v7x
topology: tpu7x:2x2x1
jax: 0.10.0
libtpu: 0.0.40
codegen_flags: <defaults>
</compile_context>

<pallas_src>
import jax
import jax.numpy as jnp
from jax.experimental import pallas as pl
from jax.experimental.pallas import tpu as pltpu


TILE = 256   # square tile: sublane axis multiple of 8, lane axis multiple of 128


def multi_power_kernel(params_ref, ps_row_ref, eta_row_ref, ps_col_ref, dlr_row_ref,
                       out_ref, acc_ref, eta_pow_ref):
    """Fold-packed grid = (ceil(nj/2), nj + 1).

    params_ref  (SMEM, (7,))          : [A, B, C, alpha, beta, gamma, L0] (scalar prefetch)
    ps_row_ref  (VMEM, (1, T))        : partial_sum, current column block (lane layout)
    eta_row_ref (VMEM, (1, T))        : learning-rate schedule, current column block
    ps_col_ref  (VMEM, (T, 1))        : partial_sum, current row block (sublane layout)
    dlr_row_ref (VMEM, (1, T))        : diff_lr (zero-padded), current row block (lane layout)
    out_ref     (VMEM, (1, T))        : predicted loss (same block across the column's steps)
    acc_ref     (VMEM scratch, (1,T)) : running sum_i diff_lr[i] * power[i, j]
    eta_pow_ref (VMEM scratch, (1,T)) : eta[j]^(-gamma), hoisted once per column block
    """
    r = pl.program_id(0)
    s = pl.program_id(1)
    nj = pl.num_programs(1) - 1

    # Fold bookkeeping: column r for s <= r, column nj-1-r for s > r.
    # A column's diagonal tile is its last step, so "diag" doubles as "finalize".
    is_init = jnp.logical_or(s == 0, s == r + 1)
    is_diag = jnp.logical_or(s == r, s == nj)

    C = params_ref[2]
    beta = params_ref[4]
    gamma = params_ref[5]

    @pl.when(is_init)
    def _init():
        acc_ref[...] = jnp.zeros_like(acc_ref)
        # Hoisted per-column EUP work: reused by every row block of this column.
        eta_pow_ref[...] = eta_row_ref[...] ** (-gamma)

    def accumulate(frag):
        x_power = eta_pow_ref[...] * frag                       # (T, T)
        power = 1.0 - (1.0 + C * x_power) ** (-beta)            # (T, T), EUP-bound
        # Contraction over i on the idle MXU: (1,T) @ (T,T) -> (1,T), f32 accumulate.
        acc_ref[...] += jax.lax.dot_general(
            dlr_row_ref[...], power,
            dimension_numbers=(((1,), (0,)), ((), ())),
            preferred_element_type=jnp.float32,
            precision=jax.lax.Precision.HIGHEST)

    @pl.when(jnp.logical_not(is_diag))
    def _off_diag():
        # Strictly above the diagonal: every row index < every column index,
        # so no mask machinery at all.
        accumulate(ps_row_ref[...] - ps_col_ref[...])

    @pl.when(is_diag)
    def _diag():
        # Tile bases cancel on the diagonal tile -> grid-invariant local mask.
        # Masking frag (not power) keeps the pow base at 1.0 in the masked region,
        # so power is exactly 0 there and no NaNs reach the MXU for valid lanes.
        ti = ps_col_ref.shape[0]
        tj = ps_row_ref.shape[1]
        row = jax.lax.broadcasted_iota(jnp.int32, (ti, tj), 0)
        col = jax.lax.broadcasted_iota(jnp.int32, (ti, tj), 1)
        frag = jnp.where(row < col, ps_row_ref[...] - ps_col_ref[...], 0.0)
        accumulate(frag)

    @pl.when(is_diag)
    def _finalize():
        A = params_ref[0]
        B = params_ref[1]
        alpha = params_ref[3]
        L0 = params_ref[6]
        const_term = A * ps_row_ref[...] ** (-alpha) + L0        # (1, T)
        out_ref[...] = const_term - B * acc_ref[...]


def _round_up(x, m):
    return ((x + m - 1) // m) * m


def multi_power(step, eta, params):
    """step, eta: (n,) float arrays; params: (7,) [A, B, C, alpha, beta, gamma, L0]."""
    n = eta.shape[0]
    step = step.astype(jnp.float32)
    eta = eta.astype(jnp.float32)
    params = params.astype(jnp.float32)

    # --- O(n) prefix-sum / diff setup (plain-JAX glue) ---
    diff_lr = eta[:-1] - eta[1:]
    ext = jnp.concatenate([step[:1], step, step[-1:]])
    step_diff = ext[2:] - ext[:-2]
    partial_sum = jnp.cumsum(0.5 * eta * step_diff) + 0.5 * eta[0] * step[0]

    # --- pad to a lane-dense multiple of the tile size ---
    n_pad = _round_up(n, TILE)
    pad = n_pad - n
    # ps/eta padded with 1.0 (finite const_term in trimmed lanes); diff_lr padded
    # with 0.0 so padded rows contribute nothing.  Padded rows never hit a valid
    # column unmasked (they lie at/below the diagonal there), so valid lanes stay
    # NaN-free regardless of pad values.
    ps_pad = jnp.pad(partial_sum, (0, pad), constant_values=1.0)
    eta_pad = jnp.pad(eta, (0, pad), constant_values=1.0)
    dlr_pad = jnp.pad(diff_lr, (0, pad + 1), constant_values=0.0)   # length n_pad

    ps_row = ps_pad[None, :]        # (1, n_pad)
    eta_row = eta_pad[None, :]      # (1, n_pad)
    ps_col = ps_pad[:, None]        # (n_pad, 1)
    dlr_row = dlr_pad[None, :]      # (1, n_pad)  lane-dense feed for the MXU dot

    nj = n_pad // TILE
    n_rows = (nj + 1) // 2          # folded column-pair rows

    # Fold index arithmetic (pure int ops -> scalar core friendly):
    #   s <= r : column block r,        row block s
    #   s >  r : column block nj-1-r,   row block s - r - 1
    def j_map(r, s, p):
        second = (s > r).astype(jnp.int32)
        return (0, r + second * (nj - 1 - 2 * r))

    def i_col_map(r, s, p):
        second = (s > r).astype(jnp.int32)
        return (s - second * (r + 1), 0)

    def i_row_map(r, s, p):
        second = (s > r).astype(jnp.int32)
        return (0, s - second * (r + 1))

    grid_spec = pltpu.PrefetchScalarGridSpec(
        num_scalar_prefetch=1,                       # params -> SMEM
        grid=(n_rows, nj + 1),                       # (parallel column-pairs, packed reduction)
        in_specs=[
            pl.BlockSpec((1, TILE), j_map),          # ps_row   (column block)
            pl.BlockSpec((1, TILE), j_map),          # eta_row  (column block)
            pl.BlockSpec((TILE, 1), i_col_map),      # ps_col   (row block, sublane layout)
            pl.BlockSpec((1, TILE), i_row_map),      # dlr_row  (row block, lane-dense)
        ],
        out_specs=pl.BlockSpec((1, TILE), j_map),
        scratch_shapes=[
            pltpu.VMEM((1, TILE), jnp.float32),      # loss-drop accumulator
            pltpu.VMEM((1, TILE), jnp.float32),      # hoisted eta^(-gamma)
        ],
    )

    out = pl.pallas_call(
        multi_power_kernel,
        out_shape=jax.ShapeDtypeStruct((1, n_pad), jnp.float32),
        grid_spec=grid_spec,
        compiler_params=pltpu.CompilerParams(
            dimension_semantics=("parallel", "arbitrary"),
            vmem_limit_bytes=32 * 1024 * 1024,
        ),
    )(params, ps_row, eta_row, ps_col, dlr_row)
    return out[0, :n]


def multi_power_ref(step, eta, params):
    """Pure-JAX mirror of the PyTorch forward, for correctness checking."""
    A, B, C, alpha, beta, gamma, L0 = [params[i] for i in range(7)]
    step = step.astype(jnp.float32)
    eta = eta.astype(jnp.float32)
    diff_lr = eta[:-1] - eta[1:]
    ext = jnp.concatenate([step[:1], step, step[-1:]])
    step_diff = ext[2:] - ext[:-2]
    partial_sum = jnp.cumsum(0.5 * eta * step_diff) + 0.5 * eta[0] * step[0]
    frag = partial_sum[None, 1:] - partial_sum[:-1, None]
    frag = jnp.triu(frag, k=0)
    x_power = eta[None, 1:] ** (-gamma) * frag
    power = 1.0 - (1.0 + C * x_power) ** (-beta)
    loss_drop = B * jnp.matmul(diff_lr[None, :], power,
                               precision=jax.lax.Precision.HIGHEST)[0]
    loss_drop = jnp.concatenate([jnp.zeros((1,), jnp.float32), loss_drop])
    const_term = A * partial_sum ** (-alpha) + L0
    return const_term - loss_drop


if __name__ == "__main__":
    # Deterministic parameter init from the module defaults.
    params = jnp.array([0.4, 200.0, 0.25, 0.5, 0.15, 0.1, 5.0], dtype=jnp.float32)

    # Small case implied by the module spec (seq = 8): single-column folded grid.
    n = 8
    step = jnp.arange(1, n + 1, dtype=jnp.float32) * 100.0
    eta = jnp.sort(jax.random.uniform(jax.random.PRNGKey(0), (n,), jnp.float32, 1e-4, 1e-3))[::-1]
    out = jax.block_until_ready(multi_power(step, eta, params))
    ref = multi_power_ref(step, eta, params)
    assert out.shape == (n,) and out.dtype == jnp.float32
    assert jnp.allclose(out, ref, rtol=1e-5, atol=1e-5), (out, ref)

    # Larger case exercising the multi-column fold, diagonal masking and padding.
    n = 300
    step = jnp.arange(1, n + 1, dtype=jnp.float32) * 100.0
    eta = jnp.sort(jax.random.uniform(jax.random.PRNGKey(1), (n,), jnp.float32, 1e-4, 1e-3))[::-1]
    out = jax.block_until_ready(multi_power(step, eta, params))
    ref = multi_power_ref(step, eta, params)
    assert out.shape == (n,)
    assert jnp.allclose(out, ref, rtol=1e-4, atol=1e-4), (out, ref)

    print("KERNEL_OK")
</pallas_src>

<mosaic_0001>
module attributes {stable_mosaic.version = 11 : i64} {
  func.func @multi_power_kernel(%arg0: i32, %arg1: i32, %arg2: memref<7xf32, #tpu.memory_space<smem>>, %arg3: memref<1x256xf32, #tpu.memory_space<vmem>>, %arg4: memref<1x256xf32, #tpu.memory_space<vmem>>, %arg5: memref<256x1xf32, #tpu.memory_space<vmem>>, %arg6: memref<1x256xf32, #tpu.memory_space<vmem>>, %arg7: memref<1x256xf32, #tpu.memory_space<vmem>>, %arg8: memref<1x256xf32, #tpu.memory_space<vmem>>, %arg9: memref<1x256xf32, #tpu.memory_space<vmem>>) attributes {dimension_semantics = [#tpu.dimension_semantics<parallel>, #tpu.dimension_semantics<arbitrary>], iteration_bounds = array<i64: 1, 2>, scalar_prefetch = 1 : i64, scratch_operands = 2 : i64, tpu.core_type = #tpu.core_type<tc>, window_params = [{transform_indices = @transform_0, window_bounds = array<i64: 1, 256>}, {transform_indices = @transform_1, window_bounds = array<i64: 1, 256>}, {transform_indices = @transform_2, window_bounds = array<i64: 256, 1>}, {transform_indices = @transform_3, window_bounds = array<i64: 1, 256>}, {transform_indices = @transform_4, window_bounds = array<i64: 1, 256>}]} {
    %c0_i32 = arith.constant 0 : i32
    %0 = arith.cmpi eq, %arg1, %c0_i32 : i32
    %c1_i32 = arith.constant 1 : i32
    %1 = arith.addi %arg0, %c1_i32 : i32
    %2 = arith.cmpi eq, %arg1, %1 : i32
    %3 = arith.ori %0, %2 : i1
    %4 = arith.cmpi eq, %arg1, %arg0 : i32
    %c1_i32_0 = arith.constant 1 : i32
    %5 = arith.cmpi eq, %arg1, %c1_i32_0 : i32
    %6 = arith.ori %4, %5 : i1
    %c2 = arith.constant 2 : index
    %7 = memref.load %arg2[%c2] : memref<7xf32, #tpu.memory_space<smem>>
    %c4 = arith.constant 4 : index
    %8 = memref.load %arg2[%c4] : memref<7xf32, #tpu.memory_space<smem>>
    %c5 = arith.constant 5 : index
    %9 = memref.load %arg2[%c5] : memref<7xf32, #tpu.memory_space<smem>>
    %10 = arith.extui %3 : i1 to i32
    %c0_i32_1 = arith.constant 0 : i32
    %11 = arith.cmpi ne, %10, %c0_i32_1 : i32
    scf.if %11 {
      %cst = arith.constant 0.000000e+00 : f32
      %19 = vector.broadcast %cst : f32 to vector<1x256xf32>
      %c0 = arith.constant 0 : index
      %c0_5 = arith.constant 0 : index
      %20 = vector.load %arg8[%c0, %c0_5] : memref<1x256xf32, #tpu.memory_space<vmem>>, vector<1x256xf32>
      tpu.vector_store %arg8[%c0, %c0_5], %19 {strides = array<i32>} : memref<1x256xf32, #tpu.memory_space<vmem>>, vector<1x256xf32>,
      %c0_6 = arith.constant 0 : index
      %c0_7 = arith.constant 0 : index
      %21 = vector.load %arg4[%c0_6, %c0_7] : memref<1x256xf32, #tpu.memory_space<vmem>>, vector<1x256xf32>
      %cst_8 = arith.constant 0.000000e+00 : f32
      %22 = arith.subf %cst_8, %9 : f32
      %23 = vector.broadcast %22 : f32 to vector<1x256xf32>
      %24 = math.powf %21, %23 : vector<1x256xf32>
      %c0_9 = arith.constant 0 : index
      %c0_10 = arith.constant 0 : index
      %25 = vector.load %arg9[%c0_9, %c0_10] : memref<1x256xf32, #tpu.memory_space<vmem>>, vector<1x256xf32>
      tpu.vector_store %arg9[%c0_9, %c0_10], %24 {strides = array<i32>} : memref<1x256xf32, #tpu.memory_space<vmem>>, vector<1x256xf32>,
    } else {
    }
    %true = arith.constant true
    %12 = arith.xori %6, %true : i1
    %13 = arith.extui %12 : i1 to i32
    %c0_i32_2 = arith.constant 0 : i32
    %14 = arith.cmpi ne, %13, %c0_i32_2 : i32
    scf.if %14 {
      %c0 = arith.constant 0 : index
      %c0_5 = arith.constant 0 : index
      %19 = vector.load %arg3[%c0, %c0_5] : memref<1x256xf32, #tpu.memory_space<vmem>>, vector<1x256xf32>
      %c0_6 = arith.constant 0 : index
      %c0_7 = arith.constant 0 : index
      %20 = vector.load %arg5[%c0_6, %c0_7] : memref<256x1xf32, #tpu.memory_space<vmem>>, vector<256x1xf32>
      %21 = vector.broadcast %19 : vector<1x256xf32> to vector<256x256xf32>
      %22 = vector.broadcast %20 : vector<256x1xf32> to vector<256x256xf32>
      %23 = arith.subf %21, %22 : vector<256x256xf32>
      %c0_8 = arith.constant 0 : index
      %c0_9 = arith.constant 0 : index
      %24 = vector.load %arg9[%c0_8, %c0_9] : memref<1x256xf32, #tpu.memory_space<vmem>>, vector<1x256xf32>
      %25 = vector.broadcast %24 : vector<1x256xf32> to vector<256x256xf32>
      %26 = arith.mulf %25, %23 : vector<256x256xf32>
      %27 = vector.broadcast %7 : f32 to vector<256x256xf32>
      %28 = arith.mulf %27, %26 : vector<256x256xf32>
      %cst = arith.constant 1.000000e+00 : f32
      %29 = vector.broadcast %cst : f32 to vector<256x256xf32>
      %30 = arith.addf %29, %28 : vector<256x256xf32>
      %cst_10 = arith.constant 0.000000e+00 : f32
      %31 = arith.subf %cst_10, %8 : f32
      %32 = vector.broadcast %31 : f32 to vector<256x256xf32>
      %33 = math.powf %30, %32 : vector<256x256xf32>
      %cst_11 = arith.constant 1.000000e+00 : f32
      %34 = vector.broadcast %cst_11 : f32 to vector<256x256xf32>
      %35 = arith.subf %34, %33 : vector<256x256xf32>
      %c0_12 = arith.constant 0 : index
      %c0_13 = arith.constant 0 : index
      %36 = vector.load %arg8[%c0_12, %c0_13] : memref<1x256xf32, #tpu.memory_space<vmem>>, vector<1x256xf32>
      %c0_14 = arith.constant 0 : index
      %c0_15 = arith.constant 0 : index
      %37 = vector.load %arg6[%c0_14, %c0_15] : memref<1x256xf32, #tpu.memory_space<vmem>>, vector<1x256xf32>
      %cst_16 = arith.constant dense<0.000000e+00> : vector<1x256xf32>
      %38 = tpu.matmul %37, %35, %cst_16 {dimension_numbers = #tpu.dot_dimension_numbers<[1], [0], [0], [1], [0, 0, 1, 1], [], []>, precision = #tpu.contract_precision<fp32>} : vector<1x256xf32>, vector<256x256xf32>, vector<1x256xf32> -> vector<1x256xf32>
      %39 = arith.addf %36, %38 : vector<1x256xf32>
      %c0_17 = arith.constant 0 : index
      %c0_18 = arith.constant 0 : index
      %40 = vector.load %arg8[%c0_17, %c0_18] : memref<1x256xf32, #tpu.memory_space<vmem>>, vector<1x256xf32>
      tpu.vector_store %arg8[%c0_17, %c0_18], %39 {strides = array<i32>} : memref<1x256xf32, #tpu.memory_space<vmem>>, vector<1x256xf32>,
    } else {
    }
    %15 = arith.extui %6 : i1 to i32
    %c0_i32_3 = arith.constant 0 : i32
    %16 = arith.cmpi ne, %15, %c0_i32_3 : i32
    scf.if %16 {
      %19 = tpu.iota {dimensions = array<i32: 0>} : vector<256x256xi32>
      %20 = tpu.iota {dimensions = array<i32: 1>} : vector<256x256xi32>
      %21 = arith.cmpi slt, %19, %20 : vector<256x256xi32>
      %c0 = arith.constant 0 : index
      %c0_5 = arith.constant 0 : index
      %22 = vector.load %arg3[%c0, %c0_5] : memref<1x256xf32, #tpu.memory_space<vmem>>, vector<1x256xf32>
      %c0_6 = arith.constant 0 : index
      %c0_7 = arith.constant 0 : index
      %23 = vector.load %arg5[%c0_6, %c0_7] : memref<256x1xf32, #tpu.memory_space<vmem>>, vector<256x1xf32>
      %24 = vector.broadcast %22 : vector<1x256xf32> to vector<256x256xf32>
      %25 = vector.broadcast %23 : vector<256x1xf32> to vector<256x256xf32>
      %26 = arith.subf %24, %25 : vector<256x256xf32>
      %cst = arith.constant 0.000000e+00 : f32
      %27 = vector.broadcast %cst : f32 to vector<256x256xf32>
      %28 = arith.select %21, %26, %27 : vector<256x256xi1>, vector<256x256xf32>
      %c0_8 = arith.constant 0 : index
      %c0_9 = arith.constant 0 : index
      %29 = vector.load %arg9[%c0_8, %c0_9] : memref<1x256xf32, #tpu.memory_space<vmem>>, vector<1x256xf32>
      %30 = vector.broadcast %29 : vector<1x256xf32> to vector<256x256xf32>
      %31 = arith.mulf %30, %28 : vector<256x256xf32>
      %32 = vector.broadcast %7 : f32 to vector<256x256xf32>
      %33 = arith.mulf %32, %31 : vector<256x256xf32>
      %cst_10 = arith.constant 1.000000e+00 : f32
      %34 = vector.broadcast %cst_10 : f32 to vector<256x256xf32>
      %35 = arith.addf %34, %33 : vector<256x256xf32>
      %cst_11 = arith.constant 0.000000e+00 : f32
      %36 = arith.subf %cst_11, %8 : f32
      %37 = vector.broadcast %36 : f32 to vector<256x256xf32>
      %38 = math.powf %35, %37 : vector<256x256xf32>
      %cst_12 = arith.constant 1.000000e+00 : f32
      %39 = vector.broadcast %cst_12 : f32 to vector<256x256xf32>
      %40 = arith.subf %39, %38 : vector<256x256xf32>
      %c0_13 = arith.constant 0 : index
      %c0_14 = arith.constant 0 : index
      %41 = vector.load %arg8[%c0_13, %c0_14] : memref<1x256xf32, #tpu.memory_space<vmem>>, vector<1x256xf32>
      %c0_15 = arith.constant 0 : index
      %c0_16 = arith.constant 0 : index
      %42 = vector.load %arg6[%c0_15, %c0_16] : memref<1x256xf32, #tpu.memory_space<vmem>>, vector<1x256xf32>
      %cst_17 = arith.constant dense<0.000000e+00> : vector<1x256xf32>
      %43 = tpu.matmul %42, %40, %cst_17 {dimension_numbers = #tpu.dot_dimension_numbers<[1], [0], [0], [1], [0, 0, 1, 1], [], []>, precision = #tpu.contract_precision<fp32>} : vector<1x256xf32>, vector<256x256xf32>, vector<1x256xf32> -> vector<1x256xf32>
      %44 = arith.addf %41, %43 : vector<1x256xf32>
      %c0_18 = arith.constant 0 : index
      %c0_19 = arith.constant 0 : index
      %45 = vector.load %arg8[%c0_18, %c0_19] : memref<1x256xf32, #tpu.memory_space<vmem>>, vector<1x256xf32>
      tpu.vector_store %arg8[%c0_18, %c0_19], %44 {strides = array<i32>} : memref<1x256xf32, #tpu.memory_space<vmem>>, vector<1x256xf32>,
    } else {
    }
    %17 = arith.extui %6 : i1 to i32
    %c0_i32_4 = arith.constant 0 : i32
    %18 = arith.cmpi ne, %17, %c0_i32_4 : i32
    scf.if %18 {
      %c0 = arith.constant 0 : index
      %19 = memref.load %arg2[%c0] : memref<7xf32, #tpu.memory_space<smem>>
      %c1 = arith.constant 1 : index
      %20 = memref.load %arg2[%c1] : memref<7xf32, #tpu.memory_space<smem>>
      %c3 = arith.constant 3 : index
      %21 = memref.load %arg2[%c3] : memref<7xf32, #tpu.memory_space<smem>>
      %c6 = arith.constant 6 : index
      %22 = memref.load %arg2[%c6] : memref<7xf32, #tpu.memory_space<smem>>
      %c0_5 = arith.constant 0 : index
      %c0_6 = arith.constant 0 : index
      %23 = vector.load %arg3[%c0_5, %c0_6] : memref<1x256xf32, #tpu.memory_space<vmem>>, vector<1x256xf32>
      %cst = arith.constant 0.000000e+00 : f32
      %24 = arith.subf %cst, %21 : f32
      %25 = vector.broadcast %24 : f32 to vector<1x256xf32>
      %26 = math.powf %23, %25 : vector<1x256xf32>
      %27 = vector.broadcast %19 : f32 to vector<1x256xf32>
      %28 = arith.mulf %27, %26 : vector<1x256xf32>
      %29 = vector.broadcast %22 : f32 to vector<1x256xf32>
      %30 = arith.addf %28, %29 : vector<1x256xf32>
      %c0_7 = arith.constant 0 : index
      %c0_8 = arith.constant 0 : index
      %31 = vector.load %arg8[%c0_7, %c0_8] : memref<1x256xf32, #tpu.memory_space<vmem>>, vector<1x256xf32>
      %32 = vector.broadcast %20 : f32 to vector<1x256xf32>
      %33 = arith.mulf %32, %31 : vector<1x256xf32>
      %34 = arith.subf %30, %33 : vector<1x256xf32>
      %c0_9 = arith.constant 0 : index
      %c0_10 = arith.constant 0 : index
      %35 = vector.load %arg7[%c0_9, %c0_10] : memref<1x256xf32, #tpu.memory_space<vmem>>, vector<1x256xf32>
      tpu.vector_store %arg7[%c0_9, %c0_10], %34 {strides = array<i32>} : memref<1x256xf32, #tpu.memory_space<vmem>>, vector<1x256xf32>,
    } else {
    }
    return
  }
  func.func @transform_0(%arg0: i32, %arg1: i32, %arg2: memref<7xf32, #tpu.memory_space<smem>>) -> (i32, i32) {
    %0 = arith.cmpi sgt, %arg1, %arg0 : i32
    %1 = arith.extui %0 : i1 to i32
    %c2_i32 = arith.constant 2 : i32
    %2 = arith.muli %c2_i32, %arg0 : i32
    %c0_i32 = arith.constant 0 : i32
    %3 = arith.subi %c0_i32, %2 : i32
    %4 = arith.muli %1, %3 : i32
    %5 = arith.addi %arg0, %4 : i32
    %c0_i32_0 = arith.constant 0 : i32
    %c0_i32_1 = arith.constant 0 : i32
    return %c0_i32_0, %5 : i32, i32
  }
  func.func @transform_1(%arg0: i32, %arg1: i32, %arg2: memref<7xf32, #tpu.memory_space<smem>>) -> (i32, i32) {
    %0 = arith.cmpi sgt, %arg1, %arg0 : i32
    %1 = arith.extui %0 : i1 to i32
    %c2_i32 = arith.constant 2 : i32
    %2 = arith.muli %c2_i32, %arg0 : i32
    %c0_i32 = arith.constant 0 : i32
    %3 = arith.subi %c0_i32, %2 : i32
    %4 = arith.muli %1, %3 : i32
    %5 = arith.addi %arg0, %4 : i32
    %c0_i32_0 = arith.constant 0 : i32
    %c0_i32_1 = arith.constant 0 : i32
    return %c0_i32_0, %5 : i32, i32
  }
  func.func @transform_2(%arg0: i32, %arg1: i32, %arg2: memref<7xf32, #tpu.memory_space<smem>>) -> (i32, i32) {
    %0 = arith.cmpi sgt, %arg1, %arg0 : i32
    %1 = arith.extui %0 : i1 to i32
    %c1_i32 = arith.constant 1 : i32
    %2 = arith.addi %arg0, %c1_i32 : i32
    %3 = arith.muli %1, %2 : i32
    %4 = arith.subi %arg1, %3 : i32
    %c0_i32 = arith.constant 0 : i32
    %c0_i32_0 = arith.constant 0 : i32
    return %4, %c0_i32 : i32, i32
  }
  func.func @transform_3(%arg0: i32, %arg1: i32, %arg2: memref<7xf32, #tpu.memory_space<smem>>) -> (i32, i32) {
    %0 = arith.cmpi sgt, %arg1, %arg0 : i32
    %1 = arith.extui %0 : i1 to i32
    %c1_i32 = arith.constant 1 : i32
    %2 = arith.addi %arg0, %c1_i32 : i32
    %3 = arith.muli %1, %2 : i32
    %4 = arith.subi %arg1, %3 : i32
    %c0_i32 = arith.constant 0 : i32
    %c0_i32_0 = arith.constant 0 : i32
    return %c0_i32, %4 : i32, i32
  }
  func.func @transform_4(%arg0: i32, %arg1: i32, %arg2: memref<7xf32, #tpu.memory_space<smem>>) -> (i32, i32) {
    %0 = arith.cmpi sgt, %arg1, %arg0 : i32
    %1 = arith.extui %0 : i1 to i32
    %c2_i32 = arith.constant 2 : i32
    %2 = arith.muli %c2_i32, %arg0 : i32
    %c0_i32 = arith.constant 0 : i32
    %3 = arith.subi %c0_i32, %2 : i32
    %4 = arith.muli %1, %3 : i32
    %5 = arith.addi %arg0, %4 : i32
    %c0_i32_0 = arith.constant 0 : i32
    %c0_i32_1 = arith.constant 0 : i32
    return %c0_i32_0, %5 : i32, i32
  }
}

</mosaic_0001>

<bundles_post_ra>
// kernel: tpu_custom_call.1
= control target key start
LH: loop header
LB: loop body
LE: loop exit
PB: predicated region body
PF: predicated region fallthrough
CT: control target
= control target key end

     0   :  { %s25190_s0 = inlined_call_operand.vmem [shape: f32[7], index: 0, kind: input, shape index: {}]   ;;  %s25191_s1 = inlined_call_operand.vmem [shape: f32[1,256], index: 1, kind: input, shape index: {}]   ;;  %s25192_s2 = inlined_call_operand.vmem [shape: f32[1,256], index: 2, kind: input, shape index: {}]   ;;  %s25193_s3 = inlined_call_operand.vmem [shape: f32[256,1], index: 3, kind: input, shape index: {}]   ;;  %s25194_s4 = inlined_call_operand.vmem [shape: f32[1,256], index: 4, kind: input, shape index: {}]   ;;  %s25195_s5 = inlined_call_operand.hbm [shape: f32[1,256], index: 5, kind: output, shape index: {}]  }
   0x1   :  { %s10_s20 = sshll.u32 %s25190_s0, 4  ;;  %s11_s20 = int_to_ptr.vmem [resolvable:$true] %s10_s20 }
   0x2   :  { %s11919_s21 = scalar_lea.vmem %s11_s20, 16  ;;  %p11924_p1 = scmp.lt.s32.totalorder %s11_s20, %s11_s20 }
   0x3   :  { %p11920_p0 = scmp.ne.s32.totalorder %s11_s20, %s11919_s21  ;;  %p11925_p2 = scmp.lt.s32.totalorder %s11919_s21, %s11919_s21 }
   0x5   :  { %p11926_p3 = por %p11925_p2, %p11924_p1 }
   0x7   :  { %p11927_p4 = pnand %p11926_p3, %p11920_p0 }
   0x9   :  { %11930 = shalt.err (!%p11927_p4)  }
   0xa   :  { %s11987_s22 = smov [#allocation5]  }
   0xb   :  { %13 = dma.vmem_to_smem %s11_s20, 16, %s11987_s22, [#allocation4] }
   0xc   :  { %11969 = dma.done.wait [#allocation4], 16 }
   0xd   :  { %11970 = vsyncadd [#allocation4], 4294967280 }
   0xe   :  { %15 = sfence }
   0xf   :  { %16 = vsyncpa [#allocation7], 0 }
  0x10   :  { %18 = vsyncpa [#allocation7 + $0x1], 0  ;;  %s12031_s23 = smov 0   ;;  %s12033_s24 = smov 0  }
  0x11   :  { %s12035_s0 = smov 0  }
  0x12 LB: > { %s4621_s25 = sadd.s32 4294967295, %s11985_s0   ;;  %s4622_s26 = sadd.s32 4294967294, %s11985_s0   ;;  %s11985_s0 = sphi %s12035_s0, %s24_s0   ;;  %s11981_s24 = sphi %s12033_s24, %s28566_s24   ;;  %s11977_s23 = sphi %s12031_s23, %s28565_s23  }
  0x13   : > { %s33_s27 = sadd.s32 1, %s11981_s24  ;;  %p4627_p5 = scmp.ge.s32.totalorder %s11985_s0, 1 }
  0x14   : > { %p34_p6 = scmp.ge.s32.totalorder %s33_s27, 2  ;;  %p315_p7 = scmp.lt.s32.totalorder %s11985_s0, 3 }
  0x16   : > { %s28568_s27 = smov (%p34_p6, %s33_s27), 0  ;;  %p316_p8 = pnand %p4627_p5, %p315_p7 }
  0x17   : > { %p409_p9 = scmp.gt.s32.totalorder (!%p316_p8), %s11977_s23, 0  ;;  %p447_p10 = scmp.eq.s32.totalorder (!%p316_p8), %s11977_s23, 0 }
  0x18   : > { %319 = sbr.rel (%p316_p8) target bundleno = 2246 (0x8c6), region = 36  ;;  %p449_p11 = scmp.eq.s32.totalorder (!%p316_p8), %s11977_s23, 1 }
  0x19   : > { %s12051_s28 = sld [smem:[#allocation5 + $0x2]] (!%p316_p8)  ;;  %s12057_s6 = sld [smem:[#allocation5 + $0x4]] (!%p316_p8) }
  0x1a   : > { %p12053_p12 = por (!%p316_p8), %p449_p11, %p447_p10  ;;  %s4633_s8 = sld [smem:[#allocation5 + $0x5]] (!%p316_p8) }
  0x1f   : > { %s410_s29 = scalar_select %p409_p9, 1, 0 }
  0x20   : > { %v460_v0 = vlaneseq (%p12053_p12)  ;;  %v465_v1 = vld [vmem:[%s25192_s2] sm:$0x3] (%p12053_p12)  ;;  %s466_s20 = ssub.f32 (%p12053_p12), 0.0, %s4633_s8  ;;  %v25583_v3 = vmov (%p12053_p12), 0  ;;  %v11988_v5 = vmov (%p12053_p12), 0.0   ;;  %v11989_v13 = vmov (%p12053_p12), 2139095040  }
  0x21   : > { %s413_s7 = ssub.s32 %s11977_s23, %s410_s29  ;;  %459 = sbr.rel (!%p12053_p12) target bundleno = 70 (0x46), region = 40  ;;  %v5429_v2 = vand.u32 (%p12053_p12), 2147483647, %v465_v1  ;;  %vm5450_vm5 = vcmp.eq.f32.partialorder (%p12053_p12), %v465_v1, 0  ;;  %vm25198_vm9 = vcmp.lt.f32.partialorder (%p12053_p12), %v465_v1, 0  ;;  %v11990_v16 = vmov (%p12053_p12), 0  }
  0x22   : > { %s4628_s9 = sshll.u32 %s413_s7, 5  ;;  %s4630_s10 = sshll.u32 %s413_s7, 1  ;;  %vm12074_vm0 = vcmp.lt.s32.totalorder (%p12053_p12), %v460_v0, 256  ;;  %v467_v4 = vstv (%p12053_p12), %s466_s20 }
  0x23   : > { %p415_p13 = scmp.lt.s32.totalorder %s4628_s9, 31  ;;  %p431_p0 = scmp.lt.s32.totalorder %s4630_s10, 1  ;;  %v25584_v3 = vsel (%p12053_p12), %vm12074_vm0, 4294967295, %v25583_v3  ;;  %464 = vst.msk [vmem:[#allocation2] sm:$0x3] (%p12053_p12), %vm12074_vm0, %v11988_v5  ;;  %11455 = vlog2.f32 (%p12053_p12), %v5429_v2  ;;  %v5438_v8 = vtrunc.f32 (%p12053_p12), %v467_v4  ;;  %vm5437_vm4 = vcmp.lt.f32.partialorder (%p12053_p12), %v467_v4, 0 }
  0x24   : > { %v5433_v6 = vand.u32 (%p12053_p12), 2147483647, %v467_v4  ;;  %vm5453_vm6 = vcmp.gt.f32.partialorder (%p12053_p12), %v5429_v2, 1065353216  ;;  %vm5462_vm10 = vmand (%p12053_p12), %vm5437_vm4, %vm5450_vm5  ;;  %v5469_v14 = vsel (%p12053_p12), %vm5437_vm4, 0, %v11989_v13  ;;  %v5457_v17 = vsel (%p12053_p12), %vm5437_vm4, 2139095040, %v11990_v16 }
  0x25   : > { %s28570_s9 = smov (!%p415_p13, %s4628_s9), 31  ;;  %s28572_s10 = smov (!%p431_p0, %s4630_s10), 1 }
  0x26   : > { %s4629_s11 = sshll.u32 %s28570_s9, 3  ;;  %s12067_s17 = scalar_lea.vmem %s25194_s4, %s28572_s10  ;;  %v5442_v7 = vtrunc.f32 (%p12053_p12), %v5433_v6  ;;  %vm25196_vm1 = vcmp.eq.f32.partialorder (%p12053_p12), %v5433_v6, 2139095040  ;;  %vm5439_vm2 = vcmp.ne.f32.partialorder (%p12053_p12), %v467_v4, %v5438_v8  ;;  %vm5463_vm11 = vmxor (%p12053_p12), %vm5437_vm4, %vm5453_vm6  ;;  %vm5441_vm12 = vcmp.lt.f32.partialorder (%p12053_p12), %v5433_v6, 1266679808 }
  0x27   : > { %s12062_s14 = scalar_lea.vmem %s25193_s3, %s4629_s11  ;;  %vm5440_vm3 = vmor (%p12053_p12), %vm5439_vm2, %vm25196_vm1  ;;  %v5470_v15 = vxor.u32 (%p12053_p12), 2147483648, %v5469_v14  ;;  %vm5452_vm1 = vcmp.lt.s32.totalorder (%p12053_p12), %v465_v1, 0  ;;  %vm5466_vm0 = vcmp.eq.f32.partialorder (%p12053_p12), %v465_v1, 3212836864  ;;  %vm25586_vm4 = vcmp.eq.f32.partialorder (%p12053_p12), %v5433_v6, 2139095040 }
  0x28   : > { %v5443_v9 = vcvt.f32.s32 %v5442_v7  ;;  %vm5446_vm8 = vmneg %vm5440_vm3 }
  0x29   : > { %vm5455_vm14 = vmand %vm25198_vm9, %vm5440_vm3  ;;  %vm5435_vm3 = vcmp.eq.f32.partialorder %v467_v4, 0  ;;  %vm5451_vm9 = vcmp.eq.f32.partialorder %v465_v1, 1065353216 }
  0x2a   : > { %v5444_v12 = vand.u32 1, %v5443_v9  ;;  %vm5464_vm15 = vmor %vm5462_vm10, %vm5463_vm11  ;;  %vm5454_vm10 = vcmp.eq.f32.partialorder %v5429_v2, 2139095040  ;;  %vm25585_vm11 = vcmp.lt.f32.partialorder %v465_v1, 0 }
  0x2b   : > { %v5465_v19 = vsel %vm5464_vm15, 2139095040, %v11990_v16  ;;  %vm5436_vm15 = vcmp.eq.f32.partialorder %v467_v4, 1065353216 }
  0x2c   : > { %vm5445_vm7 = vcmp.eq.s32.totalorder %v5444_v12, 1  ;;  %v5467_v24 = vsel %vm5466_vm0, 1065353216, %v5465_v19 }
  0x2d   : > { %v11456_v10 = vpop.eup %11455  ;;  %vm5447_vm13 = vmand %vm5445_vm7, %vm5446_vm8  ;;  %vm5474_vm7 = vcmp.ne.f32.partialorder %v465_v1, %v465_v1  ;;  %vm5475_vm8 = vcmp.ne.f32.partialorder %v467_v4, %v467_v4 }
  0x2e   : > { %v5431_v11 = vmul.f32 %v11456_v10, %v467_v4  ;;  %vm5448_vm2 = vmand %vm5441_vm12, %vm5447_vm13 }
  0x2f   : > { %v5471_v21 = vsel %vm5448_vm2, %v5470_v15, %v5469_v14  ;;  %vm5459_vm6 = vmand %vm5452_vm1, %vm5448_vm2  ;;  %vm25587_vm1 = vnez %v25584_v3 }
  0x30   : > { %11457 = vpow2.f32 %v5431_v11  ;;  %v5472_v25 = vsel %vm25585_vm11, %v5471_v21, %v5469_v14  ;;  %vm5476_vm12 = vmor %vm5474_vm7, %vm5475_vm8 }
  0x31   : > { %vm5478_vm13 = vmor %vm5451_vm9, %vm5435_vm3 }
  0x3a   : > { %v11458_v18 = vpop.eup %11457 }
  0x3b   : > { %v5456_v20 = vsel %vm5455_vm14, 2143289344, %v11458_v18 }
  0x3c   : > { %v5458_v22 = vsel %vm5450_vm5, %v5457_v17, %v5456_v20 }
  0x3d   : > { %v5460_v23 = vxor.u32 2147483648, %v5458_v22 }
  0x3f   : > { %v5461_v26 = vsel %vm5459_vm6, %v5460_v23, %v5458_v22 }
  0x40   : > { %v5468_v27 = vsel %vm25586_vm4, %v5467_v24, %v5461_v26 }
  0x41   : > { %v5473_v28 = vsel %vm5454_vm10, %v5472_v25, %v5468_v27 }
  0x42   : > { %v5477_v29 = vsel %vm5476_vm12, 2143289344, %v5473_v28 }
  0x43   : > { %v5479_v30 = vsel %vm5478_vm13, 1065353216, %v5477_v29 }
  0x44   : > { %v5480_v31 = vsel %vm5436_vm15, %v465_v1, %v5479_v30 }
  0x45   : > { %469 = vst.msk [vmem:[#allocation3] sm:$0x3] %vm25587_vm1, %v5480_v31 }
  0x46 PF: > { %472 = sbr.rel (!%p12053_p12) target bundleno = 1082 (0x43a), region = 44 }
  0x4d   : > { %v576_v32 = vld [vmem:[%s12062_s14 + $0x10] sm:$0xff]  ;;  %v574_v33 = vld [vmem:[%s12062_s14] sm:$0xff]  ;;  %v25201_v34 = vmov 0   ;;  %v577_v35 = vld [vmem:[%s12062_s14 + $0x18] sm:$0xff]  ;;  %s1110_s21 = ssub.f32 0.0, %s12057_s6  ;;  %v25199_v7 = vlaneseq  ;;  %v25589_v10 = vmov 0  ;;  %v12170_v19 = vstv %s12051_s28 }
  0x4e   : > { %11460 = vset.pattern.permute.xlu1 %v25201_v34  ;;  %11459 = vset.pattern.permute.xlu0 %v25201_v34  ;;  %v575_v36 = vld [vmem:[%s12062_s14 + $0x8] sm:$0xff]  ;;  %v578_v38 = vld [vmem:[%s12062_s14 + $0x20] sm:$0xff]  ;;  %v581_v39 = vld [vmem:[%s12062_s14 + $0x38] sm:$0xff]  ;;  %v25200_v16 = vmov 2139095040   ;;  %s4635_s8 = sld [smem:[#allocation5 + $0x3]]  ;;  %s2561_s10 = sld [smem:[#allocation5]] }
  0x4f   : > { %629 = vperm.xlu1 %11460, %v576_v32   ;;  %619 = vperm.xlu0 %11459, %v574_v33   ;;  %v579_v37 = vld [vmem:[%s12062_s14 + $0x28] sm:$0xff]  ;;  %v580_v40 = vld [vmem:[%s12062_s14 + $0x30] sm:$0xff]  ;;  %v582_v42 = vld [vmem:[%s12062_s14 + $0x40] sm:$0xff]  ;;  %v12129_v1 = vstv %s1110_s21  ;;  %v12150_v11 = vshrl.u32 %v25199_v7, 7  ;;  %v12162_v15 = vand.u32 127, %v25199_v7  ;;  %s4636_s11 = sld [smem:[#allocation5 + $0x6]] }
  0x50   : > { %v583_v41 = vld [vmem:[%s12062_s14 + $0x48] sm:$0xff]  ;;  %v585_v43 = vld [vmem:[%s12062_s14 + $0x58] sm:$0xff]  ;;  %v584_v44 = vld [vmem:[%s12062_s14 + $0x50] sm:$0xff]  ;;  %v12132_v2 = vand.u32 2147483647, %v12129_v1  ;;  %v5490_v4 = vtrunc.f32 %v12129_v1  ;;  %vm25234_vm14 = vcmp.lt.f32.partialorder %v12129_v1, 0 }
  0x51   : > { %v587_v45 = vld [vmem:[%s12062_s14 + $0x68] sm:$0xff]  ;;  %v586_v46 = vld [vmem:[%s12062_s14 + $0x60] sm:$0xff]  ;;  %v589_v47 = vld [vmem:[%s12062_s14 + $0x78] sm:$0xff]  ;;  %25591 = vst [vmem:[#allocation11_spill] sm:$0xff] %v12150_v11  ;;  %v12159_v14 = vadd.s32 16, %v12150_v11  ;;  %v12167_v17 = vsel %vm25234_vm14, 0, %v25200_v16  ;;  %vm509_vm10 = vcmp.lt.s32.totalorder %v12150_v11, %v12162_v15 }
  0x52   : > { %v588_v48 = vld [vmem:[%s12062_s14 + $0x70] sm:$0xff]  ;;  %v591_v49 = vld [vmem:[%s12062_s14 + $0x88] sm:$0xff]  ;;  %v590_v50 = vld [vmem:[%s12062_s14 + $0x80] sm:$0xff]  ;;  %25588 = vst [vmem:[#allocation10_spill] sm:$0xff] %v12132_v2  ;;  %v5494_v3 = vtrunc.f32 %v12132_v2  ;;  %vm25220_vm0 = vcmp.eq.f32.partialorder %v12132_v2, 2139095040  ;;  %vm5491_vm5 = vcmp.ne.f32.partialorder %v12129_v1, %v5490_v4  ;;  %vm5493_vm7 = vcmp.lt.f32.partialorder %v12132_v2, 1266679808 }
  0x53   : > { %634 = vperm.xlu1 %11460, %v577_v35   ;;  %624 = vperm.xlu0 %11459, %v575_v36   ;;  %v593_v51 = vld [vmem:[%s12062_s14 + $0x98] sm:$0xff]  ;;  %v592_v52 = vld [vmem:[%s12062_s14 + $0x90] sm:$0xff]  ;;  %v595_v53 = vld [vmem:[%s12062_s14 + $0xa8] sm:$0xff]  ;;  %v12178_v21 = vsub.s32 0, %v12150_v11  ;;  %v12181_v22 = vsub.s32 1, %v12150_v11  ;;  %v481_v25 = vadd.s32 56, %v12150_v11  ;;  %vm513_vm3 = vcmp.lt.s32.totalorder %v12159_v14, %v12162_v15 }
  0x54   : > { %v594_v54 = vld [vmem:[%s12062_s14 + $0xa0] sm:$0xff]  ;;  %v597_v55 = vld [vmem:[%s12062_s14 + $0xb8] sm:$0xff]  ;;  %v596_v56 = vld [vmem:[%s12062_s14 + $0xb0] sm:$0xff]  ;;  %v5495_v5 = vcvt.f32.s32 %v5494_v3  ;;  %v480_v26 = vadd.s32 48, %v12150_v11  ;;  %v12193_v28 = vadd.s32 24, %v12150_v11  ;;  %v483_v29 = vadd.s32 72, %v12150_v11 }
  0x55   : > { %v599_v57 = vld [vmem:[%s12062_s14 + $0xc8] sm:$0xff]  ;;  %v598_v58 = vld [vmem:[%s12062_s14 + $0xc0] sm:$0xff]  ;;  %v601_v59 = vld [vmem:[%s12062_s14 + $0xd8] sm:$0xff]  ;;  %25594 = vst [vmem:[#allocation12_spill] sm:$0xff] %v12178_v21  ;;  %v12197_v30 = vadd.s32 64, %v12150_v11  ;;  %v5522_v31 = vxor.u32 2147483648, %v12167_v17  ;;  %vm523_vm12 = vcmp.lt.s32.totalorder %v481_v25, %v12162_v15 }
  0x56   : > { %v600_v60 = vld [vmem:[%s12062_s14 + $0xd0] sm:$0xff]  ;;  %v603_v61 = vld [vmem:[%s12062_s14 + $0xe8] sm:$0xff]  ;;  %v602_v62 = vld [vmem:[%s12062_s14 + $0xe0] sm:$0xff]  ;;  %v5496_v9 = vand.u32 1, %v5495_v5  ;;  %25595 = vst [vmem:[#allocation13_spill] sm:$0xff] %v12181_v22  ;;  %v12208_v33 = vadd.s32 8, %v12150_v11  ;;  %vm521_vm4 = vcmp.lt.s32.totalorder %v480_v26, %v12162_v15  ;;  %vm527_vm13 = vcmp.lt.s32.totalorder %v483_v29, %v12162_v15 }
  0x57   : > { %644 = vperm.xlu1 %11460, %v579_v37   ;;  %639 = vperm.xlu0 %11459, %v578_v38   ;;  %v605_v63 = vld [vmem:[%s12062_s14 + $0xf8] sm:$0xff]  ;;  %v604_v0 = vld [vmem:[%s12062_s14 + $0xf0] sm:$0xff]  ;;  %vm12144_vm9 = vmor %vm5491_vm5, %vm25220_vm0  ;;  %v12211_v35 = vadd.s32 88, %v12150_v11  ;;  %v25597_v36 = vmov 0  ;;  %v12225_v38 = vadd.s32 40, %v12150_v11  ;;  %vm525_vm15 = vcmp.lt.s32.totalorder %v12197_v30, %v12162_v15  ;;  %s2566_s9 = ssub.f32 0.0, %s4635_s8 }
  0x58   : > { %v25590_v10 = vsel %vm12144_vm9, 4294967295, %v25589_v10  ;;  %vm5497_vm2 = vcmp.eq.s32.totalorder %v5496_v9, 1  ;;  %vm5498_vm6 = vmneg %vm12144_vm9  ;;  %v905_v18 = vld [vmem:[#allocation3] sm:$0x3]  ;;  %v573_v27 = vld [vmem:[%s25191_s1] sm:$0x3]  ;;  %vm515_vm5 = vcmp.lt.s32.totalorder %v12193_v28, %v12162_v15 }
  0x59   : > { %vm12173_vm8 = vmand %vm5497_vm2, %vm5498_vm6  ;;  %v12203_v32 = vrot.slane %v905_v18, %v12178_v21  ;;  %v12222_v37 = vrot.slane %v905_v18, %v12181_v22  ;;  %vm531_vm1 = vcmp.lt.s32.totalorder %v12211_v35, %v12162_v15  ;;  %vm511_vm6 = vcmp.lt.s32.totalorder %v12208_v33, %v12162_v15  ;;  %s4634_s12 = sld [smem:[#allocation5 + $0x1]] }
  0x5a   : > { %vm12217_vm11 = vmand %vm5493_vm7, %vm12173_vm8  ;;  %vm519_vm7 = vcmp.lt.s32.totalorder %v12225_v38, %v12162_v15  ;;  %v12326_v5 = vadd.s32 168, %v12150_v11  ;;  %v12339_v18 = vadd.s32 176, %v12150_v11  ;;  %v12342_v20 = vadd.s32 200, %v12150_v11 }
  0x5b   : > { %654 = vperm.xlu1 %11460, %v581_v39   ;;  %649 = vperm.xlu0 %11459, %v580_v40   ;;  %25596 = vst [vmem:[#allocation14_spill] sm:$0xff] %v12203_v32  ;;  %v25598_v36 = vsel %vm12217_vm11, 4294967295, %v25597_v36  ;;  %v12228_v39 = vadd.s32 32, %v12150_v11  ;;  %v12231_v40 = vadd.s32 80, %v12150_v11 }
  0x5c   : > { %25599 = vst [vmem:[#allocation15_spill] sm:$0xff] %v25598_v36 }
  0x5d   : > { %vm529_vm2 = vcmp.lt.s32.totalorder %v12231_v40, %v12162_v15  ;;  %vm517_vm8 = vcmp.lt.s32.totalorder %v12228_v39, %v12162_v15 }
  0x5f   : > { %664 = vperm.xlu1 %11460, %v583_v41   ;;  %659 = vperm.xlu0 %11459, %v582_v42   ;;  %v12234_v41 = vrot.slane %v573_v27, %v12178_v21  ;;  %v12237_v42 = vrot.slane %v573_v27, %v12181_v22 }
  0x63   : > { %674 = vperm.xlu1 %11460, %v585_v43   ;;  %669 = vperm.xlu0 %11459, %v584_v44  }
  0x67   : > { %684 = vperm.xlu1 %11460, %v587_v45   ;;  %679 = vperm.xlu0 %11459, %v586_v46   ;;  %v12249_v45 = vadd.s32 104, %v12150_v11  ;;  %v12254_v46 = vsel %vm12217_vm11, %v5522_v31, %v12167_v17 }
  0x68   : > { %25600 = vst [vmem:[#allocation16_spill] sm:$0xff] %v12254_v46 }
  0x6b   : > { %694 = vperm.xlu1 %11460, %v589_v47   ;;  %689 = vperm.xlu0 %11459, %v588_v48   ;;  %v12261_v48 = vadd.s32 96, %v12150_v11 }
  0x6f   : > { %704 = vperm.xlu1 %11460, %v591_v49   ;;  %699 = vperm.xlu0 %11459, %v590_v50   ;;  %v12264_v49 = vadd.s32 120, %v12150_v11  ;;  %v12267_v50 = vadd.s32 112, %v12150_v11 }
  0x73   : > { %714 = vperm.xlu1 %11460, %v593_v51   ;;  %709 = vperm.xlu0 %11459, %v592_v52   ;;  %v12276_v52 = vadd.s32 136, %v12150_v11 }
  0x77   : > { %724 = vperm.xlu1 %11460, %v595_v53   ;;  %719 = vperm.xlu0 %11459, %v594_v54   ;;  %v12279_v53 = vadd.s32 128, %v12162_v15  ;;  %v12282_v54 = vadd.s32 128, %v12150_v11 }
  0x7b   : > { %734 = vperm.xlu1 %11460, %v597_v55   ;;  %729 = vperm.xlu0 %11459, %v596_v56  }
  0x7f   : > { %744 = vperm.xlu1 %11460, %v599_v57   ;;  %739 = vperm.xlu0 %11459, %v598_v58  }
  0x83   : > { %754 = vperm.xlu1 %11460, %v601_v59   ;;  %749 = vperm.xlu0 %11459, %v600_v60   ;;  %v12297_v59 = vadd.s32 152, %v12150_v11  ;;  %v12302_v60 = vsel %vm25234_vm14, 2139095040, %v25201_v34  ;;  %v12377_v34 = vadd.s32 232, %v12150_v11 }
  0x85   : > { %25603 = vst [vmem:[#allocation19_spill] sm:$0xff] %v12377_v34 }
  0x87   : > { %764 = vperm.xlu1 %11460, %v603_v61   ;;  %759 = vperm.xlu0 %11459, %v602_v62  }
  0x8b   : > { %774 = vperm.xlu1 %11460, %v605_v63   ;;  %769 = vperm.xlu0 %11459, %v604_v0   ;;  %v12315_v0 = vadd.s32 144, %v12150_v11 }
  0xce   : > { %v12138_v6 = vpop.permute.xlu1 %629  ;;  %v12140_v8 = vpop.permute.xlu0 %619 }
  0xcf   : > { %v781_v55 = vsub.f32 %v12234_v41, %v12138_v6  ;;  %v782_v61 = vsub.f32 %v12237_v42, %v12138_v6  ;;  %v777_v62 = vsub.f32 %v12234_v41, %v12140_v8  ;;  %v778_v3 = vsub.f32 %v12237_v42, %v12140_v8 }
  0xd0   : > { %v12329_v6 = vadd.s32 160, %v12150_v11  ;;  %v12336_v8 = vadd.s32 184, %v12150_v11 }
  0xd1   : > { %v845_v25 = vsel %vm513_vm3, %v781_v55, 0.0  ;;  %v922_v7 = vmul.f32 %v12222_v37, %v782_v61  ;;  %v841_v14 = vsel %vm509_vm10, %v777_v62, 0.0  ;;  %v12371_v55 = vadd.s32 208, %v12150_v11 }
  0xd2   : > { %v12152_v12 = vpop.permute.xlu1 %634  ;;  %v12154_v13 = vpop.permute.xlu0 %624  ;;  %v12380_v61 = vadd.s32 224, %v12150_v11  ;;  %v921_v62 = vmul.f32 %v12203_v32, %v845_v25  ;;  %vm539_vm3 = vcmp.lt.s32.totalorder %v12264_v49, %v12162_v15  ;;  %v917_v22 = vmul.f32 %v12203_v32, %v841_v14 }
  0xd3   : > { %25602 = vst [vmem:[#allocation18_spill] sm:$0xff] %v12371_v55  ;;  %v783_v16 = vsub.f32 %v12234_v41, %v12152_v12  ;;  %v779_v30 = vsub.f32 %v12234_v41, %v12154_v13  ;;  %v784_v21 = vsub.f32 %v12237_v42, %v12152_v12  ;;  %vm537_vm10 = vcmp.lt.s32.totalorder %v12267_v50, %v12162_v15 }
  0xd4   : > { %25604 = vst [vmem:[#allocation20_spill] sm:$0xff] %v12380_v61  ;;  %v986_v35 = vmul.f32 %v12170_v19, %v921_v62  ;;  %v982_v28 = vmul.f32 %v12170_v19, %v917_v22 }
  0xd5   : > { %v847_v36 = vsel %vm515_vm5, %v783_v16, 0.0  ;;  %vm546_vm5 = vcmp.lt.s32.totalorder %v12315_v0, %v12279_v53 }
  0xd6   : > { %v12183_v23 = vpop.permute.xlu1 %644  ;;  %v12185_v24 = vpop.permute.xlu0 %639  ;;  %v923_v33 = vmul.f32 %v12203_v32, %v847_v36 }
  0xd7   : > { %v787_v25 = vsub.f32 %v12234_v41, %v12183_v23  ;;  %v785_v14 = vsub.f32 %v12234_v41, %v12185_v24 }
  0xd9   : > { %v851_v40 = vsel %vm519_vm7, %v787_v25, 0.0  ;;  %vm556_vm7 = vcmp.lt.s32.totalorder %v12336_v8, %v12279_v53 }
  0xda   : > { %v12239_v43 = vpop.permute.xlu1 %654  ;;  %v12242_v44 = vpop.permute.xlu0 %649 }
  0xdb   : > { %v791_v47 = vsub.f32 %v12234_v41, %v12239_v43  ;;  %v789_v51 = vsub.f32 %v12234_v41, %v12242_v44 }
  0xdd   : > { %v12290_v56 = vsel %vm523_vm12, %v791_v47, 0.0  ;;  %v12312_v63 = vsel %vm521_vm4, %v789_v51, 0.0  ;;  %vm535_vm12 = vcmp.lt.s32.totalorder %v12249_v45, %v12162_v15  ;;  %vm533_vm4 = vcmp.lt.s32.totalorder %v12261_v48, %v12162_v15 }
  0xde   : > { %v12292_v57 = vpop.permute.xlu1 %664  ;;  %v12294_v58 = vpop.permute.xlu0 %659  ;;  %v12356_v47 = vadd.s32 192, %v12150_v11  ;;  %v12359_v51 = vadd.s32 216, %v12150_v11  ;;  %v927_v45 = vmul.f32 %v12203_v32, %v851_v40  ;;  %v790_v40 = vsub.f32 %v12237_v42, %v12242_v44 }
  0xdf   : > { %v795_v4 = vsub.f32 %v12234_v41, %v12292_v57  ;;  %v793_v9 = vsub.f32 %v12234_v41, %v12294_v58  ;;  %v931_v49 = vmul.f32 %v12203_v32, %v12290_v56  ;;  %v794_v15 = vsub.f32 %v12237_v42, %v12294_v58 }
  0xe0   : > { %25601 = vst [vmem:[#allocation17_spill] sm:$0xff] %v12359_v51  ;;  %v12414_v51 = vadd.s32 240, %v12150_v11 }
  0xe1   : > { %v12349_v26 = vsel %vm527_vm13, %v795_v4, 0.0  ;;  %v12368_v29 = vsel %vm525_vm15, %v793_v9, 0.0  ;;  %v918_v4 = vmul.f32 %v12222_v37, %v778_v3  ;;  %v12390_v3 = vadd.s32 248, %v12150_v11 }
  0xe2   : > { %v12351_v27 = vpop.permute.xlu1 %674  ;;  %v12353_v31 = vpop.permute.xlu0 %669  ;;  %25606 = vst [vmem:[#allocation22_spill] sm:$0xff] %v12414_v51  ;;  %vm544_vm13 = vcmp.lt.s32.totalorder %v12276_v52, %v12279_v53  ;;  %vm542_vm15 = vcmp.lt.s32.totalorder %v12282_v54, %v12279_v53 }
  0xe3   : > { %v799_v9 = vsub.f32 %v12234_v41, %v12351_v27  ;;  %25605 = vst [vmem:[#allocation21_spill] sm:$0xff] %v12390_v3  ;;  %v797_v61 = vsub.f32 %v12234_v41, %v12353_v31  ;;  %v987_v3 = vmul.f32 %v12170_v19, %v922_v7  ;;  %v983_v2 = vmul.f32 %v12170_v19, %v918_v4 }
  0xe4   : > { %v780_v7 = vsub.f32 %v12237_v42, %v12154_v13  ;;  %v788_v4 = vsub.f32 %v12237_v42, %v12183_v23  ;;  %v924_v13 = vmul.f32 %v12222_v37, %v784_v21  ;;  %v849_v23 = vsel %vm517_vm8, %v785_v14, 0.0 }
  0xe5   : > { %v12411_v12 = vsel %vm531_vm1, %v799_v9, 0.0  ;;  %v12425_v46 = vsel %vm529_vm2, %v797_v61, 0.0  ;;  %v843_v9 = vsel %vm511_vm6, %v779_v30, 0.0  ;;  %v12442_v62 = vadd.f32 1.0, %v987_v3 }
  0xe6   : > { %v12399_v34 = vpop.permute.xlu1 %684  ;;  %v12401_v55 = vpop.permute.xlu0 %679  ;;  %v919_v38 = vmul.f32 %v12203_v32, %v843_v9  ;;  %v920_v30 = vmul.f32 %v12222_v37, %v780_v7  ;;  %v786_v3 = vsub.f32 %v12237_v42, %v12185_v24  ;;  %v12466_v25 = vadd.f32 1.0, %v983_v2 }
  0xe7   : > { %v803_v16 = vsub.f32 %v12234_v41, %v12399_v34  ;;  %v801_v61 = vsub.f32 %v12234_v41, %v12401_v55  ;;  %v928_v14 = vmul.f32 %v12222_v37, %v788_v4  ;;  %v792_v9 = vsub.f32 %v12237_v42, %v12239_v43 }
  0xe8   : > { %v12472_v7 = vadd.f32 1.0, %v986_v35  ;;  %v989_v24 = vmul.f32 %v12170_v19, %v924_v13  ;;  %v988_v2 = vmul.f32 %v12170_v19, %v923_v33  ;;  %v984_v43 = vmul.f32 %v12170_v19, %v919_v38 }
  0xe9   : > { %v12451_v22 = vsel %vm535_vm12, %v803_v16, 0.0  ;;  %v12462_v36 = vsel %vm533_vm4, %v801_v61, 0.0  ;;  %v925_v16 = vmul.f32 %v12203_v32, %v849_v23  ;;  %v12478_v61 = vadd.f32 1.0, %v982_v28 }
  0xea   : > { %v12453_v21 = vpop.permute.xlu1 %694  ;;  %v12464_v39 = vpop.permute.xlu0 %689  ;;  %v985_v35 = vmul.f32 %v12170_v19, %v920_v30  ;;  %v926_v13 = vmul.f32 %v12222_v37, %v786_v3  ;;  %v992_v28 = vmul.f32 %v12170_v19, %v927_v45  ;;  %v993_v33 = vmul.f32 %v12170_v19, %v928_v14 }
  0xeb   : > { %v807_v48 = vsub.f32 %v12234_v41, %v12453_v21  ;;  %v805_v4 = vsub.f32 %v12234_v41, %v12464_v39  ;;  %v932_v44 = vmul.f32 %v12222_v37, %v792_v9  ;;  %v12501_v38 = vadd.f32 1.0, %v989_v24 }
  0xec   : > { %v990_v30 = vmul.f32 %v12170_v19, %v925_v16  ;;  %v796_v3 = vsub.f32 %v12237_v42, %v12292_v57  ;;  %v12508_v45 = vadd.f32 1.0, %v988_v2  ;;  %v929_v14 = vmul.f32 %v12203_v32, %v12312_v63 }
  0xed   : > { %v12491_v23 = vsel %vm539_vm3, %v807_v48, 0.0  ;;  %v12499_v41 = vsel %vm537_vm10, %v805_v4, 0.0  ;;  %v930_v9 = vmul.f32 %v12222_v37, %v790_v40  ;;  %v12515_v50 = vadd.f32 1.0, %v984_v43 }
  0xee   : > { %v12517_v24 = vadd.f32 1.0, %v985_v35  ;;  %v991_v16 = vmul.f32 %v12170_v19, %v926_v13  ;;  %v800_v56 = vsub.f32 %v12237_v42, %v12351_v27  ;;  %v12522_v57 = vpop.permute.xlu1 %704  ;;  %v12524_v48 = vpop.permute.xlu0 %699  ;;  %v12526_v2 = vadd.f32 1.0, %v992_v28 }
  0xef   : > { %v12528_v63 = vadd.f32 1.0, %v993_v33  ;;  %v997_v40 = vmul.f32 %v12170_v19, %v932_v44  ;;  %v798_v58 = vsub.f32 %v12237_v42, %v12353_v31  ;;  %v12533_v4 = vadd.f32 1.0, %v990_v30 }
  0xf0   : > { %v996_v43 = vmul.f32 %v12170_v19, %v931_v49  ;;  %v935_v27 = vmul.f32 %v12203_v32, %v12349_v26  ;;  %v936_v35 = vmul.f32 %v12222_v37, %v796_v3  ;;  %v994_v13 = vmul.f32 %v12170_v19, %v929_v14 }
  0xf1   : > { %v995_v28 = vmul.f32 %v12170_v19, %v930_v9  ;;  %v933_v33 = vmul.f32 %v12203_v32, %v12368_v29  ;;  %v934_v44 = vmul.f32 %v12222_v37, %v794_v15  ;;  %v939_v31 = vmul.f32 %v12203_v32, %v12411_v12 }
  0xf2   : > { %v940_v30 = vmul.f32 %v12222_v37, %v800_v56  ;;  %v937_v49 = vmul.f32 %v12203_v32, %v12425_v46  ;;  %v12554_v26 = vand.u32 2147483647, %v12466_v25  ;;  %v12556_v29 = vadd.f32 1.0, %v991_v16  ;;  %v715_v56 = vpop.permute.xlu1 %714 }
  0xf3   : > { %v12558_v3 = vadd.f32 1.0, %v997_v40  ;;  %v938_v12 = vmul.f32 %v12222_v37, %v798_v58  ;;  %v804_v14 = vsub.f32 %v12237_v42, %v12399_v34  ;;  %vm548_vm1 = vcmp.lt.s32.totalorder %v12297_v59, %v12279_v53  ;;  %v710_v40 = vpop.permute.xlu0 %709 }
  0xf4   : > { %v12565_v46 = vadd.f32 1.0, %v996_v43  ;;  %v1000_v9 = vmul.f32 %v12170_v19, %v935_v27  ;;  %v1001_v15 = vmul.f32 %v12170_v19, %v936_v35  ;;  %v802_v16 = vsub.f32 %v12237_v42, %v12401_v55 }
  0xf5   : > { %v12571_v11 = vadd.f32 1.0, %v994_v13  ;;  %v998_v58 = vmul.f32 %v12170_v19, %v933_v33  ;;  %v999_v34 = vmul.f32 %v12170_v19, %v934_v44  ;;  %11461 = vlog2.f32 %v12554_v26 }
  0xf6   : > { %25607 = vst [vmem:[#allocation23_spill] sm:$0xff] %v12565_v46  ;;  %v12578_v43 = vadd.f32 1.0, %v995_v28  ;;  %v1004_v27 = vmul.f32 %v12170_v19, %v939_v31  ;;  %v1005_v35 = vmul.f32 %v12170_v19, %v940_v30  ;;  %v1002_v55 = vmul.f32 %v12170_v19, %v937_v49 }
  0xf7   : > { %v1003_v13 = vmul.f32 %v12170_v19, %v938_v12  ;;  %v943_v33 = vmul.f32 %v12203_v32, %v12451_v22  ;;  %v944_v44 = vmul.f32 %v12222_v37, %v804_v14  ;;  %v941_v51 = vmul.f32 %v12203_v32, %v12462_v36 }
  0xf8   : > { %vm552_vm2 = vcmp.lt.s32.totalorder %v12326_v5, %v12279_v53  ;;  %vm550_vm6 = vcmp.lt.s32.totalorder %v12329_v6, %v12279_v53  ;;  %v12593_v28 = vadd.f32 1.0, %v1000_v9  ;;  %v12595_v31 = vadd.f32 1.0, %v1001_v15 }
  0xf9   : > { %v942_v30 = vmul.f32 %v12222_v37, %v802_v16  ;;  %v808_v22 = vsub.f32 %v12237_v42, %v12453_v21  ;;  %v12600_v49 = vadd.f32 1.0, %v998_v58  ;;  %v12602_v12 = vadd.f32 1.0, %v999_v34  ;;  %v720_v21 = vpop.permute.xlu0 %719 }
  0xfa   : > { %25608 = vst [vmem:[#allocation24_spill] sm:$0xff] %v12593_v28  ;;  %v812_v36 = vsub.f32 %v12237_v42, %v12522_v57  ;;  %v810_v14 = vsub.f32 %v12237_v42, %v12524_v48  ;;  %v12608_v46 = vadd.f32 1.0, %v1004_v27  ;;  %v12610_v9 = vadd.f32 1.0, %v1005_v35  ;;  %v725_v28 = vpop.permute.xlu1 %724 }
  0xfb   : > { %25609 = vst [vmem:[#allocation25_spill] sm:$0xff] %v12600_v49  ;;  %v12612_v15 = vadd.f32 1.0, %v1002_v55  ;;  %v816_v16 = vsub.f32 %v12237_v42, %v715_v56  ;;  %v12615_v58 = vadd.f32 1.0, %v1003_v13  ;;  %v1008_v34 = vmul.f32 %v12170_v19, %v943_v33 }
  0xfc   : > { %25610 = vst [vmem:[#allocation26_spill] sm:$0xff] %v12608_v46  ;;  %v1009_v49 = vmul.f32 %v12170_v19, %v944_v44  ;;  %v1006_v57 = vmul.f32 %v12170_v19, %v941_v51  ;;  %v1007_v48 = vmul.f32 %v12170_v19, %v942_v30  ;;  %v948_v27 = vmul.f32 %v12222_v37, %v808_v22 }
  0xfd   : > { %v806_v35 = vsub.f32 %v12237_v42, %v12464_v39  ;;  %v814_v55 = vsub.f32 %v12237_v42, %v710_v40  ;;  %vm554_vm8 = vcmp.lt.s32.totalorder %v12339_v18, %v12279_v53  ;;  %v947_v56 = vmul.f32 %v12203_v32, %v12491_v23 }
  0xfe   : > { %v876_v51 = vsel %vm544_vm13, %v812_v36, 0.0  ;;  %v874_v13 = vsel %vm542_vm15, %v810_v14, 0.0  ;;  %v12638_v39 = vand.u32 2147483647, %v12517_v24  ;;  %v945_v40 = vmul.f32 %v12203_v32, %v12499_v41  ;;  %v735_v14 = vpop.permute.xlu1 %734 }
  0xff   : > { %v880_v33 = vsel %vm548_vm1, %v816_v16, 0.0  ;;  %v820_v23 = vsub.f32 %v12237_v42, %v725_v28  ;;  %v818_v44 = vsub.f32 %v12237_v42, %v720_v21  ;;  %v11462_v52 = vpop.eup %11461  ;;  %v12647_v30 = vadd.f32 1.0, %v1008_v34  ;;  %v730_v16 = vpop.permute.xlu0 %729 }
 0x100   : > { %v12649_v22 = vadd.f32 1.0, %v1009_v49  ;;  %v12651_v54 = vadd.f32 1.0, %v1006_v57  ;;  %11463 = vlog2.f32 %v12638_v39  ;;  %v946_v36 = vmul.f32 %v12222_v37, %v806_v35 }
 0x101   : > { %25611 = vst [vmem:[#allocation27_spill] sm:$0xff] %v12647_v30  ;;  %v952_v41 = vmul.f32 %v12222_v37, %v876_v51  ;;  %v950_v59 = vmul.f32 %v12222_v37, %v874_v13  ;;  %v878_v28 = vsel %vm546_vm5, %v814_v55, 0.0  ;;  %v12660_v21 = vadd.f32 1.0, %v1007_v48 }
 0x102   : > { %25612 = vst [vmem:[#allocation28_spill] sm:$0xff] %v12649_v22  ;;  %25613 = vst [vmem:[#allocation29_spill] sm:$0xff] %v12651_v54  ;;  %v1013_v49 = vmul.f32 %v12170_v19, %v948_v27  ;;  %v956_v34 = vmul.f32 %v12222_v37, %v880_v33  ;;  %v5535_v57 = vmul.f32 %v11462_v52, %v12129_v1  ;;  %v884_v13 = vsel %vm552_vm2, %v820_v23, 0.0 }
 0x103   : > { %25614 = vst [vmem:[#allocation30_spill] sm:$0xff] %v12660_v21  ;;  %v1012_v35 = vmul.f32 %v12170_v19, %v947_v56  ;;  %v1010_v51 = vmul.f32 %v12170_v19, %v945_v40  ;;  %v882_v0 = vsel %vm550_vm6, %v818_v44, 0.0  ;;  %v954_v48 = vmul.f32 %v12222_v37, %v878_v28 }
 0x104   : > { %v824_v27 = vsub.f32 %v12237_v42, %v735_v14  ;;  %v822_v55 = vsub.f32 %v12237_v42, %v730_v16  ;;  %11465 = vpow2.f32 %v5535_v57  ;;  %v1011_v33 = vmul.f32 %v12170_v19, %v946_v36 }
 0x105   : > { %v1017_v56 = vmul.f32 %v12170_v19, %v952_v41  ;;  %v1015_v40 = vmul.f32 %v12170_v19, %v950_v59  ;;  %v12680_v5 = vand.u32 2147483647, %v12478_v61  ;;  %v1021_v23 = vmul.f32 %v12170_v19, %v956_v34 }
 0x106   : > { %v960_v6 = vmul.f32 %v12222_v37, %v884_v13  ;;  %v958_v44 = vmul.f32 %v12222_v37, %v882_v0  ;;  %vm560_vm12 = vcmp.lt.s32.totalorder %v12342_v20, %v12279_v53  ;;  %vm558_vm4 = vcmp.lt.s32.totalorder %v12356_v47, %v12279_v53  ;;  %v745_v0 = vpop.permute.xlu1 %744 }
 0x107   : > { %vm5557_vm3 = vcmp.gt.f32.partialorder %v12554_v26, 1065353216  ;;  %v12690_v52 = vadd.f32 1.0, %v1012_v35  ;;  %v12692_v36 = vadd.f32 1.0, %v1013_v49  ;;  %v12694_v41 = vadd.f32 1.0, %v1010_v51 }
 0x108   : > { %11467 = vlog2.f32 %v12680_v5  ;;  %v1019_v59 = vmul.f32 %v12170_v19, %v954_v48  ;;  %v888_v28 = vsel %vm556_vm7, %v824_v27, 0.0  ;;  %v886_v14 = vsel %vm554_vm8, %v822_v55, 0.0  ;;  %vm12723_vm5 = vmxor %vm25234_vm14, %vm5557_vm3  ;;  %v740_v48 = vpop.permute.xlu0 %739 }
 0x109   : > { %25615 = vst [vmem:[#allocation31_spill] sm:$0xff] %v12690_v52  ;;  %25616 = vst [vmem:[#allocation32_spill] sm:$0xff] %v12692_v36  ;;  %vm5554_vm13 = vcmp.eq.f32.partialorder %v12466_v25, 0  ;;  %v12706_v16 = vadd.f32 1.0, %v1011_v33  ;;  %v12708_v49 = vadd.f32 1.0, %v1017_v56  ;;  %v12710_v34 = vadd.f32 1.0, %v1015_v40 }
 0x10a   : > { %25617 = vst [vmem:[#allocation33_spill] sm:$0xff] %v12694_v41  ;;  %vm12714_vm15 = vcmp.ne.f32.partialorder %v12129_v1, %v12129_v1  ;;  %v25621_v57 = vmov 0  ;;  %vm5553_vm1 = vcmp.lt.f32.partialorder %v12466_v25, 0  ;;  %v11464_v18 = vpop.eup %11463  ;;  %v12727_v35 = vadd.f32 1.0, %v1021_v23  ;;  %vm12740_vm2 = vmand %vm25234_vm14, %vm5554_vm13 }
 0x10b   : > { %25618 = vst [vmem:[#allocation34_spill] sm:$0xff] %v12706_v16  ;;  %25619 = vst [vmem:[#allocation35_spill] sm:$0xff] %v12708_v49  ;;  %v25622_v57 = vsel %vm12714_vm15, 4294967295, %v25621_v57  ;;  %v1025_v51 = vmul.f32 %v12170_v19, %v960_v6  ;;  %v1023_v13 = vmul.f32 %v12170_v19, %v958_v44  ;;  %v12732_v27 = vand.u32 2147483647, %v12515_v50 }
 0x10c   : > { %25620 = vst [vmem:[#allocation36_spill] sm:$0xff] %v12710_v34  ;;  %25625 = vst [vmem:[#allocation37_spill] sm:$0xff] %v12727_v35  ;;  %v964_v55 = vmul.f32 %v12222_v37, %v888_v28  ;;  %v962_v33 = vmul.f32 %v12222_v37, %v886_v14  ;;  %v5639_v40 = vmul.f32 %v11464_v18, %v12129_v1  ;;  %vm5661_vm6 = vcmp.gt.f32.partialorder %v12638_v39, 1065353216 }
 0x10d   : > { %v12746_v23 = vadd.f32 1.0, %v1019_v59  ;;  %vm5568_vm3 = vmor %vm12740_vm2, %vm12723_vm5  ;;  %11469 = vlog2.f32 %v12732_v27  ;;  %v828_v6 = vsub.f32 %v12237_v42, %v745_v0  ;;  %v826_v44 = vsub.f32 %v12237_v42, %v740_v48 }
 0x10e   : > { %vm5559_vm7 = vmand %vm5553_vm1, %vm12144_vm9  ;;  %11471 = vpow2.f32 %v5639_v40  ;;  %vm25225_vm10 = vcmp.eq.f32.partialorder %v12517_v24, 0  ;;  %v11466_v59 = vpop.eup %11465  ;;  %v12763_v28 = vadd.f32 1.0, %v1025_v51  ;;  %v12765_v14 = vadd.f32 1.0, %v1023_v13 }
 0x10f   : > { %25628 = vst [vmem:[#allocation38_spill] sm:$0xff] %v12746_v23  ;;  %vm5558_vm8 = vcmp.eq.f32.partialorder %v12554_v26, 2139095040  ;;  %vm12772_vm0 = vmxor %vm25234_vm14, %vm5661_vm6  ;;  %v12777_v0 = vand.u32 2147483647, %v12442_v62  ;;  %v12780_v48 = vmul.f32 %v12170_v19, %v964_v55  ;;  %v12783_v51 = vmul.f32 %v12170_v19, %v962_v33  ;;  %v25634_v55 = vld [vmem:[#allocation16_spill] sm:$0xff]  ;;  %v25637_v23 = vld [vmem:[#allocation15_spill] sm:$0xff] }
 0x110   : > { %25629 = vst [vmem:[#allocation39_spill] sm:$0xff] %v12763_v28  ;;  %25630 = vst [vmem:[#allocation40_spill] sm:$0xff] %v12765_v14  ;;  %v5560_v13 = vsel %vm5559_vm7, 2143289344, %v11466_v59  ;;  %v25633_v40 = vmov 0   ;;  %vm5570_vm6 = vcmp.eq.f32.partialorder %v12466_v25, 3212836864  ;;  %v5576_v33 = vsel %vm5553_vm1, %v25634_v55, %v12167_v17 }
 0x111   : > { %v5569_v28 = vsel %vm5568_vm3, 2139095040, %v25633_v40  ;;  %v5562_v14 = vsel %vm5554_vm13, %v12302_v60, %v5560_v13  ;;  %vm12803_vm7 = vmand %vm25234_vm14, %vm25225_vm10  ;;  %11473 = vlog2.f32 %v12777_v0  ;;  %v12811_v59 = vsel %vm560_vm12, %v828_v6, 0.0 }
 0x112   : > { %v11468_v8 = vpop.eup %11467  ;;  %v12816_v13 = vsel %vm558_vm4, %v826_v44, 0.0  ;;  %v5564_v35 = vxor.u32 2147483648, %v5562_v14  ;;  %vm5578_vm13 = vcmp.ne.f32.partialorder %v12466_v25, %v12466_v25  ;;  %vm5672_vm1 = vmor %vm12803_vm7, %vm12772_vm0  ;;  %vm25638_vm5 = vcmp.lt.s32.totalorder %v12466_v25, 0 }
 0x113   : > { %vm5563_vm12 = vmand %vm25638_vm5, %vm12217_vm11  ;;  %v5571_v20 = vsel %vm5570_vm6, 1065353216, %v5569_v28  ;;  %v5483_v6 = vmul.f32 %v11468_v8, %v12129_v1  ;;  %vm5505_vm4 = vcmp.gt.f32.partialorder %v12680_v5, 1065353216  ;;  %v12831_v47 = vand.u32 2147483647, %v12501_v38  ;;  %v25643_v28 = vld [vmem:[#allocation10_spill] sm:$0xff] }
 0x114   : > { %v5565_v44 = vsel %vm5563_vm12, %v5564_v35, %v5562_v14  ;;  %vm25639_vm2 = vcmp.eq.f32.partialorder %v12129_v1, 0  ;;  %vm25640_vm3 = vcmp.eq.f32.partialorder %v12466_v25, 1065353216  ;;  %vm5657_vm0 = vcmp.lt.f32.partialorder %v12517_v24, 0  ;;  %vm12848_vm12 = vmor %vm5578_vm13, %vm12714_vm15 }
 0x115   : > { %vm12837_vm10 = vmor %vm25640_vm3, %vm25639_vm2  ;;  %vm5659_vm6 = vcmp.eq.f32.partialorder %v12517_v24, 1065353216  ;;  %vm25644_vm5 = vcmp.eq.f32.partialorder %v25643_v28, 2139095040  ;;  %v5673_v14 = vsel %vm5672_vm1, 2139095040, %v25633_v40  ;;  %11475 = vpow2.f32 %v5483_v6 }
 0x116   : > { %v5572_v56 = vsel %vm25644_vm5, %v5571_v20, %v5565_v44  ;;  %vm25229_vm2 = vcmp.eq.f32.partialorder %v12478_v61, 0  ;;  %vm5674_vm7 = vcmp.eq.f32.partialorder %v12517_v24, 3212836864  ;;  %vm12862_vm13 = vmxor %vm25234_vm14, %vm5505_vm4  ;;  %11477 = vlog2.f32 %v12831_v47 }
 0x117   : > { %v5577_v8 = vsel %vm5558_vm8, %v5576_v33, %v5572_v56  ;;  %v11470_v6 = vpop.eup %11469  ;;  %vm12873_vm8 = vmand %vm5657_vm0, %vm12144_vm9  ;;  %v5680_v33 = vsel %vm5657_vm0, %v25634_v55, %v12167_v17  ;;  %vm5682_vm1 = vcmp.ne.f32.partialorder %v12517_v24, %v12517_v24  ;;  %vm5501_vm4 = vcmp.lt.f32.partialorder %v12478_v61, 0 }
 0x118   : > { %v5581_v44 = vsel %vm12848_vm12, 2143289344, %v5577_v8  ;;  %v11472_v56 = vpop.eup %11471  ;;  %v5675_v8 = vsel %vm5674_vm7, 1065353216, %v5673_v14  ;;  %vm25651_vm5 = vcmp.eq.f32.partialorder %v12129_v1, 0  ;;  %vm12898_vm0 = vmand %vm25234_vm14, %vm25229_vm2  ;;  %v5587_v18 = vmul.f32 %v11470_v6, %v12129_v1 }
 0x119   : > { %v5583_v35 = vsel %vm12837_vm10, 1065353216, %v5581_v44  ;;  %vm12890_vm12 = vmor %vm5659_vm6, %vm25651_vm5  ;;  %v12904_v14 = vand.u32 2147483647, %v12472_v7  ;;  %vm25656_vm10 = vcmp.eq.f32.partialorder %v12129_v1, 1065353216  ;;  %v5664_v34 = vsel %vm12873_vm8, 2143289344, %v11472_v56 }
 0x11a   : > { %v5584_v44 = vsel %vm25656_vm10, %v12466_v25, %v5583_v35  ;;  %vm5504_vm7 = vcmp.lt.s32.totalorder %v12478_v61, 0  ;;  %vm5516_vm5 = vmor %vm12898_vm0, %vm12862_vm13  ;;  %vm25657_vm2 = vcmp.eq.f32.partialorder %v12517_v24, 0  ;;  %vm25658_vm10 = vcmp.lt.s32.totalorder %v12517_v24, 0 }
 0x11b   : > { %v5666_v6 = vsel %vm25657_vm2, %v12302_v60, %v5664_v34  ;;  %vm5667_vm3 = vmand %vm25658_vm10, %vm12217_vm11  ;;  %v1177_v25 = vsub.f32 1.0, %v5584_v44  ;;  %11479 = vpow2.f32 %v5587_v18  ;;  %v11474_v26 = vpop.eup %11473  ;;  %vm5526_vm2 = vcmp.ne.f32.partialorder %v12478_v61, %v12478_v61 }
 0x11c   : > { %v5668_v56 = vxor.u32 2147483648, %v5666_v6  ;;  %vm12930_vm13 = vmor %vm5682_vm1, %vm12714_vm15  ;;  %vm5609_vm0 = vcmp.gt.f32.partialorder %v12732_v27, 1065353216  ;;  %11481 = vlog2.f32 %v12904_v14  ;;  %v5517_v35 = vsel %vm5516_vm5, 2139095040, %v25633_v40 }
 0x11d   : > { %v12938_v34 = vand.u32 4294901760, %v1177_v25  ;;  %vm12944_vm10 = vmand %vm5501_vm4, %vm12144_vm9  ;;  %v5743_v18 = vmul.f32 %v11474_v26, %v12129_v1  ;;  %v5524_v41 = vsel %vm5501_vm4, %v25634_v55, %v12167_v17  ;;  %vm25673_vm5 = vcmp.eq.f32.partialorder %v12129_v1, 0 }
 0x11e   : > { %v5669_v44 = vsel %vm5667_vm3, %v5668_v56, %v5666_v6  ;;  %vm12956_vm8 = vmand %vm5504_vm7, %vm12217_vm11  ;;  %vm25665_vm3 = vcmp.eq.f32.partialorder %v25643_v28, 2139095040  ;;  %vm25674_vm4 = vcmp.eq.f32.partialorder %v12478_v61, 1065353216  ;;  %v13091_v22 = vand.u32 2147483647, %v12508_v45 }
 0x11f   : > { %v5676_v6 = vsel %vm25665_vm3, %v5675_v8, %v5669_v44  ;;  %v12969_v26 = vsub.f32 %v1177_v25, %v12938_v34  ;;  %vm12976_vm7 = vmor %vm5526_vm2, %vm12714_vm15  ;;  %11483 = vpow2.f32 %v5743_v18  ;;  %v11476_v25 = vpop.eup %11475  ;;  %vm25671_vm3 = vcmp.eq.f32.partialorder %v12638_v39, 2139095040 }
 0x120   : > { %vm12985_vm6 = vmxor %vm25234_vm14, %vm5609_vm0  ;;  %v5681_v44 = vsel %vm25671_vm3, %v5680_v33, %v5676_v6  ;;  %vm25672_vm2 = vcmp.eq.f32.partialorder %v12478_v61, 3212836864  ;;  %vm25677_vm0 = vcmp.lt.f32.partialorder %v12515_v50, 0  ;;  %v11478_v39 = vpop.eup %11477  ;;  %v25681_v6 = vmov 0 }
 0x121   : > { %25666 = vst [vmem:[#allocation16_spill] sm:$0xff] %v12969_v26  ;;  %v5519_v26 = vsel %vm25672_vm2, 1065353216, %v5517_v35  ;;  %vm12997_vm1 = vmor %vm25674_vm4, %vm25673_vm5  ;;  %v5685_v33 = vsel %vm12930_vm13, 2143289344, %v5681_v44  ;;  %v5508_v35 = vsel %vm12944_vm10, 2143289344, %v11476_v25  ;;  %vm25680_vm5 = vcmp.lt.s32.totalorder %v12515_v50, 0 }
 0x122   : > { %vm13005_vm14 = vmand %vm25677_vm0, %vm12144_vm9  ;;  %vm25683_vm0 = vcmp.eq.f32.partialorder %v12515_v50, 0  ;;  %vm25684_vm3 = vcmp.lt.f32.partialorder %v12129_v1, 0  ;;  %vm5765_vm10 = vcmp.gt.f32.partialorder %v12777_v0, 1065353216  ;;  %v5687_v49 = vsel %vm12890_vm12, 1065353216, %v5685_v33 }
 0x123   : > { %vm13019_vm4 = vmand %vm25680_vm5, %vm12217_vm11  ;;  %vm25687_vm5 = vcmp.eq.f32.partialorder %v12478_v61, 0  ;;  %v5847_v25 = vmul.f32 %v11478_v39, %v12129_v1  ;;  %vm25690_vm11 = vcmp.eq.f32.partialorder %v12442_v62, 0  ;;  %vm25703_vm12 = vcmp.eq.f32.partialorder %v12515_v50, 1065353216 }
 0x124   : > { %v25682_v6 = vsel %vm13019_vm4, 4294967295, %v25681_v6  ;;  %vm13027_vm2 = vmand %vm25684_vm3, %vm25683_vm0  ;;  %v5510_v20 = vsel %vm25687_vm5, %v12302_v60, %v5508_v35  ;;  %vm25688_vm0 = vcmp.eq.f32.partialorder %v12129_v1, 1065353216  ;;  %vm25689_vm5 = vcmp.lt.f32.partialorder %v12515_v50, 0 }
 0x125   : > { %v5688_v44 = vsel %vm25688_vm0, %v12517_v24, %v5687_v49  ;;  %v5512_v32 = vxor.u32 2147483648, %v5510_v20  ;;  %v5628_v33 = vsel %vm25689_vm5, %v25634_v55, %v12167_v17  ;;  %vm13058_vm4 = vmand %vm25684_vm3, %vm25690_vm11  ;;  %vm25696_vm5 = vcmp.lt.f32.partialorder %v12442_v62, 0  ;;  %v11480_v30 = vpop.eup %11479 }
 0x126   : > { %v1179_v35 = vsub.f32 1.0, %v5688_v44  ;;  %vm25693_vm0 = vmmov %vm25684_vm3  ;;  %v13073_v49 = vsel %vm25696_vm5, %v25634_v55, %v12167_v17  ;;  %11485 = vpow2.f32 %v5847_v25  ;;  %vm5869_vm5 = vcmp.gt.f32.partialorder %v12831_v47, 1065353216  ;;  %v11482_v25 = vpop.eup %11481 }
 0x127   : > { %vm13064_vm9 = vmxor %vm25693_vm0, %vm5765_vm10  ;;  %v5513_v44 = vsel %vm12956_vm8, %v5512_v32, %v5510_v20  ;;  %vm25697_vm10 = vcmp.ne.f32.partialorder %v12515_v50, %v12515_v50  ;;  %vm25700_vm8 = vcmp.eq.f32.partialorder %v25643_v28, 2139095040  ;;  %v5612_v20 = vsel %vm13005_vm14, 2143289344, %v11480_v30 }
 0x128   : > { %vm13084_vm3 = vmor %vm25697_vm10, %vm12714_vm15  ;;  %v1257_v21 = vand.u32 4294901760, %v1179_v35  ;;  %v5520_v52 = vsel %vm25700_vm8, %v5519_v26, %v5513_v44  ;;  %vm25702_vm11 = vcmp.eq.f32.partialorder %v12129_v1, 0  ;;  %vm25706_vm0 = vcmp.eq.f32.partialorder %v12680_v5, 2139095040 }
 0x129   : > { %vm25701_vm10 = vmor %vm13027_vm2, %vm12985_vm6  ;;  %v5525_v30 = vsel %vm25706_vm0, %v5524_v41, %v5520_v52  ;;  %vm25707_vm14 = vcmp.eq.f32.partialorder %v12515_v50, 0  ;;  %v5691_v26 = vmul.f32 %v11482_v25, %v12129_v1  ;;  %11487 = vlog2.f32 %v13091_v22  ;;  %v11484_v25 = vpop.eup %11483 }
 0x12a   : > { %v5621_v32 = vsel %vm25701_vm10, 2139095040, %v25633_v40  ;;  %vm13107_vm13 = vmor %vm25703_vm12, %vm25702_vm11  ;;  %v5614_v16 = vsel %vm25707_vm14, %v12302_v60, %v5612_v20  ;;  %v13125_v8 = vpack.c.bf16 %v1257_v21, %v12938_v34  ;;  %v13127_v5 = vsub.f32 %v1179_v35, %v1257_v21 }
 0x12b   : > { %vm5776_vm2 = vmor %vm13058_vm4, %vm13064_vm9  ;;  %v5529_v41 = vsel %vm12976_vm7, 2143289344, %v5525_v30  ;;  %v5616_v18 = vxor.u32 2147483648, %v5614_v16  ;;  %vm25710_vm12 = vcmp.lt.f32.partialorder %v12129_v1, 0  ;;  %vm25713_vm0 = vcmp.eq.f32.partialorder %v12515_v50, 3212836864 }
 0x12c   : > { %25708 = vst [vmem:[#allocation15_spill] sm:$0xff] %v13125_v8  ;;  %25709 = vst [vmem:[#allocation10_spill] sm:$0xff] %v13127_v5  ;;  %v5531_v52 = vsel %vm12997_vm1, 1065353216, %v5529_v41  ;;  %v5623_v21 = vsel %vm25713_vm0, 1065353216, %v5621_v32  ;;  %vm25714_vm10 = vnez %v25590_v10  ;;  %vm25715_vm7 = vcmp.lt.f32.partialorder %v12442_v62, 0  ;;  %4642 = vmatprep.subr.bf16.mxu1 %v13125_v8  ;;  %4834 = vmatprep.subr.bf16.mxu0 %v13125_v8 }
 0x12d   : > { %vm13135_vm11 = vmxor %vm25710_vm12, %vm5869_vm5  ;;  %vm5865_vm8 = vcmp.lt.f32.partialorder %v12501_v38, 0  ;;  %11489 = vpow2.f32 %v5691_v26  ;;  %vm25716_vm5 = vcmp.eq.f32.partialorder %v12129_v1, 1065353216  ;;  %vm25717_vm1 = vnez %v25682_v6 }
 0x12e   : > { %vm5767_vm14 = vmand %vm25715_vm7, %vm25714_vm10  ;;  %v5532_v36 = vsel %vm25716_vm5, %v12478_v61, %v5531_v52  ;;  %v5617_v34 = vsel %vm25717_vm1, %v5616_v18, %v5614_v16  ;;  %v5777_v35 = vsel %vm5776_vm2, 2139095040, %v25633_v40  ;;  %vm25718_vm12 = vcmp.eq.f32.partialorder %v12501_v38, 0 }
 0x12f   : > { %v5768_v56 = vsel %vm5767_vm14, 2143289344, %v11484_v25  ;;  %vm25719_vm0 = vcmp.lt.f32.partialorder %v12129_v1, 0  ;;  %vm25722_vm5 = vcmp.eq.f32.partialorder %v25643_v28, 2139095040  ;;  %v1176_v6 = vsub.f32 1.0, %v5532_v36 }
 0x130   : > { %vm13165_vm7 = vmand %vm25719_vm0, %vm25718_vm12  ;;  %v5624_v61 = vsel %vm25722_vm5, %v5623_v21, %v5617_v34  ;;  %vm25723_vm14 = vcmp.eq.f32.partialorder %v12442_v62, 0  ;;  %vm25724_vm2 = vcmp.eq.f32.partialorder %v12732_v27, 2139095040  ;;  %vm25725_vm12 = vnez %v25637_v23 }
 0x131   : > { %v5770_v39 = vsel %vm25723_vm14, %v12302_v60, %v5768_v56  ;;  %vm5880_vm4 = vmor %vm13165_vm7, %vm13135_vm11  ;;  %v5629_v24 = vsel %vm25724_vm2, %v5628_v33, %v5624_v61  ;;  %vm25726_vm0 = vcmp.lt.s32.totalorder %v12442_v62, 0  ;;  %vm5870_vm14 = vcmp.eq.f32.partialorder %v12831_v47, 2139095040  ;;  %v11486_v33 = vpop.eup %11485 }
 0x132   : > { %vm5771_vm5 = vmand %vm25726_vm0, %vm25725_vm12  ;;  %v5772_v32 = vxor.u32 2147483648, %v5770_v39  ;;  %vm5710_vm1 = vcmp.eq.f32.partialorder %v12472_v7, 0  ;;  %v5633_v30 = vsel %vm13084_vm3, 2143289344, %v5629_v24  ;;  %v1255_v16 = vand.u32 4294901760, %v1176_v6 }
 0x133   : > { %vm25727_vm9 = vcmp.eq.f32.partialorder %v12442_v62, 3212836864  ;;  %vm25728_vm2 = vcmp.ne.f32.partialorder %v12442_v62, %v12442_v62  ;;  %vm5713_vm0 = vcmp.gt.f32.partialorder %v12904_v14, 1065353216  ;;  %v5635_v54 = vsel %vm13107_vm13, 1065353216, %v5633_v30  ;;  %vm5871_vm3 = vmand %vm5865_vm8, %vm25714_vm10  ;;  %v11488_v20 = vpop.eup %11487 }
 0x134   : > { %v5779_v26 = vsel %vm25727_vm9, 1065353216, %v5777_v35  ;;  %vm13197_vm6 = vmor %vm25728_vm2, %vm12714_vm15  ;;  %v5773_v41 = vsel %vm5771_vm5, %v5772_v32, %v5770_v39  ;;  %v5881_v18 = vsel %vm5880_vm4, 2139095040, %v25633_v40  ;;  %v13215_v25 = vand.u32 2147483647, %v12556_v29 }
 0x135   : > { %vm25731_vm9 = vcmp.eq.f32.partialorder %v12129_v1, 1065353216  ;;  %v13220_v52 = vsub.f32 %v1176_v6, %v1255_v16  ;;  %vm25733_vm13 = vcmp.eq.f32.partialorder %v25643_v28, 2139095040  ;;  %v5872_v36 = vsel %vm5871_vm3, 2143289344, %v11486_v33 }
 0x136   : > { %v5636_v46 = vsel %vm25731_vm9, %v12515_v50, %v5635_v54  ;;  %v5780_v21 = vsel %vm25733_vm13, %v5779_v26, %v5773_v41  ;;  %vm25734_vm5 = vcmp.lt.f32.partialorder %v12129_v1, 0  ;;  %vm25737_vm11 = vcmp.eq.f32.partialorder %v12777_v0, 2139095040 }
 0x137   : > { %25732 = vst [vmem:[#allocation41_spill] sm:$0xff] %v13220_v52  ;;  %vm13228_vm2 = vmand %vm25734_vm5, %vm5710_vm1  ;;  %v1178_v34 = vsub.f32 1.0, %v5636_v46  ;;  %v5785_v56 = vsel %vm25737_vm11, %v13073_v49, %v5780_v21  ;;  %vm25738_vm7 = vcmp.eq.f32.partialorder %v12501_v38, 0  ;;  %11491 = vlog2.f32 %v13215_v25  ;;  %v11490_v24 = vpop.eup %11489 }
 0x138   : > { %v5874_v50 = vsel %vm25738_vm7, %v12302_v60, %v5872_v36  ;;  %vm25739_vm4 = vmmov %vm25734_vm5  ;;  %v5789_v61 = vsel %vm13197_vm6, 2143289344, %v5785_v56  ;;  %vm25742_vm9 = vcmp.eq.f32.partialorder %v12129_v1, 0  ;;  %vm25743_vm13 = vcmp.eq.f32.partialorder %v12442_v62, 1065353216 }
 0x139   : > { %vm13242_vm3 = vmxor %vm25739_vm4, %vm5713_vm0  ;;  %v5876_v0 = vxor.u32 2147483648, %v5874_v50  ;;  %vm5882_vm11 = vcmp.eq.f32.partialorder %v12501_v38, 3212836864  ;;  %vm5709_vm7 = vcmp.lt.f32.partialorder %v12472_v7, 0  ;;  %v1259_v49 = vand.u32 4294901760, %v1178_v34 }
 0x13a   : > { %vm5790_vm5 = vmor %vm25743_vm13, %vm25742_vm9  ;;  %vm25744_vm0 = vcmp.lt.s32.totalorder %v12501_v38, 0  ;;  %vm5890_vm6 = vcmp.ne.f32.partialorder %v12501_v38, %v12501_v38  ;;  %v5795_v39 = vmul.f32 %v11488_v20, %v12129_v1  ;;  %vm25745_vm9 = vcmp.eq.f32.partialorder %v12129_v1, 1065353216 }
 0x13b   : > { %v5791_v6 = vsel %vm5790_vm5, 1065353216, %v5789_v61  ;;  %vm5875_vm4 = vmand %vm25744_vm0, %vm25725_vm12  ;;  %v5883_v26 = vsel %vm5882_vm11, 1065353216, %v5881_v18  ;;  %v5888_v27 = vsel %vm5865_vm8, %v25634_v55, %v12167_v17  ;;  %v13273_v33 = vpack.c.bf16 %v1259_v49, %v1255_v16 }
 0x13c   : > { %v5792_v32 = vsel %vm25745_vm9, %v12442_v62, %v5791_v6  ;;  %v5877_v30 = vsel %vm5875_vm4, %v5876_v0, %v5874_v50  ;;  %vm5724_vm13 = vmor %vm13228_vm2, %vm13242_vm3  ;;  %v13275_v54 = vsub.f32 %v1178_v34, %v1259_v49  ;;  %vm25748_vm5 = vcmp.eq.f32.partialorder %v25643_v28, 2139095040  ;;  %v25751_v34 = vld [vmem:[#allocation17_spill] sm:$0xff] }
 0x13d   : > { %25746 = vst [vmem:[#allocation42_spill] sm:$0xff] %v13273_v33  ;;  %v5884_v41 = vsel %vm25748_vm5, %v5883_v26, %v5877_v30  ;;  %v1181_v62 = vsub.f32 1.0, %v5792_v32  ;;  %vm5715_vm11 = vmand %vm5709_vm7, %vm25714_vm10  ;;  %vm5712_vm0 = vcmp.lt.s32.totalorder %v12472_v7, 0  ;;  %11493 = vpow2.f32 %v5795_v39  ;;  %4644 = vmatpush1.bf16.msra.mxu1 %v13273_v33  ;;  %4836 = vmatpush1.bf16.msra.mxu0 %v13273_v33  ;;  %v755_v32 = vpop.permute.xlu1 %754 }
 0x13e   : > { %25747 = vst [vmem:[#allocation43_spill] sm:$0xff] %v13275_v54  ;;  %v5889_v18 = vsel %vm5870_vm14, %v5888_v27, %v5884_v41  ;;  %vm5892_vm8 = vmor %vm5890_vm6, %vm12714_vm15  ;;  %v5716_v16 = vsel %vm5715_vm11, 2143289344, %v11490_v24  ;;  %vm25749_vm4 = vcmp.eq.f32.partialorder %v12129_v1, 0  ;;  %vm25750_vm9 = vcmp.eq.f32.partialorder %v12501_v38, 1065353216 }
 0x13f   : > { %v5893_v46 = vsel %vm5892_vm8, 2143289344, %v5889_v18  ;;  %vm5894_vm5 = vmor %vm25750_vm9, %vm25749_vm4  ;;  %v1261_v21 = vand.u32 4294901760, %v1181_v62  ;;  %v5718_v47 = vsel %vm5710_vm1, %v12302_v60, %v5716_v16  ;;  %v5725_v36 = vsel %vm5724_vm13, 2139095040, %v25633_v40  ;;  %v13355_v18 = vpop.permute.xlu0 %749 }
 0x140   : > { %vm564_vm14 = vcmp.lt.s32.totalorder %v25751_v34, %v12279_v53  ;;  %v5895_v56 = vsel %vm5894_vm5, 1065353216, %v5893_v46  ;;  %vm5711_vm6 = vcmp.eq.f32.partialorder %v12472_v7, 1065353216  ;;  %v5720_v50 = vxor.u32 2147483648, %v5718_v47  ;;  %vm5719_vm2 = vmand %vm5712_vm0, %vm25725_vm12 }
 0x141   : > { %vm5734_vm11 = vcmp.ne.f32.partialorder %v12472_v7, %v12472_v7  ;;  %vm25752_vm1 = vcmp.eq.f32.partialorder %v12129_v1, 1065353216  ;;  %v13311_v61 = vsub.f32 %v1181_v62, %v1261_v21  ;;  %vm5726_vm3 = vcmp.eq.f32.partialorder %v12472_v7, 3212836864  ;;  %v11492_v6 = vpop.eup %11491 }
 0x142   : > { %v5896_v20 = vsel %vm25752_vm1, %v12501_v38, %v5895_v56  ;;  %vm5817_vm13 = vcmp.gt.f32.partialorder %v13091_v22, 1065353216  ;;  %v5721_v35 = vsel %vm5719_vm2, %v5720_v50, %v5718_v47  ;;  %v5727_v0 = vsel %vm5726_vm3, 1065353216, %v5725_v36  ;;  %vm13331_vm0 = vmor %vm5734_vm11, %vm12714_vm15 }
 0x143   : > { %v1183_v44 = vsub.f32 1.0, %v5896_v20  ;;  %v13320_v49 = vand.u32 2147483647, %v12528_v63  ;;  %vm5714_vm8 = vcmp.eq.f32.partialorder %v12904_v14, 2139095040  ;;  %vm25753_vm4 = vcmp.eq.f32.partialorder %v25643_v28, 2139095040 }
 0x144   : > { %v5728_v38 = vsel %vm25753_vm4, %v5727_v0, %v5721_v35  ;;  %v5732_v39 = vsel %vm5709_vm7, %v25634_v55, %v12167_v17  ;;  %vm5814_vm9 = vcmp.eq.f32.partialorder %v12508_v45, 0  ;;  %vm25756_vm5 = vcmp.lt.f32.partialorder %v12129_v1, 0 }
 0x145   : > { %v1265_v30 = vand.u32 4294901760, %v1183_v44  ;;  %v5733_v26 = vsel %vm5714_vm8, %v5732_v39, %v5728_v38  ;;  %vm13338_vm1 = vmxor %vm25756_vm5, %vm5817_vm13  ;;  %v5951_v27 = vmul.f32 %v11492_v6, %v12129_v1  ;;  %11495 = vlog2.f32 %v13320_v49 }
 0x146   : > { %v13345_v41 = vadd.f32 1.0, %v12780_v48  ;;  %v5737_v62 = vsel %vm13331_vm0, 2143289344, %v5733_v26  ;;  %vm25759_vm7 = vcmp.eq.f32.partialorder %v12129_v1, 0  ;;  %vm5813_vm2 = vcmp.lt.f32.partialorder %v12508_v45, 0  ;;  %vm25762_vm13 = vmmov %vm25756_vm5 }
 0x147   : > { %vm5738_vm11 = vmor %vm5711_vm6, %vm25759_vm7  ;;  %vm5816_vm3 = vcmp.lt.s32.totalorder %v12508_v45, 0  ;;  %v13357_v16 = vpack.c.bf16 %v1265_v30, %v1261_v21  ;;  %v13359_v46 = vsub.f32 %v1183_v44, %v1265_v30  ;;  %11497 = vpow2.f32 %v5951_v27  ;;  %v11494_v50 = vpop.eup %11493 }
 0x148   : > { %v5739_v48 = vsel %vm5738_vm11, 1065353216, %v5737_v62  ;;  %vm13365_vm8 = vmand %vm25762_vm13, %vm5814_vm9  ;;  %v968_v36 = vmul.f32 %v12222_v37, %v12811_v59  ;;  %v832_v56 = vsub.f32 %v12237_v42, %v755_v32  ;;  %vm25765_vm6 = vcmp.eq.f32.partialorder %v12129_v1, 1065353216 }
 0x149   : > { %25760 = vst [vmem:[#allocation17_spill] sm:$0xff] %v13357_v16  ;;  %25761 = vst [vmem:[#allocation44_spill] sm:$0xff] %v13359_v46  ;;  %v5740_v21 = vsel %vm25765_vm6, %v12472_v7, %v5739_v48  ;;  %vm5973_vm0 = vcmp.gt.f32.partialorder %v13215_v25, 1065353216  ;;  %v13381_v20 = vadd.f32 1.0, %v12783_v51  ;;  %4646 = vmatprep.subr.bf16.mxu1 %v13357_v16  ;;  %4838 = vmatprep.subr.bf16.mxu0 %v13357_v16  ;;  %v13392_v59 = vand.u32 2147483647, %v12533_v4 }
 0x14a   : > { %vm5828_vm4 = vmor %vm13365_vm8, %vm13338_vm1  ;;  %vm5838_vm7 = vcmp.ne.f32.partialorder %v12508_v45, %v12508_v45  ;;  %v1180_v7 = vsub.f32 1.0, %v5740_v21  ;;  %v13396_v51 = vmul.f32 %v12222_v37, %v12816_v13  ;;  %vm25245_vm13 = vcmp.eq.f32.partialorder %v12556_v29, 0 }
 0x14b   : > { %vm5819_vm5 = vmand %vm5813_vm2, %vm25714_vm10  ;;  %v5829_v13 = vsel %vm5828_vm4, 2139095040, %v25633_v40  ;;  %11499 = vlog2.f32 %v13392_v59  ;;  %v13430_v24 = vmul.f32 %v12170_v19, %v968_v36  ;;  %v13435_v32 = vsel %vm564_vm14, %v832_v56, 0.0 }
 0x14c   : > { %v5820_v35 = vsel %vm5819_vm5, 2143289344, %v11494_v50  ;;  %vm13404_vm11 = vmand %vm5816_vm3, %vm25725_vm12  ;;  %v13418_v38 = vand.u32 4294901760, %v1180_v7  ;;  %vm25768_vm3 = vcmp.lt.f32.partialorder %v12129_v1, 0  ;;  %vm5830_vm8 = vcmp.eq.f32.partialorder %v12508_v45, 3212836864 }
 0x14d   : > { %v5822_v6 = vsel %vm5814_vm9, %v12302_v60, %v5820_v35  ;;  %vm13424_vm6 = vmxor %vm25768_vm3, %vm5973_vm0  ;;  %vm5815_vm9 = vcmp.eq.f32.partialorder %v12508_v45, 1065353216  ;;  %vm5969_vm14 = vcmp.lt.f32.partialorder %v12556_v29, 0  ;;  %v13461_v27 = vand.u32 2147483647, %v12526_v2 }
 0x14e   : > { %v5824_v30 = vxor.u32 2147483648, %v5822_v6  ;;  %vm13443_vm1 = vmor %vm5838_vm7, %vm12714_vm15  ;;  %v13449_v14 = vsub.f32 %v1180_v7, %v13418_v38  ;;  %vm5818_vm5 = vcmp.eq.f32.partialorder %v13091_v22, 2139095040  ;;  %v5831_v48 = vsel %vm5830_vm8, 1065353216, %v5829_v13 }
 0x14f   : > { %vm25774_vm4 = vmmov %vm25768_vm3  ;;  %v11496_v47 = vpop.eup %11495  ;;  %v5836_v22 = vsel %vm5813_vm2, %v25634_v55, %v12167_v17  ;;  %vm5972_vm8 = vcmp.lt.s32.totalorder %v12556_v29, 0  ;;  %11501 = vlog2.f32 %v13461_v27  ;;  %v5992_v26 = vsel %vm5969_vm14, %v25634_v55, %v12167_v17 }
 0x150   : > { %25773 = vst [vmem:[#allocation45_spill] sm:$0xff] %v13449_v14  ;;  %vm13456_vm0 = vmand %vm25774_vm4, %vm25245_vm13  ;;  %v5825_v62 = vsel %vm13404_vm11, %v5824_v30, %v5822_v6  ;;  %vm25777_vm4 = vcmp.eq.f32.partialorder %v25643_v28, 2139095040  ;;  %vm25778_vm13 = vcmp.eq.f32.partialorder %v12129_v1, 0  ;;  %v6055_v50 = vmul.f32 %v11496_v47, %v12129_v1 }
 0x151   : > { %vm5984_vm7 = vmor %vm13456_vm0, %vm13424_vm6  ;;  %v5832_v36 = vsel %vm25777_vm4, %v5831_v48, %v5825_v62  ;;  %v11498_v7 = vpop.eup %11497  ;;  %vm25787_vm0 = vcmp.eq.f32.partialorder %v12556_v29, 0  ;;  %v13543_v47 = vand.u32 2147483647, %v12578_v43  ;;  %v13588_v39 = vand.u32 2147483647, %v12558_v3 }
 0x152   : > { %vm5842_vm11 = vmor %vm5815_vm9, %vm25778_vm13  ;;  %v5837_v56 = vsel %vm5818_vm5, %v5836_v22, %v5832_v36  ;;  %vm5974_vm13 = vcmp.eq.f32.partialorder %v13215_v25, 2139095040  ;;  %v5985_v0 = vsel %vm5984_vm7, 2139095040, %v25633_v40  ;;  %vm5986_vm9 = vcmp.eq.f32.partialorder %v12556_v29, 3212836864 }
 0x153   : > { %vm13488_vm4 = vmand %vm5969_vm14, %vm25714_vm10  ;;  %v5841_v35 = vsel %vm13443_vm1, 2143289344, %v5837_v56  ;;  %vm25781_vm5 = vcmp.gt.f32.partialorder %v13320_v49, 1065353216  ;;  %11503 = vpow2.f32 %v6055_v50  ;;  %vm25786_vm1 = vcmp.eq.f32.partialorder %v12129_v1, 1065353216 }
 0x154   : > { %vm13508_vm2 = vmxor %vm25768_vm3, %vm25781_vm5  ;;  %v5843_v13 = vsel %vm5842_vm11, 1065353216, %v5841_v35  ;;  %v5976_v30 = vsel %vm13488_vm4, 2143289344, %v11498_v7  ;;  %vm5994_vm7 = vcmp.ne.f32.partialorder %v12556_v29, %v12556_v29  ;;  %vm25788_vm3 = vcmp.eq.f32.partialorder %v12528_v63, 0 }
 0x155   : > { %vm13518_vm6 = vmand %vm5972_vm8, %vm25725_vm12  ;;  %v5844_v34 = vsel %vm25786_vm1, %v12508_v45, %v5843_v13  ;;  %v5978_v62 = vsel %vm25787_vm0, %v12302_v60, %v5976_v30  ;;  %vm25789_vm11 = vcmp.lt.f32.partialorder %v12129_v1, 0  ;;  %v5987_v22 = vsel %vm5986_vm9, 1065353216, %v5985_v0  ;;  %v11500_v56 = vpop.eup %11499 }
 0x156   : > { %vm13538_vm8 = vmand %vm25789_vm11, %vm25788_vm3  ;;  %v1182_v36 = vsub.f32 1.0, %v5844_v34  ;;  %v5980_v45 = vxor.u32 2147483648, %v5978_v62  ;;  %vm6073_vm14 = vcmp.lt.f32.partialorder %v12528_v63, 0  ;;  %vm25792_vm5 = vcmp.eq.f32.partialorder %v12129_v1, 0 }
 0x157   : > { %vm6088_vm4 = vmor %vm13538_vm8, %vm13508_vm2  ;;  %vm25793_vm1 = vcmp.eq.f32.partialorder %v12556_v29, 1065353216  ;;  %vm6076_vm9 = vcmp.lt.s32.totalorder %v12528_v63, 0  ;;  %vm5921_vm11 = vcmp.gt.f32.partialorder %v13392_v59, 1065353216  ;;  %11505 = vlog2.f32 %v13543_v47 }
 0x158   : > { %vm13554_vm0 = vmor %vm25793_vm1, %vm25792_vm5  ;;  %v1267_v50 = vand.u32 4294901760, %v1182_v36  ;;  %v5981_v7 = vsel %vm13518_vm6, %v5980_v45, %v5978_v62  ;;  %vm6090_vm8 = vcmp.eq.f32.partialorder %v12528_v63, 3212836864  ;;  %v5899_v0 = vmul.f32 %v11500_v56, %v12129_v1 }
 0x159   : > { %vm13569_vm2 = vmor %vm5994_vm7, %vm12714_vm15  ;;  %vm25798_vm5 = vcmp.eq.f32.partialorder %v25643_v28, 2139095040  ;;  %v6089_v30 = vsel %vm6088_vm4, 2139095040, %v25633_v40  ;;  %vm25246_vm7 = vcmp.eq.f32.partialorder %v12533_v4, 0  ;;  %vm25803_vm1 = vcmp.lt.f32.partialorder %v12129_v1, 0 }
 0x15a   : > { %v5988_v6 = vsel %vm25798_vm5, %v5987_v22, %v5981_v7  ;;  %vm13581_vm6 = vmand %vm6073_vm14, %vm25714_vm10  ;;  %v13591_v34 = vpack.c.bf16 %v1267_v50, %v13418_v38  ;;  %v13593_v62 = vsub.f32 %v1182_v36, %v1267_v50  ;;  %11507 = vpow2.f32 %v5899_v0  ;;  %v11502_v22 = vpop.eup %11501 }
 0x15b   : > { %v5993_v48 = vsel %vm5974_vm13, %v5992_v26, %v5988_v6  ;;  %vm13601_vm5 = vmxor %vm25803_vm1, %vm5921_vm11  ;;  %vm6098_vm13 = vcmp.ne.f32.partialorder %v12528_v63, %v12528_v63  ;;  %vm5917_vm11 = vcmp.lt.f32.partialorder %v12533_v4, 0  ;;  %11509 = vlog2.f32 %v13588_v39 }
 0x15c   : > { %25801 = vst [vmem:[#allocation46_spill] sm:$0xff] %v13591_v34  ;;  %25802 = vst [vmem:[#allocation47_spill] sm:$0xff] %v13593_v62  ;;  %v5997_v56 = vsel %vm13569_vm2, 2143289344, %v5993_v48  ;;  %4648 = vmatpush1.bf16.msra.mxu1 %v13591_v34  ;;  %4840 = vmatpush1.bf16.msra.mxu0 %v13591_v34  ;;  %v6096_v26 = vsel %vm6073_vm14, %v25634_v55, %v12167_v17  ;;  %v6003_v21 = vmul.f32 %v11502_v22, %v12129_v1  ;;  %v25825_v36 = vmov 0 }
 0x15d   : > { %vm13611_vm4 = vmand %vm6076_vm9, %vm25725_vm12  ;;  %v5999_v38 = vsel %vm13554_vm0, 1065353216, %v5997_v56  ;;  %vm25810_vm0 = vcmp.eq.f32.partialorder %v12129_v1, 1065353216  ;;  %v6091_v7 = vsel %vm6090_vm8, 1065353216, %v6089_v30  ;;  %v11504_v35 = vpop.eup %11503  ;;  %v13662_v6 = vsel %vm5917_vm11, %v25634_v55, %v12167_v17 }
 0x15e   : > { %vm13633_vm3 = vmand %vm25803_vm1, %vm25246_vm7  ;;  %v6000_v50 = vsel %vm25810_vm0, %v12556_v29, %v5999_v38  ;;  %11511 = vpow2.f32 %v6003_v21  ;;  %v6080_v30 = vsel %vm13581_vm6, 2143289344, %v11504_v35  ;;  %vm25813_vm0 = vcmp.eq.f32.partialorder %v12129_v1, 0 }
 0x15f   : > { %vm5932_vm2 = vmor %vm13633_vm3, %vm13601_vm5  ;;  %v1185_v0 = vsub.f32 1.0, %v6000_v50  ;;  %v13679_v22 = vand.u32 2147483647, %v12571_v11  ;;  %vm25817_vm8 = vcmp.eq.f32.partialorder %v12528_v63, 0  ;;  %vm25824_vm5 = vcmp.lt.s32.totalorder %v12533_v4, 0 }
 0x160   : > { %vm13654_vm7 = vmor %vm6098_vm13, %vm12714_vm15  ;;  %vm25814_vm13 = vcmp.eq.f32.partialorder %v12528_v63, 1065353216  ;;  %v6082_v13 = vsel %vm25817_vm8, %v12302_v60, %v6080_v30  ;;  %v5933_v21 = vsel %vm5932_vm2, 2139095040, %v25633_v40  ;;  %vm25828_vm3 = vcmp.eq.f32.partialorder %v12533_v4, 3212836864 }
 0x161   : > { %vm13671_vm9 = vmor %vm25814_vm13, %vm25813_vm0  ;;  %v13684_v56 = vand.u32 4294901760, %v1185_v0  ;;  %vm25250_vm0 = vcmp.eq.f32.partialorder %v12526_v2, 0  ;;  %v11506_v50 = vpop.eup %11505  ;;  %v6084_v35 = vxor.u32 2147483648, %v6082_v13  ;;  %11513 = vlog2.f32 %v13679_v22 }
 0x162   : > { %vm13690_vm6 = vmand %vm5917_vm11, %vm25714_vm10  ;;  %vm25820_vm11 = vcmp.gt.f32.partialorder %v13461_v27, 1065353216  ;;  %v5935_v16 = vsel %vm25828_vm3, 1065353216, %v5933_v21  ;;  %v25830_v33 = vmov 0  ;;  %vm6177_vm3 = vcmp.lt.f32.partialorder %v12578_v43, 0 }
 0x163   : > { %vm13707_vm14 = vmxor %vm25803_vm1, %vm25820_vm11  ;;  %v13713_v45 = vsub.f32 %v1185_v0, %v13684_v56  ;;  %vm25827_vm11 = vcmp.lt.f32.partialorder %v12526_v2, 0  ;;  %v6159_v0 = vmul.f32 %v11506_v50, %v12129_v1  ;;  %v6085_v34 = vsel %vm13611_vm4, %v6084_v35, %v6082_v13 }
 0x164   : > { %vm13720_vm2 = vmand %vm25824_vm5, %vm25725_vm12  ;;  %v13729_v44 = vsel %vm25827_vm11, %v25634_v55, %v12167_v17  ;;  %vm25829_vm5 = vcmp.ne.f32.partialorder %v12533_v4, %v12533_v4  ;;  %vm25832_vm11 = vcmp.lt.f32.partialorder %v12129_v1, 0  ;;  %v11508_v25 = vpop.eup %11507  ;;  %vm25835_vm13 = vcmp.eq.f32.partialorder %v25643_v28, 2139095040 }
 0x165   : > { %25823 = vst [vmem:[#allocation48_spill] sm:$0xff] %v13713_v45  ;;  %v25826_v36 = vsel %vm13720_vm2, 4294967295, %v25825_v36  ;;  %vm13741_vm1 = vmor %vm25829_vm5, %vm12714_vm15  ;;  %v6092_v13 = vsel %vm25835_vm13, %v6091_v7, %v6085_v34  ;;  %vm25836_vm5 = vcmp.eq.f32.partialorder %v12129_v1, 0  ;;  %11515 = vpow2.f32 %v6159_v0  ;;  %v11510_v35 = vpop.eup %11509  ;;  %v25844_v0 = vld [vmem:[#allocation23_spill] sm:$0xff] }
 0x166   : > { %v25831_v33 = vsel %vm13741_vm1, 4294967295, %v25830_v33  ;;  %vm13749_vm8 = vmand %vm25832_vm11, %vm25250_vm0  ;;  %vm25837_vm1 = vcmp.eq.f32.partialorder %v12533_v4, 1065353216  ;;  %vm25840_vm13 = vcmp.eq.f32.partialorder %v13320_v49, 2139095040  ;;  %v5924_v7 = vsel %vm13690_vm6, 2143289344, %v11508_v25 }
 0x167   : > { %vm13762_vm2 = vmor %vm25837_vm1, %vm25836_vm5  ;;  %v6097_v34 = vsel %vm25840_vm13, %v6096_v26, %v6092_v13  ;;  %vm25841_vm1 = vcmp.lt.f32.partialorder %v12526_v2, 0  ;;  %vm6181_vm11 = vcmp.gt.f32.partialorder %v13543_v47, 1065353216  ;;  %v13786_v45 = vand.u32 2147483647, %v25844_v0 }
 0x168   : > { %vm13780_vm5 = vmand %vm25841_vm1, %vm25714_vm10  ;;  %v6101_v49 = vsel %vm13654_vm7, 2143289344, %v6097_v34  ;;  %vm25845_vm13 = vcmp.eq.f32.partialorder %v12533_v4, 0  ;;  %vm25846_vm1 = vcmp.lt.s32.totalorder %v12526_v2, 0  ;;  %v13807_v29 = vsel %vm6177_vm3, %v25634_v55, %v12167_v17  ;;  %v11512_v48 = vpop.eup %11511 }
 0x169   : > { %v5926_v26 = vsel %vm25845_vm13, %v12302_v60, %v5924_v7  ;;  %vm13798_vm4 = vmand %vm25846_vm1, %vm25725_vm12  ;;  %v6263_v25 = vmul.f32 %v11510_v35, %v12129_v1  ;;  %v6103_v13 = vsel %vm13671_vm9, 1065353216, %v6101_v49  ;;  %vm25850_vm13 = vcmp.ne.f32.partialorder %v12526_v2, %v12526_v2 }
 0x16a   : > { %v5928_v34 = vxor.u32 2147483648, %v5926_v26  ;;  %vm25849_vm7 = vmor %vm13749_vm8, %vm13707_vm14  ;;  %11517 = vlog2.f32 %v13786_v45  ;;  %vm25853_vm9 = vcmp.eq.f32.partialorder %v12129_v1, 1065353216  ;;  %vm25854_vm0 = vcmp.eq.f32.partialorder %v12129_v1, 0 }
 0x16b   : > { %v6037_v7 = vsel %vm25849_vm7, 2139095040, %v25633_v40  ;;  %vm13823_vm1 = vmor %vm25850_vm13, %vm12714_vm15  ;;  %v6104_v50 = vsel %vm25853_vm9, %v12528_v63, %v6103_v13  ;;  %vm25855_vm14 = vcmp.eq.f32.partialorder %v12526_v2, 1065353216  ;;  %v25856_v30 = vmov 0 }
 0x16c   : > { %vm13835_vm8 = vmor %vm25855_vm14, %vm25854_vm0  ;;  %vm25858_vm7 = vcmp.lt.f32.partialorder %v12129_v1, 0  ;;  %11519 = vpow2.f32 %v6263_v25  ;;  %v1187_v63 = vsub.f32 1.0, %v6104_v50  ;;  %vm25861_vm0 = vnez %v25826_v36 }
 0x16d   : > { %v25857_v30 = vsel %vm13835_vm8, 4294967295, %v25856_v30  ;;  %vm13843_vm13 = vmxor %vm25858_vm7, %vm6181_vm11  ;;  %v5929_v49 = vsel %vm25861_vm0, %v5928_v34, %v5926_v26  ;;  %v6028_v13 = vsel %vm13780_vm5, 2143289344, %v11512_v48  ;;  %vm6285_vm7 = vcmp.gt.f32.partialorder %v13588_v39, 1065353216  ;;  %v11514_v34 = vpop.eup %11513 }
 0x16e   : > { %vm13858_vm11 = vmand %vm6177_vm3, %vm25714_vm10  ;;  %vm25864_vm6 = vcmp.eq.f32.partialorder %v25643_v28, 2139095040  ;;  %vm25865_vm0 = vcmp.eq.f32.partialorder %v12526_v2, 0  ;;  %vm25866_vm5 = vcmp.eq.f32.partialorder %v12526_v2, 3212836864  ;;  %vm25867_vm9 = vcmp.eq.f32.partialorder %v12578_v43, 0 }
 0x16f   : > { %v5936_v25 = vsel %vm25864_vm6, %v5935_v16, %v5929_v49  ;;  %v6030_v8 = vsel %vm25865_vm0, %v12302_v60, %v6028_v13  ;;  %v6039_v36 = vsel %vm25866_vm5, 1065353216, %v6037_v7  ;;  %vm25868_vm3 = vcmp.lt.f32.partialorder %v12129_v1, 0 }
 0x170   : > { %vm13875_vm10 = vmand %vm25868_vm3, %vm25867_vm9  ;;  %v1273_v48 = vand.u32 4294901760, %v1187_v63  ;;  %vm25871_vm6 = vcmp.eq.f32.partialorder %v13392_v59, 2139095040  ;;  %v6032_v50 = vxor.u32 2147483648, %v6030_v8  ;;  %vm25872_vm9 = vnez %v25831_v33 }
 0x171   : > { %v5941_v16 = vsel %vm25871_vm6, %v13662_v6, %v5936_v25  ;;  %vm6192_vm0 = vmor %vm13875_vm10, %vm13843_vm13  ;;  %vm25876_vm6 = vcmp.lt.f32.partialorder %v12558_v3, 0  ;;  %v6107_v33 = vmul.f32 %v11514_v34, %v12129_v1  ;;  %vm25884_vm5 = vcmp.eq.f32.partialorder %v12558_v3, 0 }
 0x172   : > { %v5945_v7 = vsel %vm25872_vm9, 2143289344, %v5941_v16  ;;  %vm25873_vm14 = vmmov %vm25868_vm3  ;;  %v13901_v59 = vsel %vm25876_vm6, %v25634_v55, %v12167_v17  ;;  %v13907_v6 = vpack.c.bf16 %v1273_v48, %v13684_v56  ;;  %v13909_v13 = vsub.f32 %v1187_v63, %v1273_v48  ;;  %v11516_v56 = vpop.eup %11515 }
 0x173   : > { %vm13893_vm8 = vmxor %vm25873_vm14, %vm6285_vm7  ;;  %v5947_v25 = vsel %vm13762_vm2, 1065353216, %v5945_v7  ;;  %v6033_v16 = vsel %vm13798_vm4, %v6032_v50, %v6030_v8  ;;  %vm25879_vm14 = vcmp.lt.s32.totalorder %v12578_v43, 0  ;;  %vm25882_vm6 = vcmp.eq.f32.partialorder %v12129_v1, 1065353216 }
 0x174   : > { %25877 = vst [vmem:[#allocation23_spill] sm:$0xff] %v13907_v6  ;;  %25878 = vst [vmem:[#allocation49_spill] sm:$0xff] %v13909_v13  ;;  %v5948_v63 = vsel %vm25882_vm6, %v12533_v4, %v5947_v25  ;;  %vm25883_vm2 = vcmp.eq.f32.partialorder %v25643_v28, 2139095040  ;;  %11521 = vpow2.f32 %v6107_v33  ;;  %v13939_v8 = vand.u32 2147483647, %v12602_v12  ;;  %4650 = vmatprep.subr.bf16.mxu1 %v13907_v6  ;;  %4842 = vmatprep.subr.bf16.mxu0 %v13907_v6  ;;  %v11518_v62 = vpop.eup %11517 }
 0x175   : > { %vm13919_vm7 = vmand %vm25879_vm14, %vm25725_vm12  ;;  %v6040_v21 = vsel %vm25883_vm2, %v6039_v36, %v6033_v16  ;;  %vm25887_vm6 = vcmp.eq.f32.partialorder %v13461_v27, 2139095040  ;;  %v1184_v36 = vsub.f32 1.0, %v5948_v63  ;;  %v6184_v34 = vsel %vm13858_vm11, 2143289344, %v11516_v56 }
 0x176   : > { %vm13934_vm14 = vmand %vm25868_vm3, %vm25884_vm5  ;;  %v6045_v4 = vsel %vm25887_vm6, %v13729_v44, %v6040_v21  ;;  %v6193_v48 = vsel %vm6192_vm0, 2139095040, %v25633_v40  ;;  %vm25888_vm3 = vcmp.eq.f32.partialorder %v12578_v43, 0  ;;  %vm25889_vm11 = vcmp.ne.f32.partialorder %v12578_v43, %v12578_v43  ;;  %v11520_v33 = vpop.eup %11519 }
 0x177   : > { %vm6296_vm5 = vmor %vm13934_vm14, %vm13893_vm8  ;;  %v6049_v27 = vsel %vm13823_vm1, 2143289344, %v6045_v4  ;;  %v6186_v44 = vsel %vm25888_vm3, %v12302_v60, %v6184_v34  ;;  %11523 = vlog2.f32 %v13939_v8  ;;  %vm25892_vm1 = vnez %v25857_v30 }
 0x178   : > { %vm13968_vm2 = vmor %vm25889_vm11, %vm12714_vm15  ;;  %v6051_v35 = vsel %vm25892_vm1, 1065353216, %v6049_v27  ;;  %v1271_v26 = vand.u32 4294901760, %v1184_v36  ;;  %v6188_v50 = vxor.u32 2147483648, %v6186_v44  ;;  %vm25893_vm0 = vcmp.eq.f32.partialorder %v12129_v1, 0 }
 0x179   : > { %vm25894_vm6 = vcmp.eq.f32.partialorder %v12578_v43, 1065353216  ;;  %vm6126_vm11 = vcmp.eq.f32.partialorder %v12571_v11, 0  ;;  %vm25897_vm4 = vcmp.eq.f32.partialorder %v12129_v1, 1065353216  ;;  %vm25898_vm10 = vcmp.eq.f32.partialorder %v12578_v43, 3212836864 }
 0x17a   : > { %vm13981_vm3 = vmor %vm25894_vm6, %vm25893_vm0  ;;  %v6052_v25 = vsel %vm25897_vm4, %v12526_v2, %v6051_v35  ;;  %v6195_v30 = vsel %vm25898_vm10, 1065353216, %v6193_v48  ;;  %vm25899_vm1 = vnez %v25590_v10  ;;  %vm25900_vm9 = vcmp.lt.f32.partialorder %v12558_v3, 0 }
 0x17b   : > { %vm6287_vm13 = vmand %vm25900_vm9, %vm25899_vm1  ;;  %v6297_v16 = vsel %vm6296_vm5, 2139095040, %v25633_v40  ;;  %v6211_v56 = vmul.f32 %v11518_v62, %v12129_v1  ;;  %v1186_v63 = vsub.f32 1.0, %v6052_v25  ;;  %v14002_v21 = vsub.f32 %v1184_v36, %v1271_v26 }
 0x17c   : > { %v6189_v2 = vsel %vm13919_vm7, %v6188_v50, %v6186_v44  ;;  %v6288_v4 = vsel %vm6287_vm13, 2143289344, %v11520_v33  ;;  %vm25902_vm4 = vcmp.gt.f32.partialorder %v13679_v22, 1065353216  ;;  %vm25903_vm9 = vcmp.lt.f32.partialorder %v12129_v1, 0 }
 0x17d   : > { %25901 = vst [vmem:[#allocation50_spill] sm:$0xff] %v14002_v21  ;;  %vm14010_vm10 = vmxor %vm25903_vm9, %vm25902_vm4  ;;  %vm25906_vm8 = vcmp.eq.f32.partialorder %v25643_v28, 2139095040  ;;  %vm25907_vm14 = vcmp.eq.f32.partialorder %v12558_v3, 0  ;;  %vm25908_vm7 = vcmp.lt.s32.totalorder %v12558_v3, 0  ;;  %vm25257_vm13 = vcmp.lt.f32.partialorder %v12571_v11, 0 }
 0x17e   : > { %v6196_v49 = vsel %vm25906_vm8, %v6195_v30, %v6189_v2  ;;  %v6290_v38 = vsel %vm25907_vm14, %v12302_v60, %v6288_v4  ;;  %vm14023_vm5 = vmand %vm25908_vm7, %vm25725_vm12  ;;  %11525 = vpow2.f32 %v6211_v56  ;;  %v1275_v36 = vand.u32 4294901760, %v1186_v63  ;;  %v11522_v25 = vpop.eup %11521  ;;  %v25925_v2 = vld [vmem:[#allocation18_spill] sm:$0xff] }
 0x17f   : > { %vm25911_vm0 = vcmp.eq.f32.partialorder %v13543_v47, 2139095040  ;;  %v6292_v27 = vxor.u32 2147483648, %v6290_v38  ;;  %vm14037_vm8 = vmand %vm25903_vm9, %vm6126_vm11  ;;  %vm25914_vm14 = vcmp.eq.f32.partialorder %v12558_v3, 3212836864  ;;  %vm25921_vm7 = vcmp.eq.f32.partialorder %v25643_v28, 2139095040 }
 0x180   : > { %v6201_v48 = vsel %vm25911_vm0, %v13807_v29, %v6196_v49  ;;  %v6299_v47 = vsel %vm25914_vm14, 1065353216, %v6297_v16  ;;  %vm6140_vm0 = vmor %vm14037_vm8, %vm14010_vm10  ;;  %v14051_v29 = vpack.c.bf16 %v1275_v36, %v1271_v26  ;;  %v14053_v35 = vsub.f32 %v1186_v63, %v1275_v36 }
 0x181   : > { %v6205_v62 = vsel %vm13968_vm2, 2143289344, %v6201_v48  ;;  %v6293_v50 = vsel %vm14023_vm5, %v6292_v27, %v6290_v38  ;;  %vm25917_vm2 = vcmp.ne.f32.partialorder %v12558_v3, %v12558_v3  ;;  %vm25920_vm14 = vcmp.eq.f32.partialorder %v12129_v1, 1065353216  ;;  %v11524_v63 = vpop.eup %11523 }
 0x182   : > { %25915 = vst [vmem:[#allocation51_spill] sm:$0xff] %v14051_v29  ;;  %25916 = vst [vmem:[#allocation52_spill] sm:$0xff] %v14053_v35  ;;  %v6207_v14 = vsel %vm13981_vm3, 1065353216, %v6205_v62  ;;  %v6300_v7 = vsel %vm25921_vm7, %v6299_v47, %v6293_v50  ;;  %vm6142_vm5 = vcmp.eq.f32.partialorder %v12571_v11, 3212836864  ;;  %4652 = vmatpush1.bf16.msra.mxu1 %v14051_v29  ;;  %4844 = vmatpush1.bf16.msra.mxu0 %v14051_v29  ;;  %vm25922_vm4 = vcmp.eq.f32.partialorder %v13588_v39, 2139095040 }
 0x183   : > { %vm14064_vm9 = vmor %vm25917_vm2, %vm12714_vm15  ;;  %v6208_v26 = vsel %vm25920_vm14, %v12578_v43, %v6207_v14  ;;  %vm6230_vm2 = vcmp.eq.f32.partialorder %v25844_v0, 0  ;;  %v6305_v43 = vsel %vm25922_vm4, %v13901_v59, %v6300_v7  ;;  %vm25923_vm14 = vcmp.eq.f32.partialorder %v12129_v1, 0 }
 0x184   : > { %vm6131_vm3 = vmand %vm25257_vm13, %vm25899_vm1  ;;  %vm25924_vm7 = vcmp.eq.f32.partialorder %v12558_v3, 1065353216  ;;  %v1189_v30 = vsub.f32 1.0, %v6208_v26  ;;  %v6141_v56 = vsel %vm6140_vm0, 2139095040, %v25633_v40  ;;  %v6309_v39 = vsel %vm14064_vm9, 2143289344, %v6305_v43 }
 0x185   : > { %vm6310_vm6 = vmor %vm25924_vm7, %vm25923_vm14  ;;  %v6132_v16 = vsel %vm6131_vm3, 2143289344, %v11522_v25  ;;  %vm25258_vm4 = vcmp.lt.f32.partialorder %v25844_v0, 0  ;;  %vm25926_vm3 = vcmp.gt.f32.partialorder %v13786_v45, 1065353216  ;;  %vm25927_vm14 = vcmp.lt.f32.partialorder %v12129_v1, 0 }
 0x186   : > { %v6134_v59 = vsel %vm6126_vm11, %v12302_v60, %v6132_v16  ;;  %vm14106_vm7 = vmxor %vm25927_vm14, %vm25926_vm3  ;;  %v14111_v34 = vand.u32 2147483647, %v12595_v31  ;;  %v6311_v49 = vsel %vm6310_vm6, 1065353216, %v6309_v39  ;;  %v1277_v38 = vand.u32 4294901760, %v1189_v30 }
 0x187   : > { %vm25930_vm10 = vcmp.lt.s32.totalorder %v12571_v11, 0  ;;  %v6136_v46 = vxor.u32 2147483648, %v6134_v59  ;;  %v6367_v36 = vmul.f32 %v11524_v63, %v12129_v1  ;;  %vm25931_vm8 = vcmp.eq.f32.partialorder %v12129_v1, 1065353216  ;;  %vm25932_vm6 = vmmov %vm25927_vm14 }
 0x188   : > { %vm6135_vm11 = vmand %vm25930_vm10, %vm25725_vm12  ;;  %v6312_v48 = vsel %vm25931_vm8, %v12558_v3, %v6311_v49  ;;  %v6143_v27 = vsel %vm6142_vm5, 1065353216, %v6141_v56  ;;  %vm6150_vm0 = vcmp.ne.f32.partialorder %v12571_v11, %v12571_v11  ;;  %11527 = vlog2.f32 %v14111_v34  ;;  %v11526_v14 = vpop.eup %11525  ;;  %v25946_v49 = vld [vmem:[#allocation25_spill] sm:$0xff] }
 0x189   : > { %vm14129_vm9 = vmand %vm25932_vm6, %vm6230_vm2  ;;  %v1191_v62 = vsub.f32 1.0, %v6312_v48  ;;  %v14134_v47 = vsub.f32 %v1189_v30, %v1277_v38  ;;  %v6137_v3 = vsel %vm6135_vm11, %v6136_v46, %v6134_v59  ;;  %11529 = vpow2.f32 %v6367_v36 }
 0x18a   : > { %vm6244_vm5 = vmor %vm14129_vm9, %vm14106_vm7  ;;  %vm25936_vm3 = vcmp.eq.f32.partialorder %v25643_v28, 2139095040  ;;  %vm25937_vm14 = vcmp.lt.f32.partialorder %v12571_v11, 0  ;;  %vm6232_vm8 = vcmp.lt.s32.totalorder %v25844_v0, 0  ;;  %vm25938_vm6 = vcmp.eq.f32.partialorder %v13679_v22, 2139095040 }
 0x18b   : > { %25935 = vst [vmem:[#allocation18_spill] sm:$0xff] %v14134_v47  ;;  %v6144_v50 = vsel %vm25936_vm3, %v6143_v27, %v6137_v3  ;;  %v6148_v33 = vsel %vm25937_vm14, %v25634_v55, %v12167_v17  ;;  %vm6235_vm11 = vmand %vm25258_vm4, %vm25899_vm1  ;;  %v1281_v25 = vand.u32 4294901760, %v1191_v62  ;;  %vm6254_vm14 = vcmp.ne.f32.partialorder %v25844_v0, %v25844_v0 }
 0x18c   : > { %v6149_v26 = vsel %vm25938_vm6, %v6148_v33, %v6144_v50  ;;  %vm6152_vm3 = vmor %vm6150_vm0, %vm12714_vm15  ;;  %v6236_v7 = vsel %vm6235_vm11, 2143289344, %v11526_v14  ;;  %vm25939_vm13 = vcmp.eq.f32.partialorder %v12129_v1, 0  ;;  %vm25940_vm10 = vcmp.eq.f32.partialorder %v12571_v11, 1065353216 }
 0x18d   : > { %v6153_v43 = vsel %vm6152_vm3, 2143289344, %v6149_v26  ;;  %vm6154_vm4 = vmor %vm25940_vm10, %vm25939_vm13  ;;  %v6238_v22 = vsel %vm6230_vm2, %v12302_v60, %v6236_v7  ;;  %v6245_v30 = vsel %vm6244_vm5, 2139095040, %v25633_v40  ;;  %vm6389_vm0 = vcmp.gt.f32.partialorder %v13939_v8, 1065353216 }
 0x18e   : > { %v14175_v16 = vpack.c.bf16 %v1281_v25, %v1277_v38  ;;  %v14177_v56 = vsub.f32 %v1191_v62, %v1281_v25  ;;  %v6155_v63 = vsel %vm6154_vm4, 1065353216, %v6153_v43  ;;  %vm6239_vm13 = vmand %vm6232_vm8, %vm25725_vm12  ;;  %v6240_v39 = vxor.u32 2147483648, %v6238_v22 }
 0x18f   : > { %vm25943_vm2 = vcmp.eq.f32.partialorder %v12129_v1, 1065353216  ;;  %vm6246_vm7 = vcmp.eq.f32.partialorder %v25844_v0, 3212836864  ;;  %vm14189_vm9 = vmor %vm6254_vm14, %vm12714_vm15  ;;  %vm6386_vm4 = vcmp.eq.f32.partialorder %v12602_v12, 0  ;;  %v14195_v38 = vand.u32 2147483647, %v25946_v49 }
 0x190   : > { %25941 = vst [vmem:[#allocation53_spill] sm:$0xff] %v14175_v16  ;;  %25942 = vst [vmem:[#allocation54_spill] sm:$0xff] %v14177_v56  ;;  %v6156_v59 = vsel %vm25943_vm2, %v12571_v11, %v6155_v63  ;;  %4654 = vmatprep.subr.bf16.mxu1 %v14175_v16  ;;  %4846 = vmatprep.subr.bf16.mxu0 %v14175_v16  ;;  %vm6234_vm5 = vcmp.eq.f32.partialorder %v13786_v45, 2139095040  ;;  %v6241_v11 = vsel %vm6239_vm13, %v6240_v39, %v6238_v22  ;;  %v26025_v29 = vmov 0 }
 0x191   : > { %v6247_v46 = vsel %vm6246_vm7, 1065353216, %v6245_v30  ;;  %v1188_v36 = vsub.f32 1.0, %v6156_v59  ;;  %vm25947_vm10 = vcmp.lt.f32.partialorder %v12129_v1, 0  ;;  %vm25950_vm11 = vcmp.eq.f32.partialorder %v25643_v28, 2139095040  ;;  %v765_v30 = vpop.permute.xlu1 %764  ;;  %v25964_v59 = vld [vmem:[#allocation24_spill] sm:$0xff] }
 0x192   : > { %vm14204_vm8 = vmxor %vm25947_vm10, %vm6389_vm0  ;;  %v6248_v27 = vsel %vm25950_vm11, %v6247_v46, %v6241_v11  ;;  %vm25951_vm6 = vcmp.lt.f32.partialorder %v25844_v0, 0  ;;  %vm25952_vm3 = vcmp.eq.f32.partialorder %v12129_v1, 0  ;;  %vm25953_vm14 = vcmp.eq.f32.partialorder %v25844_v0, 1065353216  ;;  %v11528_v26 = vpop.eup %11527 }
 0x193   : > { %v6252_v44 = vsel %vm25951_vm6, %v25634_v55, %v12167_v17  ;;  %vm14218_vm13 = vmor %vm25953_vm14, %vm25952_vm3  ;;  %vm6385_vm0 = vcmp.lt.f32.partialorder %v12602_v12, 0  ;;  %11531 = vlog2.f32 %v14195_v38  ;;  %v1031_v62 = vmul.f32 %v12170_v19, %v13396_v51  ;;  %v11530_v43 = vpop.eup %11529 }
 0x194   : > { %v25956_v3 = vsub.f32 %v12237_v42, %v13355_v18  ;;  %vm25957_vm2 = vcmp.lt.s32.totalorder %v25925_v2, %v12279_v53  ;;  %v6253_v50 = vsel %vm6234_vm5, %v6252_v44, %v6248_v27  ;;  %v1279_v33 = vand.u32 4294901760, %v1188_v36  ;;  %vm25958_vm7 = vmmov %vm25947_vm10  ;;  %v25961_v2 = vld [vmem:[#allocation19_spill] sm:$0xff] }
 0x195   : > { %vm14236_vm10 = vmand %vm25958_vm7, %vm6386_vm4  ;;  %v14241_v51 = vadd.f32 1.0, %v13430_v24  ;;  %v972_v18 = vmul.f32 %v12222_v37, %v13435_v32  ;;  %vm568_vm11 = vcmp.lt.s32.totalorder %v25961_v2, %v12279_v53  ;;  %v6257_v7 = vsel %vm14189_vm9, 2143289344, %v6253_v50 }
 0x196   : > { %v894_v14 = vsel %vm25957_vm2, %v25956_v3, 0.0  ;;  %vm6387_vm5 = vcmp.eq.f32.partialorder %v12602_v12, 1065353216  ;;  %vm6400_vm6 = vmor %vm14236_vm10, %vm14204_vm8  ;;  %v6259_v24 = vsel %vm14218_vm13, 1065353216, %v6257_v7  ;;  %v14256_v22 = vsub.f32 %v1188_v36, %v1279_v33 }
 0x197   : > { %vm6388_vm3 = vcmp.lt.s32.totalorder %v12602_v12, 0  ;;  %vm6391_vm9 = vmand %vm6385_vm0, %vm25899_vm1  ;;  %v6471_v32 = vmul.f32 %v11528_v26, %v12129_v1  ;;  %vm25963_vm14 = vcmp.eq.f32.partialorder %v12129_v1, 1065353216  ;;  %vm6410_vm8 = vcmp.ne.f32.partialorder %v12602_v12, %v12602_v12 }
 0x198   : > { %25962 = vst [vmem:[#allocation25_spill] sm:$0xff] %v14256_v22  ;;  %v6260_v63 = vsel %vm25963_vm14, %v25844_v0, %v6259_v24  ;;  %v6392_v39 = vsel %vm6391_vm9, 2143289344, %v11530_v43  ;;  %v14270_v4 = vand.u32 2147483647, %v25964_v59  ;;  %v6401_v36 = vsel %vm6400_vm6, 2139095040, %v25633_v40  ;;  %vm6395_vm13 = vmand %vm6388_vm3, %vm25725_vm12 }
 0x199   : > { %v1190_v11 = vsub.f32 1.0, %v6260_v63  ;;  %v6394_v46 = vsel %vm6386_vm4, %v12302_v60, %v6392_v39  ;;  %11533 = vpow2.f32 %v6471_v32  ;;  %v970_v48 = vmul.f32 %v12222_v37, %v894_v14  ;;  %vm14285_vm4 = vmor %vm6410_vm8, %vm12714_vm15  ;;  %v14320_v32 = vpop.permute.xlu0 %759 }
 0x19a   : > { %v6396_v0 = vxor.u32 2147483648, %v6394_v46  ;;  %vm6493_vm2 = vcmp.gt.f32.partialorder %v14111_v34, 1065353216  ;;  %11535 = vlog2.f32 %v14270_v4  ;;  %v836_v27 = vsub.f32 %v12237_v42, %v765_v30 }
 0x19b   : > { %v1283_v44 = vand.u32 4294901760, %v1190_v11  ;;  %vm6402_vm7 = vcmp.eq.f32.partialorder %v12602_v12, 3212836864  ;;  %vm6489_vm10 = vcmp.lt.f32.partialorder %v12595_v31, 0  ;;  %vm6390_vm6 = vcmp.eq.f32.partialorder %v13939_v8, 2139095040 }
 0x19c   : > { %v6397_v3 = vsel %vm6395_vm13, %v6396_v0, %v6394_v46  ;;  %v6403_v14 = vsel %vm6402_vm7, 1065353216, %v6401_v36  ;;  %vm25967_vm3 = vcmp.eq.f32.partialorder %v12129_v1, 0  ;;  %vm6490_vm14 = vcmp.eq.f32.partialorder %v12595_v31, 0  ;;  %vm14326_vm7 = vmand %vm6489_vm10, %vm25899_vm1 }
 0x19d   : > { %vm14295_vm9 = vmor %vm6387_vm5, %vm25967_vm3  ;;  %v14300_v25 = vpack.c.bf16 %v1283_v44, %v1279_v33  ;;  %v14302_v26 = vsub.f32 %v1190_v11, %v1283_v44  ;;  %vm25972_vm8 = vcmp.eq.f32.partialorder %v25643_v28, 2139095040  ;;  %v6408_v8 = vsel %vm6385_vm0, %v25634_v55, %v12167_v17  ;;  %v11532_v33 = vpop.eup %11531 }
 0x19e   : > { %v6404_v7 = vsel %vm25972_vm8, %v6403_v14, %v6397_v3  ;;  %vm25973_vm5 = vcmp.lt.f32.partialorder %v12129_v1, 0  ;;  %v14318_v24 = vadd.f32 1.0, %v1031_v62  ;;  %vm6337_vm0 = vcmp.gt.f32.partialorder %v14195_v38, 1065353216 }
 0x19f   : > { %25970 = vst [vmem:[#allocation19_spill] sm:$0xff] %v14300_v25  ;;  %25971 = vst [vmem:[#allocation24_spill] sm:$0xff] %v14302_v26  ;;  %v6409_v30 = vsel %vm6390_vm6, %v6408_v8, %v6404_v7  ;;  %v14332_v39 = vand.u32 2147483647, %v12615_v58  ;;  %v14335_v11 = vmul.f32 %v12170_v19, %v972_v18  ;;  %4656 = vmatpush1.bf16.msra.mxu1 %v14300_v25  ;;  %4848 = vmatpush1.bf16.msra.mxu0 %v14300_v25 }
 0x1a0   : > { %vm14314_vm13 = vmxor %vm25973_vm5, %vm6493_vm2  ;;  %v6413_v62 = vsel %vm14285_vm4, 2143289344, %v6409_v30  ;;  %vm6492_vm2 = vcmp.lt.s32.totalorder %v12595_v31, 0  ;;  %v6315_v18 = vmul.f32 %v11532_v33, %v12129_v1  ;;  %v14352_v36 = vmul.f32 %v12170_v19, %v970_v48 }
 0x1a1   : > { %vm25978_vm6 = vmmov %vm25973_vm5  ;;  %v6415_v0 = vsel %vm14295_vm9, 1065353216, %v6413_v62  ;;  %vm25259_vm8 = vcmp.eq.f32.partialorder %v25946_v49, 0  ;;  %11537 = vlog2.f32 %v14332_v39  ;;  %v14365_v44 = vsel %vm568_vm11, %v836_v27, 0.0 }
 0x1a2   : > { %vm14346_vm3 = vmand %vm25978_vm6, %vm6490_vm14  ;;  %vm25981_vm9 = vcmp.eq.f32.partialorder %v12129_v1, 1065353216  ;;  %11539 = vpow2.f32 %v6315_v18  ;;  %vm6491_vm6 = vcmp.eq.f32.partialorder %v12595_v31, 1065353216  ;;  %v6512_v50 = vsel %vm6489_vm10, %v25634_v55, %v12167_v17 }
 0x1a3   : > { %vm6504_vm4 = vmor %vm14346_vm3, %vm14314_vm13  ;;  %v6416_v45 = vsel %vm25981_vm9, %v12602_v12, %v6415_v0  ;;  %vm6514_vm9 = vcmp.ne.f32.partialorder %v12595_v31, %v12595_v31  ;;  %v11534_v27 = vpop.eup %11533  ;;  %v14407_v8 = vand.u32 2147483647, %v12610_v9  ;;  %vm6441_vm10 = vcmp.gt.f32.partialorder %v14270_v4, 1065353216 }
 0x1a4   : > { %vm14376_vm13 = vmxor %vm25973_vm5, %vm6337_vm0  ;;  %v1193_v12 = vsub.f32 1.0, %v6416_v45  ;;  %v6505_v14 = vsel %vm6504_vm4, 2139095040, %v25633_v40  ;;  %vm6506_vm0 = vcmp.eq.f32.partialorder %v12595_v31, 3212836864  ;;  %v11536_v43 = vpop.eup %11535  ;;  %v6496_v33 = vsel %vm14326_vm7, 2143289344, %v11534_v27 }
 0x1a5   : > { %vm14386_vm3 = vmand %vm6492_vm2, %vm25725_vm12  ;;  %vm6333_vm4 = vcmp.lt.f32.partialorder %v25946_v49, 0  ;;  %v6498_v62 = vsel %vm6490_vm14, %v12302_v60, %v6496_v33  ;;  %v6419_v46 = vmul.f32 %v11536_v43, %v12129_v1  ;;  %11541 = vlog2.f32 %v14407_v8 }
 0x1a6   : > { %vm25986_vm2 = vmmov %vm25973_vm5  ;;  %v14411_v30 = vand.u32 4294901760, %v1193_v12  ;;  %v6500_v18 = vxor.u32 2147483648, %v6498_v62  ;;  %v6507_v0 = vsel %vm6506_vm0, 1065353216, %v6505_v14  ;;  %vm25991_vm14 = vcmp.eq.f32.partialorder %v12129_v1, 0 }
 0x1a7   : > { %vm14402_vm5 = vmand %vm25986_vm2, %vm25259_vm8  ;;  %11543 = vpow2.f32 %v6419_v46  ;;  %v14459_v7 = vand.u32 2147483647, %v12612_v15  ;;  %vm6350_vm0 = vcmp.eq.f32.partialorder %v25946_v49, 3212836864  ;;  %v6356_v43 = vsel %vm6333_vm4, %v25634_v55, %v12167_v17 }
 0x1a8   : > { %vm6348_vm2 = vmor %vm14402_vm5, %vm14376_vm13  ;;  %v14445_v3 = vsub.f32 %v1193_v12, %v14411_v30  ;;  %v6501_v12 = vsel %vm14386_vm3, %v6500_v18, %v6498_v62 }
 0x1a9   : > { %vm14427_vm7 = vmor %vm6514_vm9, %vm12714_vm15  ;;  %vm6336_vm9 = vcmp.lt.s32.totalorder %v25946_v49, 0  ;;  %v6349_v14 = vsel %vm6348_vm2, 2139095040, %v25633_v40  ;;  %vm25997_vm2 = vcmp.lt.f32.partialorder %v12129_v1, 0  ;;  %11545 = vlog2.f32 %v14459_v7 }
 0x1aa   : > { %vm14440_vm13 = vmor %vm6491_vm6, %vm25991_vm14  ;;  %25994 = vst [vmem:[#allocation55_spill] sm:$0xff] %v14445_v3  ;;  %vm26000_vm6 = vcmp.eq.f32.partialorder %v25643_v28, 2139095040 }
 0x1ab   : > { %vm14452_vm5 = vmand %vm6333_vm4, %vm25899_vm1  ;;  %v6508_v2 = vsel %vm26000_vm6, %v6507_v0, %v6501_v12  ;;  %v11538_v46 = vpop.eup %11537  ;;  %v6351_v0 = vsel %vm6350_vm0, 1065353216, %v6349_v14  ;;  %vm6440_vm6 = vcmp.lt.s32.totalorder %v25964_v59, 0 }
 0x1ac   : > { %vm14473_vm8 = vmxor %vm25997_vm2, %vm6441_vm10  ;;  %vm26003_vm10 = vcmp.eq.f32.partialorder %v14111_v34, 2139095040  ;;  %vm26004_vm2 = vcmp.eq.f32.partialorder %v25964_v59, 0  ;;  %v11540_v48 = vpop.eup %11539 }
 0x1ad   : > { %vm14482_vm11 = vmand %vm6336_vm9, %vm25725_vm12  ;;  %v6513_v18 = vsel %vm26003_vm10, %v6512_v50, %v6508_v2  ;;  %vm26005_vm9 = vcmp.lt.f32.partialorder %v12129_v1, 0  ;;  %vm26008_vm10 = vcmp.lt.f32.partialorder %v25964_v59, 0  ;;  %v6575_v50 = vmul.f32 %v11538_v46, %v12129_v1 }
 0x1ae   : > { %vm14497_vm3 = vmand %vm26005_vm9, %vm26004_vm2  ;;  %v6517_v25 = vsel %vm14427_vm7, 2143289344, %v6513_v18  ;;  %v14512_v34 = vsel %vm26008_vm10, %v25634_v55, %v12167_v17  ;;  %v6340_v14 = vsel %vm14452_vm5, 2143289344, %v11540_v48  ;;  %vm26009_vm7 = vcmp.ne.f32.partialorder %v25946_v49, %v25946_v49  ;;  %v26012_v18 = vld [vmem:[#allocation26_spill] sm:$0xff] }
 0x1af   : > { %vm6452_vm0 = vmor %vm14497_vm3, %vm14473_vm8  ;;  %v6519_v63 = vsel %vm14440_vm13, 1065353216, %v6517_v25  ;;  %v14532_v16 = vand.u32 2147483647, %v26012_v18  ;;  %vm26013_vm13 = vcmp.eq.f32.partialorder %v12129_v1, 1065353216  ;;  %vm26014_vm5 = vcmp.eq.f32.partialorder %v25946_v49, 0 }
 0x1b0   : > { %vm14526_vm9 = vmor %vm26009_vm7, %vm12714_vm15  ;;  %v6520_v25 = vsel %vm26013_vm13, %v12595_v31, %v6519_v63  ;;  %v6342_v48 = vsel %vm26014_vm5, %v12302_v60, %v6340_v14  ;;  %vm26015_vm7 = vcmp.eq.f32.partialorder %v25946_v49, 1065353216  ;;  %11547 = vpow2.f32 %v6575_v50  ;;  %v11542_v50 = vpop.eup %11541 }
 0x1b1   : > { %vm14544_vm4 = vmor %vm26015_vm7, %vm25991_vm14  ;;  %vm6597_vm2 = vcmp.gt.f32.partialorder %v14332_v39, 1065353216  ;;  %v1195_v27 = vsub.f32 1.0, %v6520_v25  ;;  %v6344_v46 = vxor.u32 2147483648, %v6342_v48  ;;  %v6453_v63 = vsel %vm6452_vm0, 2139095040, %v25633_v40  ;;  %v11544_v3 = vpop.eup %11543 }
 0x1b2   : > { %vm26018_vm13 = vmmov %vm26008_vm10  ;;  %11549 = vlog2.f32 %v14532_v16  ;;  %vm26023_vm3 = vcmp.lt.f32.partialorder %v12615_v58, 0  ;;  %v6679_v6 = vmul.f32 %v11542_v50, %v12129_v1  ;;  %vm26030_vm8 = vcmp.eq.f32.partialorder %v25964_v59, 1065353216 }
 0x1b3   : > { %vm14553_vm10 = vmand %vm26018_vm13, %vm25899_vm1  ;;  %v14580_v33 = vsel %vm26023_vm3, %v25634_v55, %v12167_v17  ;;  %v1289_v12 = vand.u32 4294901760, %v1195_v27  ;;  %v6345_v25 = vsel %vm14482_vm11, %v6344_v46, %v6342_v48  ;;  %vm26027_vm3 = vcmp.eq.f32.partialorder %v25643_v28, 2139095040  ;;  %v11546_v56 = vpop.eup %11545 }
 0x1b4   : > { %vm14569_vm5 = vmand %vm6440_vm6, %vm25725_vm12  ;;  %vm26024_vm6 = vcmp.ne.f32.partialorder %v25964_v59, %v25964_v59  ;;  %v6352_v26 = vsel %vm26027_vm3, %v6351_v0, %v6345_v25  ;;  %vm26028_vm11 = vcmp.eq.f32.partialorder %v25964_v59, 3212836864  ;;  %v6444_v25 = vsel %vm14553_vm10, 2143289344, %v11544_v3 }
 0x1b5   : > { %vm14589_vm0 = vmor %vm26024_vm6, %vm12714_vm15  ;;  %v6455_v62 = vsel %vm26028_vm11, 1065353216, %v6453_v63  ;;  %vm25268_vm11 = vcmp.lt.f32.partialorder %v12610_v9, 0  ;;  %v14620_v0 = vpack.c.bf16 %v1289_v12, %v14411_v30  ;;  %v14622_v63 = vsub.f32 %v1195_v27, %v1289_v12  ;;  %v26047_v27 = vld [vmem:[#allocation30_spill] sm:$0xff] }
 0x1b6   : > { %v26026_v29 = vsel %vm14589_vm0, 4294967295, %v26025_v29  ;;  %vm26029_vm13 = vmmov %vm25991_vm14  ;;  %vm26033_vm14 = vcmp.lt.f32.partialorder %v12129_v1, 0  ;;  %vm26044_vm10 = vcmp.lt.f32.partialorder %v12129_v1, 0  ;;  %11551 = vpow2.f32 %v6679_v6 }
 0x1b7   : > { %vm14604_vm6 = vmor %vm26030_vm8, %vm26029_vm13  ;;  %26036 = vst [vmem:[#allocation26_spill] sm:$0xff] %v14620_v0  ;;  %vm26038_vm13 = vcmp.eq.f32.partialorder %v14195_v38, 2139095040  ;;  %vm26042_vm8 = vcmp.eq.f32.partialorder %v25964_v59, 0  ;;  %4658 = vmatprep.subr.bf16.mxu1 %v14620_v0  ;;  %4850 = vmatprep.subr.bf16.mxu0 %v14620_v0  ;;  %v6523_v2 = vmul.f32 %v11546_v56, %v12129_v1  ;;  %v14660_v31 = vand.u32 2147483647, %v26047_v27 }
 0x1b8   : > { %vm14612_vm7 = vmxor %vm26033_vm14, %vm6597_vm2  ;;  %26037 = vst [vmem:[#allocation56_spill] sm:$0xff] %v14622_v63  ;;  %v6357_v50 = vsel %vm26038_vm13, %v6356_v43, %v6352_v26  ;;  %vm26039_vm2 = vcmp.lt.f32.partialorder %v12615_v58, 0  ;;  %v6446_v38 = vsel %vm26042_vm8, %v12302_v60, %v6444_v25  ;;  %vm26043_vm13 = vcmp.eq.f32.partialorder %v12615_v58, 0  ;;  %v26302_v63 = vld [vmem:[#allocation14_spill] sm:$0xff] }
 0x1b9   : > { %vm14632_vm14 = vmand %vm26039_vm2, %vm25899_vm1  ;;  %v6361_v30 = vsel %vm14526_vm9, 2143289344, %v6357_v50  ;;  %vm6701_vm2 = vcmp.gt.f32.partialorder %v14407_v8, 1065353216  ;;  %v6448_v43 = vxor.u32 2147483648, %v6446_v38  ;;  %vm26048_vm8 = vcmp.eq.f32.partialorder %v12129_v1, 1065353216 }
 0x1ba   : > { %vm14645_vm3 = vmand %vm26044_vm10, %vm26043_vm13  ;;  %v6363_v3 = vsel %vm14544_vm4, 1065353216, %v6361_v30  ;;  %vm26049_vm4 = vcmp.lt.s32.totalorder %v12615_v58, 0  ;;  %v14679_v56 = vsel %vm25268_vm11, %v25634_v55, %v12167_v17  ;;  %v26053_v50 = vmov 0  ;;  %v11548_v25 = vpop.eup %11547 }
 0x1bb   : > { %vm6608_vm9 = vmor %vm14645_vm3, %vm14612_vm7  ;;  %v6364_v6 = vsel %vm26048_vm8, %v25946_v49, %v6363_v3  ;;  %v6449_v49 = vsel %vm14569_vm5, %v6448_v43, %v6446_v38  ;;  %11553 = vpow2.f32 %v6523_v2  ;;  %vm26055_vm11 = vcmp.eq.f32.partialorder %v25643_v28, 2139095040 }
 0x1bc   : > { %vm14670_vm10 = vmand %vm26049_vm4, %vm25725_vm12  ;;  %v1192_v12 = vsub.f32 1.0, %v6364_v6  ;;  %vm26052_vm4 = vcmp.ne.f32.partialorder %v12615_v58, %v12615_v58  ;;  %v6456_v30 = vsel %vm26055_vm11, %v6455_v62, %v6449_v49  ;;  %v6609_v14 = vsel %vm6608_vm9, 2139095040, %v25633_v40  ;;  %v11550_v46 = vpop.eup %11549 }
 0x1bd   : > { %vm14690_vm13 = vmor %vm26052_vm4, %vm12714_vm15  ;;  %vm26056_vm5 = vcmp.eq.f32.partialorder %v12129_v1, 0  ;;  %vm26057_vm4 = vcmp.eq.f32.partialorder %v12615_v58, 1065353216  ;;  %vm26060_vm0 = vcmp.lt.f32.partialorder %v12129_v1, 0  ;;  %11555 = vlog2.f32 %v14660_v31 }
 0x1be   : > { %v26054_v50 = vsel %vm14690_vm13, 4294967295, %v26053_v50  ;;  %vm14707_vm8 = vmor %vm26057_vm4, %vm26056_vm5  ;;  %vm26063_vm7 = vcmp.eq.f32.partialorder %v14270_v4, 2139095040  ;;  %v1287_v3 = vand.u32 4294901760, %v1192_v12  ;;  %v6600_v43 = vsel %vm14632_vm14, 2143289344, %v11548_v25 }
 0x1bf   : > { %vm14715_vm11 = vmxor %vm26060_vm0, %vm6701_vm2  ;;  %v6461_v26 = vsel %vm26063_vm7, %v14512_v34, %v6456_v30  ;;  %vm26064_vm0 = vcmp.lt.f32.partialorder %v12610_v9, 0  ;;  %vm6545_vm5 = vcmp.gt.f32.partialorder %v14459_v7, 1065353216  ;;  %vm26067_vm4 = vnez %v26026_v29 }
 0x1c0   : > { %vm14731_vm2 = vmand %vm26064_vm0, %vm25899_vm1  ;;  %v6465_v4 = vsel %vm26067_vm4, 2143289344, %v6461_v26  ;;  %vm26068_vm14 = vcmp.eq.f32.partialorder %v12615_v58, 0  ;;  %vm26069_vm7 = vcmp.lt.s32.totalorder %v12610_v9, 0  ;;  %vm26072_vm0 = vcmp.eq.f32.partialorder %v12610_v9, 0 }
 0x1c1   : > { %v6602_v22 = vsel %vm26068_vm14, %v12302_v60, %v6600_v43  ;;  %vm14746_vm3 = vmand %vm26069_vm7, %vm25725_vm12  ;;  %vm26073_vm9 = vcmp.lt.f32.partialorder %v12129_v1, 0  ;;  %v6627_v29 = vmul.f32 %v11550_v46, %v12129_v1  ;;  %v6467_v49 = vsel %vm14604_vm6, 1065353216, %v6465_v4  ;;  %v26086_v4 = vld [vmem:[#allocation28_spill] sm:$0xff] }
 0x1c2   : > { %vm14754_vm13 = vmand %vm26073_vm9, %vm26072_vm0  ;;  %v14762_v25 = vsub.f32 %v1192_v12, %v1287_v3  ;;  %v6604_v30 = vxor.u32 2147483648, %v6602_v22  ;;  %vm26077_vm14 = vcmp.eq.f32.partialorder %v12615_v58, 3212836864  ;;  %vm26078_vm7 = vcmp.eq.f32.partialorder %v12129_v1, 1065353216 }
 0x1c3   : > { %v6611_v26 = vsel %vm26077_vm14, 1065353216, %v6609_v14  ;;  %v6468_v43 = vsel %vm26078_vm7, %v25964_v59, %v6467_v49  ;;  %vm26079_vm4 = vmmov %vm26073_vm9  ;;  %vm26082_vm14 = vcmp.lt.f32.partialorder %v12612_v15, 0  ;;  %11557 = vpow2.f32 %v6627_v29  ;;  %v11552_v29 = vpop.eup %11551 }
 0x1c4   : > { %26076 = vst [vmem:[#allocation30_spill] sm:$0xff] %v14762_v25  ;;  %vm14776_vm6 = vmxor %vm26079_vm4, %vm6545_vm5  ;;  %v14785_v12 = vsel %vm26082_vm14, %v25634_v55, %v12167_v17  ;;  %v1194_v14 = vsub.f32 1.0, %v6468_v43  ;;  %v6605_v59 = vsel %vm14670_vm10, %v6604_v30, %v6602_v22  ;;  %vm26083_vm5 = vcmp.ne.f32.partialorder %v12610_v9, %v12610_v9 }
 0x1c5   : > { %vm14794_vm4 = vmor %vm26083_vm5, %vm12714_vm15  ;;  %v14801_v49 = vand.u32 2147483647, %v26086_v4  ;;  %vm26087_vm14 = vcmp.eq.f32.partialorder %v25643_v28, 2139095040  ;;  %vm26088_vm10 = vcmp.eq.f32.partialorder %v12612_v15, 0  ;;  %vm25272_vm12 = vcmp.eq.f32.partialorder %v26012_v18, 0  ;;  %v11554_v2 = vpop.eup %11553 }
 0x1c6   : > { %v6612_v45 = vsel %vm26087_vm14, %v6611_v26, %v6605_v59  ;;  %vm26089_vm0 = vmmov %vm26073_vm9  ;;  %v1291_v30 = vand.u32 4294901760, %v1194_v14  ;;  %vm26092_vm15 = vcmp.eq.f32.partialorder %v14332_v39, 2139095040  ;;  %v6704_v43 = vsel %vm14731_vm2, 2143289344, %v11552_v29 }
 0x1c7   : > { %vm14809_vm9 = vmand %vm26089_vm0, %vm26088_vm10  ;;  %v6617_v26 = vsel %vm26092_vm15, %v14580_v33, %v6612_v45  ;;  %vm6546_vm14 = vcmp.eq.f32.partialorder %v14459_v7, 2139095040  ;;  %vm26094_vm5 = vnez %v26054_v50  ;;  %vm26095_vm15 = vcmp.eq.f32.partialorder %v12610_v9, 0 }
 0x1c8   : > { %vm26093_vm0 = vmor %vm14754_vm13, %vm14715_vm11  ;;  %v6621_v39 = vsel %vm26094_vm5, 2143289344, %v6617_v26  ;;  %v6706_v33 = vsel %vm26095_vm15, %v12302_v60, %v6704_v43  ;;  %vm26096_vm7 = vcmp.gt.f32.partialorder %v14532_v16, 1065353216  ;;  %vm26097_vm13 = vcmp.lt.f32.partialorder %v12129_v1, 0  ;;  %v11556_v26 = vpop.eup %11555 }
 0x1c9   : > { %v6713_v59 = vsel %vm26093_vm0, 2139095040, %v25633_v40  ;;  %vm6556_vm10 = vmor %vm14809_vm9, %vm14776_vm6  ;;  %11559 = vlog2.f32 %v14801_v49  ;;  %v14848_v6 = vpack.c.bf16 %v1291_v30, %v1287_v3  ;;  %v14850_v50 = vsub.f32 %v1194_v14, %v1291_v30 }
 0x1ca   : > { %vm14843_vm11 = vmxor %vm26097_vm13, %vm26096_vm7  ;;  %v6623_v29 = vsel %vm14707_vm8, 1065353216, %v6621_v39  ;;  %v6708_v45 = vxor.u32 2147483648, %v6706_v33  ;;  %vm26102_vm5 = vcmp.lt.f32.partialorder %v12612_v15, 0  ;;  %vm26103_vm15 = vcmp.eq.f32.partialorder %v12129_v1, 1065353216  ;;  %v26109_v39 = vld [vmem:[#allocation20_spill] sm:$0xff] }
 0x1cb   : > { %26100 = vst [vmem:[#allocation28_spill] sm:$0xff] %v14848_v6  ;;  %26101 = vst [vmem:[#allocation57_spill] sm:$0xff] %v14850_v50  ;;  %v6624_v43 = vsel %vm26103_vm15, %v12615_v58, %v6623_v29  ;;  %vm26104_vm13 = vcmp.eq.f32.partialorder %v12610_v9, 3212836864  ;;  %v6557_v38 = vsel %vm6556_vm10, 2139095040, %v25633_v40  ;;  %vm26105_vm8 = vcmp.lt.f32.partialorder %v12129_v1, 0  ;;  %4660 = vmatpush1.bf16.msra.mxu1 %v14848_v6  ;;  %4852 = vmatpush1.bf16.msra.mxu0 %v14848_v6 }
 0x1cc   : > { %vm6547_vm0 = vmand %vm26102_vm5, %vm25899_vm1  ;;  %v6715_v3 = vsel %vm26104_vm13, 1065353216, %v6713_v59  ;;  %v6709_v58 = vsel %vm14746_vm3, %v6708_v45, %v6706_v33  ;;  %v1197_v22 = vsub.f32 1.0, %v6624_v43  ;;  %vm26108_vm9 = vcmp.eq.f32.partialorder %v12612_v15, 0 }
 0x1cd   : > { %v6548_v14 = vsel %vm6547_vm0, 2143289344, %v11554_v2  ;;  %vm14874_vm5 = vmand %vm26105_vm8, %vm25272_vm12  ;;  %v6783_v59 = vmul.f32 %v11556_v26, %v12129_v1  ;;  %vm26110_vm0 = vcmp.eq.f32.partialorder %v25643_v28, 2139095040  ;;  %vm26111_vm3 = vcmp.eq.f32.partialorder %v12129_v1, 0  ;;  %v11558_v26 = vpop.eup %11557 }
 0x1ce   : > { %v6550_v48 = vsel %vm26108_vm9, %v12302_v60, %v6548_v14  ;;  %vm6660_vm6 = vmor %vm14874_vm5, %vm14843_vm11  ;;  %v6716_v2 = vsel %vm26110_vm0, %v6715_v3, %v6709_v58  ;;  %vm26112_vm15 = vcmp.eq.f32.partialorder %v12610_v9, 1065353216  ;;  %vm6662_vm8 = vcmp.eq.f32.partialorder %v26012_v18, 3212836864 }
 0x1cf   : > { %vm6726_vm13 = vmor %vm26112_vm15, %vm26111_vm3  ;;  %v6552_v34 = vxor.u32 2147483648, %v6550_v48  ;;  %vm6670_vm9 = vcmp.ne.f32.partialorder %v26012_v18, %v26012_v18  ;;  %vm26113_vm7 = vcmp.eq.f32.partialorder %v14407_v8, 2139095040  ;;  %v1293_v29 = vand.u32 4294901760, %v1197_v22 }
 0x1d0   : > { %v6721_v33 = vsel %vm26113_vm7, %v14679_v56, %v6716_v2  ;;  %vm26114_vm10 = vnez %v25637_v23  ;;  %vm26115_vm0 = vcmp.lt.s32.totalorder %v12612_v15, 0  ;;  %vm26116_vm12 = vcmp.eq.f32.partialorder %v12612_v15, 3212836864  ;;  %v26118_v56 = vld [vmem:[#allocation29_spill] sm:$0xff] }
 0x1d1   : > { %vm6551_vm2 = vmand %vm26115_vm0, %vm26114_vm10  ;;  %v6559_v45 = vsel %vm26116_vm12, 1065353216, %v6557_v38  ;;  %11561 = vpow2.f32 %v6783_v59  ;;  %v6725_v43 = vsel %vm14794_vm4, 2143289344, %v6721_v33  ;;  %vm26117_vm3 = vcmp.lt.f32.partialorder %v26012_v18, 0 }
 0x1d2   : > { %v6553_v3 = vsel %vm6551_vm2, %v6552_v34, %v6550_v48  ;;  %vm6651_vm7 = vmand %vm26117_vm3, %vm25899_vm1  ;;  %v6661_v8 = vsel %vm6660_vm6, 2139095040, %v25633_v40  ;;  %v14923_v14 = vand.u32 2147483647, %v26118_v56  ;;  %v6727_v38 = vsel %vm6726_vm13, 1065353216, %v6725_v43 }
 0x1d3   : > { %v14925_v58 = vsub.f32 %v1197_v22, %v1293_v29  ;;  %vm26120_vm12 = vcmp.eq.f32.partialorder %v25643_v28, 2139095040  ;;  %vm26121_vm4 = vnez %v25622_v57  ;;  %vm26122_vm2 = vcmp.ne.f32.partialorder %v12612_v15, %v12612_v15  ;;  %v11560_v7 = vpop.eup %11559 }
 0x1d4   : > { %v6560_v46 = vsel %vm26120_vm12, %v6559_v45, %v6553_v3  ;;  %vm6568_vm15 = vmor %vm26122_vm2, %vm26121_vm4  ;;  %v6652_v30 = vsel %vm6651_vm7, 2143289344, %v11558_v26  ;;  %vm26123_vm11 = vcmp.eq.f32.partialorder %v12129_v1, 1065353216  ;;  %vm26124_vm5 = vcmp.eq.f32.partialorder %v12129_v1, 0 }
 0x1d5   : > { %26119 = vst [vmem:[#allocation20_spill] sm:$0xff] %v14925_v58  ;;  %v6728_v62 = vsel %vm26123_vm11, %v12610_v9, %v6727_v38  ;;  %v6565_v48 = vsel %vm6546_vm14, %v14785_v12, %v6560_v46  ;;  %vm26125_vm6 = vcmp.eq.f32.partialorder %v12612_v15, 1065353216  ;;  %vm26126_vm0 = vcmp.eq.f32.partialorder %v26012_v18, 0  ;;  %vm14961_vm2 = vmor %vm6670_vm9, %vm26121_vm4 }
 0x1d6   : > { %vm6570_vm13 = vmor %vm26125_vm6, %vm26124_vm5  ;;  %v6654_v22 = vsel %vm26126_vm0, %v12302_v60, %v6652_v30  ;;  %vm6805_vm3 = vcmp.gt.f32.partialorder %v14660_v31, 1065353216  ;;  %v1199_v59 = vsub.f32 1.0, %v6728_v62  ;;  %v6569_v2 = vsel %vm6568_vm15, 2143289344, %v6565_v48 }
 0x1d7   : > { %vm26127_vm7 = vcmp.lt.s32.totalorder %v26012_v18, 0  ;;  %v6656_v9 = vxor.u32 2147483648, %v6654_v22  ;;  %11563 = vlog2.f32 %v14923_v14  ;;  %v6571_v12 = vsel %vm6570_vm13, 1065353216, %v6569_v2 }
 0x1d8   : > { %vm6655_vm12 = vmand %vm26127_vm7, %vm26114_vm10  ;;  %vm6650_vm14 = vcmp.eq.f32.partialorder %v14532_v16, 2139095040  ;;  %v6663_v34 = vsel %vm6662_vm8, 1065353216, %v6661_v8  ;;  %vm6802_vm15 = vcmp.eq.f32.partialorder %v26047_v27, 0  ;;  %v1297_v45 = vand.u32 4294901760, %v1199_v59 }
 0x1d9   : > { %v6572_v26 = vsel %vm26123_vm11, %v12612_v15, %v6571_v12  ;;  %v6657_v43 = vsel %vm6655_vm12, %v6656_v9, %v6654_v22  ;;  %vm26130_vm8 = vcmp.lt.f32.partialorder %v12129_v1, 0  ;;  %v6887_v8 = vmul.f32 %v11560_v7, %v12129_v1 }
 0x1da   : > { %vm14973_vm5 = vmxor %vm26130_vm8, %vm6805_vm3  ;;  %vm26133_vm9 = vcmp.eq.f32.partialorder %v25643_v28, 2139095040  ;;  %vm26134_vm6 = vcmp.lt.f32.partialorder %v26012_v18, 0  ;;  %vm26135_vm13 = vcmp.eq.f32.partialorder %v12129_v1, 0  ;;  %vm26136_vm0 = vcmp.eq.f32.partialorder %v26012_v18, 1065353216 }
 0x1db   : > { %v6664_v38 = vsel %vm26133_vm9, %v6663_v34, %v6657_v43  ;;  %v6668_v46 = vsel %vm26134_vm6, %v25634_v55, %v12167_v17  ;;  %vm14988_vm7 = vmor %vm26136_vm0, %vm26135_vm13  ;;  %v1196_v30 = vsub.f32 1.0, %v6572_v26  ;;  %vm6801_vm3 = vcmp.lt.f32.partialorder %v26047_v27, 0  ;;  %v11562_v16 = vpop.eup %11561  ;;  %v26149_v43 = vld [vmem:[#allocation27_spill] sm:$0xff] }
 0x1dc   : > { %v14993_v62 = vpack.c.bf16 %v1297_v45, %v1293_v29  ;;  %v14995_v48 = vsub.f32 %v1199_v59, %v1297_v45  ;;  %v6669_v22 = vsel %vm6650_vm14, %v6668_v46, %v6664_v38  ;;  %vm26141_vm12 = vmmov %vm26130_vm8  ;;  %11565 = vpow2.f32 %v6887_v8 }
 0x1dd   : > { %vm15003_vm11 = vmand %vm26141_vm12, %vm6802_vm15  ;;  %v976_v9 = vmul.f32 %v12222_v37, %v14365_v44  ;;  %v6673_v29 = vsel %vm14961_vm2, 2143289344, %v6669_v22  ;;  %v1295_v59 = vand.u32 4294901760, %v1196_v30  ;;  %vm6804_vm8 = vcmp.lt.s32.totalorder %v26047_v27, 0 }
 0x1de   : > { %26139 = vst [vmem:[#allocation29_spill] sm:$0xff] %v14993_v62  ;;  %26140 = vst [vmem:[#allocation58_spill] sm:$0xff] %v14995_v48  ;;  %v26144_v7 = vsub.f32 %v12237_v42, %v14320_v32  ;;  %vm26145_vm9 = vcmp.lt.s32.totalorder %v26109_v39, %v12279_v53  ;;  %4662 = vmatprep.subr.bf16.mxu1 %v14993_v62  ;;  %4854 = vmatprep.subr.bf16.mxu0 %v14993_v62  ;;  %v6675_v44 = vsel %vm14988_vm7, 1065353216, %v6673_v29  ;;  %v26146_v32 = vld [vmem:[#allocation21_spill] sm:$0xff]  ;;  %v26235_v50 = vmov 0 }
 0x1df   : > { %vm6816_vm14 = vmor %vm15003_vm11, %vm14973_vm5  ;;  %vm6803_vm2 = vcmp.eq.f32.partialorder %v26047_v27, 1065353216  ;;  %vm6826_vm13 = vcmp.ne.f32.partialorder %v26047_v27, %v26047_v27  ;;  %vm26147_vm12 = vcmp.eq.f32.partialorder %v12129_v1, 1065353216  ;;  %v15038_v34 = vsub.f32 %v1196_v30, %v1295_v59 }
 0x1e0   : > { %v898_v12 = vsel %vm26145_vm9, %v26144_v7, 0.0  ;;  %vm6807_vm6 = vmand %vm6801_vm3, %vm25899_vm1  ;;  %v6676_v39 = vsel %vm26147_vm12, %v26012_v18, %v6675_v44  ;;  %vm6909_vm7 = vcmp.gt.f32.partialorder %v14801_v49, 1065353216  ;;  %v6817_v18 = vsel %vm6816_vm14, 2139095040, %v25633_v40 }
 0x1e1   : > { %26148 = vst [vmem:[#allocation21_spill] sm:$0xff] %v15038_v34  ;;  %v6808_v33 = vsel %vm6807_vm6, 2143289344, %v11562_v16  ;;  %v1198_v45 = vsub.f32 1.0, %v6676_v39  ;;  %vm6811_vm9 = vmand %vm6804_vm8, %vm26114_vm10  ;;  %v15055_v8 = vand.u32 2147483647, %v26149_v43  ;;  %v15058_v38 = vmul.f32 %v12170_v19, %v976_v9  ;;  %v11564_v3 = vpop.eup %11563  ;;  %v775_v9 = vpop.permute.xlu1 %774 }
 0x1e2   : > { %v6810_v26 = vsel %vm6802_vm15, %v12302_v60, %v6808_v33  ;;  %v974_v46 = vmul.f32 %v12222_v37, %v898_v12  ;;  %vm15063_vm15 = vmor %vm6826_vm13, %vm26121_vm4  ;;  %vm6906_vm8 = vcmp.eq.f32.partialorder %v26086_v4, 0  ;;  %vm6806_vm5 = vcmp.eq.f32.partialorder %v14660_v31, 2139095040 }
 0x1e3   : > { %v6812_v15 = vxor.u32 2147483648, %v6810_v26  ;;  %v1299_v22 = vand.u32 4294901760, %v1198_v45  ;;  %vm6818_vm11 = vcmp.eq.f32.partialorder %v26047_v27, 3212836864  ;;  %vm26152_vm14 = vcmp.lt.f32.partialorder %v12129_v1, 0 }
 0x1e4   : > { %vm15074_vm6 = vmxor %vm26152_vm14, %vm6909_vm7  ;;  %11567 = vlog2.f32 %v15055_v8  ;;  %v6819_v16 = vsel %vm6818_vm11, 1065353216, %v6817_v18  ;;  %vm26155_vm13 = vcmp.eq.f32.partialorder %v12129_v1, 0  ;;  %vm6905_vm0 = vcmp.lt.f32.partialorder %v26086_v4, 0 }
 0x1e5   : > { %v6813_v29 = vsel %vm6811_vm9, %v6812_v15, %v6810_v26  ;;  %vm15083_vm12 = vmor %vm6803_vm2, %vm26155_vm13  ;;  %v6731_v12 = vmul.f32 %v11564_v3, %v12129_v1  ;;  %v15089_v44 = vpack.c.bf16 %v1299_v22, %v1295_v59  ;;  %v15091_v39 = vsub.f32 %v1198_v45, %v1299_v22  ;;  %v15118_v22 = vpop.permute.xlu0 %769 }
 0x1e6   : > { %vm26160_vm7 = vcmp.eq.f32.partialorder %v25643_v28, 2139095040  ;;  %v6824_v26 = vsel %vm6801_vm3, %v25634_v55, %v12167_v17  ;;  %vm26161_vm2 = vmmov %vm26152_vm14  ;;  %v15108_v59 = vmul.f32 %v12170_v19, %v974_v46  ;;  %vm6908_vm11 = vcmp.lt.s32.totalorder %v26086_v4, 0  ;;  %v11566_v15 = vpop.eup %11565  ;;  %v26164_v46 = vld [vmem:[#allocation34_spill] sm:$0xff] }
 0x1e7   : > { %26158 = vst [vmem:[#allocation27_spill] sm:$0xff] %v15089_v44  ;;  %26159 = vst [vmem:[#allocation59_spill] sm:$0xff] %v15091_v39  ;;  %v6820_v33 = vsel %vm26160_vm7, %v6819_v16, %v6813_v29  ;;  %11569 = vpow2.f32 %v6731_v12  ;;  %v840_v3 = vsub.f32 %v12237_v42, %v775_v9  ;;  %4664 = vmatpush1.bf16.msra.mxu1 %v15089_v44  ;;  %4856 = vmatpush1.bf16.msra.mxu0 %v15089_v44 }
 0x1e8   : > { %vm15103_vm9 = vmand %vm26161_vm2, %vm6906_vm8  ;;  %v6825_v45 = vsel %vm6806_vm5, %v6824_v26, %v6820_v33  ;;  %vm6930_vm14 = vcmp.ne.f32.partialorder %v26086_v4, %v26086_v4  ;;  %v15131_v29 = vand.u32 2147483647, %v26164_v46  ;;  %vm6907_vm13 = vcmp.eq.f32.partialorder %v26086_v4, 1065353216 }
 0x1e9   : > { %vm6920_vm3 = vmor %vm15103_vm9, %vm15074_vm6  ;;  %v6829_v31 = vsel %vm15063_vm15, 2143289344, %v6825_v45  ;;  %vm6753_vm7 = vcmp.gt.f32.partialorder %v14923_v14, 1065353216  ;;  %vm26165_vm15 = vcmp.eq.f32.partialorder %v12129_v1, 1065353216  ;;  %vm6922_vm6 = vcmp.eq.f32.partialorder %v26086_v4, 3212836864 }
 0x1ea   : > { %vm6911_vm5 = vmand %vm6905_vm0, %vm25899_vm1  ;;  %v6831_v9 = vsel %vm15083_vm12, 1065353216, %v6829_v31  ;;  %v6921_v7 = vsel %vm6920_vm3, 2139095040, %v25633_v40  ;;  %11571 = vlog2.f32 %v15131_v29  ;;  %vm6749_vm12 = vcmp.lt.f32.partialorder %v26118_v56, 0 }
 0x1eb   : > { %v6912_v16 = vsel %vm6911_vm5, 2143289344, %v11566_v15  ;;  %v6832_v30 = vsel %vm26165_vm15, %v26047_v27, %v6831_v9  ;;  %vm6915_vm2 = vmand %vm6908_vm11, %vm26114_vm10  ;;  %vm26168_vm11 = vcmp.lt.s32.totalorder %v26146_v32, %v12279_v53  ;;  %vm26169_vm9 = vcmp.eq.f32.partialorder %v12129_v1, 0  ;;  %v26172_v15 = vld [vmem:[#allocation32_spill] sm:$0xff] }
 0x1ec   : > { %v6914_v12 = vsel %vm6906_vm8, %v12302_v60, %v6912_v16  ;;  %vm15158_vm8 = vmor %vm6930_vm14, %vm26121_vm4  ;;  %v1201_v45 = vsub.f32 1.0, %v6832_v30  ;;  %v904_v2 = vsel %vm26168_vm11, %v840_v3, 0.0  ;;  %vm6750_vm5 = vcmp.eq.f32.partialorder %v26118_v56, 0 }
 0x1ed   : > { %v6916_v33 = vxor.u32 2147483648, %v6914_v12  ;;  %vm15171_vm3 = vmor %vm6907_vm13, %vm26169_vm9  ;;  %v15177_v31 = vand.u32 2147483647, %v26172_v15  ;;  %vm6910_vm14 = vcmp.eq.f32.partialorder %v14801_v49, 2139095040  ;;  %v6923_v32 = vsel %vm6922_vm6, 1065353216, %v6921_v7 }
 0x1ee   : > { %v1301_v3 = vand.u32 4294901760, %v1201_v45  ;;  %vm26173_vm15 = vcmp.lt.f32.partialorder %v12129_v1, 0  ;;  %v11568_v30 = vpop.eup %11567  ;;  %vm26176_vm13 = vcmp.eq.f32.partialorder %v25643_v28, 2139095040  ;;  %v6928_v49 = vsel %vm6905_vm0, %v25634_v55, %v12167_v17  ;;  %vm15199_vm6 = vmand %vm6749_vm12, %vm25899_vm1 }
 0x1ef   : > { %v6917_v9 = vsel %vm6915_vm2, %v6916_v33, %v6914_v12  ;;  %vm15184_vm11 = vmxor %vm26173_vm15, %vm6753_vm7  ;;  %vm6752_vm2 = vcmp.lt.s32.totalorder %v26118_v56, 0  ;;  %11573 = vlog2.f32 %v15177_v31  ;;  %vm6774_vm9 = vcmp.ne.f32.partialorder %v26118_v56, %v26118_v56 }
 0x1f0   : > { %v6924_v27 = vsel %vm26176_vm13, %v6923_v32, %v6917_v9  ;;  %v15204_v33 = vsub.f32 %v1201_v45, %v1301_v3  ;;  %vm26180_vm7 = vmmov %vm26173_vm15  ;;  %v6835_v32 = vmul.f32 %v11568_v30, %v12129_v1  ;;  %v15218_v44 = vmul.f32 %v12222_v37, %v904_v2  ;;  %v26188_v30 = vld [vmem:[#allocation33_spill] sm:$0xff] }
 0x1f1   : > { %v6929_v7 = vsel %vm6910_vm14, %v6928_v49, %v6924_v27  ;;  %vm15210_vm0 = vmand %vm26180_vm7, %vm6750_vm5  ;;  %vm6751_vm14 = vcmp.eq.f32.partialorder %v26118_v56, 1065353216  ;;  %v11570_v45 = vpop.eup %11569  ;;  %vm6857_vm15 = vcmp.gt.f32.partialorder %v15055_v8, 1065353216 }
 0x1f2   : > { %26179 = vst [vmem:[#allocation34_spill] sm:$0xff] %v15204_v33  ;;  %v6933_v27 = vsel %vm15158_vm8, 2143289344, %v6929_v7  ;;  %vm6764_vm13 = vmor %vm15210_vm0, %vm15184_vm11  ;;  %vm6766_vm8 = vcmp.eq.f32.partialorder %v26118_v56, 3212836864  ;;  %11575 = vpow2.f32 %v6835_v32  ;;  %vm26185_vm11 = vcmp.eq.f32.partialorder %v12129_v1, 1065353216 }
 0x1f3   : > { %v6935_v49 = vsel %vm15171_vm3, 1065353216, %v6933_v27  ;;  %vm15234_vm7 = vmand %vm6752_vm2, %vm26114_vm10  ;;  %v6756_v18 = vsel %vm15199_vm6, 2143289344, %v11570_v45  ;;  %vm6853_vm2 = vcmp.lt.f32.partialorder %v26149_v43, 0  ;;  %v15256_v7 = vand.u32 2147483647, %v26188_v30 }
 0x1f4   : > { %v6936_v2 = vsel %vm26185_vm11, %v26086_v4, %v6935_v49  ;;  %vm15250_vm3 = vmor %vm6774_vm9, %vm26121_vm4  ;;  %v6758_v4 = vsel %vm6750_vm5, %v12302_v60, %v6756_v18  ;;  %v6765_v12 = vsel %vm6764_vm13, 2139095040, %v25633_v40  ;;  %vm26189_vm6 = vcmp.eq.f32.partialorder %v12129_v1, 0  ;;  %v11572_v27 = vpop.eup %11571 }
 0x1f5   : > { %v1203_v9 = vsub.f32 1.0, %v6936_v2  ;;  %vm15266_vm0 = vmor %vm6751_vm14, %vm26189_vm6  ;;  %vm25279_vm9 = vcmp.eq.f32.partialorder %v26149_v43, 0  ;;  %v6760_v45 = vxor.u32 2147483648, %v6758_v4  ;;  %v6772_v49 = vsel %vm6749_vm12, %v25634_v55, %v12167_v17 }
 0x1f6   : > { %vm26192_vm13 = vcmp.lt.f32.partialorder %v12129_v1, 0  ;;  %11577 = vlog2.f32 %v15256_v7  ;;  %vm6856_vm14 = vcmp.lt.s32.totalorder %v26149_v43, 0  ;;  %vm15290_vm12 = vmand %vm6853_vm2, %vm25899_vm1  ;;  %v6991_v6 = vmul.f32 %v11572_v27, %v12129_v1 }
 0x1f7   : > { %vm15280_vm11 = vmxor %vm26192_vm13, %vm6857_vm15  ;;  %v1305_v18 = vand.u32 4294901760, %v1203_v9  ;;  %v6761_v0 = vsel %vm15234_vm7, %v6760_v45, %v6758_v4  ;;  %v6767_v33 = vsel %vm6766_vm8, 1065353216, %v6765_v12  ;;  %vm7013_vm6 = vcmp.gt.f32.partialorder %v15131_v29, 1065353216 }
 0x1f8   : > { %vm26197_vm15 = vmmov %vm26192_vm13  ;;  %vm26202_vm7 = vcmp.eq.f32.partialorder %v25643_v28, 2139095040  ;;  %11579 = vpow2.f32 %v6991_v6 }
 0x1f9   : > { %vm15304_vm13 = vmand %vm26197_vm15, %vm25279_vm9  ;;  %v15311_v27 = vpack.c.bf16 %v1305_v18, %v1301_v3  ;;  %v15313_v26 = vsub.f32 %v1203_v9, %v1305_v18  ;;  %v6768_v4 = vsel %vm26202_vm7, %v6767_v33, %v6761_v0  ;;  %v11574_v12 = vpop.eup %11573  ;;  %vm26203_vm15 = vcmp.eq.f32.partialorder %v14923_v14, 2139095040  ;;  %v26206_v0 = vld [vmem:[#allocation31_spill] sm:$0xff]  ;;  %v26228_v9 = vld [vmem:[#allocation36_spill] sm:$0xff] }
 0x1fa   : > { %vm6868_vm8 = vmor %vm15304_vm13, %vm15280_vm11  ;;  %v6773_v45 = vsel %vm26203_vm15, %v6772_v49, %v6768_v4  ;;  %v15334_v33 = vand.u32 2147483647, %v26206_v0  ;;  %v6876_v14 = vsel %vm6853_vm2, %v25634_v55, %v12167_v17  ;;  %vm26207_vm7 = vcmp.lt.f32.partialorder %v12129_v1, 0 }
 0x1fb   : > { %26200 = vst [vmem:[#allocation32_spill] sm:$0xff] %v15311_v27  ;;  %26201 = vst [vmem:[#allocation33_spill] sm:$0xff] %v15313_v26  ;;  %4666 = vmatprep.subr.bf16.mxu1 %v15311_v27  ;;  %4858 = vmatprep.subr.bf16.mxu0 %v15311_v27  ;;  %v6777_v6 = vsel %vm15250_vm3, 2143289344, %v6773_v45  ;;  %v7095_v16 = vmul.f32 %v11574_v12, %v12129_v1  ;;  %v6869_v18 = vsel %vm6868_vm8, 2139095040, %v25633_v40  ;;  %vm26214_vm11 = vcmp.eq.f32.partialorder %v12129_v1, 0 }
 0x1fc   : > { %vm15327_vm9 = vmand %vm6856_vm14, %vm26114_vm10  ;;  %v6779_v49 = vsel %vm15266_vm0, 1065353216, %v6777_v6  ;;  %vm26210_vm3 = vcmp.ne.f32.partialorder %v26149_v43, %v26149_v43  ;;  %11581 = vlog2.f32 %v15334_v33  ;;  %v11576_v32 = vpop.eup %11575  ;;  %vm26213_vm0 = vcmp.eq.f32.partialorder %v12129_v1, 1065353216 }
 0x1fd   : > { %vm15350_vm5 = vmxor %vm26207_vm7, %vm7013_vm6  ;;  %vm7012_vm6 = vcmp.lt.s32.totalorder %v26164_v46, 0  ;;  %v6780_v39 = vsel %vm26213_vm0, %v26118_v56, %v6779_v49  ;;  %vm26215_vm13 = vcmp.eq.f32.partialorder %v26149_v43, 1065353216  ;;  %vm26218_vm7 = vcmp.eq.f32.partialorder %v26164_v46, 0 }
 0x1fe   : > { %vm15368_vm2 = vmor %vm26210_vm3, %vm26121_vm4  ;;  %vm26219_vm3 = vcmp.lt.f32.partialorder %v12129_v1, 0  ;;  %vm26222_vm0 = vcmp.lt.f32.partialorder %v26164_v46, 0  ;;  %11583 = vpow2.f32 %v7095_v16  ;;  %v6860_v45 = vsel %vm15290_vm12, 2143289344, %v11576_v32 }
 0x1ff   : > { %vm15381_vm8 = vmor %vm26215_vm13, %vm26214_vm11  ;;  %v15398_v56 = vsel %vm26222_vm0, %v25634_v55, %v12167_v17  ;;  %v1200_v6 = vsub.f32 1.0, %v6780_v39  ;;  %vm26224_vm0 = vcmp.eq.f32.partialorder %v26149_v43, 3212836864  ;;  %vm26225_vm12 = vcmp.lt.f32.partialorder %v26164_v46, 0 }
 0x200   : > { %vm15389_vm15 = vmand %vm26219_vm3, %vm26218_vm7  ;;  %vm7113_vm7 = vcmp.lt.f32.partialorder %v26172_v15, 0  ;;  %vm26223_vm3 = vcmp.eq.f32.partialorder %v26149_v43, 0  ;;  %v6871_v16 = vsel %vm26224_vm0, 1065353216, %v6869_v18  ;;  %v15424_v32 = vand.u32 2147483647, %v26228_v9  ;;  %v11578_v39 = vpop.eup %11577 }
 0x201   : > { %vm7024_vm11 = vmor %vm15389_vm15, %vm15350_vm5  ;;  %v6862_v49 = vsel %vm26223_vm3, %v12302_v60, %v6860_v45  ;;  %v15426_v27 = vand.u32 4294901760, %v1200_v6  ;;  %v6939_v34 = vmul.f32 %v11578_v39, %v12129_v1  ;;  %vm26238_vm5 = vcmp.lt.f32.partialorder %v12129_v1, 0 }
 0x202   : > { %vm15418_vm14 = vmand %vm26225_vm12, %vm25899_vm1  ;;  %v6864_v12 = vxor.u32 2147483648, %v6862_v49  ;;  %v7025_v45 = vsel %vm7024_vm11, 2139095040, %v25633_v40  ;;  %11585 = vlog2.f32 %v15424_v32  ;;  %vm26237_vm12 = vcmp.gt.f32.partialorder %v15177_v31, 1065353216 }
 0x203   : > { %vm15432_vm15 = vmand %vm7012_vm6, %vm26114_vm10  ;;  %v15454_v58 = vsub.f32 %v1200_v6, %v15426_v27  ;;  %vm26234_vm6 = vcmp.ne.f32.partialorder %v26164_v46, %v26164_v46  ;;  %v15478_v3 = vsel %vm7113_vm7, %v25634_v55, %v12167_v17  ;;  %v11580_v6 = vpop.eup %11579  ;;  %vm26241_vm0 = vcmp.eq.f32.partialorder %v25643_v28, 2139095040 }
 0x204   : > { %vm15445_vm13 = vmand %vm7113_vm7, %vm25899_vm1  ;;  %v6865_v48 = vsel %vm15327_vm9, %v6864_v12, %v6862_v49  ;;  %vm26246_vm7 = vcmp.lt.s32.totalorder %v26172_v15, 0  ;;  %11587 = vpow2.f32 %v6939_v34  ;;  %vm26249_vm1 = vcmp.eq.f32.partialorder %v15055_v8, 2139095040 }
 0x205   : > { %26233 = vst [vmem:[#allocation31_spill] sm:$0xff] %v15454_v58  ;;  %vm15461_vm11 = vmor %vm26234_vm6, %vm26121_vm4  ;;  %v6872_v49 = vsel %vm26241_vm0, %v6871_v16, %v6865_v48  ;;  %v7016_v16 = vsel %vm15418_vm14, 2143289344, %v11580_v6  ;;  %vm26260_vm6 = vcmp.lt.f32.partialorder %v26188_v30, 0  ;;  %vm26262_vm14 = vcmp.eq.f32.partialorder %v12129_v1, 0 }
 0x206   : > { %v26236_v50 = vsel %vm15461_vm11, 4294967295, %v26235_v50  ;;  %vm15469_vm3 = vmxor %vm26238_vm5, %vm26237_vm12  ;;  %vm26242_vm5 = vcmp.eq.f32.partialorder %v12129_v1, 0  ;;  %vm26243_vm12 = vcmp.eq.f32.partialorder %v26164_v46, 1065353216  ;;  %v6877_v48 = vsel %vm26249_vm1, %v6876_v14, %v6872_v49  ;;  %v26256_v14 = vld [vmem:[#allocation35_spill] sm:$0xff] }
 0x207   : > { %vm15488_vm11 = vmor %vm26243_vm12, %vm26242_vm5  ;;  %vm26250_vm5 = vcmp.eq.f32.partialorder %v26164_v46, 3212836864  ;;  %vm26251_vm12 = vcmp.eq.f32.partialorder %v26172_v15, 0  ;;  %v6881_v34 = vsel %vm15368_vm2, 2143289344, %v6877_v48  ;;  %vm26255_vm1 = vcmp.eq.f32.partialorder %v26164_v46, 0 }
 0x208   : > { %vm15496_vm9 = vmand %vm26246_vm7, %vm26114_vm10  ;;  %v7027_v25 = vsel %vm26250_vm5, 1065353216, %v7025_v45  ;;  %vm26252_vm7 = vcmp.lt.f32.partialorder %v12129_v1, 0  ;;  %v7018_v8 = vsel %vm26255_vm1, %v12302_v60, %v7016_v16  ;;  %v15529_v62 = vand.u32 2147483647, %v26256_v14  ;;  %v11582_v45 = vpop.eup %11581 }
 0x209   : > { %vm15512_vm10 = vmand %vm26252_vm7, %vm26251_vm12  ;;  %vm6961_vm12 = vcmp.gt.f32.partialorder %v15256_v7, 1065353216  ;;  %v6883_v4 = vsel %vm15381_vm8, 1065353216, %v6881_v34  ;;  %v7020_v6 = vxor.u32 2147483648, %v7018_v8  ;;  %vm26257_vm2 = vcmp.ne.f32.partialorder %v26172_v15, %v26172_v15  ;;  %v11584_v2 = vpop.eup %11583 }
 0x20a   : > { %vm7128_vm5 = vmor %vm15512_vm10, %vm15469_vm3  ;;  %v15547_v48 = vsel %vm26260_vm6, %v25634_v55, %v12167_v17  ;;  %vm26261_vm8 = vcmp.eq.f32.partialorder %v12129_v1, 1065353216  ;;  %v7043_v47 = vmul.f32 %v11582_v45, %v12129_v1  ;;  %11589 = vlog2.f32 %v15529_v62  ;;  %v26353_v45 = vld [vmem:[#allocation22_spill] sm:$0xff] }
 0x20b   : > { %vm15538_vm7 = vmor %vm26257_vm2, %vm26121_vm4  ;;  %v6884_v16 = vsel %vm26261_vm8, %v26149_v43, %v6883_v4  ;;  %vm26263_vm2 = vcmp.eq.f32.partialorder %v26172_v15, 1065353216  ;;  %v7021_v21 = vsel %vm15432_vm15, %v7020_v6, %v7018_v8  ;;  %v7120_v43 = vsel %vm15445_vm13, 2143289344, %v11584_v2 }
 0x20c   : > { %vm15556_vm0 = vmor %vm26263_vm2, %vm26262_vm14  ;;  %v1202_v35 = vsub.f32 1.0, %v6884_v16  ;;  %v7129_v4 = vsel %vm7128_vm5, 2139095040, %v25633_v40  ;;  %vm26266_vm6 = vcmp.lt.f32.partialorder %v12129_v1, 0  ;;  %vm26269_vm15 = vcmp.eq.f32.partialorder %v25643_v28, 2139095040  ;;  %v11586_v6 = vpop.eup %11585 }
 0x20d   : > { %vm15578_vm14 = vmxor %vm26266_vm6, %vm6961_vm12  ;;  %v7028_v18 = vsel %vm26269_vm15, %v7027_v25, %v7021_v21  ;;  %vm26270_vm13 = vcmp.eq.f32.partialorder %v26172_v15, 0  ;;  %vm26271_vm8 = vnez %v25590_v10  ;;  %vm26272_vm10 = vcmp.lt.f32.partialorder %v26188_v30, 0 }
 0x20e   : > { %v7122_v26 = vsel %vm26270_vm13, %v12302_v60, %v7120_v43  ;;  %vm15591_vm3 = vmand %vm26272_vm10, %vm26271_vm8  ;;  %11591 = vpow2.f32 %v7043_v47  ;;  %v1307_v39 = vand.u32 4294901760, %v1202_v35  ;;  %vm26275_vm2 = vcmp.eq.f32.partialorder %v15131_v29, 2139095040 }
 0x20f   : > { %v7033_v21 = vsel %vm26275_vm2, %v15398_v56, %v7028_v18  ;;  %v7124_v25 = vxor.u32 2147483648, %v7122_v26  ;;  %vm26276_vm6 = vcmp.eq.f32.partialorder %v26188_v30, 0  ;;  %vm26277_vm15 = vcmp.lt.f32.partialorder %v12129_v1, 0 }
 0x210   : > { %vm15604_vm13 = vmand %vm26277_vm15, %vm26276_vm6  ;;  %vm26280_vm5 = vnez %v26236_v50  ;;  %vm26281_vm12 = vcmp.eq.f32.partialorder %v26172_v15, 3212836864  ;;  %vm7065_vm10 = vcmp.gt.f32.partialorder %v15334_v33, 1065353216  ;;  %v15622_v29 = vpack.c.bf16 %v1307_v39, %v15426_v27 }
 0x211   : > { %v7037_v47 = vsel %vm26280_vm5, 2143289344, %v7033_v21  ;;  %v7131_v2 = vsel %vm26281_vm12, 1065353216, %v7129_v4  ;;  %vm6972_vm1 = vmor %vm15604_vm13, %vm15578_vm14  ;;  %v15624_v50 = vsub.f32 %v1202_v35, %v1307_v39  ;;  %v7125_v16 = vsel %vm15496_vm9, %v7124_v25, %v7122_v26  ;;  %v11588_v4 = vpop.eup %11587 }
 0x212   : > { %26282 = vst [vmem:[#allocation36_spill] sm:$0xff] %v15622_v29  ;;  %v7039_v56 = vsel %vm15488_vm11, 1065353216, %v7037_v47  ;;  %vm26284_vm5 = vnez %v25637_v23  ;;  %vm26285_vm12 = vcmp.lt.s32.totalorder %v26188_v30, 0  ;;  %vm26288_vm2 = vcmp.eq.f32.partialorder %v12129_v1, 1065353216  ;;  %4668 = vmatpush1.bf16.msra.mxu1 %v15622_v29  ;;  %4860 = vmatpush1.bf16.msra.mxu0 %v15622_v29 }
 0x213   : > { %26283 = vst [vmem:[#allocation35_spill] sm:$0xff] %v15624_v50  ;;  %vm15634_vm6 = vmand %vm26285_vm12, %vm26284_vm5  ;;  %v7040_v35 = vsel %vm26288_vm2, %v26164_v46, %v7039_v56  ;;  %vm26289_vm15 = vcmp.eq.f32.partialorder %v25643_v28, 2139095040  ;;  %vm26290_vm11 = vcmp.ne.f32.partialorder %v26188_v30, %v26188_v30  ;;  %vm7086_vm12 = vcmp.ne.f32.partialorder %v26206_v0, %v26206_v0 }
 0x214   : > { %v7132_v27 = vsel %vm26289_vm15, %v7131_v2, %v7125_v16  ;;  %vm15648_vm9 = vmor %vm26290_vm11, %vm26121_vm4  ;;  %v7199_v12 = vmul.f32 %v11586_v6, %v12129_v1  ;;  %vm26293_vm2 = vcmp.eq.f32.partialorder %v15177_v31, 2139095040  ;;  %v1205_v18 = vsub.f32 1.0, %v7040_v35  ;;  %v26307_v2 = vld [vmem:[#allocation38_spill] sm:$0xff]  ;;  %v11590_v16 = vpop.eup %11589 }
 0x215   : > { %v7137_v46 = vsel %vm26293_vm2, %v15478_v3, %v7132_v27  ;;  %v6964_v26 = vsel %vm15591_vm3, 2143289344, %v11588_v4  ;;  %v6973_v39 = vsel %vm6972_vm1, 2139095040, %v25633_v40  ;;  %vm26294_vm15 = vcmp.lt.f32.partialorder %v12129_v1, 0 }
 0x216   : > { %vm15672_vm11 = vmxor %vm26294_vm15, %vm7065_vm10  ;;  %v7141_v31 = vsel %vm15538_vm7, 2143289344, %v7137_v46  ;;  %vm26297_vm3 = vcmp.eq.f32.partialorder %v26188_v30, 0  ;;  %vm26298_vm14 = vcmp.eq.f32.partialorder %v12129_v1, 0  ;;  %vm26299_vm1 = vcmp.eq.f32.partialorder %v26188_v30, 1065353216 }
 0x217   : > { %v6966_v3 = vsel %vm26297_vm3, %v12302_v60, %v6964_v26  ;;  %vm15686_vm13 = vmor %vm26299_vm1, %vm26298_vm14  ;;  %11593 = vpow2.f32 %v7199_v12  ;;  %v949_v25 = vmul.f32 0.0, %v26302_v63  ;;  %v7143_v8 = vsel %vm15556_vm0, 1065353216, %v7141_v31 }
 0x218   : > { %v1309_v49 = vand.u32 4294901760, %v1205_v18  ;;  %v6968_v6 = vxor.u32 2147483648, %v6966_v3  ;;  %vm26303_vm7 = vcmp.eq.f32.partialorder %v26206_v0, 0  ;;  %vm26304_vm10 = vmmov %vm26294_vm15  ;;  %v15702_v56 = vand.u32 2147483647, %v26307_v2  ;;  %v11592_v46 = vpop.eup %11591 }
 0x219   : > { %vm15697_vm15 = vmand %vm26304_vm10, %vm26303_vm7  ;;  %vm26308_vm3 = vcmp.eq.f32.partialorder %v12129_v1, 1065353216  ;;  %v1014_v34 = vmul.f32 %v12170_v19, %v949_v25  ;;  %vm26310_vm10 = vcmp.eq.f32.partialorder %v26188_v30, 3212836864  ;;  %vm26312_vm2 = vcmp.eq.f32.partialorder %v25643_v28, 2139095040 }
 0x21a   : > { %v7144_v4 = vsel %vm26308_vm3, %v26172_v15, %v7143_v8  ;;  %vm7076_vm14 = vmor %vm15697_vm15, %vm15672_vm11  ;;  %v15715_v27 = vsub.f32 %v1205_v18, %v1309_v49  ;;  %v6969_v12 = vsel %vm15634_vm6, %v6968_v6, %v6966_v3  ;;  %v6975_v15 = vsel %vm26310_vm10, 1065353216, %v6973_v39 }
 0x21b   : > { %v1207_v35 = vsub.f32 1.0, %v7144_v4  ;;  %vm26311_vm3 = vcmp.lt.f32.partialorder %v26206_v0, 0  ;;  %v6976_v26 = vsel %vm26312_vm2, %v6975_v15, %v6969_v12  ;;  %vm26313_vm1 = vcmp.lt.s32.totalorder %v26206_v0, 0  ;;  %vm15753_vm2 = vmor %vm7086_vm12, %vm26121_vm4 }
 0x21c   : > { %26309 = vst [vmem:[#allocation14_spill] sm:$0xff] %v15715_v27  ;;  %vm7067_vm0 = vmand %vm26311_vm3, %vm26271_vm8  ;;  %v7251_v43 = vmul.f32 %v11590_v16, %v12129_v1  ;;  %v15736_v39 = vadd.f32 1.0, %v1014_v34  ;;  %11595 = vlog2.f32 %v15702_v56  ;;  %vm26316_vm6 = vcmp.eq.f32.partialorder %v15256_v7, 2139095040 }
 0x21d   : > { %vm15731_vm7 = vmand %vm26313_vm1, %vm26284_vm5  ;;  %v1313_v31 = vand.u32 4294901760, %v1207_v35  ;;  %v6981_v3 = vsel %vm26316_vm6, %v15547_v48, %v6976_v26  ;;  %v7068_v63 = vsel %vm7067_vm0, 2143289344, %v11592_v46  ;;  %v7077_v25 = vsel %vm7076_vm14, 2139095040, %v25633_v40 }
 0x21e   : > { %v6985_v7 = vsel %vm15648_vm9, 2143289344, %v6981_v3  ;;  %vm26319_vm0 = vcmp.eq.f32.partialorder %v26206_v0, 0  ;;  %vm26320_vm1 = vcmp.gt.f32.partialorder %v15424_v32, 1065353216  ;;  %vm26321_vm11 = vcmp.lt.f32.partialorder %v12129_v1, 0 }
 0x21f   : > { %v7070_v48 = vsel %vm26319_vm0, %v12302_v60, %v7068_v63  ;;  %vm15766_vm15 = vmxor %vm26321_vm11, %vm26320_vm1  ;;  %11597 = vpow2.f32 %v7251_v43  ;;  %v15771_v6 = vand.u32 2147483647, %v15736_v39  ;;  %v15773_v47 = vpack.c.bf16 %v1313_v31, %v1309_v49 }
 0x220   : > { %v15775_v58 = vsub.f32 %v1207_v35, %v1313_v31  ;;  %v6987_v16 = vsel %vm15686_vm13, 1065353216, %v6985_v7  ;;  %v7072_v4 = vxor.u32 2147483648, %v7070_v48  ;;  %vm26326_vm9 = vcmp.eq.f32.partialorder %v12129_v1, 0  ;;  %vm26332_vm0 = vmmov %vm26321_vm11 }
 0x221   : > { %26324 = vst [vmem:[#allocation38_spill] sm:$0xff] %v15773_v47  ;;  %vm26327_vm12 = vcmp.eq.f32.partialorder %v26206_v0, 1065353216  ;;  %vm26330_vm10 = vcmp.eq.f32.partialorder %v12129_v1, 1065353216  ;;  %vm7078_vm3 = vcmp.eq.f32.partialorder %v26206_v0, 3212836864  ;;  %vm26331_vm6 = vcmp.eq.f32.partialorder %v26228_v9, 0  ;;  %4670 = vmatprep.subr.bf16.mxu1 %v15773_v47  ;;  %4862 = vmatprep.subr.bf16.mxu0 %v15773_v47  ;;  %v11594_v15 = vpop.eup %11593 }
 0x222   : > { %26325 = vst [vmem:[#allocation60_spill] sm:$0xff] %v15775_v58  ;;  %vm15783_vm14 = vmor %vm26327_vm12, %vm26326_vm9  ;;  %v6988_v12 = vsel %vm26330_vm10, %v26188_v30, %v6987_v16  ;;  %vm7273_vm1 = vcmp.gt.f32.partialorder %v15529_v62, 1065353216  ;;  %11599 = vlog2.f32 %v15771_v6  ;;  %v7073_v30 = vsel %vm15731_vm7, %v7072_v4, %v7070_v48 }
 0x223   : > { %vm15795_vm13 = vmand %vm26332_vm0, %vm26331_vm6  ;;  %v7079_v49 = vsel %vm7078_vm3, 1065353216, %v7077_v25  ;;  %v1204_v35 = vsub.f32 1.0, %v6988_v12  ;;  %vm26335_vm12 = vcmp.eq.f32.partialorder %v25643_v28, 2139095040  ;;  %vm26336_vm10 = vcmp.lt.f32.partialorder %v26206_v0, 0 }
 0x224   : > { %v7080_v46 = vsel %vm26335_vm12, %v7079_v49, %v7073_v30  ;;  %v7084_v26 = vsel %vm26336_vm10, %v25634_v55, %v12167_v17  ;;  %vm26337_vm3 = vcmp.lt.f32.partialorder %v26228_v9, 0  ;;  %vm25294_vm0 = vcmp.eq.f32.partialorder %v26256_v14, 0  ;;  %vm26339_vm10 = vmmov %vm26321_vm11 }
 0x225   : > { %vm7223_vm6 = vmand %vm26337_vm3, %vm26271_vm8  ;;  %vm26338_vm9 = vcmp.eq.f32.partialorder %v15334_v33, 2139095040  ;;  %v1311_v43 = vand.u32 4294901760, %v1204_v35  ;;  %vm7222_vm12 = vcmp.eq.f32.partialorder %v15424_v32, 2139095040  ;;  %vm26342_vm3 = vcmp.eq.f32.partialorder %v26228_v9, 0 }
 0x226   : > { %v7085_v18 = vsel %vm26338_vm9, %v7084_v26, %v7080_v46  ;;  %v7224_v31 = vsel %vm7223_vm6, 2143289344, %v11594_v15  ;;  %vm15829_vm11 = vmxor %vm26339_vm10, %vm7273_vm1  ;;  %vm26343_vm9 = vcmp.lt.s32.totalorder %v26228_v9, 0  ;;  %vm25295_vm10 = vcmp.lt.f32.partialorder %v26256_v14, 0  ;;  %v11596_v21 = vpop.eup %11595 }
 0x227   : > { %v7089_v63 = vsel %vm15753_vm2, 2143289344, %v7085_v18  ;;  %v7226_v33 = vsel %vm26342_vm3, %v12302_v60, %v7224_v31  ;;  %vm15842_vm6 = vmand %vm26343_vm9, %vm26284_vm5  ;;  %vm7234_vm2 = vcmp.eq.f32.partialorder %v26228_v9, 3212836864  ;;  %v15855_v48 = vsub.f32 %v1204_v35, %v1311_v43 }
 0x228   : > { %vm26346_vm1 = vmor %vm15795_vm13, %vm15766_vm15  ;;  %v7091_v7 = vsel %vm15783_vm14, 1065353216, %v7089_v63  ;;  %v7228_v16 = vxor.u32 2147483648, %v7226_v33  ;;  %vm26348_vm3 = vcmp.lt.f32.partialorder %v12129_v1, 0  ;;  %vm26351_vm15 = vcmp.eq.f32.partialorder %v12129_v1, 1065353216 }
 0x229   : > { %v7233_v8 = vsel %vm26346_vm1, 2139095040, %v25633_v40  ;;  %26347 = vst [vmem:[#allocation61_spill] sm:$0xff] %v15855_v48  ;;  %vm15862_vm9 = vmand %vm26348_vm3, %vm25294_vm0  ;;  %v7092_v12 = vsel %vm26351_vm15, %v26206_v0, %v7091_v7  ;;  %vm26352_vm14 = vcmp.lt.f32.partialorder %v26228_v9, 0  ;;  %vm7242_vm13 = vcmp.ne.f32.partialorder %v26228_v9, %v26228_v9  ;;  %v11598_v15 = vpop.eup %11597 }
 0x22a   : > { %v7240_v34 = vsel %vm26352_vm14, %v25634_v55, %v12167_v17  ;;  %vm7284_vm3 = vmor %vm15862_vm9, %vm15829_vm11  ;;  %v1206_v30 = vsub.f32 1.0, %v7092_v12  ;;  %v7229_v0 = vsel %vm15842_vm6, %v7228_v16, %v7226_v33  ;;  %v7235_v49 = vsel %vm7234_vm2, 1065353216, %v7233_v8  ;;  %v26363_v12 = vld [vmem:[#allocation37_spill] sm:$0xff] }
 0x22b   : > { %v7303_v35 = vmul.f32 %v11596_v21, %v12129_v1  ;;  %vm26354_vm15 = vcmp.eq.f32.partialorder %v25643_v28, 2139095040  ;;  %vm7272_vm14 = vcmp.lt.s32.totalorder %v26256_v14, 0  ;;  %vm7275_vm1 = vmand %vm25295_vm10, %vm26271_vm8  ;;  %vm7294_vm0 = vcmp.ne.f32.partialorder %v26256_v14, %v26256_v14 }
 0x22c   : > { %v7236_v46 = vsel %vm26354_vm15, %v7235_v49, %v7229_v0  ;;  %vm25296_vm7 = vcmp.eq.f32.partialorder %v15736_v39, 0  ;;  %v1315_v26 = vand.u32 4294901760, %v1206_v30  ;;  %vm7244_vm6 = vmor %vm7242_vm13, %vm26121_vm4  ;;  %v7276_v31 = vsel %vm7275_vm1, 2143289344, %v11598_v15  ;;  %v11600_v33 = vpop.eup %11599 }
 0x22d   : > { %v7241_v18 = vsel %vm7222_vm12, %v7240_v34, %v7236_v46  ;;  %v7285_v63 = vsel %vm7284_vm3, 2139095040, %v25633_v40  ;;  %vm26355_vm2 = vcmp.eq.f32.partialorder %v12129_v1, 0  ;;  %vm26356_vm12 = vcmp.eq.f32.partialorder %v26228_v9, 1065353216  ;;  %vm7279_vm11 = vmand %vm7272_vm14, %vm26284_vm5 }
 0x22e   : > { %v7245_v25 = vsel %vm7244_vm6, 2143289344, %v7241_v18  ;;  %vm7246_vm15 = vmor %vm26356_vm12, %vm26355_vm2  ;;  %vm26357_vm10 = vcmp.eq.f32.partialorder %v26256_v14, 0  ;;  %vm7169_vm13 = vcmp.gt.f32.partialorder %v15771_v6, 1065353216  ;;  %11601 = vpow2.f32 %v7303_v35 }
 0x22f   : > { %v7278_v32 = vsel %vm26357_vm10, %v12302_v60, %v7276_v31  ;;  %v15916_v8 = vpack.c.bf16 %v1315_v26, %v1311_v43  ;;  %v15918_v7 = vsub.f32 %v1206_v30, %v1315_v26  ;;  %v7247_v3 = vsel %vm7246_vm15, 1065353216, %v7245_v25  ;;  %vm15933_vm1 = vmor %vm7294_vm0, %vm26121_vm4 }
 0x230   : > { %v7280_v16 = vxor.u32 2147483648, %v7278_v32  ;;  %vm26360_vm9 = vcmp.eq.f32.partialorder %v12129_v1, 1065353216  ;;  %vm7286_vm10 = vcmp.eq.f32.partialorder %v26256_v14, 3212836864  ;;  %v7147_v21 = vmul.f32 %v11600_v33, %v12129_v1 }
 0x231   : > { %26358 = vst [vmem:[#allocation22_spill] sm:$0xff] %v15916_v8  ;;  %26359 = vst [vmem:[#allocation62_spill] sm:$0xff] %v15918_v7  ;;  %v7248_v4 = vsel %vm26360_vm9, %v26228_v9, %v7247_v3  ;;  %v15939_v34 = vand.u32 2147483647, %v26363_v12  ;;  %4672 = vmatpush1.bf16.msra.mxu1 %v15916_v8  ;;  %4864 = vmatpush1.bf16.msra.mxu0 %v15916_v8  ;;  %v7287_v30 = vsel %vm7286_vm10, 1065353216, %v7285_v63  ;;  %vm26364_vm3 = vcmp.lt.f32.partialorder %v12129_v1, 0 }
 0x232   : > { %v7281_v9 = vsel %vm7279_vm11, %v7280_v16, %v7278_v32  ;;  %v1209_v0 = vsub.f32 1.0, %v7248_v4  ;;  %vm15947_vm0 = vmand %vm26364_vm3, %vm25296_vm7  ;;  %vm7325_vm14 = vcmp.gt.f32.partialorder %v15702_v56, 1065353216  ;;  %vm7274_vm6 = vcmp.eq.f32.partialorder %v15529_v62, 2139095040 }
 0x233   : > { %vm26367_vm2 = vcmp.eq.f32.partialorder %v25643_v28, 2139095040  ;;  %vm26368_vm12 = vcmp.lt.f32.partialorder %v26256_v14, 0  ;;  %11603 = vpow2.f32 %v7147_v21  ;;  %vm26369_vm15 = vmmov %vm26364_vm3  ;;  %vm26372_vm9 = vcmp.eq.f32.partialorder %v12129_v1, 0 }
 0x234   : > { %v7288_v35 = vsel %vm26367_vm2, %v7287_v30, %v7281_v9  ;;  %v7292_v15 = vsel %vm26368_vm12, %v25634_v55, %v12167_v17  ;;  %vm15963_vm11 = vmxor %vm26369_vm15, %vm7169_vm13  ;;  %vm26373_vm10 = vcmp.eq.f32.partialorder %v26256_v14, 1065353216  ;;  %v1317_v62 = vand.u32 4294901760, %v1209_v0 }
 0x235   : > { %v7293_v26 = vsel %vm7274_vm6, %v7292_v15, %v7288_v35  ;;  %vm7298_vm3 = vmor %vm26373_vm10, %vm26372_vm9  ;;  %vm25297_vm2 = vcmp.eq.f32.partialorder %v26307_v2, 0  ;;  %11605 = vlog2.f32 %v15939_v34  ;;  %v15974_v18 = vadd.f32 1.0, %v14335_v11 }
 0x236   : > { %v15977_v31 = vadd.f32 1.0, %v14352_v36  ;;  %v15980_v63 = vadd.f32 1.0, %v15058_v38  ;;  %v7297_v33 = vsel %vm15933_vm1, 2143289344, %v7293_v26  ;;  %vm26374_vm13 = vmmov %vm26369_vm15  ;;  %v15993_v11 = vadd.f32 1.0, %v15108_v59 }
 0x237   : > { %vm15988_vm6 = vmxor %vm26374_vm13, %vm7325_vm14  ;;  %v7299_v32 = vsel %vm7298_vm3, 1065353216, %v7297_v33  ;;  %v15995_v36 = vsub.f32 %v1209_v0, %v1317_v62  ;;  %vm7321_vm1 = vcmp.lt.f32.partialorder %v26307_v2, 0  ;;  %v16004_v38 = vmul.f32 %v12170_v19, %v15218_v44  ;;  %v26384_v44 = vld [vmem:[#allocation40_spill] sm:$0xff] }
 0x238   : > { %vm7180_vm12 = vmor %vm15947_vm0, %vm15963_vm11  ;;  %v26378_v3 = vsub.f32 %v12237_v42, %v15118_v22  ;;  %vm26379_vm14 = vcmp.lt.s32.totalorder %v26353_v45, %v12279_v53  ;;  %vm26380_vm15 = vcmp.eq.f32.partialorder %v12129_v1, 1065353216  ;;  %v16024_v43 = vand.u32 2147483647, %v26384_v44  ;;  %v11602_v53 = vpop.eup %11601  ;;  %v26385_v45 = vld [vmem:[#allocation39_spill] sm:$0xff] }
 0x239   : > { %26377 = vst [vmem:[#allocation37_spill] sm:$0xff] %v15995_v36  ;;  %v7300_v16 = vsel %vm26380_vm15, %v26256_v14, %v7299_v32  ;;  %vm26381_vm9 = vmmov %vm26374_vm13  ;;  %vm25298_vm3 = vcmp.lt.f32.partialorder %v15736_v39, 0  ;;  %vm7182_vm7 = vcmp.eq.f32.partialorder %v15736_v39, 3212836864  ;;  %v16044_v21 = vand.u32 2147483647, %v26385_v45 }
 0x23a   : > { %v902_v59 = vsel %vm26379_vm14, %v26378_v3, 0.0  ;;  %vm16019_vm10 = vmand %vm26381_vm9, %vm25297_vm2  ;;  %v1211_v42 = vsub.f32 1.0, %v7300_v16  ;;  %vm7190_vm2 = vcmp.ne.f32.partialorder %v15736_v39, %v15736_v39  ;;  %11607 = vlog2.f32 %v16024_v43 }
 0x23b   : > { %vm7336_vm15 = vmor %vm16019_vm10, %vm15988_vm6  ;;  %vm7324_vm14 = vcmp.lt.s32.totalorder %v26307_v2, 0  ;;  %v7181_v30 = vsel %vm7180_vm12, 2139095040, %v25633_v40  ;;  %vm7323_vm10 = vcmp.eq.f32.partialorder %v26307_v2, 1065353216  ;;  %vm26391_vm9 = vcmp.lt.s32.totalorder %v15736_v39, 0 }
 0x23c   : > { %vm7327_vm13 = vmand %vm7321_vm1, %vm26271_vm8  ;;  %v1321_v22 = vand.u32 4294901760, %v1211_v42  ;;  %v7337_v35 = vsel %vm7336_vm15, 2139095040, %v25633_v40  ;;  %vm7326_vm0 = vcmp.eq.f32.partialorder %v15702_v56, 2139095040  ;;  %vm7338_vm12 = vcmp.eq.f32.partialorder %v26307_v2, 3212836864 }
 0x23d   : > { %v7328_v14 = vsel %vm7327_vm13, 2143289344, %v11602_v53  ;;  %vm16050_vm6 = vmand %vm25298_vm3, %vm26271_vm8  ;;  %vm26388_vm13 = vcmp.eq.f32.partialorder %v26307_v2, 0  ;;  %v11604_v33 = vpop.eup %11603  ;;  %vm7346_vm15 = vcmp.ne.f32.partialorder %v26307_v2, %v26307_v2  ;;  %11609 = vlog2.f32 %v16044_v21 }
 0x23e   : > { %v7330_v0 = vsel %vm26388_vm13, %v12302_v60, %v7328_v14  ;;  %v16065_v15 = vpack.c.bf16 %v1321_v22, %v1317_v62  ;;  %v16067_v26 = vsub.f32 %v1211_v42, %v1321_v22  ;;  %vm16073_vm3 = vmand %vm26391_vm9, %vm26284_vm5  ;;  %v7344_v62 = vsel %vm7321_vm1, %v25634_v55, %v12167_v17 }
 0x23f   : > { %v7332_v46 = vxor.u32 2147483648, %v7330_v0  ;;  %vm7331_vm11 = vmand %vm7324_vm14, %vm26284_vm5  ;;  %v11606_v25 = vpop.eup %11605  ;;  %v7172_v32 = vsel %vm16050_vm6, 2143289344, %v11604_v33  ;;  %v7183_v3 = vsel %vm7182_vm7, 1065353216, %v7181_v30  ;;  %v7339_v42 = vsel %vm7338_vm12, 1065353216, %v7337_v35 }
 0x240   : > { %26389 = vst [vmem:[#allocation40_spill] sm:$0xff] %v16065_v15  ;;  %26390 = vst [vmem:[#allocation39_spill] sm:$0xff] %v16067_v26  ;;  %4674 = vmatprep.subr.bf16.mxu1 %v16065_v15  ;;  %4866 = vmatprep.subr.bf16.mxu0 %v16065_v15  ;;  %vm26396_vm14 = vcmp.eq.f32.partialorder %v15736_v39, 0  ;;  %vm26397_vm9 = vcmp.eq.f32.partialorder %v12129_v1, 0  ;;  %vm26398_vm6 = vcmp.eq.f32.partialorder %v15736_v39, 1065353216  ;;  %vm26401_vm13 = vcmp.eq.f32.partialorder %v25643_v28, 2139095040 }
 0x241   : > { %vm16099_vm1 = vmor %vm7190_vm2, %vm26121_vm4  ;;  %v7333_v4 = vsel %vm7331_vm11, %v7332_v46, %v7330_v0  ;;  %v7174_v53 = vsel %vm26396_vm14, %v12302_v60, %v7172_v32  ;;  %v7355_v9 = vmul.f32 %v11606_v25, %v12129_v1  ;;  %vm7377_vm2 = vcmp.gt.f32.partialorder %v15939_v34, 1065353216 }
 0x242   : > { %vm16110_vm7 = vmor %vm26398_vm6, %vm26397_vm9  ;;  %v7340_v14 = vsel %vm26401_vm13, %v7339_v42, %v7333_v4  ;;  %v7176_v30 = vxor.u32 2147483648, %v7174_v53  ;;  %vm7373_vm12 = vcmp.lt.f32.partialorder %v26363_v12, 0  ;;  %v16127_v35 = vand.u32 2147483647, %v13381_v20 }
 0x243   : > { %v7345_v0 = vsel %vm7326_vm0, %v7344_v62, %v7340_v14  ;;  %vm7348_vm11 = vmor %vm7346_vm15, %vm26121_vm4  ;;  %vm26402_vm14 = vcmp.lt.f32.partialorder %v15736_v39, 0  ;;  %11611 = vpow2.f32 %v7355_v9  ;;  %vm25299_vm6 = vcmp.eq.f32.partialorder %v26363_v12, 0 }
 0x244   : > { %v7188_v46 = vsel %vm26402_vm14, %v25634_v55, %v12167_v17  ;;  %v7349_v33 = vsel %vm7348_vm11, 2143289344, %v7345_v0  ;;  %vm7350_vm0 = vmor %vm7323_vm10, %vm26397_vm9  ;;  %v16139_v56 = vmul.f32 %v12222_v37, %v902_v59  ;;  %v7177_v62 = vsel %vm16073_vm3, %v7176_v30, %v7174_v53  ;;  %v11608_v4 = vpop.eup %11607 }
 0x245   : > { %v7351_v25 = vsel %vm7350_vm0, 1065353216, %v7349_v33  ;;  %vm26403_vm15 = vcmp.lt.f32.partialorder %v12129_v1, 0  ;;  %11613 = vlog2.f32 %v16127_v35  ;;  %vm26406_vm10 = vcmp.eq.f32.partialorder %v25643_v28, 2139095040  ;;  %vm16160_vm3 = vmand %vm7373_vm12, %vm26271_vm8 }
 0x246   : > { %vm16145_vm13 = vmxor %vm26403_vm15, %vm7377_vm2  ;;  %v7184_v42 = vsel %vm26406_vm10, %v7183_v3, %v7177_v62  ;;  %vm26407_vm11 = vcmp.eq.f32.partialorder %v12129_v1, 1065353216  ;;  %vm7429_vm2 = vcmp.gt.f32.partialorder %v16024_v43, 1065353216  ;;  %vm26410_vm9 = vcmp.eq.f32.partialorder %v15771_v6, 2139095040 }
 0x247   : > { %v7352_v37 = vsel %vm26407_vm11, %v26307_v2, %v7351_v25  ;;  %v7189_v49 = vsel %vm26410_vm9, %v7188_v46, %v7184_v42  ;;  %vm7376_vm0 = vcmp.lt.s32.totalorder %v26363_v12, 0  ;;  %vm16172_vm10 = vmand %vm26403_vm15, %vm25299_vm6  ;;  %v7407_v53 = vmul.f32 %v11608_v4, %v12129_v1  ;;  %v11610_v0 = vpop.eup %11609 }
 0x248   : > { %v1213_v3 = vsub.f32 1.0, %v7352_v37  ;;  %v7193_v14 = vsel %vm16099_vm1, 2143289344, %v7189_v49  ;;  %vm7388_vm11 = vmor %vm16172_vm10, %vm16145_vm13  ;;  %v16188_v6 = vsel %vm7373_vm12, %v25634_v55, %v12167_v17  ;;  %vm25300_vm15 = vcmp.eq.f32.partialorder %v26384_v44, 0 }
 0x249   : > { %v7195_v9 = vsel %vm16110_vm7, 1065353216, %v7193_v14  ;;  %vm7398_vm1 = vcmp.ne.f32.partialorder %v26363_v12, %v26363_v12  ;;  %11615 = vpow2.f32 %v7407_v53  ;;  %vm26413_vm6 = vcmp.lt.f32.partialorder %v12129_v1, 0  ;;  %vm16214_vm7 = vmand %vm7376_vm0, %vm26284_vm5 }
 0x24a   : > { %v16195_v16 = vand.u32 4294901760, %v1213_v3  ;;  %vm16201_vm14 = vmxor %vm26413_vm6, %vm7429_vm2  ;;  %vm26416_vm12 = vcmp.eq.f32.partialorder %v12129_v1, 1065353216  ;;  %vm7425_vm9 = vcmp.lt.f32.partialorder %v26384_v44, 0  ;;  %v16221_v33 = vand.u32 2147483647, %v13345_v41 }
 0x24b   : > { %v16208_v22 = vsel %vm26416_vm12, %v15736_v39, %v7195_v9  ;;  %v7389_v39 = vsel %vm7388_vm11, 2139095040, %v25633_v40  ;;  %vm26421_vm2 = vmmov %vm26413_vm6  ;;  %v7459_v42 = vmul.f32 %v11610_v0, %v12129_v1  ;;  %v16268_v49 = vsel %vm7425_vm9, %v25634_v55, %v12167_v17 }
 0x24c   : > { %26417 = vst [vmem:[#allocation63_spill] sm:$0xff] %v16208_v22  ;;  %v25301_v62 = vsub.f32 1.0, %v16208_v22  ;;  %v16231_v25 = vsub.f32 %v1213_v3, %v16195_v16  ;;  %vm16237_vm0 = vmand %vm26421_vm2, %vm25300_vm15  ;;  %11617 = vlog2.f32 %v16221_v33  ;;  %vm26427_vm12 = vcmp.eq.f32.partialorder %v26363_v12, 3212836864 }
 0x24d   : > { %vm16260_vm2 = vmor %vm7398_vm1, %vm26121_vm4  ;;  %11619 = vpow2.f32 %v7459_v42  ;;  %v11612_v2 = vpop.eup %11611  ;;  %v7391_v3 = vsel %vm26427_vm12, 1065353216, %v7389_v39  ;;  %vm26428_vm10 = vcmp.eq.f32.partialorder %v12129_v1, 0  ;;  %vm26429_vm1 = vcmp.eq.f32.partialorder %v26363_v12, 1065353216 }
 0x24e   : > { %26420 = vst [vmem:[#allocation64_spill] sm:$0xff] %v16231_v25  ;;  %v16253_v32 = vand.u32 4294901760, %v25301_v62  ;;  %vm16278_vm6 = vmor %vm26429_vm1, %vm26428_vm10  ;;  %vm25307_vm15 = vcmp.lt.f32.partialorder %v26385_v45, 0  ;;  %vm25304_vm12 = vcmp.eq.f32.partialorder %v26385_v45, 0  ;;  %v7380_v39 = vsel %vm16160_vm3, 2143289344, %v11612_v2 }
 0x24f   : > { %vm16286_vm11 = vmand %vm7425_vm9, %vm26271_vm8  ;;  %v11614_v9 = vpop.eup %11613  ;;  %vm26436_vm10 = vcmp.gt.f32.partialorder %v16044_v21, 1065353216  ;;  %vm26437_vm1 = vcmp.lt.f32.partialorder %v12129_v1, 0  ;;  %v16314_v15 = vand.u32 2147483647, %v14318_v24  ;;  %vm26440_vm3 = vcmp.eq.f32.partialorder %v26363_v12, 0 }
 0x250   : > { %26424 = vst [vmem:[#allocation65_spill] sm:$0xff] %v16253_v32  ;;  %v16295_v0 = vpack.c.bf16 %v16253_v32, %v16253_v32  ;;  %vm26435_vm9 = vmor %vm16237_vm0, %vm16201_vm14  ;;  %v7382_v59 = vsel %vm26440_vm3, %v12302_v60, %v7380_v39  ;;  %vm26441_vm14 = vcmp.lt.s32.totalorder %v26384_v44, 0  ;;  %v26442_v30 = vmov 0 }
 0x251   : > { %v7441_v42 = vsel %vm26435_vm9, 2139095040, %v25633_v40  ;;  %vm16309_vm13 = vmxor %vm26437_vm1, %vm26436_vm10  ;;  %v7511_v4 = vmul.f32 %v11614_v9, %v12129_v1  ;;  %v7384_v2 = vxor.u32 2147483648, %v7382_v59  ;;  %v16345_v9 = vsel %vm25307_vm15, %v25634_v55, %v12167_v17 }
 0x252   : > { %26434 = vst [vmem:[#allocation66_spill] sm:$0xff] %v16295_v0  ;;  %vm16323_vm0 = vmand %vm26441_vm14, %vm26284_vm5  ;;  %4676 = vmatpush1.bf16.msra.mxu1 %v16295_v0  ;;  %4868 = vmatpush1.bf16.msra.mxu0 %v16295_v0  ;;  %11621 = vlog2.f32 %v16314_v15  ;;  %v26449_v47 = vmov 0  ;;  %vm7502_vm10 = vcmp.ne.f32.partialorder %v26385_v45, %v26385_v45  ;;  %vm26452_vm15 = vcmp.eq.f32.partialorder %v26384_v44, 1065353216 }
 0x253   : > { %v26443_v30 = vsel %vm16323_vm0, 4294967295, %v26442_v30  ;;  %vm26444_vm3 = vmmov %vm26437_vm1  ;;  %vm26447_vm1 = vcmp.eq.f32.partialorder %v26384_v44, 3212836864  ;;  %11623 = vpow2.f32 %v7511_v4  ;;  %v7385_v29 = vsel %vm16214_vm7, %v7384_v2, %v7382_v59 }
 0x254   : > { %vm16337_vm14 = vmand %vm26444_vm3, %vm25304_vm12  ;;  %v7443_v8 = vsel %vm26447_vm1, 1065353216, %v7441_v42  ;;  %vm26448_vm3 = vcmp.ne.f32.partialorder %v26384_v44, %v26384_v44  ;;  %v11616_v42 = vpop.eup %11615  ;;  %v16380_v4 = vand.u32 2147483647, %v14241_v51  ;;  %vm26455_vm1 = vcmp.eq.f32.partialorder %v25643_v28, 2139095040 }
 0x255   : > { %vm16356_vm12 = vmor %vm26448_vm3, %vm26121_vm4  ;;  %vm26451_vm3 = vcmp.eq.f32.partialorder %v12129_v1, 0  ;;  %v7392_v22 = vsel %vm26455_vm1, %v7391_v3, %v7385_v29  ;;  %v7432_v46 = vsel %vm16286_vm11, 2143289344, %v11616_v42  ;;  %vm26459_vm9 = vcmp.lt.f32.partialorder %v13381_v20, 0 }
 0x256   : > { %v26450_v47 = vsel %vm16356_vm12, 4294967295, %v26449_v47  ;;  %vm16373_vm12 = vmor %vm26452_vm15, %vm26451_vm3  ;;  %vm26456_vm15 = vcmp.lt.f32.partialorder %v26385_v45, 0  ;;  %v16399_v2 = vsel %vm26459_vm9, %v25634_v55, %v12167_v17  ;;  %vm26460_vm1 = vcmp.eq.f32.partialorder %v15939_v34, 2139095040 }
 0x257   : > { %vm16390_vm7 = vmand %vm26456_vm15, %vm26271_vm8  ;;  %v7397_v29 = vsel %vm26460_vm1, %v16188_v6, %v7392_v22  ;;  %vm26461_vm11 = vcmp.eq.f32.partialorder %v26384_v44, 0  ;;  %vm26462_vm0 = vcmp.lt.s32.totalorder %v26385_v45, 0  ;;  %11625 = vlog2.f32 %v16380_v4  ;;  %v11618_v6 = vpop.eup %11617 }
 0x258   : > { %v7434_v3 = vsel %vm26461_vm11, %v12302_v60, %v7432_v46  ;;  %vm16412_vm3 = vmand %vm26462_vm0, %vm26284_vm5  ;;  %v7401_v22 = vsel %vm16260_vm2, 2143289344, %v7397_v29  ;;  %v11620_v62 = vpop.eup %11619  ;;  %vm26468_vm2 = vcmp.eq.f32.partialorder %v12129_v1, 0  ;;  %vm26469_vm1 = vcmp.eq.f32.partialorder %v26385_v45, 1065353216 }
 0x259   : > { %vm26465_vm9 = vmor %vm16337_vm14, %vm16309_vm13  ;;  %v7436_v42 = vxor.u32 2147483648, %v7434_v3  ;;  %v7403_v37 = vsel %vm16278_vm6, 1065353216, %v7401_v22  ;;  %v26470_v39 = vmov 0  ;;  %v7563_v32 = vmul.f32 %v11618_v6, %v12129_v1 }
 0x25a   : > { %v7493_v34 = vsel %vm26465_vm9, 2139095040, %v25633_v40  ;;  %vm16430_vm0 = vmor %vm7502_vm10, %vm26121_vm4  ;;  %vm26472_vm10 = vcmp.lt.f32.partialorder %v13381_v20, 0  ;;  %v7484_v26 = vsel %vm16390_vm7, 2143289344, %v11620_v62  ;;  %vm26478_vm14 = vcmp.gt.f32.partialorder %v16127_v35, 1065353216 }
 0x25b   : > { %vm16443_vm11 = vmor %vm26469_vm1, %vm26468_vm2  ;;  %vm26475_vm2 = vcmp.eq.f32.partialorder %v12129_v1, 1065353216  ;;  %vm26476_vm1 = vnez %v26443_v30  ;;  %vm26479_vm13 = vcmp.lt.f32.partialorder %v12129_v1, 0  ;;  %vm26484_vm7 = vcmp.lt.s32.totalorder %v13381_v20, 0 }
 0x25c   : > { %v26471_v39 = vsel %vm16443_vm11, 4294967295, %v26470_v39  ;;  %vm16451_vm9 = vmand %vm26472_vm10, %vm26271_vm8  ;;  %v7404_v53 = vsel %vm26475_vm2, %v26363_v12, %v7403_v37  ;;  %v7437_v22 = vsel %vm26476_vm1, %v7436_v42, %v7434_v3  ;;  %vm26477_vm10 = vcmp.eq.f32.partialorder %v26385_v45, 3212836864 }
 0x25d   : > { %v7495_v36 = vsel %vm26477_vm10, 1065353216, %v7493_v34  ;;  %vm16471_vm6 = vmxor %vm26479_vm13, %vm26478_vm14  ;;  %v1215_v7 = vsub.f32 1.0, %v7404_v53  ;;  %vm26482_vm2 = vcmp.eq.f32.partialorder %v25643_v28, 2139095040  ;;  %vm26483_vm1 = vcmp.eq.f32.partialorder %v26385_v45, 0 }
 0x25e   : > { %v7444_v12 = vsel %vm26482_vm2, %v7443_v8, %v7437_v22  ;;  %v7486_v30 = vsel %vm26483_vm1, %v12302_v60, %v7484_v26  ;;  %vm16484_vm10 = vmand %vm26484_vm7, %vm26284_vm5  ;;  %v26485_v59 = vmov 0  ;;  %11627 = vpow2.f32 %v7563_v32  ;;  %v11622_v32 = vpop.eup %11621 }
 0x25f   : > { %v26486_v59 = vsel %vm16484_vm10, 4294967295, %v26485_v59  ;;  %vm26487_vm2 = vcmp.eq.f32.partialorder %v16024_v43, 2139095040  ;;  %v7488_v3 = vxor.u32 2147483648, %v7486_v30  ;;  %vm26488_vm1 = vcmp.eq.f32.partialorder %v13381_v20, 0  ;;  %vm26489_vm15 = vmmov %vm26479_vm13 }
 0x260   : > { %v7449_v8 = vsel %vm26487_vm2, %v16268_v49, %v7444_v12  ;;  %vm16497_vm11 = vmand %vm26489_vm15, %vm26488_vm1  ;;  %vm7585_vm7 = vcmp.gt.f32.partialorder %v16221_v33, 1065353216  ;;  %v1329_v34 = vand.u32 4294901760, %v1215_v7  ;;  %vm26492_vm14 = vnez %v26450_v47  ;;  %v11624_v49 = vpop.eup %11623 }
 0x261   : > { %v7453_v43 = vsel %vm26492_vm14, 2143289344, %v7449_v8  ;;  %v7489_v62 = vsel %vm16412_vm3, %v7488_v3, %v7486_v30  ;;  %vm26493_vm14 = vcmp.ne.f32.partialorder %v13381_v20, %v13381_v20  ;;  %v7615_v37 = vmul.f32 %v11622_v32, %v12129_v1  ;;  %v11626_v3 = vpop.eup %11625 }
 0x262   : > { %v7455_v42 = vsel %vm16373_vm12, 1065353216, %v7453_v43  ;;  %vm16522_vm2 = vmor %vm26493_vm14, %vm26121_vm4  ;;  %v16528_v53 = vand.u32 2147483647, %v15977_v31  ;;  %v16531_v25 = vpack.c.bf16 %v1329_v34, %v16195_v16  ;;  %v16533_v22 = vsub.f32 %v1215_v7, %v1329_v34 }
 0x263   : > { %vm26497_vm12 = vcmp.eq.f32.partialorder %v12129_v1, 1065353216  ;;  %vm26498_vm3 = vcmp.eq.f32.partialorder %v25643_v28, 2139095040  ;;  %vm26499_vm14 = vcmp.eq.f32.partialorder %v12129_v1, 0  ;;  %vm26500_vm1 = vcmp.eq.f32.partialorder %v13381_v20, 1065353216 }
 0x264   : > { %26496 = vst [vmem:[#allocation67_spill] sm:$0xff] %v16531_v25  ;;  %v7456_v14 = vsel %vm26497_vm12, %v26384_v44, %v7455_v42  ;;  %v7496_v12 = vsel %vm26498_vm3, %v7495_v36, %v7489_v62  ;;  %vm16544_vm10 = vmor %vm26500_vm1, %vm26499_vm14  ;;  %vm26503_vm13 = vcmp.lt.f32.partialorder %v13345_v41, 0  ;;  %vm26506_vm12 = vcmp.eq.f32.partialorder %v16044_v21, 2139095040  ;;  %4678 = vmatprep.subr.bf16.mxu1 %v16531_v25  ;;  %4870 = vmatprep.subr.bf16.mxu0 %v16531_v25 }
 0x265   : > { %vm16552_vm15 = vmand %vm26503_vm13, %vm26271_vm8  ;;  %v7501_v36 = vsel %vm26506_vm12, %v16345_v9, %v7496_v12  ;;  %v1217_v44 = vsub.f32 1.0, %v7456_v14  ;;  %v7536_v16 = vsel %vm16451_vm9, 2143289344, %v11624_v49  ;;  %vm26507_vm1 = vcmp.lt.f32.partialorder %v12129_v1, 0  ;;  %4680 = vmatpush1.bf16.msra.mxu1 %v16295_v0  ;;  %4872 = vmatpush1.bf16.msra.mxu0 %v16295_v0 }
 0x266   : > { %vm16565_vm3 = vmxor %vm26507_vm1, %vm7585_vm7  ;;  %11629 = vpow2.f32 %v7615_v37  ;;  %v7505_v21 = vsel %vm16430_vm0, 2143289344, %v7501_v36  ;;  %vm26510_vm9 = vcmp.eq.f32.partialorder %v13381_v20, 0  ;;  %vm26512_vm7 = vcmp.lt.s32.totalorder %v13345_v41, 0 }
 0x267   : > { %v7538_v9 = vsel %vm26510_vm9, %v12302_v60, %v7536_v16  ;;  %vm26511_vm13 = vmor %vm16497_vm11, %vm16471_vm6  ;;  %11631 = vlog2.f32 %v16528_v53  ;;  %vm26515_vm0 = vnez %v26471_v39  ;;  %v1333_v6 = vand.u32 4294901760, %v1217_v44 }
 0x268   : > { %v7545_v29 = vsel %vm26511_vm13, 2139095040, %v25633_v40  ;;  %vm16586_vm14 = vmand %vm26512_vm7, %vm26284_vm5  ;;  %v7507_v46 = vsel %vm26515_vm0, 1065353216, %v7505_v21  ;;  %v7540_v26 = vxor.u32 2147483648, %v7538_v9  ;;  %vm26516_vm11 = vcmp.eq.f32.partialorder %v13345_v41, 0  ;;  %v11628_v12 = vpop.eup %11627 }
 0x269   : > { %vm26517_vm6 = vmmov %vm26507_vm1  ;;  %v7667_v43 = vmul.f32 %v11626_v3, %v12129_v1  ;;  %vm26520_vm1 = vcmp.eq.f32.partialorder %v12129_v1, 1065353216  ;;  %vm26521_vm0 = vcmp.lt.f32.partialorder %v13345_v41, 0  ;;  %v16618_v62 = vsub.f32 %v1217_v44, %v1333_v6 }
 0x26a   : > { %vm16599_vm12 = vmand %vm26517_vm6, %vm26516_vm11  ;;  %v7508_v49 = vsel %vm26520_vm1, %v26385_v45, %v7507_v46  ;;  %v7604_v39 = vsel %vm26521_vm0, %v25634_v55, %v12167_v17  ;;  %vm26522_vm6 = vnez %v26486_v59  ;;  %vm26523_vm1 = vcmp.eq.f32.partialorder %v13381_v20, 3212836864 }
 0x26b   : > { %v1219_v42 = vsub.f32 1.0, %v7508_v49  ;;  %v7541_v45 = vsel %vm26522_vm6, %v7540_v26, %v7538_v9  ;;  %v7547_v37 = vsel %vm26523_vm1, 1065353216, %v7545_v29  ;;  %vm26524_vm9 = vcmp.ne.f32.partialorder %v13345_v41, %v13345_v41 }
 0x26c   : > { %vm16629_vm7 = vmor %vm26524_vm9, %vm26121_vm4  ;;  %vm26527_vm0 = vcmp.eq.f32.partialorder %v25643_v28, 2139095040  ;;  %vm26528_vm13 = vcmp.gt.f32.partialorder %v16314_v15, 1065353216  ;;  %vm26529_vm1 = vcmp.lt.f32.partialorder %v12129_v1, 0  ;;  %vm26532_vm9 = vcmp.lt.f32.partialorder %v14318_v24, 0 }
 0x26d   : > { %v7548_v36 = vsel %vm26527_vm0, %v7547_v37, %v7541_v45  ;;  %vm16641_vm5 = vmxor %vm26529_vm1, %vm26528_vm13  ;;  %v16649_v44 = vsel %vm26532_vm9, %v25634_v55, %v12167_v17  ;;  %11633 = vpow2.f32 %v7667_v43  ;;  %v1337_v16 = vand.u32 4294901760, %v1219_v42 }
 0x26e   : > { %vm26533_vm0 = vcmp.eq.f32.partialorder %v16127_v35, 2139095040  ;;  %v7588_v21 = vsel %vm16552_vm15, 2143289344, %v11628_v12  ;;  %vm26534_vm13 = vcmp.eq.f32.partialorder %v12129_v1, 0  ;;  %vm26535_vm1 = vcmp.eq.f32.partialorder %v13345_v41, 1065353216  ;;  %vm26539_vm15 = vmor %vm16599_vm12, %vm16565_vm3 }
 0x26f   : > { %v7553_v3 = vsel %vm26533_vm0, %v16399_v2, %v7548_v36  ;;  %vm16660_vm11 = vmor %vm26535_vm1, %vm26534_vm13  ;;  %vm26538_vm0 = vcmp.eq.f32.partialorder %v13345_v41, 0  ;;  %v7597_v7 = vsel %vm26539_vm15, 2139095040, %v25633_v40  ;;  %vm26540_vm13 = vcmp.eq.f32.partialorder %v14318_v24, 0 }
 0x270   : > { %v7557_v35 = vsel %vm16522_vm2, 2143289344, %v7553_v3  ;;  %v7590_v2 = vsel %vm26538_vm0, %v12302_v60, %v7588_v21  ;;  %vm26541_vm1 = vcmp.lt.f32.partialorder %v12129_v1, 0  ;;  %vm7689_vm2 = vcmp.gt.f32.partialorder %v16380_v4, 1065353216  ;;  %v11630_v43 = vpop.eup %11629 }
 0x271   : > { %vm16682_vm9 = vmand %vm26541_vm1, %vm26540_vm13  ;;  %v16687_v47 = vpack.c.bf16 %v1337_v16, %v1333_v6  ;;  %v16689_v46 = vsub.f32 %v1219_v42, %v1337_v16  ;;  %v7559_v26 = vsel %vm16544_vm10, 1065353216, %v7557_v35  ;;  %v7592_v8 = vxor.u32 2147483648, %v7590_v2  ;;  %v11632_v37 = vpop.eup %11631 }
 0x272   : > { %vm7648_vm12 = vmor %vm16682_vm9, %vm16641_vm5  ;;  %vm26545_vm0 = vcmp.eq.f32.partialorder %v12129_v1, 1065353216  ;;  %vm26546_vm15 = vcmp.lt.f32.partialorder %v14318_v24, 0  ;;  %vm25315_vm1 = vcmp.eq.f32.partialorder %v14241_v51, 0  ;;  %v16712_v30 = vand.u32 2147483647, %v15974_v18 }
 0x273   : > { %26544 = vst [vmem:[#allocation68_spill] sm:$0xff] %v16687_v47  ;;  %v7560_v34 = vsel %vm26545_vm0, %v13381_v20, %v7559_v26  ;;  %vm16705_vm13 = vmand %vm26546_vm15, %vm26271_vm8  ;;  %4682 = vmatprep.subr.bf16.mxu1 %v16687_v47  ;;  %4874 = vmatprep.subr.bf16.mxu0 %v16687_v47  ;;  %v7593_v20 = vsel %vm16586_vm14, %v7592_v8, %v7590_v2  ;;  %vm26549_vm0 = vcmp.eq.f32.partialorder %v13345_v41, 3212836864  ;;  %vm26550_vm3 = vcmp.lt.f32.partialorder %v12129_v1, 0 }
 0x274   : > { %v7599_v49 = vsel %vm26549_vm0, 1065353216, %v7597_v7  ;;  %v1221_v42 = vsub.f32 1.0, %v7560_v34  ;;  %vm16725_vm10 = vmxor %vm26550_vm3, %vm7689_vm2  ;;  %4684 = vmatpush1.bf16.msra.mxu1 %v16295_v0  ;;  %4876 = vmatpush1.bf16.msra.mxu0 %v16295_v0  ;;  %vm26553_vm14 = vcmp.eq.f32.partialorder %v25643_v28, 2139095040  ;;  %v7640_v12 = vsel %vm16705_vm13, 2143289344, %v11630_v43 }
 0x275   : > { %v7600_v32 = vsel %vm26553_vm14, %v7599_v49, %v7593_v20  ;;  %vm26554_vm0 = vnez %v25637_v23  ;;  %vm26555_vm15 = vcmp.lt.s32.totalorder %v14318_v24, 0  ;;  %v7649_v16 = vsel %vm7648_vm12, 2139095040, %v25633_v40 }
 0x276   : > { %vm16739_vm6 = vmand %vm26555_vm15, %vm26554_vm0  ;;  %11635 = vlog2.f32 %v16712_v30  ;;  %vm26558_vm2 = vcmp.eq.f32.partialorder %v16221_v33, 2139095040  ;;  %v1341_v21 = vand.u32 4294901760, %v1221_v42  ;;  %vm26559_vm3 = vcmp.eq.f32.partialorder %v14318_v24, 0 }
 0x277   : > { %v7605_v3 = vsel %vm26558_vm2, %v7604_v39, %v7600_v32  ;;  %v7642_v35 = vsel %vm26559_vm3, %v12302_v60, %v7640_v12  ;;  %vm26560_vm13 = vcmp.lt.f32.partialorder %v12129_v1, 0  ;;  %v7719_v59 = vmul.f32 %v11632_v37, %v12129_v1  ;;  %v11634_v26 = vpop.eup %11633  ;;  %v26641_v37 = vld [vmem:[#allocation16_spill] sm:$0xff] }
 0x278   : > { %vm16759_vm15 = vmand %vm26560_vm13, %vm25315_vm1  ;;  %v7609_v7 = vsel %vm16629_vm7, 2143289344, %v7605_v3  ;;  %v7644_v33 = vxor.u32 2147483648, %v7642_v35  ;;  %v16774_v29 = vsub.f32 %v1221_v42, %v1341_v21  ;;  %vm26563_vm7 = vcmp.ne.f32.partialorder %v14318_v24, %v14318_v24 }
 0x279   : > { %vm7700_vm12 = vmor %vm16759_vm15, %vm16725_vm10  ;;  %v7611_v39 = vsel %vm16660_vm11, 1065353216, %v7609_v7  ;;  %11637 = vpow2.f32 %v7719_v59  ;;  %vm26566_vm3 = vcmp.eq.f32.partialorder %v12129_v1, 1065353216  ;;  %vm26567_vm11 = vcmp.eq.f32.partialorder %v14318_v24, 3212836864 }
 0x27a   : > { %vm16781_vm14 = vmor %vm26563_vm7, %vm26121_vm4  ;;  %v7612_v9 = vsel %vm26566_vm3, %v13345_v41, %v7611_v39  ;;  %v7645_v8 = vsel %vm16739_vm6, %v7644_v33, %v7642_v35  ;;  %v7651_v34 = vsel %vm26567_vm11, 1065353216, %v7649_v16  ;;  %vm26568_vm13 = vcmp.lt.f32.partialorder %v14241_v51, 0 }
 0x27b   : > { %vm7691_vm7 = vmand %vm26568_vm13, %vm26271_vm8  ;;  %vm7741_vm9 = vcmp.gt.f32.partialorder %v16528_v53, 1065353216  ;;  %v1223_v6 = vsub.f32 1.0, %v7612_v9  ;;  %vm26569_vm2 = vcmp.eq.f32.partialorder %v25643_v28, 2139095040  ;;  %vm26570_vm5 = vcmp.eq.f32.partialorder %v12129_v1, 0 }
 0x27c   : > { %v7652_v43 = vsel %vm26569_vm2, %v7651_v34, %v7645_v8  ;;  %vm26571_vm3 = vcmp.eq.f32.partialorder %v14318_v24, 1065353216  ;;  %v7692_v41 = vsel %vm7691_vm7, 2143289344, %v11634_v26  ;;  %v7701_v20 = vsel %vm7700_vm12, 2139095040, %v25633_v40 }
 0x27d   : > { %vm7662_vm1 = vmor %vm26571_vm3, %vm26570_vm5  ;;  %vm26572_vm6 = vcmp.eq.f32.partialorder %v16314_v15, 2139095040  ;;  %vm26573_vm2 = vcmp.eq.f32.partialorder %v14241_v51, 0  ;;  %vm26574_vm5 = vcmp.lt.s32.totalorder %v14241_v51, 0  ;;  %vm7702_vm13 = vcmp.eq.f32.partialorder %v14241_v51, 3212836864 }
 0x27e   : > { %v7657_v49 = vsel %vm26572_vm6, %v16649_v44, %v7652_v43  ;;  %v7694_v42 = vsel %vm26573_vm2, %v12302_v60, %v7692_v41  ;;  %vm16821_vm11 = vmand %vm26574_vm5, %vm26554_vm0  ;;  %vm26577_vm10 = vcmp.lt.f32.partialorder %v14241_v51, 0  ;;  %v1345_v44 = vand.u32 4294901760, %v1223_v6 }
 0x27f   : > { %v7708_v15 = vsel %vm26577_vm10, %v25634_v55, %v12167_v17  ;;  %v7661_v45 = vsel %vm16781_vm14, 2143289344, %v7657_v49  ;;  %v7696_v32 = vxor.u32 2147483648, %v7694_v42  ;;  %vm26578_vm15 = vcmp.ne.f32.partialorder %v14241_v51, %v14241_v51 }
 0x280   : > { %vm16837_vm12 = vmor %vm26578_vm15, %vm26121_vm4  ;;  %vm7738_vm7 = vcmp.eq.f32.partialorder %v15977_v31, 0  ;;  %v7663_v36 = vsel %vm7662_vm1, 1065353216, %v7661_v45  ;;  %v7703_v16 = vsel %vm7702_vm13, 1065353216, %v7701_v20  ;;  %vm25316_vm3 = vcmp.lt.f32.partialorder %v15977_v31, 0  ;;  %v11636_v14 = vpop.eup %11635 }
 0x281   : > { %vm26581_vm14 = vcmp.lt.f32.partialorder %v12129_v1, 0  ;;  %v16852_v35 = vand.u32 2147483647, %v15993_v11  ;;  %v16854_v2 = vpack.c.bf16 %v1345_v44, %v1341_v21  ;;  %v16856_v59 = vsub.f32 %v1223_v6, %v1345_v44 }
 0x282   : > { %vm16847_vm6 = vmxor %vm26581_vm14, %vm7741_vm9  ;;  %vm26585_vm1 = vcmp.eq.f32.partialorder %v12129_v1, 1065353216  ;;  %v7697_v33 = vsel %vm16821_vm11, %v7696_v32, %v7694_v42  ;;  %vm26586_vm2 = vcmp.eq.f32.partialorder %v12129_v1, 0  ;;  %vm26587_vm9 = vcmp.eq.f32.partialorder %v14241_v51, 1065353216 }
 0x283   : > { %26584 = vst [vmem:[#allocation69_spill] sm:$0xff] %v16854_v2  ;;  %v7664_v7 = vsel %vm26585_vm1, %v14318_v24, %v7663_v36  ;;  %vm16867_vm5 = vmor %vm26587_vm9, %vm26586_vm2  ;;  %vm26590_vm13 = vcmp.eq.f32.partialorder %v25643_v28, 2139095040  ;;  %vm7740_vm10 = vcmp.lt.s32.totalorder %v15977_v31, 0  ;;  %11639 = vlog2.f32 %v16852_v35  ;;  %4686 = vmatprep.subr.bf16.mxu1 %v16854_v2  ;;  %4878 = vmatprep.subr.bf16.mxu0 %v16854_v2  ;;  %v11638_v43 = vpop.eup %11637 }
 0x284   : > { %v7704_v21 = vsel %vm26590_vm13, %v7703_v16, %v7697_v33  ;;  %v1225_v26 = vsub.f32 1.0, %v7664_v7  ;;  %vm26591_vm15 = vmmov %vm26581_vm14  ;;  %v16884_v9 = vadd.f32 1.0, %v16004_v38  ;;  %vm26594_vm14 = vcmp.eq.f32.partialorder %v16380_v4, 2139095040  ;;  %4688 = vmatpush1.bf16.msra.mxu1 %v16295_v0  ;;  %4880 = vmatpush1.bf16.msra.mxu0 %v16295_v0 }
 0x285   : > { %vm16878_vm11 = vmand %vm26591_vm15, %vm7738_vm7  ;;  %v7709_v8 = vsel %vm26594_vm14, %v7708_v15, %v7704_v21  ;;  %vm7762_vm2 = vcmp.ne.f32.partialorder %v15977_v31, %v15977_v31  ;;  %v7771_v34 = vmul.f32 %v11636_v14, %v12129_v1  ;;  %v1043_v38 = vmul.f32 %v12170_v19, %v16139_v56 }
 0x286   : > { %vm7752_vm1 = vmor %vm16878_vm11, %vm16847_vm6  ;;  %v7713_v4 = vsel %vm16837_vm12, 2143289344, %v7709_v8  ;;  %v1349_v6 = vand.u32 4294901760, %v1225_v26  ;;  %vm7739_vm9 = vcmp.eq.f32.partialorder %v15977_v31, 1065353216  ;;  %vm25317_vm12 = vcmp.eq.f32.partialorder %v15974_v18, 0 }
 0x287   : > { %vm7743_vm13 = vmand %vm25316_vm3, %vm26271_vm8  ;;  %v7715_v41 = vsel %vm16867_vm5, 1065353216, %v7713_v4  ;;  %11641 = vpow2.f32 %v7771_v34  ;;  %vm7793_vm14 = vcmp.gt.f32.partialorder %v16712_v30, 1065353216  ;;  %vm26597_vm3 = vcmp.eq.f32.partialorder %v12129_v1, 1065353216 }
 0x288   : > { %vm16914_vm15 = vmand %vm7740_vm10, %vm26554_vm0  ;;  %v7716_v56 = vsel %vm26597_vm3, %v14241_v51, %v7715_v41  ;;  %v16923_v20 = vsub.f32 %v1225_v26, %v1349_v6  ;;  %v7744_v49 = vsel %vm7743_vm13, 2143289344, %v11638_v43  ;;  %v7753_v42 = vsel %vm7752_vm1, 2139095040, %v25633_v40 }
 0x289   : > { %vm16936_vm5 = vmor %vm7762_vm2, %vm26121_vm4  ;;  %v1227_v51 = vsub.f32 1.0, %v7716_v56  ;;  %v7746_v15 = vsel %vm7738_vm7, %v12302_v60, %v7744_v49  ;;  %vm26600_vm3 = vcmp.eq.f32.partialorder %v12129_v1, 0  ;;  %vm7845_vm10 = vcmp.gt.f32.partialorder %v16852_v35, 1065353216 }
 0x28a   : > { %vm16947_vm6 = vmor %vm7739_vm9, %vm26600_vm3  ;;  %v16953_v45 = vand.u32 2147483647, %v15980_v63  ;;  %v16955_v32 = vadd.f32 1.0, %v1043_v38  ;;  %v7748_v12 = vxor.u32 2147483648, %v7746_v15  ;;  %vm7754_vm7 = vcmp.eq.f32.partialorder %v15977_v31, 3212836864 }
 0x28b   : > { %vm26603_vm1 = vcmp.lt.f32.partialorder %v12129_v1, 0  ;;  %v1353_v16 = vand.u32 4294901760, %v1227_v51  ;;  %vm7789_vm9 = vcmp.lt.f32.partialorder %v15974_v18, 0  ;;  %vm25318_vm11 = vcmp.eq.f32.partialorder %v15993_v11, 0 }
 0x28c   : > { %vm16963_vm2 = vmxor %vm26603_vm1, %vm7793_vm14  ;;  %11643 = vlog2.f32 %v16953_v45  ;;  %v7749_v7 = vsel %vm16914_vm15, %v7748_v12, %v7746_v15  ;;  %v7755_v33 = vsel %vm7754_vm7, 1065353216, %v7753_v42  ;;  %vm26609_vm14 = vcmp.lt.f32.partialorder %v15977_v31, 0 }
 0x28d   : > { %vm26606_vm13 = vmmov %vm26603_vm1  ;;  %v7760_v39 = vsel %vm26609_vm14, %v25634_v55, %v12167_v17  ;;  %v16993_v21 = vpack.c.bf16 %v1353_v16, %v1349_v6  ;;  %v16995_v26 = vsub.f32 %v1227_v51, %v1353_v16  ;;  %vm26614_vm15 = vcmp.eq.f32.partialorder %v25643_v28, 2139095040  ;;  %v11640_v8 = vpop.eup %11639 }
 0x28e   : > { %vm16972_vm3 = vmand %vm26606_vm13, %vm25317_vm12  ;;  %v7756_v24 = vsel %vm26614_vm15, %v7755_v33, %v7749_v7  ;;  %vm7792_vm7 = vcmp.lt.s32.totalorder %v15974_v18, 0  ;;  %v7812_v38 = vsel %vm7789_vm9, %v25634_v55, %v12167_v17  ;;  %v17020_v6 = vand.u32 2147483647, %v16955_v32 }
 0x28f   : > { %vm26610_vm13 = vmmov %vm26603_vm1  ;;  %26613 = vst [vmem:[#allocation70_spill] sm:$0xff] %v16993_v21  ;;  %4690 = vmatprep.subr.bf16.mxu1 %v16993_v21  ;;  %4882 = vmatprep.subr.bf16.mxu0 %v16993_v21  ;;  %v7823_v43 = vmul.f32 %v11640_v8, %v12129_v1  ;;  %v17092_v16 = vand.u32 2147483647, %v16884_v9 }
 0x290   : > { %vm16989_vm12 = vmxor %vm26610_vm13, %vm7845_vm10  ;;  %vm26615_vm10 = vcmp.eq.f32.partialorder %v16528_v53, 2139095040  ;;  %4692 = vmatpush1.bf16.msra.mxu1 %v16295_v0  ;;  %4884 = vmatpush1.bf16.msra.mxu0 %v16295_v0  ;;  %11645 = vlog2.f32 %v17020_v6  ;;  %vm7858_vm13 = vcmp.eq.f32.partialorder %v15993_v11, 3212836864 }
 0x291   : > { %vm7804_vm14 = vmor %vm16972_vm3, %vm16963_vm2  ;;  %v7761_v34 = vsel %vm26615_vm10, %v7760_v39, %v7756_v24  ;;  %v11642_v56 = vpop.eup %11641  ;;  %vm26619_vm10 = vcmp.eq.f32.partialorder %v12129_v1, 1065353216  ;;  %11647 = vpow2.f32 %v7823_v43  ;;  %vm25320_vm2 = vcmp.lt.f32.partialorder %v15980_v63, 0 }
 0x292   : > { %vm26616_vm15 = vmmov %vm26603_vm1  ;;  %v7765_v53 = vsel %vm16936_vm5, 2143289344, %v7761_v34  ;;  %v7805_v19 = vsel %vm7804_vm14, 2139095040, %v25633_v40  ;;  %vm7897_vm5 = vcmp.gt.f32.partialorder %v16953_v45, 1065353216  ;;  %v17125_v8 = vsel %vm25320_vm2, %v25634_v55, %v12167_v17 }
 0x293   : > { %vm17015_vm1 = vmand %vm26616_vm15, %vm25318_vm11  ;;  %vm7841_vm15 = vcmp.lt.f32.partialorder %v15993_v11, 0  ;;  %v7767_v41 = vsel %vm16947_vm6, 1065353216, %v7765_v53  ;;  %11649 = vlog2.f32 %v17092_v16  ;;  %vm26634_vm2 = vcmp.eq.f32.partialorder %v12129_v1, 0 }
 0x294   : > { %vm7856_vm11 = vmor %vm17015_vm1, %vm16989_vm12  ;;  %v7768_v49 = vsel %vm26619_vm10, %v15977_v31, %v7767_v41  ;;  %vm26622_vm10 = vcmp.eq.f32.partialorder %v15974_v18, 0  ;;  %v17081_v12 = vsel %vm7841_vm15, %v25634_v55, %v12167_v17  ;;  %vm26624_vm12 = vcmp.lt.f32.partialorder %v12129_v1, 0 }
 0x295   : > { %vm7795_vm6 = vmand %vm7789_vm9, %vm26271_vm8  ;;  %v1229_v31 = vsub.f32 1.0, %v7768_v49  ;;  %v7857_v51 = vsel %vm7856_vm11, 2139095040, %v25633_v40  ;;  %vm25319_vm9 = vcmp.eq.f32.partialorder %v15980_v63, 0  ;;  %vm26627_vm1 = vcmp.ne.f32.partialorder %v15974_v18, %v15974_v18 }
 0x296   : > { %v7796_v42 = vsel %vm7795_vm6, 2143289344, %v11642_v56  ;;  %vm17060_vm3 = vmand %vm7792_vm7, %vm26554_vm0  ;;  %vm26623_vm7 = vcmp.eq.f32.partialorder %v15974_v18, 3212836864  ;;  %v11644_v39 = vpop.eup %11643  ;;  %v17110_v14 = vsel %vm7858_vm13, 1065353216, %v7857_v51  ;;  %vm7949_vm14 = vcmp.gt.f32.partialorder %v17020_v6, 1065353216  ;;  %v1241_v56 = vld [vmem:[%s12067_s17] sm:$0x3] }
 0x297   : > { %v7798_v15 = vsel %vm26622_vm10, %v12302_v60, %v7796_v42  ;;  %v7807_v44 = vsel %vm26623_vm7, 1065353216, %v7805_v19  ;;  %vm17087_vm11 = vmxor %vm26624_vm12, %vm7897_vm5  ;;  %v17103_v33 = vand.u32 4294901760, %v1229_v31  ;;  %vm25321_vm10 = vcmp.lt.f32.partialorder %v16955_v32, 0 }
 0x298   : > { %v7800_v3 = vxor.u32 2147483648, %v7798_v15  ;;  %vm17099_vm6 = vmor %vm26627_vm1, %vm26121_vm4  ;;  %v7875_v53 = vmul.f32 %v11644_v39, %v12129_v1  ;;  %vm26635_vm5 = vcmp.eq.f32.partialorder %v15974_v18, 1065353216  ;;  %v17154_v19 = vsel %vm25321_vm10, %v25634_v55, %v12167_v17  ;;  %v26648_v39 = vld [vmem:[#allocation12_spill] sm:$0xff] }
 0x299   : > { %vm26630_vm7 = vmmov %vm26624_vm12  ;;  %v17131_v4 = vsub.f32 %v1229_v31, %v17103_v33  ;;  %vm25323_vm1 = vcmp.lt.f32.partialorder %v16884_v9, 0  ;;  %v1400_v31 = vand.u32 4294901760, %v26641_v37  ;;  %vm8001_vm10 = vcmp.gt.f32.partialorder %v17092_v16, 1065353216 }
 0x29a   : > { %vm17116_vm12 = vmand %vm26630_vm7, %vm25319_vm9  ;;  %v7801_v34 = vsel %vm17060_vm3, %v7800_v3, %v7798_v15  ;;  %vm26633_vm9 = vcmp.eq.f32.partialorder %v25643_v28, 2139095040  ;;  %11651 = vpow2.f32 %v7875_v53  ;;  %v1412_v15 = vand.u32 4294901760, %v13127_v5 }
 0x29b   : > { %vm7908_vm13 = vmor %vm17116_vm12, %vm17087_vm11  ;;  %v7808_v43 = vsel %vm26633_vm9, %v7807_v44, %v7801_v34  ;;  %vm26638_vm9 = vcmp.eq.f32.partialorder %v16712_v30, 2139095040  ;;  %v11646_v44 = vpop.eup %11645  ;;  %v1401_v7 = vsub.f32 %v26641_v37, %v1400_v31  ;;  %v17203_v24 = vrot.slane %v1241_v56, %v26648_v39  ;;  %v26649_v34 = vld [vmem:[#allocation13_spill] sm:$0xff] }
 0x29c   : > { %vm17145_vm3 = vmor %vm26635_vm5, %vm26634_vm2  ;;  %v7813_v49 = vsel %vm26638_vm9, %v7812_v38, %v7808_v43  ;;  %vm7846_vm9 = vcmp.eq.f32.partialorder %v16852_v35, 2139095040  ;;  %v7909_v38 = vsel %vm7908_vm13, 2139095040, %v25633_v40  ;;  %v1250_v53 = vrot.slane %v1241_v56, %v26649_v34  ;;  %v11648_v43 = vpop.eup %11647 }
 0x29d   : > { %vm17165_vm2 = vmand %vm7841_vm15, %vm26271_vm8  ;;  %v7817_v30 = vsel %vm17099_vm6, 2143289344, %v7813_v49  ;;  %vm26642_vm15 = vcmp.eq.f32.partialorder %v16955_v32, 0  ;;  %vm26650_vm12 = vcmp.eq.f32.partialorder %v12129_v1, 1065353216  ;;  %vm7896_vm13 = vcmp.lt.s32.totalorder %v15980_v63, 0 }
 0x29e   : > { %vm17185_vm5 = vmand %vm26630_vm7, %vm26642_vm15  ;;  %v7819_v3 = vsel %vm17145_vm3, 1065353216, %v7817_v30  ;;  %v7927_v49 = vmul.f32 %v11646_v44, %v12129_v1  ;;  %v1413_v30 = vsub.f32 %v13127_v5, %v1412_v15  ;;  %v1406_v39 = vand.u32 4294901760, %v13220_v52 }
 0x29f   : > { %vm26645_vm11 = vmmov %vm26630_vm7  ;;  %v7820_v41 = vsel %vm26650_vm12, %v15974_v18, %v7819_v3  ;;  %v7848_v56 = vsel %vm17165_vm2, 2143289344, %v11648_v43  ;;  %vm26651_vm7 = vcmp.eq.f32.partialorder %v15980_v63, 3212836864  ;;  %v17227_v44 = vsel %vm25323_vm1, %v25634_v55, %v12167_v17 }
 0x2a0   : > { %vm17197_vm6 = vmxor %vm26645_vm11, %vm7949_vm14  ;;  %v1231_v21 = vsub.f32 1.0, %v7820_v41  ;;  %v17221_v18 = vsel %vm26651_vm7, 1065353216, %v7909_v38  ;;  %vm26652_vm3 = vcmp.eq.f32.partialorder %v15993_v11, 0  ;;  %vm26653_vm15 = vcmp.lt.s32.totalorder %v15993_v11, 0 }
 0x2a1   : > { %vm7960_vm14 = vmor %vm17185_vm5, %vm17197_vm6  ;;  %v7850_v3 = vsel %vm26652_vm3, %v12302_v60, %v7848_v56  ;;  %11653 = vpow2.f32 %v7927_v49  ;;  %v1414_v38 = vand.u32 4294901760, %v1413_v30  ;;  %v1418_v34 = vand.u32 4294901760, %v13275_v54  ;;  %v11650_v30 = vpop.eup %11649 }
 0x2a2   : > { %vm17236_vm11 = vmand %vm26653_vm15, %vm26554_vm0  ;;  %v1361_v43 = vand.u32 4294901760, %v1231_v21  ;;  %v7852_v41 = vxor.u32 2147483648, %v7850_v3  ;;  %vm26656_vm2 = vcmp.ne.f32.partialorder %v15993_v11, %v15993_v11  ;;  %v7961_v55 = vsel %vm7960_vm14, 2139095040, %v25633_v40 }
 0x2a3   : > { %vm17246_vm12 = vmor %vm26656_vm2, %vm26121_vm4  ;;  %v17258_v49 = vand.u32 4294901760, %v1250_v53  ;;  %vm26660_vm15 = vcmp.lt.f32.partialorder %v15980_v63, 0  ;;  %vm8014_vm1 = vcmp.eq.f32.partialorder %v16884_v9, 3212836864  ;;  %v1402_v51 = vand.u32 4294901760, %v1401_v7 }
 0x2a4   : > { %vm17265_vm2 = vmand %vm26660_vm15, %vm26271_vm8  ;;  %v17270_v2 = vpack.c.bf16 %v1412_v15, %v1400_v31  ;;  %v17273_v36 = vand.u32 4294901760, %v17203_v24  ;;  %v17276_v47 = vsub.f32 %v13220_v52, %v1406_v39  ;;  %v17279_v25 = vpack.c.bf16 %v1361_v43, %v17103_v33 }
 0x2a5   : > { %26659 = vst [vmem:[#allocation12_spill] sm:$0xff] %v17258_v49  ;;  %v17281_v5 = vsub.f32 %v1231_v21, %v1361_v43  ;;  %v7853_v37 = vsel %vm17236_vm11, %v7852_v41, %v7850_v3  ;;  %v7979_v31 = vmul.f32 %v11650_v30, %v12129_v1  ;;  %vm26665_vm14 = vcmp.eq.f32.partialorder %v16884_v9, 0  ;;  %v11652_v43 = vpop.eup %11651 }
 0x2a6   : > { %26663 = vst [vmem:[#allocation13_spill] sm:$0xff] %v17273_v36  ;;  %26664 = vst [vmem:[#allocation71_spill] sm:$0xff] %v17279_v25  ;;  %vm26666_vm15 = vcmp.lt.f32.partialorder %v12129_v1, 0  ;;  %vm26669_vm7 = vcmp.eq.f32.partialorder %v25643_v28, 2139095040  ;;  %vm26670_vm11 = vcmp.eq.f32.partialorder %v16955_v32, 3212836864  ;;  %v17311_v3 = vpack.c.bf16 %v1414_v38, %v1402_v51  ;;  %4694 = vmatprep.subr.bf16.mxu1 %v17279_v25  ;;  %4886 = vmatprep.subr.bf16.mxu0 %v17279_v25 }
 0x2a7   : > { %vm17292_vm3 = vmand %vm26666_vm15, %vm26665_vm14  ;;  %v7860_v21 = vsel %vm26669_vm7, %v17110_v14, %v7853_v37  ;;  %v17301_v33 = vsel %vm26670_vm11, 1065353216, %v7961_v55  ;;  %v17314_v42 = vsub.f32 %v1250_v53, %v17258_v49  ;;  %11655 = vpow2.f32 %v7979_v31  ;;  %4696 = vmatpush1.bf16.msra.mxu1 %v16295_v0  ;;  %4888 = vmatpush1.bf16.msra.mxu0 %v16295_v0 }
 0x2a8   : > { %vm26671_vm6 = vmmov %vm26666_vm15  ;;  %v7865_v14 = vsel %vm7846_vm9, %v17081_v12, %v7860_v21  ;;  %v17326_v37 = vsub.f32 %v13275_v54, %v1418_v34  ;;  %v1424_v53 = vand.u32 4294901760, %v13311_v61  ;;  %vm26675_vm9 = vcmp.eq.f32.partialorder %v12129_v1, 0 }
 0x2a9   : > { %vm17307_vm5 = vmxor %vm26671_vm6, %vm8001_vm10  ;;  %26674 = vst [vmem:[#allocation72_spill] sm:$0xff] %v17314_v42  ;;  %v7869_v38 = vsel %vm17246_vm12, 2143289344, %v7865_v14  ;;  %vm26676_vm7 = vcmp.eq.f32.partialorder %v15993_v11, 1065353216  ;;  %v7900_v35 = vsel %vm17265_vm2, 2143289344, %v11652_v43  ;;  %vm7970_vm14 = vcmp.ne.f32.partialorder %v16955_v32, %v16955_v32  ;;  %v26680_v43 = vld [vmem:[#allocation44_spill] sm:$0xff] }
 0x2aa   : > { %vm8012_vm10 = vmor %vm17292_vm3, %vm17307_vm5  ;;  %v1383_v12 = vand.u32 4294901760, %v17314_v42  ;;  %v17342_v41 = vpack.c.bf16 %v1418_v34, %v1406_v39  ;;  %vm26677_vm15 = vcmp.eq.f32.partialorder %v15980_v63, 0  ;;  %vm7947_vm12 = vcmp.eq.f32.partialorder %v16955_v32, 1065353216 }
 0x2ab   : > { %vm7870_vm6 = vmor %vm26676_vm7, %vm26675_vm9  ;;  %v7902_v17 = vsel %vm26677_vm15, %v12302_v60, %v7900_v35  ;;  %v17350_v30 = vsub.f32 %v17203_v24, %v17273_v36  ;;  %vm26679_vm2 = vcmp.eq.f32.partialorder %v12129_v1, 1065353216  ;;  %vm7950_vm11 = vcmp.eq.f32.partialorder %v17020_v6, 2139095040  ;;  %v11654_v14 = vpop.eup %11653  ;;  %v26682_v35 = vld [vmem:[#allocation45_spill] sm:$0xff] }
 0x2ac   : > { %v7871_v55 = vsel %vm7870_vm6, 1065353216, %v7869_v38  ;;  %v7904_v39 = vxor.u32 2147483648, %v7902_v17  ;;  %vm8000_vm9 = vcmp.lt.s32.totalorder %v16884_v9, 0  ;;  %v8013_v24 = vsel %vm8012_vm10, 2139095040, %v25633_v40  ;;  %2125 = vmatprep.mubr.f32.mxu0 %v1383_v12  ;;  %vm7903_vm7 = vmand %vm7896_vm13, %vm26554_vm0 }
 0x2ad   : > { %26678 = vst [vmem:[#allocation73_spill] sm:$0xff] %v17350_v30  ;;  %v17356_v51 = vsel %vm26679_vm2, %v15993_v11, %v7871_v55  ;;  %v1384_v34 = vsub.f32 %v17314_v42, %v1383_v12  ;;  %v1420_v31 = vand.u32 4294901760, %v17326_v37  ;;  %v1425_v21 = vsub.f32 %v13311_v61, %v1424_v53  ;;  %v26683_v55 = vld [vmem:[#allocation47_spill] sm:$0xff] }
 0x2ae   : > { %v1436_v15 = vand.u32 4294901760, %v26680_v43  ;;  %v7905_v7 = vsel %vm7903_vm7, %v7904_v39, %v7902_v17  ;;  %vm26681_vm3 = vcmp.lt.f32.partialorder %v16955_v32, 0  ;;  %v1430_v12 = vand.u32 4294901760, %v26682_v35 }
 0x2af   : > { %vm7951_vm5 = vmand %vm26681_vm3, %vm26271_vm8  ;;  %v1385_v38 = vand.u32 4294901760, %v1384_v34  ;;  %v1442_v56 = vand.u32 4294901760, %v26683_v55  ;;  %vm26684_vm13 = vcmp.eq.f32.partialorder %v25643_v28, 2139095040  ;;  %v8015_v40 = vsel %vm8014_vm1, 1065353216, %v8013_v24 }
 0x2b0   : > { %v7912_v37 = vsel %vm26684_vm13, %v17221_v18, %v7905_v7  ;;  %v7952_v11 = vsel %vm7951_vm5, 2143289344, %v11654_v14  ;;  %vm8022_vm10 = vcmp.ne.f32.partialorder %v16884_v9, %v16884_v9  ;;  %vm26685_vm6 = vcmp.eq.f32.partialorder %v16953_v45, 2139095040 }
 0x2b1   : > { %v7917_v39 = vsel %vm26685_vm6, %v17125_v8, %v7912_v37  ;;  %vm26686_vm15 = vcmp.ne.f32.partialorder %v15980_v63, %v15980_v63  ;;  %v26687_v18 = vsub.f32 1.0, %v17356_v51  ;;  %vm26688_vm1 = vcmp.eq.f32.partialorder %v16955_v32, 0  ;;  %1386 = vmatprep.mubr.f32.mxu1 %v1385_v38  ;;  %v11656_v17 = vpop.eup %11655 }
 0x2b2   : > { %vm7920_vm2 = vmor %vm26686_vm15, %vm26121_vm4  ;;  %v7954_v24 = vsel %vm26688_vm1, %v12302_v60, %v7952_v11  ;;  %vm7999_vm7 = vcmp.eq.f32.partialorder %v16884_v9, 1065353216  ;;  %v1437_v45 = vsub.f32 %v26680_v43, %v1436_v15  ;;  %vm26689_vm3 = vcmp.eq.f32.partialorder %v12129_v1, 0 }
 0x2b3   : > { %v17399_v34 = vand.u32 4294901760, %v26687_v18  ;;  %v7921_v8 = vsel %vm7920_vm2, 2143289344, %v7917_v39  ;;  %vm26690_vm5 = vcmp.eq.f32.partialorder %v15980_v63, 1065353216  ;;  %v7956_v14 = vxor.u32 2147483648, %v7954_v24 }
 0x2b4   : > { %vm7922_vm13 = vmor %vm26690_vm5, %vm26689_vm3  ;;  %vm8002_vm6 = vcmp.eq.f32.partialorder %v17092_v16, 2139095040  ;;  %v1426_v7 = vand.u32 4294901760, %v1425_v21  ;;  %v17411_v37 = vpack.c.bf16 %v1436_v15, %v1424_v53  ;;  %vm26691_vm15 = vcmp.lt.s32.totalorder %v16955_v32, 0  ;;  %v26694_v15 = vld [vmem:[#allocation48_spill] sm:$0xff] }
 0x2b5   : > { %v7923_v18 = vsel %vm7922_vm13, 1065353216, %v7921_v8  ;;  %vm7955_vm1 = vmand %vm26691_vm15, %vm26554_vm0  ;;  %v1438_v11 = vand.u32 4294901760, %v1437_v45  ;;  %v1431_v38 = vsub.f32 %v26682_v35, %v1430_v12  ;;  %v1443_v39 = vsub.f32 %v26683_v55, %v1442_v56 }
 0x2b6   : > { %vm26692_vm2 = vcmp.eq.f32.partialorder %v12129_v1, 1065353216  ;;  %v7957_v21 = vsel %vm7955_vm1, %v7956_v14, %v7954_v24  ;;  %vm26693_vm3 = vcmp.lt.f32.partialorder %v16884_v9, 0  ;;  %v17428_v53 = vpack.c.bf16 %v1442_v56, %v1430_v12  ;;  %v26698_v24 = vld [vmem:[#allocation50_spill] sm:$0xff] }
 0x2b7   : > { %v17422_v25 = vsel %vm26692_vm2, %v15980_v63, %v7923_v18  ;;  %vm8003_vm5 = vmand %vm26693_vm3, %vm26271_vm8  ;;  %v1448_v45 = vand.u32 4294901760, %v26694_v15  ;;  %vm26695_vm13 = vcmp.eq.f32.partialorder %v25643_v28, 2139095040  ;;  %v17435_v54 = vpack.c.bf16 %v1438_v11, %v1426_v7 }
 0x2b8   : > { %v25335_v8 = vsub.f32 1.0, %v17422_v25  ;;  %v7964_v42 = vsel %vm26695_vm13, %v17301_v33, %v7957_v21  ;;  %v8004_v36 = vsel %vm8003_vm5, 2143289344, %v11656_v17  ;;  %vm7972_vm8 = vmor %vm7970_vm14, %vm26121_vm4  ;;  %vm26696_vm15 = vcmp.eq.f32.partialorder %v16884_v9, 0 }
 0x2b9   : > { %v7969_v10 = vsel %vm7950_vm11, %v17154_v19, %v7964_v42  ;;  %v8006_v63 = vsel %vm26696_vm15, %v12302_v60, %v8004_v36  ;;  %v1432_v56 = vand.u32 4294901760, %v1431_v38  ;;  %v1444_v12 = vand.u32 4294901760, %v1443_v39  ;;  %vm8007_vm14 = vmand %vm8000_vm9, %vm26554_vm0 }
 0x2ba   : > { %v17450_v33 = vand.u32 4294901760, %v25335_v8  ;;  %v7973_v17 = vsel %vm7972_vm8, 2143289344, %v7969_v10  ;;  %vm26697_vm1 = vcmp.eq.f32.partialorder %v12129_v1, 0  ;;  %v8008_v6 = vxor.u32 2147483648, %v8006_v63  ;;  %vm26702_vm0 = vmmov %vm26695_vm13  ;;  %v26711_v8 = vld [vmem:[#allocation24_spill] sm:$0xff] }
 0x2bb   : > { %vm7974_vm11 = vmor %vm7947_vm12, %vm26697_vm1  ;;  %v1449_v19 = vsub.f32 %v26694_v15, %v1448_v45  ;;  %v17461_v60 = vpack.c.bf16 %v1444_v12, %v1432_v56  ;;  %v1460_v36 = vand.u32 4294901760, %v13909_v13  ;;  %v1454_v14 = vand.u32 4294901760, %v26698_v24 }
 0x2bc   : > { %v7975_v42 = vsel %vm7974_vm11, 1065353216, %v7973_v17  ;;  %v17467_v7 = vpack.c.bf16 %v17450_v33, %v17399_v34  ;;  %vm26700_vm12 = vmmov %vm26692_vm2  ;;  %v8009_v11 = vsel %vm8007_vm14, %v8008_v6, %v8006_v63  ;;  %v26701_v23 = vand.u32 4294901760, %v17276_v47  ;;  %v26703_v47 = vld [vmem:[#allocation52_spill] sm:$0xff] }
 0x2bd   : > { %v17472_v18 = vsel %vm26700_vm12, %v16955_v32, %v7975_v42  ;;  %v8016_v39 = vsel %vm26702_vm0, %v8015_v40, %v8009_v11  ;;  %v1450_v10 = vand.u32 4294901760, %v1449_v19  ;;  %v1461_v56 = vsub.f32 %v13909_v13, %v1460_v36  ;;  %vm8024_vm9 = vmor %vm8022_vm10, %vm26121_vm4 }
 0x2be   : > { %26699 = vst [vmem:[#allocation44_spill] sm:$0xff] %v17467_v7  ;;  %v17476_v38 = vpack.c.bf16 %v1420_v31, %v26701_v23  ;;  %v25338_v21 = vsub.f32 1.0, %v17472_v18  ;;  %4698 = vmatprep.subr.bf16.mxu1 %v17467_v7  ;;  %4890 = vmatprep.subr.bf16.mxu0 %v17467_v7  ;;  %v8021_v32 = vsel %vm8002_vm6, %v17227_v44, %v8016_v39  ;;  %v1466_v31 = vand.u32 4294901760, %v26703_v47  ;;  %vm26704_vm2 = vmmov %vm26697_vm1  ;;  %v26713_v7 = vld [vmem:[#allocation56_spill] sm:$0xff] }
 0x2bf   : > { %v17492_v40 = vpack.c.bf16 %v1460_v36, %v1448_v45  ;;  %v1455_v28 = vsub.f32 %v26698_v24, %v1454_v14  ;;  %4700 = vmatpush1.bf16.msra.mxu1 %v16295_v0  ;;  %4892 = vmatpush1.bf16.msra.mxu0 %v16295_v0  ;;  %v8025_v63 = vsel %vm8024_vm9, 2143289344, %v8021_v32  ;;  %vm8026_vm6 = vmor %vm7999_vm7, %vm26704_vm2  ;;  %v26705_v57 = vand.u32 4294901760, %v17350_v30  ;;  %v26706_v45 = vld [vmem:[#allocation18_spill] sm:$0xff] }
 0x2c0   : > { %v1462_v44 = vand.u32 4294901760, %v1461_v56  ;;  %v1472_v12 = vand.u32 4294901760, %v26706_v45  ;;  %v8027_v17 = vsel %vm8026_vm6, 1065353216, %v8025_v63  ;;  %v1467_v19 = vsub.f32 %v26703_v47, %v1466_v31  ;;  %vm26707_vm4 = vmmov %vm26700_vm12 }
 0x2c1   : > { %v1390_v16 = vsub.f32 %v17350_v30, %v26705_v57  ;;  %v1456_v6 = vand.u32 4294901760, %v1455_v28  ;;  %v17507_v42 = vpack.c.bf16 %v1466_v31, %v1454_v14  ;;  %v17512_v36 = vsel %vm26707_vm4, %v16884_v9, %v8027_v17  ;;  %v26709_v28 = vld [vmem:[#allocation54_spill] sm:$0xff]  ;;  %v26710_v14 = vld [vmem:[#allocation25_spill] sm:$0xff]  ;;  %v26712_v9 = vld [vmem:[#allocation55_spill] sm:$0xff] }
 0x2c2   : > { %26708 = vst [vmem:[#allocation45_spill] sm:$0xff] %v17512_v36  ;;  %v17516_v11 = vand.u32 4294901760, %v25338_v21  ;;  %v17518_v23 = vpack.c.bf16 %v1462_v44, %v1450_v10  ;;  %v1473_v39 = vsub.f32 %v26706_v45, %v1472_v12  ;;  %v25344_v56 = vsub.f32 1.0, %v17512_v36 }
 0x2c3   : > { %v1468_v32 = vand.u32 4294901760, %v1467_v19  ;;  %v1484_v63 = vand.u32 4294901760, %v26709_v28  ;;  %v1478_v31 = vand.u32 4294901760, %v26710_v14  ;;  %v1490_v1 = vand.u32 4294901760, %v26711_v8 }
 0x2c4   : > { %v1474_v57 = vand.u32 4294901760, %v1473_v39  ;;  %v1496_v17 = vand.u32 4294901760, %v26712_v9  ;;  %v1508_v52 = vand.u32 4294901760, %v26713_v7  ;;  %v17529_v10 = vand.u32 4294901760, %v25344_v56 }
 0x2c5   : > { %v17531_v44 = vpack.c.bf16 %v1468_v32, %v1456_v6  ;;  %v1485_v21 = vsub.f32 %v26709_v28, %v1484_v63  ;;  %v17534_v19 = vpack.c.bf16 %v1484_v63, %v1472_v12  ;;  %v1479_v45 = vsub.f32 %v26710_v14, %v1478_v31 }
 0x2c6   : > { %26714 = vst [vmem:[#allocation47_spill] sm:$0xff] %v17529_v10  ;;  %v1491_v39 = vsub.f32 %v26711_v8, %v1490_v1  ;;  %v17538_v47 = vpack.c.bf16 %v1490_v1, %v1478_v31  ;;  %v1497_v24 = vsub.f32 %v26712_v9, %v1496_v17  ;;  %v17543_v13 = vpack.c.bf16 %v17529_v10, %v17516_v11  ;;  %v26716_v9 = vld [vmem:[#allocation30_spill] sm:$0xff]  ;;  %v26717_v10 = vld [vmem:[#allocation57_spill] sm:$0xff] }
 0x2c7   : > { %v1391_v56 = vand.u32 4294901760, %v1390_v16  ;;  %v1486_v36 = vand.u32 4294901760, %v1485_v21  ;;  %v1509_v6 = vsub.f32 %v26713_v7, %v1508_v52  ;;  %v1480_v32 = vand.u32 4294901760, %v1479_v45  ;;  %v26719_v16 = vld [vmem:[#allocation58_spill] sm:$0xff] }
 0x2c8   : > { %26715 = vst [vmem:[#allocation74_spill] sm:$0xff] %v17543_v13  ;;  %v1492_v28 = vand.u32 4294901760, %v1491_v39  ;;  %v1498_v12 = vand.u32 4294901760, %v1497_v24  ;;  %v17546_v63 = vpack.c.bf16 %v1508_v52, %v1496_v17  ;;  %4702 = vmatprep.subr.bf16.mxu1 %v17543_v13  ;;  %4894 = vmatprep.subr.bf16.mxu0 %v17543_v13  ;;  %v1502_v8 = vand.u32 4294901760, %v26716_v9  ;;  %v26718_v24 = vld [vmem:[#allocation20_spill] sm:$0xff]  ;;  %v26720_v17 = vld [vmem:[#allocation21_spill] sm:$0xff] }
 0x2c9   : > { %v17550_v31 = vpack.c.bf16 %v1486_v36, %v1474_v57  ;;  %v1510_v1 = vand.u32 4294901760, %v1509_v6  ;;  %v1514_v14 = vand.u32 4294901760, %v26717_v10  ;;  %4704 = vmatpush1.bf16.msra.mxu1 %v16295_v0  ;;  %4896 = vmatpush1.bf16.msra.mxu0 %v16295_v0  ;;  %v1520_v52 = vand.u32 4294901760, %v26718_v24  ;;  %v26721_v13 = vld [vmem:[#allocation59_spill] sm:$0xff] }
 0x2ca   : > { %v17556_v21 = vpack.c.bf16 %v1492_v28, %v1480_v32  ;;  %v1532_v45 = vand.u32 4294901760, %v26719_v16  ;;  %v1526_v39 = vand.u32 4294901760, %v26720_v17  ;;  %4706 = vmatprep.subr.bf16.mxu1 %v17311_v3  ;;  %4898 = vmatprep.subr.bf16.mxu0 %v17270_v2  ;;  %v1503_v57 = vsub.f32 %v26716_v9, %v1502_v8 }
 0x2cb   : > { %v17563_v36 = vpack.c.bf16 %v1510_v1, %v1498_v12  ;;  %v1515_v6 = vsub.f32 %v26717_v10, %v1514_v14  ;;  %v1538_v0 = vand.u32 4294901760, %v26721_v13  ;;  %v17568_v28 = vpack.c.bf16 %v1514_v14, %v1502_v8 }
 0x2cc   : > { %v1521_v32 = vsub.f32 %v26718_v24, %v1520_v52  ;;  %v1533_v7 = vsub.f32 %v26719_v16, %v1532_v45  ;;  %v17572_v15 = vpack.c.bf16 %v1532_v45, %v1520_v52  ;;  %1392 = vmatmul.mubr.f32.vlgmr.msra.gmra.mrb[0].mxu1 %v1391_v56  ;;  %v26722_v3 = vand.u32 4294901760, %v17350_v30  ;;  %v26723_v52 = vld [vmem:[#allocation34_spill] sm:$0xff] }
 0x2cd   : > { %v1504_v2 = vand.u32 4294901760, %v1503_v57  ;;  %v1516_v12 = vand.u32 4294901760, %v1515_v6  ;;  %v1527_v1 = vsub.f32 %v26720_v17, %v1526_v39  ;;  %v1539_v10 = vsub.f32 %v26721_v13, %v1538_v0  ;;  %4708 = vmatpush1.bf16.msra.mxu1 %v17476_v38  ;;  %v26725_v38 = vld [vmem:[#allocation31_spill] sm:$0xff]  ;;  %1783 = vmatprep.mubr.f32.mxu1 %v17258_v49 }
 0x2ce   : > { %2129 = vmatmul.mubr.f32.vlgmr.msra.gmra.mrb[0].mxu0 %v26722_v3  ;;  %v1522_v8 = vand.u32 4294901760, %v1521_v32  ;;  %v1534_v14 = vand.u32 4294901760, %v1533_v7  ;;  %v17580_v24 = vpack.c.bf16 %v1538_v0, %v1526_v39  ;;  %v1544_v45 = vand.u32 4294901760, %v26723_v52  ;;  %4710 = vmatprep.subr.bf16.mxu1 %v17435_v54  ;;  %v26724_v3 = vld [vmem:[#allocation33_spill] sm:$0xff] }
 0x2cf   : > { %4900 = vmatpush1.bf16.msra.mxu0 %v17342_v41  ;;  %v17585_v56 = vpack.c.bf16 %v1516_v12, %v1504_v2  ;;  %v1528_v57 = vand.u32 4294901760, %v1527_v1  ;;  %v1540_v6 = vand.u32 4294901760, %v1539_v10  ;;  %v1556_v30 = vand.u32 4294901760, %v26724_v3  ;;  %2392 = vmatprep.mubr.f32.mxu0 %v17258_v49 }
 0x2d0   : > { %4902 = vmatprep.subr.bf16.mxu0 %v17411_v37  ;;  %v17588_v13 = vpack.c.bf16 %v1534_v14, %v1522_v8  ;;  %v1545_v41 = vsub.f32 %v26723_v52, %v1544_v45  ;;  %v1550_v7 = vand.u32 4294901760, %v26725_v38  ;;  %v1562_v0 = vand.u32 4294901760, %v15624_v50 }
 0x2d1   : > { %v17595_v54 = vpack.c.bf16 %v1540_v6, %v1528_v57  ;;  %v1557_v37 = vsub.f32 %v26724_v3, %v1556_v30  ;;  %v17598_v39 = vpack.c.bf16 %v1556_v30, %v1544_v45  ;;  %v1568_v10 = vand.u32 4294901760, %v15715_v27  ;;  %4712 = vmatpush1.bf16.msra.mxu1 %v17461_v60  ;;  %v26726_v57 = vld [vmem:[#allocation62_spill] sm:$0xff] }
 0x2d2   : > { %v1546_v32 = vand.u32 4294901760, %v1545_v41  ;;  %v1551_v2 = vsub.f32 %v26725_v38, %v1550_v7  ;;  %v1563_v12 = vsub.f32 %v15624_v50, %v1562_v0  ;;  %v17605_v1 = vpack.c.bf16 %v1562_v0, %v1550_v7  ;;  %4714 = vmatprep.subr.bf16.mxu1 %v17518_v23  ;;  %v26727_v41 = vld [vmem:[#allocation37_spill] sm:$0xff]  ;;  %v26733_v38 = vld [vmem:[#allocation64_spill] sm:$0xff] }
 0x2d3   : > { %4904 = vmatpush1.bf16.msra.mxu0 %v17428_v53  ;;  %v1558_v8 = vand.u32 4294901760, %v1557_v37  ;;  %v1569_v30 = vsub.f32 %v15715_v27, %v1568_v10  ;;  %v1580_v14 = vand.u32 4294901760, %v15775_v58  ;;  %v1574_v60 = vand.u32 4294901760, %v15855_v48 }
 0x2d4   : > { %4906 = vmatprep.subr.bf16.mxu0 %v17492_v40  ;;  %v1552_v45 = vand.u32 4294901760, %v1551_v2  ;;  %v1564_v53 = vand.u32 4294901760, %v1563_v12  ;;  %v1586_v6 = vand.u32 4294901760, %v26726_v57  ;;  %v1592_v49 = vand.u32 4294901760, %v26727_v41  ;;  %v26728_v12 = vld [vmem:[#allocation39_spill] sm:$0xff] }
 0x2d5   : > { %v17614_v50 = vpack.c.bf16 %v1558_v8, %v1546_v32  ;;  %v1570_v7 = vand.u32 4294901760, %v1569_v30  ;;  %v1581_v23 = vsub.f32 %v15775_v58, %v1580_v14  ;;  %v17617_v0 = vpack.c.bf16 %v1580_v14, %v1568_v10  ;;  %4716 = vmatpush1.bf16.msra.mxu1 %v17531_v44  ;;  %v26729_v44 = vld [vmem:[#allocation65_spill] sm:$0xff]  ;;  %v26730_v30 = vld [vmem:[#allocation63_spill] sm:$0xff] }
 0x2d6   : > { %v17621_v40 = vpack.c.bf16 %v1564_v53, %v1552_v45  ;;  %v1575_v37 = vsub.f32 %v15855_v48, %v1574_v60  ;;  %v1587_v2 = vsub.f32 %v26726_v57, %v1586_v6  ;;  %v1604_v27 = vand.u32 4294901760, %v26728_v12  ;;  %4718 = vmatprep.subr.bf16.mxu1 %v17550_v31 }
 0x2d7   : > { %4908 = vmatpush1.bf16.msra.mxu0 %v17507_v42  ;;  %v1582_v32 = vand.u32 4294901760, %v1581_v23  ;;  %v17628_v8 = vpack.c.bf16 %v1586_v6, %v1574_v60  ;;  %v1593_v10 = vsub.f32 %v26727_v41, %v1592_v49  ;;  %v26731_v42 = vsub.f32 1.0, %v26730_v30 }
 0x2d8   : > { %4910 = vmatprep.subr.bf16.mxu0 %v17534_v19  ;;  %v1576_v45 = vand.u32 4294901760, %v1575_v37  ;;  %v1588_v53 = vand.u32 4294901760, %v1587_v2  ;;  %v1605_v57 = vsub.f32 %v26728_v12, %v1604_v27  ;;  %v17637_v48 = vpack.c.bf16 %v1604_v27, %v1592_v49 }
 0x2d9   : > { %v17634_v14 = vsub.f32 %v26731_v42, %v26729_v44  ;;  %v4733_v58 = vpack.c.bf16 %v1582_v32, %v1570_v7  ;;  %v1594_v31 = vand.u32 4294901760, %v1593_v10  ;;  %v1616_v19 = vand.u32 4294901760, %v26733_v38  ;;  %4720 = vmatpush1.bf16.msra.mxu1 %v17556_v21 }
 0x2da   : > { %v17642_v60 = vpack.c.bf16 %v1588_v53, %v1576_v45  ;;  %v1606_v6 = vand.u32 4294901760, %v1605_v57  ;;  %v1628_v23 = vand.u32 4294901760, %v16533_v22  ;;  %v1640_v37 = vand.u32 4294901760, %v16618_v62  ;;  %4722 = vmatprep.subr.bf16.mxu1 %v17563_v36 }
 0x2db   : > { %26732 = vst [vmem:[#allocation30_spill] sm:$0xff] %v17634_v14  ;;  %4912 = vmatpush1.bf16.msra.mxu0 %v17538_v47  ;;  %v1598_v27 = vand.u32 4294901760, %v17634_v14  ;;  %v1617_v49 = vsub.f32 %v26733_v38, %v1616_v19  ;;  %v1652_v7 = vand.u32 4294901760, %v16689_v46  ;;  %v1664_v30 = vand.u32 4294901760, %v16774_v29 }
 0x2dc   : > { %4914 = vmatprep.subr.bf16.mxu0 %v17546_v63  ;;  %v4737_v21 = vpack.c.bf16 %v1606_v6, %v1594_v31  ;;  %v1629_v47 = vsub.f32 %v16533_v22, %v1628_v23  ;;  %v17652_v2 = vpack.c.bf16 %v1628_v23, %v1616_v19  ;;  %v1641_v57 = vsub.f32 %v16618_v62, %v1640_v37 }
 0x2dd   : > { %v1618_v32 = vand.u32 4294901760, %v1617_v49  ;;  %v1653_v10 = vsub.f32 %v16689_v46, %v1652_v7  ;;  %v17656_v44 = vpack.c.bf16 %v1652_v7, %v1640_v37  ;;  %4724 = vmatpush1.bf16.msra.mxu1 %v17585_v56  ;;  %v1676_v42 = vand.u32 4294901760, %v16856_v59 }
 0x2de   : > { %v1630_v63 = vand.u32 4294901760, %v1629_v47  ;;  %v1642_v36 = vand.u32 4294901760, %v1641_v57  ;;  %4726 = vmatprep.subr.bf16.mxu1 %v17588_v13  ;;  %v1599_v45 = vsub.f32 %v17634_v14, %v1598_v27  ;;  %v1688_v31 = vand.u32 4294901760, %v16923_v20  ;;  %v26758_v14 = vld [vmem:[#allocation62_spill] sm:$0xff] }
 0x2df   : > { %4916 = vmatpush1.bf16.msra.mxu0 %v17568_v28  ;;  %v1654_v53 = vand.u32 4294901760, %v1653_v10  ;;  %v1700_v19 = vand.u32 4294901760, %v16995_v26  ;;  %v1665_v28 = vsub.f32 %v16774_v29, %v1664_v30  ;;  %v1677_v6 = vsub.f32 %v16856_v59, %v1676_v42 }
 0x2e0   : > { %4918 = vmatprep.subr.bf16.mxu0 %v17572_v15  ;;  %v4741_v56 = vpack.c.bf16 %v1630_v63, %v1618_v32  ;;  %v17669_v23 = vpack.c.bf16 %v1676_v42, %v1664_v30  ;;  %v1689_v13 = vsub.f32 %v16923_v20, %v1688_v31  ;;  %v1712_v57 = vand.u32 4294901760, %v17131_v4 }
 0x2e1   : > { %v17671_v37 = vpack.c.bf16 %v1654_v53, %v1642_v36  ;;  %v1701_v15 = vsub.f32 %v16995_v26, %v1700_v19  ;;  %v17675_v49 = vpack.c.bf16 %v1700_v19, %v1688_v31  ;;  %4728 = vmatpush1.bf16.msra.mxu1 %v17595_v54  ;;  %v1666_v7 = vand.u32 4294901760, %v1665_v28 }
 0x2e2   : > { %v1678_v47 = vand.u32 4294901760, %v1677_v6  ;;  %v1724_v32 = vand.u32 4294901760, %v17281_v5  ;;  %4730 = vmatprep.subr.bf16.mxu1 %v17614_v50  ;;  %v1690_v10 = vand.u32 4294901760, %v1689_v13  ;;  %v1713_v30 = vsub.f32 %v17131_v4, %v1712_v57 }
 0x2e3   : > { %4920 = vmatpush1.bf16.msra.mxu0 %v17580_v24  ;;  %v1702_v63 = vand.u32 4294901760, %v1701_v15  ;;  %v1600_v53 = vand.u32 4294901760, %v1599_v45  ;;  %v26734_v50 = vsub.f32 1.0, %v17356_v51  ;;  %v26735_v28 = vsub.f32 1.0, %v17422_v25  ;;  %v26755_v15 = vld [vmem:[#allocation14_spill] sm:$0xff]  ;;  %v26756_v51 = vld [vmem:[#allocation60_spill] sm:$0xff] }
 0x2e4   : > { %4922 = vmatprep.subr.bf16.mxu0 %v17598_v39  ;;  %v4749_v36 = vpack.c.bf16 %v1678_v47, %v1666_v7  ;;  %v1725_v42 = vsub.f32 %v17281_v5, %v1724_v32  ;;  %v17685_v54 = vpack.c.bf16 %v1724_v32, %v1712_v57  ;;  %v1714_v31 = vand.u32 4294901760, %v1713_v30  ;;  %v26742_v7 = vld [vmem:[#allocation54_spill] sm:$0xff]  ;;  %v26743_v57 = vld [vmem:[#allocation25_spill] sm:$0xff]  ;;  %v26744_v32 = vld [vmem:[#allocation24_spill] sm:$0xff] }
 0x2e5   : > { %v4753_v24 = vpack.c.bf16 %v1702_v63, %v1690_v10  ;;  %4732 = vmatpush1.bf16.msra.mxu1 %v17621_v40  ;;  %v17693_v39 = vsub.f32 %v26734_v50, %v17399_v34  ;;  %v17698_v6 = vsub.f32 %v26735_v28, %v17450_v33  ;;  %v26736_v40 = vsub.f32 1.0, %v17472_v18  ;;  %v26737_v34 = vld [vmem:[#allocation48_spill] sm:$0xff]  ;;  %v26739_v33 = vld [vmem:[#allocation50_spill] sm:$0xff]  ;;  %v26745_v63 = vld [vmem:[#allocation55_spill] sm:$0xff] }
 0x2e6   : > { %v1726_v19 = vand.u32 4294901760, %v1725_v42  ;;  %4734 = vmatprep.subr.bf16.mxu1 %v4733_v58  ;;  %v17705_v13 = vpack.c.bf16 %v1598_v27, %v1598_v27  ;;  %v17715_v25 = vpack.c.bf16 %v1600_v53, %v1600_v53  ;;  %v26740_v18 = vld [vmem:[#allocation52_spill] sm:$0xff]  ;;  %v26741_v27 = vld [vmem:[#allocation18_spill] sm:$0xff]  ;;  %v26748_v53 = vld [vmem:[#allocation47_spill] sm:$0xff] }
 0x2e7   : > { %4924 = vmatpush1.bf16.msra.mxu0 %v17605_v1  ;;  %v17703_v1 = vsub.f32 %v26736_v40, %v17516_v11  ;;  %v26746_v30 = vld [vmem:[#allocation56_spill] sm:$0xff]  ;;  %v26753_v47 = vld [vmem:[#allocation31_spill] sm:$0xff]  ;;  %v26757_v58 = vld [vmem:[#allocation61_spill] sm:$0xff] }
 0x2e8   : > { %4926 = vmatprep.subr.bf16.mxu0 %v17617_v0  ;;  %v4757_v45 = vpack.c.bf16 %v1726_v19, %v1714_v31  ;;  %v26738_v0 = vld [vmem:[#allocation49_spill] sm:$0xff]  ;;  %v26751_v28 = vld [vmem:[#allocation20_spill] sm:$0xff]  ;;  %v26754_v11 = vld [vmem:[#allocation35_spill] sm:$0xff] }
 0x2e9   : > { %4736 = vmatpush1.bf16.msra.mxu1 %v17642_v60  ;;  %v26747_v60 = vld [vmem:[#allocation57_spill] sm:$0xff] }
 0x2ea   : > { %4738 = vmatprep.subr.bf16.mxu1 %v4737_v21  ;;  %v26749_v31 = vld [vmem:[#allocation45_spill] sm:$0xff]  ;;  %v26752_v21 = vld [vmem:[#allocation59_spill] sm:$0xff] }
 0x2eb   : > { %4928 = vmatpush1.bf16.msra.mxu0 %v17628_v8  ;;  %v26750_v19 = vsub.f32 1.0, %v26749_v31 }
 0x2ec   : > { %4930 = vmatprep.subr.bf16.mxu0 %v17637_v48 }
 0x2ed   : > { %v17731_v50 = vsub.f32 %v26750_v19, %v26748_v53  ;;  %4740 = vmatpush1.bf16.msra.mxu1 %v17715_v25  ;;  %v1760_v53 = vand.u32 4294901760, %v17703_v1 }
 0x2ee   : > { %4742 = vmatprep.subr.bf16.mxu1 %v4741_v56  ;;  %v1748_v56 = vand.u32 4294901760, %v17698_v6 }
 0x2ef   : > { %4932 = vmatpush1.bf16.msra.mxu0 %v17705_v13 }
 0x2f0   : > { %4934 = vmatprep.subr.bf16.mxu0 %v17652_v2  ;;  %v1736_v2 = vand.u32 4294901760, %v17693_v39  ;;  %v1749_v42 = vsub.f32 %v17698_v6, %v1748_v56 }
 0x2f1   : > { %4744 = vmatpush1.bf16.msra.mxu1 %v17715_v25 }
 0x2f2   : > { %4746 = vmatprep.subr.bf16.mxu1 %v17671_v37  ;;  %v1737_v19 = vsub.f32 %v17693_v39, %v1736_v2  ;;  %v1772_v37 = vand.u32 4294901760, %v17731_v50  ;;  %v1750_v31 = vand.u32 4294901760, %v1749_v42  ;;  %v4953_v10 = vpack.c.bf16 %v1748_v56, %v1736_v2  ;;  %v26769_v2 = vld [vmem:[#allocation12_spill] sm:$0xff] }
 0x2f3   : > { %4936 = vmatpush1.bf16.msra.mxu0 %v17705_v13  ;;  %v26770_v56 = vpack.c.bf16 %v26683_v55, %v26682_v35  ;;  %v26777_v35 = vld [vmem:[#allocation53_spill] sm:$0xff]  ;;  %v26778_v55 = vpack.c.bf16 %v26744_v32, %v26743_v57  ;;  %v26786_v32 = vpack.c.bf16 %v26752_v21, %v26720_v17  ;;  %v26793_v17 = vld [vmem:[#allocation38_spill] sm:$0xff]  ;;  %v26794_v21 = vpack.c.bf16 %v26758_v14, %v26757_v58  ;;  %v26801_v14 = vld [vmem:[#allocation67_spill] sm:$0xff] }
 0x2f4   : > { %4938 = vmatprep.subr.bf16.mxu0 %v17656_v44  ;;  %v1738_v44 = vand.u32 4294901760, %v1737_v19  ;;  %v26766_v19 = vpack.c.bf16 %v26680_v43, %v13311_v61  ;;  %v26774_v61 = vpack.c.bf16 %v26740_v18, %v26739_v33  ;;  %v26775_v43 = vld [vmem:[#allocation51_spill] sm:$0xff]  ;;  %v26781_v33 = vld [vmem:[#allocation26_spill] sm:$0xff]  ;;  %v26782_v18 = vpack.c.bf16 %v26747_v60, %v26716_v9  ;;  %v26785_v57 = vld [vmem:[#allocation29_spill] sm:$0xff] }
 0x2f5   : > { %4748 = vmatpush1.bf16.msra.mxu1 %v17715_v25  ;;  %v26789_v9 = vld [vmem:[#allocation32_spill] sm:$0xff]  ;;  %v26790_v60 = vpack.c.bf16 %v26754_v11, %v26753_v47  ;;  %v26797_v11 = vpack.c.bf16 %v26728_v12, %v26727_v41  ;;  %v26802_v58 = vpack.c.bf16 %v16689_v46, %v16618_v62  ;;  %v26804_v12 = vpack.c.bf16 %v16856_v59, %v16774_v29  ;;  %v26807_v62 = vld [vmem:[#allocation70_spill] sm:$0xff]  ;;  %v26809_v29 = vld [vmem:[#allocation71_spill] sm:$0xff] }
 0x2f6   : > { %4750 = vmatprep.subr.bf16.mxu1 %v4749_v36  ;;  %v1761_v36 = vsub.f32 %v17703_v1, %v1760_v53  ;;  %v4761_v8 = vpack.c.bf16 %v1750_v31, %v1738_v44  ;;  %v26761_v31 = vld [vmem:[#allocation15_spill] sm:$0xff]  ;;  %v26772_v44 = vpack.c.bf16 %v26738_v0, %v26737_v34  ;;  %v26780_v0 = vpack.c.bf16 %v26746_v30, %v26745_v63  ;;  %v26798_v47 = vld [vmem:[#allocation40_spill] sm:$0xff] }
 0x2f7   : > { %4940 = vmatpush1.bf16.msra.mxu0 %v17705_v13  ;;  %v26779_v34 = vld [vmem:[#allocation19_spill] sm:$0xff]  ;;  %v26788_v30 = vpack.c.bf16 %v26724_v3, %v26723_v52  ;;  %v26795_v52 = vld [vmem:[#allocation22_spill] sm:$0xff]  ;;  %v26803_v41 = vld [vmem:[#allocation68_spill] sm:$0xff]  ;;  %v26808_v46 = vpack.c.bf16 %v17281_v5, %v17131_v4  ;;  %v26810_v59 = vpack.c.bf16 %v17698_v6, %v17693_v39 }
 0x2f8   : > { %4942 = vmatprep.subr.bf16.mxu0 %v17669_v23  ;;  %v1773_v23 = vsub.f32 %v17731_v50, %v1772_v37  ;;  %v1762_v48 = vand.u32 4294901760, %v1761_v36  ;;  %v26773_v36 = vld [vmem:[#allocation23_spill] sm:$0xff]  ;;  %v26796_v3 = vld [vmem:[#allocation30_spill] sm:$0xff]  ;;  %v26814_v4 = vld [vmem:[#allocation73_spill] sm:$0xff] }
 0x2f9   : > { %4752 = vmatpush1.bf16.msra.mxu1 %v17715_v25  ;;  %v26787_v63 = vld [vmem:[#allocation27_spill] sm:$0xff]  ;;  %v26813_v5 = vld [vmem:[#allocation74_spill] sm:$0xff]  ;;  %v17904_v39 = vld [vmem:[%s25191_s1] sm:$0x3] }
 0x2fa   : > { %4754 = vmatprep.subr.bf16.mxu1 %v4753_v24  ;;  %v1774_v40 = vand.u32 4294901760, %v1773_v23  ;;  %v4957_v24 = vpack.c.bf16 %v1772_v37, %v1760_v53  ;;  %v26765_v53 = vld [vmem:[#allocation42_spill] sm:$0xff]  ;;  %v26776_v23 = vpack.c.bf16 %v26742_v7, %v26741_v27  ;;  %v26783_v27 = vld [vmem:[#allocation28_spill] sm:$0xff]  ;;  %v26784_v7 = vpack.c.bf16 %v26719_v16, %v26751_v28 }
 0x2fb   : > { %4944 = vmatpush1.bf16.msra.mxu0 %v17705_v13  ;;  %v26771_v37 = vld [vmem:[#allocation46_spill] sm:$0xff]  ;;  %v26791_v16 = vld [vmem:[#allocation36_spill] sm:$0xff]  ;;  %v26792_v28 = vpack.c.bf16 %v26756_v51, %v26755_v15  ;;  %v26800_v15 = vpack.c.bf16 %v16533_v22, %v26733_v38  ;;  %v26805_v22 = vld [vmem:[#allocation69_spill] sm:$0xff]  ;;  %v26806_v38 = vpack.c.bf16 %v16995_v26, %v16923_v20  ;;  %v26812_v26 = vpack.c.bf16 %v17731_v50, %v17703_v1 }
 0x2fc   : > { %4946 = vmatprep.subr.bf16.mxu0 %v17675_v49  ;;  %v4765_v49 = vpack.c.bf16 %v1774_v40, %v1762_v48  ;;  %v26764_v48 = vld [vmem:[#allocation13_spill] sm:$0xff]  ;;  %v26799_v51 = vld [vmem:[#allocation66_spill] sm:$0xff]  ;;  %v26811_v20 = vld [vmem:[#allocation44_spill] sm:$0xff]  ;;  %v8029_v6 = vand.u32 2147483647, %v17904_v39  ;;  %v17907_v50 = vstv %s2566_s9  ;;  %vm8049_vm5 = vcmp.lt.f32.partialorder %v17904_v39, 0 }
 0x2fd   : > { %4756 = vmatpush1.bf16.msra.mxu1 %v17715_v25  ;;  %vm8037_vm13 = vcmp.lt.f32.partialorder %v17907_v50, 0  ;;  %vm8050_vm8 = vcmp.eq.f32.partialorder %v17904_v39, 0 }
 0x2fe   : > { %4758 = vmatprep.subr.bf16.mxu1 %v4757_v45  ;;  %v26759_v45 = vld [vmem:[#allocation16_spill] sm:$0xff]  ;;  %11657 = vlog2.f32 %v8029_v6  ;;  %vm8053_vm15 = vcmp.gt.f32.partialorder %v8029_v6, 1065353216  ;;  %vm17929_vm12 = vmand %vm8037_vm13, %vm8050_vm8 }
 0x2ff   : > { %4948 = vmatpush1.bf16.msra.mxu0 %v17705_v13  ;;  %vm8063_vm0 = vmxor %vm8037_vm13, %vm8053_vm15  ;;  %vm8066_vm15 = vcmp.eq.f32.partialorder %v17904_v39, 3212836864 }
 0x300   : > { %4950 = vmatprep.subr.bf16.mxu0 %v17685_v54  ;;  %v26760_v54 = vld [vmem:[#allocation10_spill] sm:$0xff]  ;;  %vm8064_vm6 = vmor %vm17929_vm12, %vm8063_vm0  ;;  %vm8036_vm12 = vcmp.eq.f32.partialorder %v17907_v50, 1065353216 }
 0x301   : > { %4760 = vmatpush1.bf16.msra.mxu1 %v17715_v25  ;;  %v4769_v42 = vpack.c.bf16 %v26760_v54, %v26759_v45 }
 0x302   : > { %4762 = vmatprep.subr.bf16.mxu1 %v4761_v8  ;;  %v26762_v8 = vld [vmem:[#allocation41_spill] sm:$0xff] }
 0x303   : > { %4952 = vmatpush1.bf16.msra.mxu0 %v17705_v13 }
 0x304   : > { %4954 = vmatprep.subr.bf16.mxu0 %v4953_v10  ;;  %v26763_v10 = vld [vmem:[#allocation43_spill] sm:$0xff] }
 0x305   : > { %4764 = vmatpush1.bf16.msra.mxu1 %v17715_v25  ;;  %v4771_v40 = vpack.c.bf16 %v26763_v10, %v26762_v8 }
 0x306   : > { %4766 = vmatprep.subr.bf16.mxu1 %v4765_v49  ;;  %v4803_v49 = vpack.c.bf16 %v26796_v3, %v26796_v3 }
 0x307   : > { %4956 = vmatpush1.bf16.msra.mxu0 %v17705_v13 }
 0x308   : > { %4958 = vmatprep.subr.bf16.mxu0 %v4957_v24  ;;  %v11658_v1 = vpop.eup %11657  ;;  %v8033_v24 = vand.u32 2147483647, %v17907_v50 }
 0x309   : > { %4768 = vmatpush1.bf16.msra.mxu1 %v17715_v25  ;;  %v26767_v25 = vld [vmem:[#allocation17_spill] sm:$0xff]  ;;  %v8031_v45 = vmul.f32 %v11658_v1, %v17907_v50 }
 0x30a   : > { %4770 = vmatprep.subr.bf16.mxu1 %v4769_v42  ;;  %v8042_v54 = vtrunc.f32 %v8033_v24  ;;  %v8038_v42 = vtrunc.f32 %v17907_v50  ;;  %vm8034_vm10 = vcmp.eq.f32.partialorder %v8033_v24, 2139095040  ;;  %vm8041_vm9 = vcmp.lt.f32.partialorder %v8033_v24, 1266679808 }
 0x30b   : > { %4960 = vmatpush1.bf16.msra.mxu0 %v17705_v13  ;;  %v26768_v13 = vld [vmem:[#allocation72_spill] sm:$0xff]  ;;  %11659 = vpow2.f32 %v8031_v45 }
 0x30c   : > { %4962 = vmatprep.subr.bf16.mxu0 %v26761_v31  ;;  %1785 = vmatmul.mubr.f32.vlgmr.msra.gmra.mrb[0].mxu1 %v26764_v48  ;;  %v8043_v31 = vcvt.f32.s32 %v8042_v54  ;;  %vm8039_vm7 = vcmp.ne.f32.partialorder %v17907_v50, %v8038_v42 }
 0x30d   : > { %4772 = vmatpush1.bf16.msra.mxu1 %v4771_v40  ;;  %1985 = vmatprep.mubr.f32.mxu1 %v26768_v13  ;;  %vm17914_vm3 = vmor %vm8039_vm7, %vm8034_vm10  ;;  %vm8052_vm7 = vcmp.lt.s32.totalorder %v17904_v39, 0 }
 0x30e   : > { %2394 = vmatmul.mubr.f32.vlgmr.msra.gmra.mrb[0].mxu0 %v26764_v48  ;;  %4774 = vmatprep.subr.bf16.mxu1 %v26766_v19  ;;  %v8044_v10 = vand.u32 1, %v8043_v31  ;;  %vm8055_vm1 = vmand %vm8049_vm5, %vm17914_vm3  ;;  %v26819_v19 = vmov 0  }
 0x30f   : > { %4964 = vmatpush1.bf16.msra.mxu0 %v26765_v53  ;;  %2529 = vmatprep.mubr.f32.mxu0 %v26769_v2  ;;  %vm8046_vm14 = vmneg %vm17914_vm3  ;;  %v26820_v2 = vmov 2139095040  }
 0x310   : > { %4966 = vmatprep.subr.bf16.mxu0 %v26767_v25  ;;  %vm8045_vm11 = vcmp.eq.s32.totalorder %v8044_v10, 1  ;;  %v8057_v25 = vsel %vm8037_vm13, 2139095040, %v26819_v19 }
 0x311   : > { %4776 = vmatpush1.bf16.msra.mxu1 %v26770_v56  ;;  %vm8047_vm2 = vmand %vm8045_vm11, %vm8046_vm14  ;;  %v8069_v56 = vsel %vm8037_vm13, 0, %v26820_v2  ;;  %vm8054_vm13 = vcmp.eq.f32.partialorder %v8029_v6, 2139095040  ;;  %vm8035_vm11 = vcmp.eq.f32.partialorder %v17907_v50, 0  ;;  %vm8051_vm14 = vcmp.eq.f32.partialorder %v17904_v39, 1065353216 }
 0x312   : > { %4778 = vmatprep.subr.bf16.mxu1 %v26772_v44  ;;  %vm8048_vm4 = vmand %vm8041_vm9, %vm8047_vm2  ;;  %v8070_v44 = vxor.u32 2147483648, %v8069_v56 }
 0x313   : > { %4968 = vmatpush1.bf16.msra.mxu0 %v26771_v37  ;;  %vm8059_vm3 = vmand %vm8052_vm7, %vm8048_vm4 }
 0x314   : > { %4970 = vmatprep.subr.bf16.mxu0 %v26773_v36  ;;  %v11993_v36 = vmov 1966171168  }
 0x315   : > { %4780 = vmatpush1.bf16.msra.mxu1 %v26774_v61  ;;  %v11660_v40 = vpop.eup %11659  ;;  %v2541_v61 = vunpack.c.l.s4 %v11993_v36 }
 0x316   : > { %4782 = vmatprep.subr.bf16.mxu1 %v26776_v23  ;;  %v8056_v53 = vsel %vm8055_vm1, 2143289344, %v11660_v40  ;;  %vm8075_vm1 = vcmp.ne.f32.partialorder %v17907_v50, %v17907_v50 }
 0x317   : > { %4972 = vmatpush1.bf16.msra.mxu0 %v26775_v43  ;;  %v8058_v13 = vsel %vm8050_vm8, %v8057_v25, %v8056_v53  ;;  %v8065_v43 = vsel %vm8064_vm6, 2139095040, %v26819_v19  ;;  %vm8074_vm8 = vcmp.ne.f32.partialorder %v17904_v39, %v17904_v39 }
 0x318   : > { %4974 = vmatprep.subr.bf16.mxu0 %v26777_v35  ;;  %v8060_v37 = vxor.u32 2147483648, %v8058_v13  ;;  %v8067_v35 = vsel %vm8066_vm15, 1065353216, %v8065_v43 }
 0x319   : > { %4784 = vmatpush1.bf16.msra.mxu1 %v26778_v55  ;;  %v8071_v55 = vsel %vm8048_vm4, %v8070_v44, %v8069_v56 }
 0x31a   : > { %4786 = vmatprep.subr.bf16.mxu1 %v26780_v0  ;;  %v8061_v23 = vsel %vm8059_vm3, %v8060_v37, %v8058_v13 }
 0x31b   : > { %4976 = vmatpush1.bf16.msra.mxu0 %v26779_v34  ;;  %v2542_v34 = vunpack.c.0.s8 %v2541_v61  ;;  %v8068_v0 = vsel %vm8034_vm10, %v8067_v35, %v8061_v23  ;;  %vm8076_vm10 = vmor %vm8074_vm8, %vm8075_vm1 }
 0x31c   : > { %4978 = vmatprep.subr.bf16.mxu0 %v26781_v33  ;;  %v8072_v33 = vsel %vm8049_vm5, %v8071_v55, %v8069_v56  ;;  %vm8078_vm5 = vmor %vm8051_vm14, %vm8035_vm11 }
 0x31d   : > { %4788 = vmatpush1.bf16.msra.mxu1 %v26782_v18 }
 0x31e   : > { %4790 = vmatprep.subr.bf16.mxu1 %v26784_v7 }
 0x31f   : > { %4980 = vmatpush1.bf16.msra.mxu0 %v26783_v27 }
 0x320   : > { %4982 = vmatprep.subr.bf16.mxu0 %v26785_v57 }
 0x321   : > { %4792 = vmatpush1.bf16.msra.mxu1 %v26786_v32 }
 0x322   : > { %4794 = vmatprep.subr.bf16.mxu1 %v26788_v30 }
 0x323   : > { %4984 = vmatpush1.bf16.msra.mxu0 %v26787_v63  ;;  %v26821_v63 = vld [vmem:[#allocation11_spill] sm:$0xff] }
 0x324   : > { %4986 = vmatprep.subr.bf16.mxu0 %v26789_v9  ;;  %v2545_v30 = vsub.s32 %v2542_v34, %v26821_v63 }
 0x325   : > { %4796 = vmatpush1.bf16.msra.mxu1 %v26790_v60  ;;  %v8073_v60 = vsel %vm8054_vm13, %v8072_v33, %v8068_v0 }
 0x326   : > { %4798 = vmatprep.subr.bf16.mxu1 %v26792_v28  ;;  %v8077_v28 = vsel %vm8076_vm10, 2143289344, %v8073_v60 }
 0x327   : > { %4988 = vmatpush1.bf16.msra.mxu0 %v26791_v16  ;;  %v8079_v3 = vsel %vm8078_vm5, 1065353216, %v8077_v28 }
 0x328   : > { %4990 = vmatprep.subr.bf16.mxu0 %v26793_v17 }
 0x329   : > { %4800 = vmatpush1.bf16.msra.mxu1 %v26794_v21  ;;  %v1240_v21 = vld [vmem:[#allocation2] sm:$0x3] }
 0x32a   : > { %4802 = vmatprep.subr.bf16.mxu1 %v26797_v11 }
 0x32b   : > { %4992 = vmatpush1.bf16.msra.mxu0 %v26795_v52 }
 0x32c   : > { %4994 = vmatprep.subr.bf16.mxu0 %v26798_v47  ;;  %v8080_v47 = vsel %vm8036_vm12, %v17904_v39, %v8079_v3 }
 0x32d   : > { %4804 = vmatpush1.bf16.msra.mxu1 %v4803_v49 }
 0x32e   : > { %4806 = vmatprep.subr.bf16.mxu1 %v26800_v15 }
 0x32f   : > { %4996 = vmatpush1.bf16.msra.mxu0 %v26799_v51 }
 0x330   : > { %4998 = vmatprep.subr.bf16.mxu0 %v26801_v14  ;;  %v2571_v14 = vstv %s4636_s11 }
 0x331   : > { %4808 = vmatpush1.bf16.msra.mxu1 %v4803_v49 }
 0x332   : > { %4810 = vmatprep.subr.bf16.mxu1 %v26802_v58  ;;  %v2574_v58 = vstv %s4634_s12 }
 0x333   : > { %5000 = vmatpush1.bf16.msra.mxu0 %v26799_v51 }
 0x334   : > { %5002 = vmatprep.subr.bf16.mxu0 %v26803_v41 }
 0x335   : > { %4812 = vmatpush1.bf16.msra.mxu1 %v4803_v49 }
 0x336   : > { %4814 = vmatprep.subr.bf16.mxu1 %v26804_v12 }
 0x337   : > { %5004 = vmatpush1.bf16.msra.mxu0 %v26799_v51 }
 0x338   : > { %5006 = vmatprep.subr.bf16.mxu0 %v26805_v22 }
 0x339   : > { %4816 = vmatpush1.bf16.msra.mxu1 %v4803_v49 }
 0x33a   : > { %4818 = vmatprep.subr.bf16.mxu1 %v26806_v38 }
 0x33b   : > { %5008 = vmatpush1.bf16.msra.mxu0 %v26799_v51 }
 0x33c   : > { %5010 = vmatprep.subr.bf16.mxu0 %v26807_v62 }
 0x33d   : > { %4820 = vmatpush1.bf16.msra.mxu1 %v4803_v49 }
 0x33e   : > { %4822 = vmatprep.subr.bf16.mxu1 %v26808_v46 }
 0x33f   : > { %5012 = vmatpush1.bf16.msra.mxu0 %v26799_v51 }
 0x340   : > { %5014 = vmatprep.subr.bf16.mxu0 %v26809_v29 }
 0x341   : > { %4824 = vmatpush1.bf16.msra.mxu1 %v4803_v49 }
 0x342   : > { %4826 = vmatprep.subr.bf16.mxu1 %v26810_v59 }
 0x343   : > { %5016 = vmatpush1.bf16.msra.mxu0 %v26799_v51 }
 0x344   : > { %5018 = vmatprep.subr.bf16.mxu0 %v26811_v20 }
 0x345   : > { %4828 = vmatpush1.bf16.msra.mxu1 %v4803_v49 }
 0x346   : > { %4830 = vmatprep.subr.bf16.mxu1 %v26812_v26 }
 0x347   : > { %5020 = vmatpush1.bf16.msra.mxu0 %v26799_v51 }
 0x348   : > { %5022 = vmatprep.subr.bf16.mxu0 %v26813_v5 }
 0x349   : > { %4832 = vmatpush1.bf16.msra.mxu1 %v4803_v49  ;;  %v26822_v49 = vlaneseq }
 0x34b   : > { %5024 = vmatpush1.bf16.msra.mxu0 %v26799_v51  ;;  %vm2558_vm0 = vcmp.lt.s32.totalorder %v26822_v49, 256  ;;  %v2569_v51 = vstv %s2561_s10 }
 0x34c   : > { %1988 = vmatmul.mubr.f32.vlgmr.msra.gmra.mrb[0].mxu1 %v26814_v4  ;;  %v2570_v15 = vmul.f32 %v8080_v47, %v2569_v51 }
 0x34e   : > { %2531 = vmatmul.mubr.f32.vlgmr.msra.gmra.mrb[0].mxu0 %v26764_v48  ;;  %v2572_v41 = vadd.f32 %v2571_v14, %v2570_v15 }
 0x41f   : > { %v1989_v18 = vpop.f32.mrb[0].mxu1 }
 0x420   : > { %v1991_v57 = vpop.f32.mrb[1].mxu1 }
 0x421   : > { %v2532_v27 = vpop.f32.mrb[0].mxu0 }
 0x422   : > { %v5409_v7 = vadd.f32 %v2532_v27, %v1989_v18  ;;  %v2534_v32 = vpop.f32.mrb[1].mxu0 }
 0x423   : > { %v5410_v9 = vadd.f32 %v2534_v32, %v1991_v57 }
 0x425   : > { %v2539_v16 = vcombine.low %v5409_v7, %v5410_v9 }
 0x427   : > { %v2546_v17 = vrot.slane %v2539_v16, %v2545_v30 }
 0x429   : > { %v2553_v52 = vrot.slane %v2546_v17, %v2545_v30 }
 0x42b   : > { %v2555_v11 = vadd.f32 %v2553_v52, %v1240_v21 }
 0x42d   : > { %2560 = vst.msk [vmem:[#allocation2] sm:$0x3] %vm2558_vm0, %v2555_v11 }
 0x434   : > { %v2573_v12 = vld [vmem:[#allocation2] sm:$0x3] }
 0x435   : > { %v2575_v22 = vmul.f32 %v2574_v58, %v2573_v12 }
 0x437   : > { %v2576_v38 = vsub.f32 %v2572_v41, %v2575_v22 }
 0x439   : > { %2577 = vst.msk [vmem:[#allocation6] sm:$0x3] %vm2558_vm0, %v2576_v38 }
 0x43a PF: > { %2580 = sbr.rel (%p12053_p12) target bundleno = 2223 (0x8af), region = 48 }
 0x441   : > { %v2584_v62 = vld [vmem:[%s12062_s14 + $0x10] sm:$0xff]  ;;  %v2582_v46 = vld [vmem:[%s12062_s14] sm:$0xff]  ;;  %v25373_v29 = vmov 0   ;;  %v2585_v59 = vld [vmem:[%s12062_s14 + $0x18] sm:$0xff]  ;;  %s3054_s30 = ssub.f32 0.0, %s12057_s6  ;;  %v25372_v0 = vlaneseq  ;;  %v26826_v47 = vmov 0 }
 0x442   : > { %11662 = vset.pattern.permute.xlu1 %v25373_v29  ;;  %11661 = vset.pattern.permute.xlu0 %v25373_v29  ;;  %v2583_v20 = vld [vmem:[%s12062_s14 + $0x8] sm:$0xff]  ;;  %v2586_v5 = vld [vmem:[%s12062_s14 + $0x20] sm:$0xff]  ;;  %v2589_v4 = vld [vmem:[%s12062_s14 + $0x38] sm:$0xff] }
 0x443   : > { %2637 = vperm.xlu1 %11662, %v2584_v62   ;;  %2627 = vperm.xlu0 %11661, %v2582_v46   ;;  %v2587_v26 = vld [vmem:[%s12062_s14 + $0x28] sm:$0xff]  ;;  %v2588_v39 = vld [vmem:[%s12062_s14 + $0x30] sm:$0xff]  ;;  %v2590_v1 = vld [vmem:[%s12062_s14 + $0x40] sm:$0xff]  ;;  %v17999_v34 = vstv %s3054_s30  ;;  %v18005_v7 = vshrl.u32 %v25372_v0, 7  ;;  %v11995_v62 = vmov 2139095040  }
 0x444   : > { %v2591_v6 = vld [vmem:[%s12062_s14 + $0x48] sm:$0xff]  ;;  %v2593_v50 = vld [vmem:[%s12062_s14 + $0x58] sm:$0xff]  ;;  %v2592_v24 = vld [vmem:[%s12062_s14 + $0x50] sm:$0xff]  ;;  %v18002_v27 = vand.u32 2147483647, %v17999_v34  ;;  %v8090_v30 = vtrunc.f32 %v17999_v34  ;;  %vm25394_vm4 = vcmp.lt.f32.partialorder %v17999_v34, 0  ;;  %vm18327_vm11 = vcmp.ne.f32.partialorder %v17999_v34, %v17999_v34 }
 0x445   : > { %v2595_v45 = vld [vmem:[%s12062_s14 + $0x68] sm:$0xff]  ;;  %v2594_v54 = vld [vmem:[%s12062_s14 + $0x60] sm:$0xff]  ;;  %v2597_v42 = vld [vmem:[%s12062_s14 + $0x78] sm:$0xff]  ;;  %26823 = vst [vmem:[#allocation75_spill] sm:$0xff] %v18005_v7  ;;  %v18010_v9 = vsub.s32 0, %v18005_v7  ;;  %v18013_v16 = vsub.s32 1, %v18005_v7 }
 0x446   : > { %v2596_v31 = vld [vmem:[%s12062_s14 + $0x70] sm:$0xff]  ;;  %v2599_v8 = vld [vmem:[%s12062_s14 + $0x88] sm:$0xff]  ;;  %v2598_v10 = vld [vmem:[%s12062_s14 + $0x80] sm:$0xff]  ;;  %v8094_v32 = vtrunc.f32 %v18002_v27  ;;  %vm25390_vm9 = vcmp.eq.f32.partialorder %v18002_v27, 2139095040  ;;  %vm8091_vm2 = vcmp.ne.f32.partialorder %v17999_v34, %v8090_v30  ;;  %v18055_v46 = vsel %vm25394_vm4, 0, %v11995_v62 }
 0x447   : > { %2642 = vperm.xlu1 %11662, %v2585_v59   ;;  %2632 = vperm.xlu0 %11661, %v2583_v20   ;;  %v2601_v40 = vld [vmem:[%s12062_s14 + $0x98] sm:$0xff]  ;;  %v2600_v48 = vld [vmem:[%s12062_s14 + $0x90] sm:$0xff]  ;;  %v2603_v53 = vld [vmem:[%s12062_s14 + $0xa8] sm:$0xff]  ;;  %26824 = vst [vmem:[#allocation76_spill] sm:$0xff] %v18010_v9  ;;  %vm8093_vm15 = vcmp.lt.f32.partialorder %v18002_v27, 1266679808  ;;  %vm25398_vm10 = vcmp.eq.f32.partialorder %v17999_v34, 0 }
 0x448   : > { %v2602_v19 = vld [vmem:[%s12062_s14 + $0xa0] sm:$0xff]  ;;  %v2605_v25 = vld [vmem:[%s12062_s14 + $0xb8] sm:$0xff]  ;;  %v2604_v13 = vld [vmem:[%s12062_s14 + $0xb0] sm:$0xff]  ;;  %v8095_v60 = vcvt.f32.s32 %v8094_v32  ;;  %26825 = vst [vmem:[#allocation77_spill] sm:$0xff] %v18013_v16 }
 0x449   : > { %v2607_v2 = vld [vmem:[%s12062_s14 + $0xc8] sm:$0xff]  ;;  %v2606_v56 = vld [vmem:[%s12062_s14 + $0xc0] sm:$0xff]  ;;  %v2609_v37 = vld [vmem:[%s12062_s14 + $0xd8] sm:$0xff] }
 0x44a   : > { %v2608_v44 = vld [vmem:[%s12062_s14 + $0xd0] sm:$0xff]  ;;  %v2611_v36 = vld [vmem:[%s12062_s14 + $0xe8] sm:$0xff]  ;;  %v2610_v61 = vld [vmem:[%s12062_s14 + $0xe0] sm:$0xff]  ;;  %v8096_v3 = vand.u32 1, %v8095_v60 }
 0x44b   : > { %2652 = vperm.xlu1 %11662, %v2587_v26   ;;  %2647 = vperm.xlu0 %11661, %v2586_v5   ;;  %v2613_v43 = vld [vmem:[%s12062_s14 + $0xf8] sm:$0xff]  ;;  %v2612_v23 = vld [vmem:[%s12062_s14 + $0xf0] sm:$0xff]  ;;  %v2581_v28 = vld [vmem:[%s25191_s1] sm:$0x3]  ;;  %v18061_v26 = vstv %s12051_s28 }
 0x44c   : > { %v18023_v21 = vrot.slane %v2581_v28, %v18010_v9  ;;  %v2849_v49 = vld [vmem:[#allocation3] sm:$0x3]  ;;  %v18028_v11 = vrot.slane %v2581_v28, %v18013_v16  ;;  %vm18032_vm6 = vmor %vm8091_vm2, %vm25390_vm9  ;;  %vm8097_vm7 = vcmp.eq.s32.totalorder %v8096_v3, 1 }
 0x44d   : > { %v26827_v47 = vsel %vm18032_vm6, 4294967295, %v26826_v47  ;;  %v18038_v51 = vrot.slane %v2849_v49, %v18010_v9  ;;  %vm8098_vm3 = vmneg %vm18032_vm6  ;;  %v18046_v58 = vrot.slane %v2849_v49, %v18013_v16 }
 0x44e   : > { %vm8099_vm8 = vmand %vm8097_vm7, %vm8098_vm3 }
 0x44f   : > { %2662 = vperm.xlu1 %11662, %v2589_v4   ;;  %2657 = vperm.xlu0 %11661, %v2588_v39   ;;  %v8122_v39 = vxor.u32 2147483648, %v18055_v46  ;;  %vm18072_vm13 = vmand %vm8093_vm15, %vm8099_vm8 }
 0x453   : > { %2672 = vperm.xlu1 %11662, %v2591_v6   ;;  %2667 = vperm.xlu0 %11661, %v2590_v1  }
 0x457   : > { %2682 = vperm.xlu1 %11662, %v2593_v50   ;;  %2677 = vperm.xlu0 %11661, %v2592_v24  }
 0x45b   : > { %2692 = vperm.xlu1 %11662, %v2595_v45   ;;  %2687 = vperm.xlu0 %11661, %v2594_v54   ;;  %v26828_v54 = vmov 0 }
 0x45c   : > { %v26829_v54 = vsel %vm18072_vm13, 4294967295, %v26828_v54 }
 0x45f   : > { %2702 = vperm.xlu1 %11662, %v2597_v42   ;;  %2697 = vperm.xlu0 %11661, %v2596_v31  }
 0x463   : > { %2712 = vperm.xlu1 %11662, %v2599_v8   ;;  %2707 = vperm.xlu0 %11661, %v2598_v10  }
 0x467   : > { %2722 = vperm.xlu1 %11662, %v2601_v40   ;;  %2717 = vperm.xlu0 %11661, %v2600_v48  }
 0x46b   : > { %2732 = vperm.xlu1 %11662, %v2603_v53   ;;  %2727 = vperm.xlu0 %11661, %v2602_v19  }
 0x46f   : > { %2742 = vperm.xlu1 %11662, %v2605_v25   ;;  %2737 = vperm.xlu0 %11661, %v2604_v13   ;;  %v18089_v13 = vsel %vm18072_vm13, %v8122_v39, %v18055_v46 }
 0x473   : > { %2752 = vperm.xlu1 %11662, %v2607_v2   ;;  %2747 = vperm.xlu0 %11661, %v2606_v56  }
 0x477   : > { %2762 = vperm.xlu1 %11662, %v2609_v37   ;;  %2757 = vperm.xlu0 %11661, %v2608_v44  }
 0x47b   : > { %2772 = vperm.xlu1 %11662, %v2611_v36   ;;  %2767 = vperm.xlu0 %11661, %v2610_v61  }
 0x47f   : > { %2782 = vperm.xlu1 %11662, %v2613_v43   ;;  %2777 = vperm.xlu0 %11661, %v2612_v23  }
 0x4c2   : > { %v2638_v35 = vpop.permute.xlu1 %2637  ;;  %v2628_v55 = vpop.permute.xlu0 %2627 }
 0x4c3   : > { %v2789_v15 = vsub.f32 %v18023_v21, %v2638_v35  ;;  %v2790_v41 = vsub.f32 %v18028_v11, %v2638_v35  ;;  %v2785_v12 = vsub.f32 %v18023_v21, %v2628_v55  ;;  %v2786_v22 = vsub.f32 %v18028_v11, %v2628_v55 }
 0x4c5   : > { %v2865_v59 = vmul.f32 %v18038_v51, %v2789_v15  ;;  %v2866_v5 = vmul.f32 %v18046_v58, %v2790_v41  ;;  %v2861_v6 = vmul.f32 %v18038_v51, %v2785_v12  ;;  %v2862_v1 = vmul.f32 %v18046_v58, %v2786_v22 }
 0x4c6   : > { %v2643_v33 = vpop.permute.xlu1 %2642  ;;  %v2633_v18 = vpop.permute.xlu0 %2632 }
 0x4c7   : > { %v2791_v20 = vsub.f32 %v18023_v21, %v2643_v33  ;;  %v2792_v4 = vsub.f32 %v18028_v11, %v2643_v33  ;;  %v2787_v50 = vsub.f32 %v18023_v21, %v2633_v18  ;;  %v2788_v24 = vsub.f32 %v18028_v11, %v2633_v18 }
 0x4c8   : > { %v2930_v40 = vmul.f32 %v18061_v26, %v2865_v59  ;;  %v2931_v19 = vmul.f32 %v18061_v26, %v2866_v5  ;;  %v2926_v2 = vmul.f32 %v18061_v26, %v2861_v6  ;;  %v2927_v56 = vmul.f32 %v18061_v26, %v2862_v1 }
 0x4c9   : > { %v2867_v48 = vmul.f32 %v18038_v51, %v2791_v20  ;;  %v2868_v25 = vmul.f32 %v18046_v58, %v2792_v4  ;;  %v2863_v37 = vmul.f32 %v18038_v51, %v2787_v50  ;;  %v2864_v44 = vmul.f32 %v18046_v58, %v2788_v24 }
 0x4ca   : > { %v2653_v57 = vpop.permute.xlu1 %2652  ;;  %v2648_v63 = vpop.permute.xlu0 %2647  ;;  %v18099_v35 = vadd.f32 1.0, %v2930_v40  ;;  %v18111_v32 = vadd.f32 1.0, %v2931_v19  ;;  %v18118_v28 = vadd.f32 1.0, %v2926_v2  ;;  %v18120_v3 = vadd.f32 1.0, %v2927_v56 }
 0x4cb   : > { %v2795_v42 = vsub.f32 %v18023_v21, %v2653_v57  ;;  %v2796_v31 = vsub.f32 %v18028_v11, %v2653_v57  ;;  %v2793_v8 = vsub.f32 %v18023_v21, %v2648_v63  ;;  %v2794_v10 = vsub.f32 %v18028_v11, %v2648_v63 }
 0x4cc   : > { %v2932_v55 = vmul.f32 %v18061_v26, %v2867_v48  ;;  %v18109_v57 = vsel %vm25394_vm4, 2139095040, %v25373_v29  ;;  %v2933_v63 = vmul.f32 %v18061_v26, %v2868_v25  ;;  %v2928_v49 = vmul.f32 %v18061_v26, %v2863_v37 }
 0x4cd   : > { %v2871_v36 = vmul.f32 %v18038_v51, %v2795_v42  ;;  %v2872_v61 = vmul.f32 %v18046_v58, %v2796_v31  ;;  %v2869_v43 = vmul.f32 %v18038_v51, %v2793_v8  ;;  %v2870_v23 = vmul.f32 %v18046_v58, %v2794_v10 }
 0x4ce   : > { %v18018_v17 = vpop.permute.xlu1 %2662  ;;  %v18025_v52 = vpop.permute.xlu0 %2657  ;;  %v2929_v15 = vmul.f32 %v18061_v26, %v2864_v44  ;;  %v18128_v59 = vadd.f32 1.0, %v2932_v55  ;;  %v18135_v39 = vadd.f32 1.0, %v2933_v63  ;;  %v18141_v24 = vadd.f32 1.0, %v2928_v49 }
 0x4cf   : > { %v2799_v33 = vsub.f32 %v18023_v21, %v18018_v17  ;;  %v2800_v30 = vsub.f32 %v18028_v11, %v18018_v17  ;;  %v2797_v60 = vsub.f32 %v18023_v21, %v18025_v52  ;;  %v2936_v12 = vmul.f32 %v18061_v26, %v2871_v36 }
 0x4d0   : > { %v2937_v22 = vmul.f32 %v18061_v26, %v2872_v61  ;;  %v2934_v62 = vmul.f32 %v18061_v26, %v2869_v43  ;;  %v2935_v17 = vmul.f32 %v18061_v26, %v2870_v23  ;;  %v2798_v5 = vsub.f32 %v18028_v11, %v18025_v52 }
 0x4d1   : > { %v2875_v20 = vmul.f32 %v18038_v51, %v2799_v33  ;;  %v2876_v6 = vmul.f32 %v18046_v58, %v2800_v30  ;;  %v2873_v1 = vmul.f32 %v18038_v51, %v2797_v60  ;;  %v18143_v42 = vadd.f32 1.0, %v2929_v15 }
 0x4d2   : > { %v18041_v14 = vpop.permute.xlu1 %2672  ;;  %v18051_v38 = vpop.permute.xlu0 %2667  ;;  %v18151_v10 = vadd.f32 1.0, %v2936_v12  ;;  %v18153_v40 = vadd.f32 1.0, %v2937_v22  ;;  %v18155_v48 = vadd.f32 1.0, %v2934_v62  ;;  %v18157_v19 = vadd.f32 1.0, %v2935_v17 }
 0x4d3   : > { %v2803_v4 = vsub.f32 %v18023_v21, %v18041_v14  ;;  %v2804_v50 = vsub.f32 %v18028_v11, %v18041_v14  ;;  %v2801_v31 = vsub.f32 %v18023_v21, %v18051_v38  ;;  %v2802_v52 = vsub.f32 %v18028_v11, %v18051_v38 }
 0x4d4   : > { %v2940_v14 = vmul.f32 %v18061_v26, %v2875_v20  ;;  %v2874_v25 = vmul.f32 %v18046_v58, %v2798_v5  ;;  %v2941_v37 = vmul.f32 %v18061_v26, %v2876_v6  ;;  %v2938_v44 = vmul.f32 %v18061_v26, %v2873_v1 }
 0x4d5   : > { %v2879_v2 = vmul.f32 %v18038_v51, %v2803_v4  ;;  %v2880_v36 = vmul.f32 %v18046_v58, %v2804_v50  ;;  %v2877_v43 = vmul.f32 %v18038_v51, %v2801_v31  ;;  %v2878_v23 = vmul.f32 %v18046_v58, %v2802_v52 }
 0x4d6   : > { %v18070_v45 = vpop.permute.xlu1 %2682  ;;  %v18082_v53 = vpop.permute.xlu0 %2677  ;;  %v18183_v49 = vadd.f32 1.0, %v2940_v14  ;;  %v2939_v15 = vmul.f32 %v18061_v26, %v2874_v25  ;;  %v18190_v17 = vadd.f32 1.0, %v2938_v44  ;;  %vm25393_vm14 = vcmp.eq.f32.partialorder %v18120_v3, 0 }
 0x4d7   : > { %v2807_v56 = vsub.f32 %v18023_v21, %v18070_v45  ;;  %v2808_v61 = vsub.f32 %v18028_v11, %v18070_v45  ;;  %v2805_v55 = vsub.f32 %v18023_v21, %v18082_v53  ;;  %v2806_v33 = vsub.f32 %v18028_v11, %v18082_v53  ;;  %vm18369_vm0 = vmand %vm25394_vm4, %vm25393_vm14 }
 0x4d8   : > { %26830 = vst [vmem:[#allocation78_spill] sm:$0xff] %v18183_v49  ;;  %v2944_v12 = vmul.f32 %v18061_v26, %v2879_v2  ;;  %v18188_v53 = vadd.f32 1.0, %v2941_v37  ;;  %26831 = vst [vmem:[#allocation79_spill] sm:$0xff] %v18190_v17  ;;  %v2945_v20 = vmul.f32 %v18061_v26, %v2880_v36  ;;  %v2942_v5 = vmul.f32 %v18061_v26, %v2877_v43 }
 0x4d9   : > { %v2883_v22 = vmul.f32 %v18038_v51, %v2807_v56  ;;  %v2881_v4 = vmul.f32 %v18038_v51, %v2805_v55  ;;  %v2882_v6 = vmul.f32 %v18046_v58, %v2806_v33  ;;  %v18202_v25 = vadd.f32 1.0, %v2939_v15 }
 0x4da   : > { %v18104_v18 = vpop.permute.xlu1 %2692  ;;  %v2688_v41 = vpop.permute.xlu0 %2687  ;;  %v18204_v2 = vadd.f32 1.0, %v2944_v12  ;;  %v18209_v44 = vadd.f32 1.0, %v2945_v20  ;;  %vm25389_vm7 = vcmp.eq.f32.partialorder %v18143_v42, 0  ;;  %vm8153_vm15 = vcmp.lt.f32.partialorder %v18120_v3, 0 }
 0x4db   : > { %v2811_v63 = vsub.f32 %v18023_v21, %v18104_v18  ;;  %v2812_v30 = vsub.f32 %v18028_v11, %v18104_v18  ;;  %v2809_v60 = vsub.f32 %v18023_v21, %v2688_v41  ;;  %v2810_v45 = vsub.f32 %v18028_v11, %v2688_v41 }
 0x4dc   : > { %v2884_v18 = vmul.f32 %v18046_v58, %v2808_v61  ;;  %v2943_v41 = vmul.f32 %v18061_v26, %v2878_v23  ;;  %26832 = vst [vmem:[#allocation80_spill] sm:$0xff] %v18204_v2  ;;  %v2948_v56 = vmul.f32 %v18061_v26, %v2883_v22  ;;  %26833 = vst [vmem:[#allocation81_spill] sm:$0xff] %v18209_v44  ;;  %v18216_v23 = vadd.f32 1.0, %v2942_v5 }
 0x4dd   : > { %v2887_v50 = vmul.f32 %v18038_v51, %v2811_v63  ;;  %v2888_v31 = vmul.f32 %v18046_v58, %v2812_v30  ;;  %v2885_v52 = vmul.f32 %v18038_v51, %v2809_v60  ;;  %v2886_v14 = vmul.f32 %v18046_v58, %v2810_v45 }
 0x4de   : > { %v18149_v8 = vpop.permute.xlu1 %2702  ;;  %v18164_v38 = vpop.permute.xlu0 %2697  ;;  %v2949_v36 = vmul.f32 %v18061_v26, %v2884_v18  ;;  %26834 = vst [vmem:[#allocation82_spill] sm:$0xff] %v18216_v23  ;;  %v18218_v55 = vadd.f32 1.0, %v2943_v41  ;;  %v2946_v33 = vmul.f32 %v18061_v26, %v2881_v4  ;;  %v2947_v63 = vmul.f32 %v18061_v26, %v2882_v6 }
 0x4df   : > { %v2815_v37 = vsub.f32 %v18023_v21, %v18149_v8  ;;  %v2816_v61 = vsub.f32 %v18028_v11, %v18149_v8  ;;  %v2813_v43 = vsub.f32 %v18023_v21, %v18164_v38  ;;  %v2952_v60 = vmul.f32 %v18061_v26, %v2887_v50 }
 0x4e0   : > { %26835 = vst [vmem:[#allocation83_spill] sm:$0xff] %v18218_v55  ;;  %v2953_v45 = vmul.f32 %v18061_v26, %v2888_v31  ;;  %v2950_v15 = vmul.f32 %v18061_v26, %v2885_v52  ;;  %v2951_v8 = vmul.f32 %v18061_v26, %v2886_v14  ;;  %v18226_v12 = vadd.f32 1.0, %v2948_v56 }
 0x4e1   : > { %v2891_v22 = vmul.f32 %v18038_v51, %v2815_v37  ;;  %v2814_v20 = vsub.f32 %v18028_v11, %v18164_v38  ;;  %v18232_v41 = vadd.f32 1.0, %v2949_v36  ;;  %v2892_v4 = vmul.f32 %v18046_v58, %v2816_v61 }
 0x4e2   : > { %v2713_v62 = vpop.permute.xlu1 %2712  ;;  %v2708_v1 = vpop.permute.xlu0 %2707  ;;  %26836 = vst [vmem:[#allocation84_spill] sm:$0xff] %v18226_v12  ;;  %v2889_v6 = vmul.f32 %v18038_v51, %v2813_v43  ;;  %v18237_v31 = vadd.f32 1.0, %v2946_v33  ;;  %v18239_v52 = vadd.f32 1.0, %v2947_v63  ;;  %v18243_v38 = vadd.f32 1.0, %v2952_v60 }
 0x4e3   : > { %v2819_v18 = vsub.f32 %v18023_v21, %v2713_v62  ;;  %26837 = vst [vmem:[#allocation85_spill] sm:$0xff] %v18232_v41  ;;  %v2820_v50 = vsub.f32 %v18028_v11, %v2713_v62  ;;  %v2817_v14 = vsub.f32 %v18023_v21, %v2708_v1  ;;  %v2818_v56 = vsub.f32 %v18028_v11, %v2708_v1 }
 0x4e4   : > { %26838 = vst [vmem:[#allocation86_spill] sm:$0xff] %v18237_v31  ;;  %26839 = vst [vmem:[#allocation87_spill] sm:$0xff] %v18239_v52  ;;  %v18245_v37 = vadd.f32 1.0, %v2953_v45  ;;  %v18247_v36 = vadd.f32 1.0, %v2950_v15  ;;  %v18249_v0 = vadd.f32 1.0, %v2951_v8  ;;  %v2956_v61 = vmul.f32 %v18061_v26, %v2891_v22 }
 0x4e5   : > { %26840 = vst [vmem:[#allocation88_spill] sm:$0xff] %v18243_v38  ;;  %v2890_v62 = vmul.f32 %v18046_v58, %v2814_v20  ;;  %v2895_v43 = vmul.f32 %v18038_v51, %v2819_v18  ;;  %v2957_v29 = vmul.f32 %v18061_v26, %v2892_v4  ;;  %v2954_v1 = vmul.f32 %v18061_v26, %v2889_v6 }
 0x4e6   : > { %v2723_v30 = vpop.permute.xlu1 %2722  ;;  %v2718_v5 = vpop.permute.xlu0 %2717  ;;  %26841 = vst [vmem:[#allocation89_spill] sm:$0xff] %v18245_v37  ;;  %26842 = vst [vmem:[#allocation90_spill] sm:$0xff] %v18247_v36  ;;  %v2896_v60 = vmul.f32 %v18046_v58, %v2820_v50  ;;  %v18259_v45 = vand.u32 2147483647, %v18120_v3  ;;  %v2893_v15 = vmul.f32 %v18038_v51, %v2817_v14  ;;  %v2894_v8 = vmul.f32 %v18046_v58, %v2818_v56 }
 0x4e7   : > { %26843 = vst [vmem:[#allocation91_spill] sm:$0xff] %v18249_v0  ;;  %v2823_v33 = vsub.f32 %v18023_v21, %v2723_v30  ;;  %v2824_v22 = vsub.f32 %v18028_v11, %v2723_v30  ;;  %v2821_v20 = vsub.f32 %v18023_v21, %v2718_v5  ;;  %v2822_v7 = vsub.f32 %v18028_v11, %v2718_v5 }
 0x4e8   : > { %11663 = vlog2.f32 %v18259_v45  ;;  %v18269_v50 = vadd.f32 1.0, %v2956_v61  ;;  %v2955_v16 = vmul.f32 %v18061_v26, %v2890_v62  ;;  %v2960_v14 = vmul.f32 %v18061_v26, %v2895_v43 }
 0x4e9   : > { %v2899_v56 = vmul.f32 %v18038_v51, %v2823_v33  ;;  %v2961_v30 = vmul.f32 %v18061_v26, %v2896_v60  ;;  %v18278_v38 = vand.u32 2147483647, %v18143_v42  ;;  %v2959_v61 = vmul.f32 %v18061_v26, %v2894_v8 }
 0x4ea   : > { %v2733_v63 = vpop.permute.xlu1 %2732  ;;  %v2728_v18 = vpop.permute.xlu0 %2727  ;;  %26844 = vst [vmem:[#allocation92_spill] sm:$0xff] %v18269_v50  ;;  %v2900_v50 = vmul.f32 %v18046_v58, %v2824_v22  ;;  %v2897_v62 = vmul.f32 %v18038_v51, %v2821_v20  ;;  %v2898_v43 = vmul.f32 %v18046_v58, %v2822_v7  ;;  %v18290_v36 = vadd.f32 1.0, %v2954_v1 }
 0x4eb   : > { %v2827_v4 = vsub.f32 %v18023_v21, %v2733_v63  ;;  %v2828_v6 = vsub.f32 %v18028_v11, %v2733_v63  ;;  %v2825_v9 = vsub.f32 %v18023_v21, %v2728_v18  ;;  %v2826_v5 = vsub.f32 %v18028_v11, %v2728_v18 }
 0x4ec   : > { %v2958_v63 = vmul.f32 %v18061_v26, %v2893_v15  ;;  %11665 = vlog2.f32 %v18278_v38  ;;  %v18288_v18 = vadd.f32 1.0, %v2957_v29  ;;  %26846 = vst [vmem:[#allocation94_spill] sm:$0xff] %v18290_v36  ;;  %v18292_v37 = vadd.f32 1.0, %v2955_v16 }
 0x4ed   : > { %v2903_v33 = vmul.f32 %v18038_v51, %v2827_v4  ;;  %v2904_v60 = vmul.f32 %v18046_v58, %v2828_v6  ;;  %v2964_v15 = vmul.f32 %v18061_v26, %v2899_v56  ;;  %v18295_v8 = vadd.f32 1.0, %v2960_v14 }
 0x4ee   : > { %26845 = vst [vmem:[#allocation93_spill] sm:$0xff] %v18288_v18  ;;  %26847 = vst [vmem:[#allocation95_spill] sm:$0xff] %v18292_v37  ;;  %v18297_v22 = vadd.f32 1.0, %v2961_v30  ;;  %v2901_v7 = vmul.f32 %v18038_v51, %v2825_v9  ;;  %v2902_v20 = vmul.f32 %v18046_v58, %v2826_v5  ;;  %v2743_v4 = vpop.permute.xlu1 %2742  ;;  %v18301_v6 = vadd.f32 1.0, %v2958_v63  ;;  %v2738_v1 = vpop.permute.xlu0 %2737 }
 0x4ef   : > { %26848 = vst [vmem:[#allocation96_spill] sm:$0xff] %v18295_v8  ;;  %v18303_v0 = vadd.f32 1.0, %v2959_v61  ;;  %v2965_v29 = vmul.f32 %v18061_v26, %v2900_v50  ;;  %v18307_v16 = vand.u32 2147483647, %v18118_v28  ;;  %v2962_v14 = vmul.f32 %v18061_v26, %v2897_v62 }
 0x4f0   : > { %26849 = vst [vmem:[#allocation97_spill] sm:$0xff] %v18297_v22  ;;  %26850 = vst [vmem:[#allocation98_spill] sm:$0xff] %v18301_v6  ;;  %v2963_v56 = vmul.f32 %v18061_v26, %v2898_v43  ;;  %v2968_v30 = vmul.f32 %v18061_v26, %v2903_v33  ;;  %v2969_v9 = vmul.f32 %v18061_v26, %v2904_v60  ;;  %v18313_v5 = vadd.f32 1.0, %v2964_v15 }
 0x4f1   : > { %26851 = vst [vmem:[#allocation99_spill] sm:$0xff] %v18303_v0  ;;  %v2831_v63 = vsub.f32 %v18023_v21, %v2743_v4  ;;  %vm8157_vm1 = vcmp.gt.f32.partialorder %v18259_v45, 1065353216  ;;  %11667 = vlog2.f32 %v18307_v16  ;;  %v2966_v61 = vmul.f32 %v18061_v26, %v2901_v7 }
 0x4f2   : > { %26852 = vst [vmem:[#allocation100_spill] sm:$0xff] %v18313_v5  ;;  %v11664_v50 = vpop.eup %11663  ;;  %v2967_v8 = vmul.f32 %v18061_v26, %v2902_v20  ;;  %v2832_v62 = vsub.f32 %v18028_v11, %v2743_v4  ;;  %v2829_v43 = vsub.f32 %v18023_v21, %v2738_v1  ;;  %v18322_v33 = vadd.f32 1.0, %v2965_v29  ;;  %vm18346_vm5 = vmxor %vm25394_vm4, %vm8157_vm1 }
 0x4f3   : > { %v2830_v60 = vsub.f32 %v18028_v11, %v2738_v1  ;;  %v26854_v15 = vmov 0  ;;  %v8135_v5 = vmul.f32 %v11664_v50, %v17999_v34  ;;  %v18333_v7 = vadd.f32 1.0, %v2962_v14  ;;  %v18351_v14 = vpop.permute.xlu1 %2752  ;;  %vm8168_vm2 = vmor %vm18369_vm0, %vm18346_vm5 }
 0x4f4   : > { %26853 = vst [vmem:[#allocation101_spill] sm:$0xff] %v18322_v33  ;;  %v26855_v15 = vsel %vm18327_vm11, 4294967295, %v26854_v15  ;;  %v18335_v20 = vadd.f32 1.0, %v2963_v56  ;;  %v18337_v4 = vadd.f32 1.0, %v2968_v30  ;;  %v18339_v29 = vadd.f32 1.0, %v2969_v9  ;;  %v18353_v56 = vpop.permute.xlu0 %2747  ;;  %vm18415_vm1 = vmand %vm25394_vm4, %vm25389_vm7 }
 0x4f5   : > { %26856 = vst [vmem:[#allocation102_spill] sm:$0xff] %v18333_v7  ;;  %v2907_v50 = vmul.f32 %v18038_v51, %v2831_v63  ;;  %11669 = vpow2.f32 %v8135_v5  ;;  %vm8261_vm12 = vcmp.gt.f32.partialorder %v18278_v38, 1065353216  ;;  %v18357_v30 = vand.u32 2147483647, %v18141_v24  ;;  %vm18433_vm7 = vmand %vm8153_vm15, %vm18032_vm6 }
 0x4f6   : > { %26857 = vst [vmem:[#allocation103_spill] sm:$0xff] %v18335_v20  ;;  %26858 = vst [vmem:[#allocation104_spill] sm:$0xff] %v18337_v4  ;;  %v11666_v9 = vpop.eup %11665  ;;  %v18359_v4 = vadd.f32 1.0, %v2966_v61  ;;  %v2908_v7 = vmul.f32 %v18046_v58, %v2832_v62  ;;  %v2905_v33 = vmul.f32 %v18038_v51, %v2829_v43  ;;  %v18374_v63 = vmul.f32 %v18046_v58, %v2830_v60 }
 0x4f7   : > { %26859 = vst [vmem:[#allocation105_spill] sm:$0xff] %v18339_v29  ;;  %v18361_v29 = vadd.f32 1.0, %v2967_v8  ;;  %v8239_v8 = vmul.f32 %v11666_v9, %v17999_v34  ;;  %11671 = vlog2.f32 %v18357_v30  ;;  %vm18393_vm3 = vmxor %vm25394_vm4, %vm8261_vm12  ;;  %v18398_v1 = vand.u32 2147483647, %v18111_v32 }
 0x4f8   : > { %26862 = vst [vmem:[#allocation106_spill] sm:$0xff] %v18359_v4  ;;  %v18401_v9 = vmul.f32 %v18061_v26, %v2907_v50  ;;  %v18407_v43 = vmul.f32 %v18061_v26, %v2908_v7  ;;  %vm8156_vm8 = vcmp.lt.s32.totalorder %v18120_v3, 0  ;;  %v26868_v62 = vmov 0  }
 0x4f9   : > { %26863 = vst [vmem:[#allocation107_spill] sm:$0xff] %v18361_v29  ;;  %11673 = vpow2.f32 %v8239_v8  ;;  %v8169_v61 = vsel %vm8168_vm2, 2139095040, %v26868_v62  ;;  %v18421_v8 = vmul.f32 %v18061_v26, %v2905_v33  ;;  %vm8155_vm5 = vcmp.eq.f32.partialorder %v18120_v3, 1065353216  ;;  %vm8272_vm2 = vmor %vm18415_vm1, %vm18393_vm3 }
 0x4fa   : > { %11675 = vlog2.f32 %v18398_v1  ;;  %vm8170_vm12 = vcmp.eq.f32.partialorder %v18120_v3, 3212836864  ;;  %vm8178_vm0 = vcmp.ne.f32.partialorder %v18120_v3, %v18120_v3  ;;  %v8176_v33 = vsel %vm8153_vm15, %v18089_v13, %v18055_v46  ;;  %vm18449_vm3 = vmand %vm8156_vm8, %vm18072_vm13 }
 0x4fb   : > { %v11668_v5 = vpop.eup %11667  ;;  %v18442_v29 = vand.u32 2147483647, %v18135_v39  ;;  %v8171_v50 = vsel %vm8170_vm12, 1065353216, %v8169_v61  ;;  %vm8260_vm1 = vcmp.lt.s32.totalorder %v18143_v42, 0  ;;  %vm8105_vm4 = vcmp.gt.f32.partialorder %v18307_v16, 1065353216  ;;  %vm18459_vm14 = vmor %vm8178_vm0, %vm18327_vm11 }
 0x4fc   : > { %v8083_v4 = vmul.f32 %v11668_v5, %v17999_v34  ;;  %v8273_v20 = vsel %vm8272_vm2, 2139095040, %v26868_v62  ;;  %vm18470_vm15 = vmor %vm8155_vm5, %vm25398_vm10  ;;  %vm26879_vm0 = vcmp.lt.f32.partialorder %v18143_v42, 0  ;;  %vm8282_vm5 = vcmp.ne.f32.partialorder %v18143_v42, %v18143_v42 }
 0x4fd   : > { %vm18478_vm9 = vmand %vm26879_vm0, %vm18032_vm6  ;;  %vm26883_vm8 = vcmp.lt.f32.partialorder %v17999_v34, 0  ;;  %v18505_v18 = vand.u32 2147483647, %v18099_v35  ;;  %vm26886_vm10 = vcmp.eq.f32.partialorder %v18120_v3, 0  ;;  %vm26890_vm12 = vcmp.lt.f32.partialorder %v18118_v28, 0 }
 0x4fe   : > { %11677 = vpow2.f32 %v8083_v4  ;;  %vm26882_vm2 = vmmov %vm26879_vm0  ;;  %v26891_v41 = vmov 0  ;;  %v26912_v60 = vmov 0 }
 0x4ff   : > { %v11670_v61 = vpop.eup %11669  ;;  %v18486_v4 = vsel %vm26882_vm2, %v18089_v13, %v18055_v46  ;;  %11679 = vlog2.f32 %v18442_v29  ;;  %vm18500_vm2 = vmxor %vm26883_vm8, %vm8105_vm4  ;;  %vm26889_vm4 = vcmp.eq.f32.partialorder %v18143_v42, 3212836864 }
 0x500   : > { %v8160_v0 = vsel %vm18433_vm7, 2143289344, %v11670_v61  ;;  %vm18515_vm0 = vmand %vm8260_vm1, %vm18072_vm13  ;;  %v26887_v61 = vmov 0  ;;  %v8275_v12 = vsel %vm26889_vm4, 1065353216, %v8273_v20  ;;  %vm26893_vm1 = vcmp.eq.f32.partialorder %v18118_v28, 0 }
 0x501   : > { %v11672_v37 = vpop.eup %11671  ;;  %v8162_v7 = vsel %vm26886_vm10, %v18109_v57, %v8160_v0  ;;  %v26888_v61 = vsel %vm18515_vm0, 4294967295, %v26887_v61  ;;  %v18526_v0 = vsel %vm26890_vm12, %v18089_v13, %v18055_v46  ;;  %vm18533_vm10 = vmor %vm8282_vm5, %vm18327_vm11  ;;  %vm26897_vm5 = vcmp.eq.f32.partialorder %v17999_v34, 0 }
 0x502   : > { %v8164_v31 = vxor.u32 2147483648, %v8162_v7  ;;  %v26892_v41 = vsel %vm18533_vm10, 4294967295, %v26891_v41  ;;  %vm26894_vm4 = vmmov %vm26883_vm8  ;;  %v8187_v52 = vmul.f32 %v11672_v37, %v17999_v34  ;;  %vm26898_vm0 = vcmp.eq.f32.partialorder %v18143_v42, 1065353216 }
 0x503   : > { %vm18541_vm7 = vmand %vm26894_vm4, %vm26893_vm1  ;;  %v11674_v2 = vpop.eup %11673  ;;  %11681 = vlog2.f32 %v18505_v18  ;;  %v26925_v20 = vmov 0 }
 0x504   : > { %vm18552_vm10 = vmor %vm26898_vm0, %vm26897_vm5  ;;  %v11676_v37 = vpop.eup %11675  ;;  %v8165_v44 = vsel %vm18449_vm3, %v8164_v31, %v8162_v7  ;;  %v8264_v55 = vsel %vm18478_vm9, 2143289344, %v11674_v2  ;;  %11683 = vpow2.f32 %v8187_v52  ;;  %vm26905_vm3 = vcmp.eq.f32.partialorder %v18143_v42, 0 }
 0x505   : > { %vm26901_vm0 = vmmov %vm26890_vm12  ;;  %vm26904_vm12 = vcmp.eq.f32.partialorder %v18002_v27, 2139095040  ;;  %v8266_v31 = vsel %vm26905_vm3, %v18109_v57, %v8264_v55  ;;  %vm26906_vm9 = vcmp.gt.f32.partialorder %v18357_v30, 1065353216 }
 0x506   : > { %vm18573_vm5 = vmand %vm26901_vm0, %vm18032_vm6  ;;  %v8172_v17 = vsel %vm26904_vm12, %v8171_v50, %v8165_v44  ;;  %vm26909_vm0 = vcmp.lt.f32.partialorder %v18141_v24, 0  ;;  %v8343_v44 = vmul.f32 %v11676_v37, %v17999_v34  ;;  %vm26910_vm12 = vcmp.eq.f32.partialorder %v18259_v45, 2139095040 }
 0x507   : > { %vm18587_vm1 = vmxor %vm26894_vm4, %vm26906_vm9  ;;  %v18595_v52 = vsel %vm26909_vm0, %v18089_v13, %v18055_v46  ;;  %v8177_v22 = vsel %vm26910_vm12, %v8176_v33, %v8172_v17  ;;  %v8268_v55 = vxor.u32 2147483648, %v8266_v31  ;;  %vm26911_vm4 = vcmp.lt.s32.totalorder %v18118_v28, 0 }
 0x508   : > { %vm18605_vm9 = vmand %vm26911_vm4, %vm18072_vm13  ;;  %v8181_v17 = vsel %vm18459_vm14, 2143289344, %v8177_v22  ;;  %vm26915_vm4 = vcmp.ne.f32.partialorder %v18118_v28, %v18118_v28  ;;  %11685 = vpow2.f32 %v8343_v44  ;;  %v11678_v33 = vpop.eup %11677  ;;  %vm26923_vm12 = vcmp.eq.f32.partialorder %v17999_v34, 0 }
 0x509   : > { %v26913_v60 = vsel %vm18605_vm9, 4294967295, %v26912_v60  ;;  %vm26914_vm0 = vmor %vm18541_vm7, %vm18500_vm2  ;;  %vm26918_vm9 = vcmp.eq.f32.partialorder %v18141_v24, 0  ;;  %v8183_v5 = vsel %vm18470_vm15, 1065353216, %v8181_v17  ;;  %v11680_v6 = vpop.eup %11679  ;;  %vm26931_vm14 = vcmp.lt.f32.partialorder %v17999_v34, 0 }
 0x50a   : > { %v8117_v50 = vsel %vm26914_vm0, 2139095040, %v26868_v62  ;;  %vm18624_vm3 = vmor %vm26915_vm4, %vm18327_vm11  ;;  %vm26922_vm4 = vnez %v26888_v61 }
 0x50b   : > { %vm26919_vm2 = vmmov %vm26883_vm8  ;;  %v8269_v7 = vsel %vm26922_vm4, %v8268_v55, %v8266_v31  ;;  %vm26927_vm4 = vcmp.eq.f32.partialorder %v17999_v34, 1065353216  ;;  %vm26928_vm8 = vcmp.eq.f32.partialorder %v18002_v27, 2139095040  ;;  %v8108_v31 = vsel %vm18573_vm5, 2143289344, %v11678_v33 }
 0x50c   : > { %vm18632_vm7 = vmand %vm26919_vm2, %vm26918_vm9  ;;  %vm26924_vm9 = vcmp.eq.f32.partialorder %v18118_v28, 1065353216  ;;  %v8184_v61 = vsel %vm26927_vm4, %v18120_v3, %v8183_v5  ;;  %v8276_v37 = vsel %vm26928_vm8, %v8275_v12, %v8269_v7  ;;  %vm26934_vm4 = vcmp.eq.f32.partialorder %v18278_v38, 2139095040 }
 0x50d   : > { %vm18647_vm2 = vmor %vm26924_vm9, %vm26923_vm12  ;;  %vm26929_vm12 = vcmp.eq.f32.partialorder %v18118_v28, 3212836864  ;;  %vm26930_vm9 = vcmp.eq.f32.partialorder %v18111_v32, 0  ;;  %v8281_v3 = vsel %vm26934_vm4, %v18486_v4, %v8276_v37  ;;  %v3121_v55 = vsub.f32 1.0, %v8184_v61  ;;  %v11682_v23 = vpop.eup %11681 }
 0x50e   : > { %v26926_v20 = vsel %vm18647_vm2, 4294967295, %v26925_v20  ;;  %v8119_v44 = vsel %vm26929_vm12, 1065353216, %v8117_v50  ;;  %vm18670_vm0 = vmand %vm26931_vm14, %vm26930_vm9  ;;  %vm26935_vm8 = vcmp.eq.f32.partialorder %v18118_v28, 0  ;;  %vm26936_vm5 = vcmp.gt.f32.partialorder %v18398_v1, 1065353216 }
 0x50f   : > { %v8110_v49 = vsel %vm26935_vm8, %v18109_v57, %v8108_v31  ;;  %vm26937_vm12 = vmmov %vm26931_vm14  ;;  %v8447_v50 = vmul.f32 %v11680_v6, %v17999_v34  ;;  %vm26940_vm14 = vnez %v26892_v41  ;;  %vm26941_vm9 = vcmp.lt.f32.partialorder %v18141_v24, 0 }
 0x510   : > { %vm18684_vm15 = vmxor %vm26937_vm12, %vm26936_vm5  ;;  %v8285_v17 = vsel %vm26940_vm14, 2143289344, %v8281_v3  ;;  %v8112_v38 = vxor.u32 2147483648, %v8110_v49  ;;  %vm26944_vm5 = vcmp.lt.f32.partialorder %v18111_v32, 0  ;;  %v3197_v5 = vand.u32 4294901760, %v3121_v55 }
 0x511   : > { %vm18695_vm4 = vmand %vm26941_vm9, %vm18032_vm6  ;;  %v18704_v33 = vsel %vm26944_vm5, %v18089_v13, %v18055_v46  ;;  %v8287_v41 = vsel %vm18552_vm10, 1065353216, %v8285_v17  ;;  %vm26945_vm9 = vcmp.lt.s32.totalorder %v18141_v24, 0  ;;  %11687 = vpow2.f32 %v8447_v50 }
 0x512   : > { %vm18714_vm2 = vmand %vm26945_vm9, %vm18072_vm13  ;;  %vm26949_vm8 = vcmp.eq.f32.partialorder %v17999_v34, 1065353216  ;;  %vm26950_vm9 = vnez %v26913_v60  ;;  %vm26951_vm14 = vcmp.ne.f32.partialorder %v18141_v24, %v18141_v24  ;;  %v18747_v36 = vsub.f32 %v3121_v55, %v3197_v5 }
 0x513   : > { %vm26948_vm5 = vmor %vm18632_vm7, %vm18587_vm1  ;;  %v8288_v61 = vsel %vm26949_vm8, %v18143_v42, %v8287_v41  ;;  %v8113_v37 = vsel %vm26950_vm9, %v8112_v38, %v8110_v49  ;;  %v11684_v42 = vpop.eup %11683  ;;  %vm26956_vm9 = vcmp.eq.f32.partialorder %v17999_v34, 0  ;;  %vm26957_vm1 = vcmp.eq.f32.partialorder %v18141_v24, 1065353216 }
 0x514   : > { %v8221_v6 = vsel %vm26948_vm5, 2139095040, %v26868_v62  ;;  %vm18736_vm12 = vmor %vm26951_vm14, %vm18327_vm11  ;;  %v3123_v60 = vsub.f32 1.0, %v8288_v61  ;;  %26954 = vst [vmem:[#allocation108_spill] sm:$0xff] %v18747_v36  ;;  %vm26955_vm14 = vcmp.eq.f32.partialorder %v18002_v27, 2139095040  ;;  %v8291_v49 = vmul.f32 %v11682_v23, %v17999_v34  ;;  %v11686_v41 = vpop.eup %11685 }
 0x515   : > { %v8120_v31 = vsel %vm26955_vm14, %v8119_v44, %v8113_v37  ;;  %vm18755_vm10 = vmor %vm26957_vm1, %vm26956_vm9  ;;  %vm26960_vm8 = vcmp.eq.f32.partialorder %v18307_v16, 2139095040  ;;  %v8212_v55 = vsel %vm18695_vm4, 2143289344, %v11684_v42  ;;  %vm26961_vm5 = vcmp.eq.f32.partialorder %v18141_v24, 3212836864 }
 0x516   : > { %v8125_v50 = vsel %vm26960_vm8, %v18526_v0, %v8120_v31  ;;  %v8223_v44 = vsel %vm26961_vm5, 1065353216, %v8221_v6  ;;  %vm26962_vm1 = vcmp.lt.f32.partialorder %v18111_v32, 0  ;;  %v3201_v16 = vand.u32 4294901760, %v3123_v60 }
 0x517   : > { %vm18772_vm9 = vmand %vm26962_vm1, %vm18032_vm6  ;;  %v8129_v0 = vsel %vm18624_vm3, 2143289344, %v8125_v50  ;;  %vm26965_vm4 = vcmp.eq.f32.partialorder %v18141_v24, 0  ;;  %vm26966_vm8 = vcmp.lt.s32.totalorder %v18111_v32, 0  ;;  %vm26970_vm3 = vnez %v26926_v20 }
 0x518   : > { %v8214_v38 = vsel %vm26965_vm4, %v18109_v57, %v8212_v55  ;;  %vm18786_vm5 = vmand %vm26966_vm8, %vm18072_vm13  ;;  %v8131_v6 = vsel %vm26970_vm3, 1065353216, %v8129_v0  ;;  %vm26971_vm4 = vcmp.gt.f32.partialorder %v18442_v29, 1065353216  ;;  %vm26972_vm7 = vcmp.lt.f32.partialorder %v17999_v34, 0 }
 0x519   : > { %vm26969_vm1 = vmor %vm18670_vm0, %vm18684_vm15  ;;  %v8216_v23 = vxor.u32 2147483648, %v8214_v38  ;;  %11689 = vpow2.f32 %v8291_v49  ;;  %vm25413_vm14 = vcmp.eq.f32.partialorder %v18099_v35, 0  ;;  %v18807_v22 = vpack.c.bf16 %v3201_v16, %v3197_v5 }
 0x51a   : > { %v8377_v45 = vsel %vm26969_vm1, 2139095040, %v26868_v62  ;;  %vm18802_vm8 = vmxor %vm26972_vm7, %vm26971_vm4  ;;  %v18809_v12 = vsub.f32 %v3123_v60, %v3201_v16  ;;  %vm26977_vm0 = vcmp.eq.f32.partialorder %v17999_v34, 1065353216  ;;  %v8368_v37 = vsel %vm18772_vm9, 2143289344, %v11686_v41 }
 0x51b   : > { %26975 = vst [vmem:[#allocation109_spill] sm:$0xff] %v18807_v22  ;;  %v8132_v20 = vsel %vm26977_vm0, %v18118_v28, %v8131_v6  ;;  %vm26978_vm15 = vcmp.lt.f32.partialorder %v18135_v39, 0  ;;  %v8217_v5 = vsel %vm18714_vm2, %v8216_v23, %v8214_v38  ;;  %vm26981_vm3 = vcmp.eq.f32.partialorder %v18111_v32, 0  ;;  %5026 = vmatprep.subr.bf16.mxu1 %v18807_v22  ;;  %5218 = vmatprep.subr.bf16.mxu0 %v18807_v22  ;;  %v11688_v0 = vpop.eup %11687 }
 0x51c   : > { %26976 = vst [vmem:[#allocation110_spill] sm:$0xff] %v18809_v12  ;;  %vm18820_vm7 = vmand %vm26978_vm15, %vm18032_vm6  ;;  %v3120_v60 = vsub.f32 1.0, %v8132_v20  ;;  %v8370_v28 = vsel %vm26981_vm3, %v18109_v57, %v8368_v37  ;;  %vm26982_vm4 = vcmp.eq.f32.partialorder %v18135_v39, 0  ;;  %vm26983_vm0 = vcmp.lt.f32.partialorder %v17999_v34, 0 }
 0x51d   : > { %vm18835_vm15 = vmand %vm26983_vm0, %vm26982_vm4  ;;  %vm8313_vm1 = vcmp.gt.f32.partialorder %v18505_v18, 1065353216  ;;  %vm26986_vm2 = vcmp.eq.f32.partialorder %v18002_v27, 2139095040  ;;  %v8372_v49 = vxor.u32 2147483648, %v8370_v28  ;;  %v18850_v50 = vand.u32 2147483647, %v18128_v59 }
 0x51e   : > { %v8224_v7 = vsel %vm26986_vm2, %v8223_v44, %v8217_v5  ;;  %vm26987_vm0 = vcmp.eq.f32.partialorder %v18357_v30, 2139095040  ;;  %v3199_v17 = vand.u32 4294901760, %v3120_v60  ;;  %vm26988_vm2 = vcmp.lt.f32.partialorder %v18135_v39, 0 }
 0x51f   : > { %v8229_v55 = vsel %vm26987_vm0, %v18595_v52, %v8224_v7  ;;  %v8488_v44 = vsel %vm26988_vm2, %v18089_v13, %v18055_v46  ;;  %vm26989_vm3 = vcmp.lt.f32.partialorder %v17999_v34, 0  ;;  %v8373_v52 = vsel %vm18786_vm5, %v8372_v49, %v8370_v28 }
 0x520   : > { %vm18864_vm4 = vmand %vm26989_vm3, %vm25413_vm14  ;;  %v8233_v30 = vsel %vm18736_vm12, 2143289344, %v8229_v55  ;;  %vm26992_vm0 = vcmp.eq.f32.partialorder %v18111_v32, 3212836864  ;;  %11691 = vlog2.f32 %v18850_v50  ;;  %v18885_v6 = vsub.f32 %v3120_v60, %v3199_v17 }
 0x521   : > { %v8379_v38 = vsel %vm26992_vm0, 1065353216, %v8377_v45  ;;  %vm26993_vm2 = vmmov %vm26989_vm3  ;;  %v8235_v2 = vsel %vm18755_vm10, 1065353216, %v8233_v30  ;;  %vm26997_vm12 = vcmp.eq.f32.partialorder %v18002_v27, 2139095040  ;;  %vm26998_vm5 = vcmp.ne.f32.partialorder %v18111_v32, %v18111_v32 }
 0x522   : > { %vm18878_vm9 = vmxor %vm26993_vm2, %vm8313_vm1  ;;  %26996 = vst [vmem:[#allocation111_spill] sm:$0xff] %v18885_v6  ;;  %v8380_v4 = vsel %vm26997_vm12, %v8379_v38, %v8373_v52  ;;  %v8472_v45 = vsel %vm18820_vm7, 2143289344, %v11688_v0  ;;  %vm26999_vm1 = vcmp.eq.f32.partialorder %v17999_v34, 1065353216  ;;  %vm27000_vm10 = vcmp.eq.f32.partialorder %v18398_v1, 2139095040 }
 0x523   : > { %vm8388_vm3 = vmor %vm26998_vm5, %vm18327_vm11  ;;  %v8236_v23 = vsel %vm26999_vm1, %v18141_v24, %v8235_v2  ;;  %v8385_v3 = vsel %vm27000_vm10, %v18704_v33, %v8380_v4  ;;  %vm27001_vm0 = vcmp.eq.f32.partialorder %v17999_v34, 0  ;;  %vm27002_vm2 = vcmp.eq.f32.partialorder %v18111_v32, 1065353216  ;;  %v11690_v61 = vpop.eup %11689 }
 0x524   : > { %vm8390_vm12 = vmor %vm27002_vm2, %vm27001_vm0  ;;  %vm27003_vm14 = vcmp.eq.f32.partialorder %v18135_v39, 0  ;;  %v3122_v37 = vsub.f32 1.0, %v8236_v23  ;;  %v8389_v42 = vsel %vm8388_vm3, 2143289344, %v8385_v3  ;;  %vm8490_vm5 = vcmp.ne.f32.partialorder %v18135_v39, %v18135_v39 }
 0x525   : > { %v8474_v20 = vsel %vm27003_vm14, %v18109_v57, %v8472_v45  ;;  %vm27004_vm7 = vmor %vm18835_vm15, %vm18802_vm8  ;;  %v8391_v33 = vsel %vm8390_vm12, 1065353216, %v8389_v42  ;;  %vm27005_vm14 = vcmp.lt.s32.totalorder %v18135_v39, 0  ;;  %vm8311_vm8 = vcmp.eq.f32.partialorder %v18099_v35, 1065353216 }
 0x526   : > { %v8481_v24 = vsel %vm27004_vm7, 2139095040, %v26868_v62  ;;  %v8476_v1 = vxor.u32 2147483648, %v8474_v20  ;;  %vm8324_vm1 = vmor %vm18864_vm4, %vm18878_vm9  ;;  %vm8312_vm15 = vcmp.lt.s32.totalorder %v18099_v35, 0  ;;  %vm8326_vm3 = vcmp.eq.f32.partialorder %v18099_v35, 3212836864 }
 0x527   : > { %vm8475_vm10 = vmand %vm27005_vm14, %vm18072_vm13  ;;  %v3203_v5 = vand.u32 4294901760, %v3122_v37  ;;  %vm27006_vm0 = vcmp.eq.f32.partialorder %v17999_v34, 1065353216  ;;  %vm27007_vm9 = vcmp.eq.f32.partialorder %v18135_v39, 3212836864  ;;  %vm27008_vm4 = vcmp.lt.f32.partialorder %v18099_v35, 0 }
 0x528   : > { %v8392_v60 = vsel %vm27006_vm0, %v18111_v32, %v8391_v33  ;;  %v8477_v28 = vsel %vm8475_vm10, %v8476_v1, %v8474_v20  ;;  %v8483_v31 = vsel %vm27007_vm9, 1065353216, %v8481_v24  ;;  %vm8315_vm2 = vmand %vm27008_vm4, %vm18032_vm6  ;;  %vm27009_vm12 = vcmp.eq.f32.partialorder %v18002_v27, 2139095040 }
 0x529   : > { %v8484_v7 = vsel %vm27009_vm12, %v8483_v31, %v8477_v28  ;;  %v3125_v49 = vsub.f32 1.0, %v8392_v60  ;;  %v8316_v55 = vsel %vm8315_vm2, 2143289344, %v11690_v61  ;;  %v8325_v16 = vsel %vm8324_vm1, 2139095040, %v26868_v62  ;;  %vm8492_vm14 = vmor %vm8490_vm5, %vm18327_vm11 }
 0x52a   : > { %v18940_v0 = vpack.c.bf16 %v3203_v5, %v3199_v17  ;;  %v18942_v30 = vsub.f32 %v3122_v37, %v3203_v5  ;;  %vm27012_vm7 = vcmp.eq.f32.partialorder %v18442_v29, 2139095040  ;;  %vm27013_vm10 = vcmp.eq.f32.partialorder %v18099_v35, 0  ;;  %vm8319_vm5 = vmand %vm8312_vm15, %vm18072_vm13  ;;  %v11692_v4 = vpop.eup %11691 }
 0x52b   : > { %v8489_v32 = vsel %vm27012_vm7, %v8488_v44, %v8484_v7  ;;  %v8318_v52 = vsel %vm27013_vm10, %v18109_v57, %v8316_v55  ;;  %vm27014_vm1 = vcmp.eq.f32.partialorder %v17999_v34, 0  ;;  %vm27015_vm0 = vcmp.eq.f32.partialorder %v18135_v39, 1065353216 }
 0x52c   : > { %27010 = vst [vmem:[#allocation112_spill] sm:$0xff] %v18940_v0  ;;  %27011 = vst [vmem:[#allocation113_spill] sm:$0xff] %v18942_v30  ;;  %v8493_v38 = vsel %vm8492_vm14, 2143289344, %v8489_v32  ;;  %v3205_v17 = vand.u32 4294901760, %v3125_v49  ;;  %vm8314_vm4 = vcmp.eq.f32.partialorder %v18505_v18, 2139095040  ;;  %v8320_v29 = vxor.u32 2147483648, %v8318_v52  ;;  %5028 = vmatpush1.bf16.msra.mxu1 %v18940_v0  ;;  %5220 = vmatpush1.bf16.msra.mxu0 %v18940_v0 }
 0x52d   : > { %vm8494_vm9 = vmor %vm27015_vm0, %vm27014_vm1  ;;  %vm27016_vm2 = vcmp.lt.f32.partialorder %v18099_v35, 0  ;;  %vm8334_vm12 = vcmp.ne.f32.partialorder %v18099_v35, %v18099_v35  ;;  %v18972_v2 = vand.u32 2147483647, %v18157_v19  ;;  %vm27017_vm7 = vcmp.eq.f32.partialorder %v17999_v34, 1065353216 }
 0x52e   : > { %v8495_v44 = vsel %vm8494_vm9, 1065353216, %v8493_v38  ;;  %v8332_v41 = vsel %vm27016_vm2, %v18089_v13, %v18055_v46  ;;  %v18977_v23 = vsub.f32 %v3125_v49, %v3205_v17  ;;  %v8321_v3 = vsel %vm8319_vm5, %v8320_v29, %v8318_v52  ;;  %vm27022_vm10 = vmmov %vm27014_vm1  ;;  %v19035_v29 = vpop.permute.xlu1 %2762 }
 0x52f   : > { %v8496_v45 = vsel %vm27017_vm7, %v18135_v39, %v8495_v44  ;;  %v8327_v20 = vsel %vm8326_vm3, 1065353216, %v8325_v16  ;;  %vm27019_vm15 = vcmp.eq.f32.partialorder %v18002_v27, 2139095040  ;;  %v8395_v42 = vmul.f32 %v11692_v4, %v17999_v34  ;;  %vm8336_vm3 = vmor %vm8334_vm12, %vm18327_vm11 }
 0x530   : > { %27018 = vst [vmem:[#allocation114_spill] sm:$0xff] %v18977_v23  ;;  %v3127_v24 = vsub.f32 1.0, %v8496_v45  ;;  %v8328_v37 = vsel %vm27019_vm15, %v8327_v20, %v8321_v3  ;;  %11693 = vlog2.f32 %v18972_v2  ;;  %v2971_v1 = vmul.f32 %v18061_v26, %v18374_v63  ;;  %vm8338_vm1 = vmor %vm8311_vm8, %vm27022_vm10  ;;  %v19043_v45 = vpop.permute.xlu0 %2757 }
 0x531   : > { %v27020_v39 = vsub.f32 %v18023_v21, %v18351_v14  ;;  %v8333_v61 = vsel %vm8314_vm4, %v8332_v41, %v8328_v37  ;;  %vm8417_vm14 = vcmp.gt.f32.partialorder %v18850_v50, 1065353216  ;;  %v27021_v5 = vsub.f32 %v18028_v11, %v18351_v14  ;;  %vm27027_vm8 = vmmov %vm27017_vm7 }
 0x532   : > { %v3209_v28 = vand.u32 4294901760, %v3127_v24  ;;  %v8337_v63 = vsel %vm8336_vm3, 2143289344, %v8333_v61  ;;  %11695 = vpow2.f32 %v8395_v42  ;;  %v27023_v18 = vsub.f32 %v18023_v21, %v18353_v56 }
 0x533   : > { %v2911_v33 = vmul.f32 %v18038_v51, %v27020_v39  ;;  %v2912_v60 = vmul.f32 %v18046_v58, %v27021_v5  ;;  %v27024_v7 = vsub.f32 %v18028_v11, %v18353_v56  ;;  %v8339_v49 = vsel %vm8338_vm1, 1065353216, %v8337_v63 }
 0x534   : > { %v2909_v31 = vmul.f32 %v18038_v51, %v27023_v18  ;;  %vm8414_vm0 = vcmp.eq.f32.partialorder %v18128_v59, 0  ;;  %v19013_v55 = vpack.c.bf16 %v3209_v28, %v3205_v17  ;;  %v19015_v16 = vsub.f32 %v3127_v24, %v3209_v28 }
 0x535   : > { %v2910_v14 = vmul.f32 %v18046_v58, %v27024_v7  ;;  %v8340_v32 = vsel %vm27027_vm8, %v18099_v35, %v8339_v49  ;;  %vm27028_vm9 = vcmp.lt.f32.partialorder %v17999_v34, 0  ;;  %v19027_v56 = vand.u32 2147483647, %v18153_v40 }
 0x536   : > { %27025 = vst [vmem:[#allocation115_spill] sm:$0xff] %v19013_v55  ;;  %27026 = vst [vmem:[#allocation116_spill] sm:$0xff] %v19015_v16  ;;  %v19030_v38 = vadd.f32 1.0, %v18401_v9  ;;  %v19033_v17 = vadd.f32 1.0, %v18407_v43  ;;  %v3124_v44 = vsub.f32 1.0, %v8340_v32  ;;  %vm8573_vm5 = vcmp.gt.f32.partialorder %v18972_v2, 1065353216  ;;  %5030 = vmatprep.subr.bf16.mxu1 %v19013_v55  ;;  %5222 = vmatprep.subr.bf16.mxu0 %v19013_v55 }
 0x537   : > { %vm19022_vm4 = vmxor %vm27028_vm9, %vm8417_vm14  ;;  %v19039_v35 = vadd.f32 1.0, %v18421_v8  ;;  %v2976_v41 = vmul.f32 %v18061_v26, %v2911_v33  ;;  %v2977_v4 = vmul.f32 %v18061_v26, %v2912_v60  ;;  %11697 = vlog2.f32 %v19027_v56  ;;  %v27078_v55 = vld [vmem:[#allocation79_spill] sm:$0xff] }
 0x538   : > { %vm27031_vm2 = vmmov %vm27028_vm9  ;;  %v19056_v9 = vadd.f32 1.0, %v2971_v1  ;;  %v19059_v8 = vmul.f32 %v18061_v26, %v2909_v31  ;;  %v19065_v3 = vand.u32 4294901760, %v3124_v44  ;;  %vm25414_vm15 = vcmp.eq.f32.partialorder %v18157_v19, 0 }
 0x539   : > { %vm19051_vm12 = vmand %vm27031_vm2, %vm8414_vm0  ;;  %v19069_v20 = vmul.f32 %v18061_v26, %v2910_v14  ;;  %v19084_v1 = vand.u32 2147483647, %v18155_v48  ;;  %vm8413_vm10 = vcmp.lt.f32.partialorder %v18128_v59, 0  ;;  %v19094_v60 = vadd.f32 1.0, %v2976_v41 }
 0x53a   : > { %vm8428_vm7 = vmor %vm19051_vm12, %vm19022_vm4  ;;  %v19092_v61 = vsub.f32 %v3124_v44, %v19065_v3  ;;  %v11694_v5 = vpop.eup %11693  ;;  %v19096_v28 = vadd.f32 1.0, %v2977_v4  ;;  %vm8415_vm9 = vcmp.eq.f32.partialorder %v18128_v59, 1065353216  ;;  %vm8416_vm4 = vcmp.lt.s32.totalorder %v18128_v59, 0 }
 0x53b   : > { %vm27034_vm3 = vmmov %vm27031_vm2  ;;  %27038 = vst [vmem:[#allocation118_spill] sm:$0xff] %v19094_v60  ;;  %v8429_v63 = vsel %vm8428_vm7, 2139095040, %v26868_v62  ;;  %11699 = vlog2.f32 %v19084_v1  ;;  %v8551_v31 = vmul.f32 %v11694_v5, %v17999_v34  ;;  %v19116_v7 = vand.u32 2147483647, %v18151_v10 }
 0x53c   : > { %vm19079_vm14 = vmxor %vm27034_vm3, %vm8573_vm5  ;;  %27037 = vst [vmem:[#allocation117_spill] sm:$0xff] %v19092_v61  ;;  %v11696_v14 = vpop.eup %11695  ;;  %vm8430_vm7 = vcmp.eq.f32.partialorder %v18128_v59, 3212836864  ;;  %v8436_v49 = vsel %vm8413_vm10, %v18089_v13, %v18055_v46  ;;  %vm8438_vm3 = vcmp.ne.f32.partialorder %v18128_v59, %v18128_v59  ;;  %v19167_v18 = vand.u32 2147483647, %v18202_v25 }
 0x53d   : > { %vm27039_vm1 = vmmov %vm27031_vm2  ;;  %vm8418_vm2 = vcmp.eq.f32.partialorder %v18850_v50, 2139095040  ;;  %v8431_v52 = vsel %vm8430_vm7, 1065353216, %v8429_v63  ;;  %11701 = vpow2.f32 %v8551_v31  ;;  %vm8586_vm7 = vcmp.eq.f32.partialorder %v18157_v19, 3212836864 }
 0x53e   : > { %vm19103_vm8 = vmand %vm27039_vm1, %vm25414_vm15  ;;  %11703 = vlog2.f32 %v19116_v7  ;;  %vm25415_vm15 = vcmp.eq.f32.partialorder %v18153_v40, 0  ;;  %v19309_v0 = vand.u32 2147483647, %v27078_v55 }
 0x53f   : > { %vm8584_vm5 = vmor %vm19103_vm8, %vm19079_vm14  ;;  %vm8569_vm14 = vcmp.lt.f32.partialorder %v18157_v19, 0  ;;  %11705 = vlog2.f32 %v19167_v18 }
 0x540   : > { %vm8419_vm12 = vmand %vm8413_vm10, %vm18032_vm6  ;;  %v8585_v41 = vsel %vm8584_vm5, 2139095040, %v26868_v62  ;;  %vm8677_vm10 = vcmp.gt.f32.partialorder %v19027_v56, 1065353216  ;;  %v19162_v63 = vsel %vm8569_vm14, %v18089_v13, %v18055_v46 }
 0x541   : > { %v8420_v32 = vsel %vm8419_vm12, 2143289344, %v11696_v14  ;;  %vm8423_vm1 = vmand %vm8416_vm4, %vm18072_vm13  ;;  %v11698_v42 = vpop.eup %11697  ;;  %vm27044_vm4 = vcmp.eq.f32.partialorder %v17999_v34, 0  ;;  %v19169_v14 = vsel %vm8586_vm7, 1065353216, %v8585_v41  ;;  %vm27050_vm12 = vcmp.eq.f32.partialorder %v18002_v27, 2139095040 }
 0x542   : > { %v8422_v44 = vsel %vm8414_vm0, %v18109_v57, %v8420_v32  ;;  %vm19143_vm8 = vmor %vm8438_vm3, %vm18327_vm11  ;;  %vm8673_vm3 = vcmp.lt.f32.partialorder %v18153_v40, 0  ;;  %v8655_v32 = vmul.f32 %v11698_v42, %v17999_v34 }
 0x543   : > { %v8424_v4 = vxor.u32 2147483648, %v8422_v44  ;;  %vm19154_vm5 = vmor %vm8415_vm9, %vm27044_vm4  ;;  %vm27047_vm4 = vcmp.lt.f32.partialorder %v17999_v34, 0  ;;  %vm27059_vm9 = vcmp.eq.f32.partialorder %v17999_v34, 1065353216 }
 0x544   : > { %vm19178_vm0 = vmxor %vm27047_vm4, %vm8677_vm10  ;;  %11707 = vpow2.f32 %v8655_v32 }
 0x545   : > { %v8425_v31 = vsel %vm8423_vm1, %v8424_v4, %v8422_v44  ;;  %vm19188_vm1 = vmand %vm8569_vm14, %vm18032_vm6  ;;  %v19210_v4 = vsel %vm8673_vm3, %v18089_v13, %v18055_v46  ;;  %v11700_v42 = vpop.eup %11699 }
 0x546   : > { %v8432_v39 = vsel %vm27050_vm12, %v8431_v52, %v8425_v31  ;;  %vm27053_vm10 = vmmov %vm27047_vm4  ;;  %v8499_v31 = vmul.f32 %v11700_v42, %v17999_v34  ;;  %vm27063_vm4 = vcmp.eq.f32.partialorder %v17999_v34, 0 }
 0x547   : > { %v8437_v41 = vsel %vm8418_vm2, %v8436_v49, %v8432_v39  ;;  %vm19201_vm12 = vmand %vm27053_vm10, %vm25415_vm15  ;;  %v19222_v39 = vand.u32 2147483647, %v18188_v53 }
 0x548   : > { %v8441_v50 = vsel %vm19143_vm8, 2143289344, %v8437_v41  ;;  %vm8688_vm2 = vmor %vm19201_vm12, %vm19178_vm0  ;;  %vm27056_vm8 = vcmp.lt.s32.totalorder %v18157_v19, 0  ;;  %v11702_v41 = vpop.eup %11701  ;;  %vm27080_vm0 = vcmp.eq.f32.partialorder %v18155_v48, 0 }
 0x549   : > { %v8443_v49 = vsel %vm19154_vm5, 1065353216, %v8441_v50  ;;  %vm19231_vm7 = vmand %vm27056_vm8, %vm18072_vm13  ;;  %vm27060_vm5 = vcmp.ne.f32.partialorder %v18157_v19, %v18157_v19  ;;  %11709 = vlog2.f32 %v19222_v39  ;;  %v11704_v37 = vpop.eup %11703  ;;  %v8576_v24 = vsel %vm19188_vm1, 2143289344, %v11702_v41 }
 0x54a   : > { %v8444_v5 = vsel %vm27059_vm9, %v18128_v59, %v8443_v49  ;;  %vm19246_vm15 = vmor %vm27060_vm5, %vm18327_vm11  ;;  %vm27064_vm9 = vcmp.eq.f32.partialorder %v18157_v19, 1065353216  ;;  %v8689_v49 = vsel %vm8688_vm2, 2139095040, %v26868_v62  ;;  %11711 = vpow2.f32 %v8499_v31 }
 0x54b   : > { %v3126_v42 = vsub.f32 1.0, %v8444_v5  ;;  %vm19257_vm14 = vmor %vm27064_vm9, %vm27063_vm4  ;;  %vm27069_vm4 = vcmp.lt.f32.partialorder %v18155_v48, 0  ;;  %vm27074_vm1 = vcmp.eq.f32.partialorder %v18157_v19, 0  ;;  %v8603_v41 = vmul.f32 %v11704_v37, %v17999_v34 }
 0x54c   : > { %vm19265_vm5 = vmand %vm8673_vm3, %vm18032_vm6  ;;  %v19279_v5 = vsel %vm27069_vm4, %v18089_v13, %v18055_v46  ;;  %vm27070_vm3 = vcmp.gt.f32.partialorder %v19084_v1, 1065353216  ;;  %v8578_v44 = vsel %vm27074_vm1, %v18109_v57, %v8576_v24  ;;  %vm27079_vm4 = vcmp.eq.f32.partialorder %v18153_v40, 3212836864 }
 0x54d   : > { %vm27071_vm9 = vmmov %vm27053_vm10  ;;  %v3211_v33 = vand.u32 4294901760, %v3126_v42  ;;  %v8580_v22 = vxor.u32 2147483648, %v8578_v44  ;;  %v8691_v61 = vsel %vm27079_vm4, 1065353216, %v8689_v49  ;;  %11713 = vpow2.f32 %v8603_v41  ;;  %v11706_v49 = vpop.eup %11705 }
 0x54e   : > { %vm19287_vm8 = vmxor %vm27071_vm9, %vm27070_vm3  ;;  %vm27075_vm3 = vcmp.lt.s32.totalorder %v18153_v40, 0  ;;  %vm27089_vm2 = vcmp.lt.f32.partialorder %v18151_v10, 0  ;;  %11715 = vlog2.f32 %v19309_v0  ;;  %v8759_v41 = vmul.f32 %v11706_v49, %v17999_v34 }
 0x54f   : > { %vm19303_vm9 = vmand %vm27075_vm3, %vm18072_vm13  ;;  %v19324_v37 = vpack.c.bf16 %v3211_v33, %v19065_v3  ;;  %v19326_v16 = vsub.f32 %v3126_v42, %v3211_v33  ;;  %v8581_v23 = vsel %vm19231_vm7, %v8580_v22, %v8578_v44  ;;  %v27087_v3 = vmov 0  ;;  %v11708_v22 = vpop.eup %11707 }
 0x550   : > { %vm27081_vm1 = vmmov %vm27053_vm10  ;;  %v19349_v42 = vsel %vm27089_vm2, %v18089_v13, %v18055_v46  ;;  %vm27090_vm7 = vcmp.eq.f32.partialorder %v18002_v27, 2139095040  ;;  %v27093_v33 = vmov 0  ;;  %vm27095_vm10 = vcmp.lt.f32.partialorder %v18155_v48, 0 }
 0x551   : > { %vm19317_vm12 = vmand %vm27081_vm1, %vm27080_vm0  ;;  %27084 = vst [vmem:[#allocation79_spill] sm:$0xff] %v19324_v37  ;;  %vm27086_vm1 = vcmp.ne.f32.partialorder %v18153_v40, %v18153_v40  ;;  %5032 = vmatpush1.bf16.msra.mxu1 %v19324_v37  ;;  %5224 = vmatpush1.bf16.msra.mxu0 %v19324_v37  ;;  %v8588_v43 = vsel %vm27090_vm7, %v19169_v14, %v8581_v23  ;;  %vm27092_vm0 = vcmp.eq.f32.partialorder %v18153_v40, 1065353216  ;;  %v8680_v14 = vsel %vm19265_vm5, 2143289344, %v11708_v22 }
 0x552   : > { %27085 = vst [vmem:[#allocation119_spill] sm:$0xff] %v19326_v16  ;;  %vm19341_vm3 = vmor %vm27086_vm1, %vm18327_vm11  ;;  %vm27091_vm1 = vcmp.eq.f32.partialorder %v17999_v34, 0  ;;  %v27100_v37 = vmov 0  ;;  %vm27103_vm5 = vcmp.eq.f32.partialorder %v18153_v40, 0  ;;  %vm27104_vm7 = vcmp.gt.f32.partialorder %v19116_v7, 1065353216 }
 0x553   : > { %v27088_v3 = vsel %vm19341_vm3, 4294967295, %v27087_v3  ;;  %vm19363_vm2 = vmor %vm27092_vm0, %vm27091_vm1  ;;  %vm27098_vm0 = vcmp.eq.f32.partialorder %v18972_v2, 2139095040  ;;  %11717 = vpow2.f32 %v8759_v41  ;;  %v11710_v52 = vpop.eup %11709  ;;  %v27115_v41 = vld [vmem:[#allocation78_spill] sm:$0xff] }
 0x554   : > { %v27094_v33 = vsel %vm19363_vm2, 4294967295, %v27093_v33  ;;  %vm19371_vm4 = vmand %vm27095_vm10, %vm18032_vm6  ;;  %v8593_v23 = vsel %vm27098_vm0, %v19162_v63, %v8588_v43  ;;  %vm27099_vm10 = vcmp.lt.s32.totalorder %v18155_v48, 0  ;;  %v8682_v63 = vsel %vm27103_vm5, %v18109_v57, %v8680_v14  ;;  %v11712_v14 = vpop.eup %11711 }
 0x555   : > { %vm19387_vm1 = vmand %vm27099_vm10, %vm18072_vm13  ;;  %v8597_v2 = vsel %vm19246_vm15, 2143289344, %v8593_v23  ;;  %v8684_v24 = vxor.u32 2147483648, %v8682_v63  ;;  %vm27108_vm15 = vcmp.ne.f32.partialorder %v18155_v48, %v18155_v48  ;;  %v19440_v23 = vand.u32 2147483647, %v27115_v41 }
 0x556   : > { %v27101_v37 = vsel %vm19387_vm1, 4294967295, %v27100_v37  ;;  %vm27102_vm3 = vmor %vm19317_vm12, %vm19287_vm8  ;;  %vm27105_vm1 = vcmp.lt.f32.partialorder %v17999_v34, 0  ;;  %v8599_v32 = vsel %vm19257_vm14, 1065353216, %v8597_v2  ;;  %vm27116_vm5 = vcmp.eq.f32.partialorder %v17999_v34, 1065353216 }
 0x557   : > { %v8533_v49 = vsel %vm27102_vm3, 2139095040, %v26868_v62  ;;  %vm19408_vm2 = vmxor %vm27105_vm1, %vm27104_vm7  ;;  %vm27111_vm3 = vcmp.lt.f32.partialorder %v18151_v10, 0  ;;  %vm27114_vm1 = vcmp.lt.f32.partialorder %v18202_v25, 0  ;;  %v8600_v2 = vsel %vm27116_vm5, %v18157_v19, %v8599_v32 }
 0x558   : > { %vm19420_vm12 = vmor %vm27108_vm15, %vm18327_vm11  ;;  %v19437_v59 = vsel %vm27114_vm1, %v18089_v13, %v18055_v46  ;;  %vm27117_vm15 = vcmp.eq.f32.partialorder %v18155_v48, 3212836864  ;;  %vm27119_vm14 = vcmp.eq.f32.partialorder %v18155_v48, 1065353216  ;;  %vm27122_vm1 = vcmp.eq.f32.partialorder %v18151_v10, 0 }
 0x559   : > { %vm19428_vm7 = vmand %vm27111_vm3, %vm18032_vm6  ;;  %v8535_v16 = vsel %vm27117_vm15, 1065353216, %v8533_v49  ;;  %vm27118_vm3 = vcmp.eq.f32.partialorder %v17999_v34, 0  ;;  %vm27123_vm0 = vcmp.lt.f32.partialorder %v17999_v34, 0  ;;  %v8863_v19 = vmul.f32 %v11710_v52, %v17999_v34 }
 0x55a   : > { %vm19451_vm10 = vmor %vm27119_vm14, %vm27118_vm3  ;;  %v8685_v49 = vsel %vm19303_vm9, %v8684_v24, %v8682_v63  ;;  %v3129_v32 = vsub.f32 1.0, %v8600_v2  ;;  %v8524_v12 = vsel %vm19371_vm4, 2143289344, %v11712_v14  ;;  %vm27126_vm15 = vcmp.eq.f32.partialorder %v18002_v27, 2139095040 }
 0x55b   : > { %vm19459_vm8 = vmand %vm27123_vm0, %vm27122_vm1  ;;  %v8692_v36 = vsel %vm27126_vm15, %v8691_v61, %v8685_v49  ;;  %vm27127_vm3 = vcmp.eq.f32.partialorder %v18155_v48, 0  ;;  %vm27128_vm4 = vcmp.lt.s32.totalorder %v18151_v10, 0  ;;  %11719 = vpow2.f32 %v8863_v19 }
 0x55c   : > { %vm8636_vm0 = vmor %vm19459_vm8, %vm19408_vm2  ;;  %v8526_v52 = vsel %vm27127_vm3, %v18109_v57, %v8524_v12  ;;  %vm27131_vm15 = vcmp.eq.f32.partialorder %v19027_v56, 2139095040  ;;  %v3213_v12 = vand.u32 4294901760, %v3129_v32  ;;  %vm27132_vm3 = vcmp.ne.f32.partialorder %v18151_v10, %v18151_v10 }
 0x55d   : > { %vm19485_vm1 = vmand %vm27128_vm4, %vm18072_vm13  ;;  %v8697_v61 = vsel %vm27131_vm15, %v19210_v4, %v8692_v36  ;;  %v8528_v44 = vxor.u32 2147483648, %v8526_v52  ;;  %v27133_v63 = vmov 0  ;;  %vm27135_vm5 = vcmp.lt.f32.partialorder %v18202_v25, 0  ;;  %v11714_v36 = vpop.eup %11713 }
 0x55e   : > { %vm19499_vm4 = vmor %vm27132_vm3, %vm18327_vm11  ;;  %11721 = vlog2.f32 %v19440_v23  ;;  %vm27138_vm14 = vnez %v27088_v3  ;;  %v8637_v4 = vsel %vm8636_vm0, 2139095040, %v26868_v62  ;;  %vm27140_vm3 = vcmp.eq.f32.partialorder %v18151_v10, 1065353216  ;;  %v11716_v50 = vpop.eup %11715 }
 0x55f   : > { %v27134_v63 = vsel %vm19499_vm4, 4294967295, %v27133_v63  ;;  %vm19507_vm9 = vmand %vm27135_vm5, %vm18032_vm6  ;;  %v8701_v56 = vsel %vm27138_vm14, 2143289344, %v8697_v61  ;;  %vm27139_vm5 = vcmp.eq.f32.partialorder %v17999_v34, 0  ;;  %vm27143_vm15 = vcmp.gt.f32.partialorder %v19167_v18, 1065353216 }
 0x560   : > { %vm19525_vm6 = vmor %vm27140_vm3, %vm27139_vm5  ;;  %vm27144_vm4 = vcmp.lt.f32.partialorder %v17999_v34, 0  ;;  %vm8885_vm2 = vcmp.gt.f32.partialorder %v19222_v39, 1065353216  ;;  %vm27147_vm8 = vcmp.lt.f32.partialorder %v18188_v53, 0  ;;  %vm27148_vm0 = vnez %v27094_v33 }
 0x561   : > { %vm19533_vm14 = vmxor %vm27144_vm4, %vm27143_vm15  ;;  %v19543_v6 = vsel %vm27147_vm8, %v18089_v13, %v18055_v46  ;;  %v8703_v2 = vsel %vm27148_vm0, 1065353216, %v8701_v56  ;;  %v19547_v19 = vsub.f32 %v3129_v32, %v3213_v12  ;;  %vm27150_vm4 = vnez %v27101_v37 }
 0x562   : > { %v8529_v49 = vsel %vm27150_vm4, %v8528_v44, %v8526_v52  ;;  %v8628_v61 = vsel %vm19428_vm7, 2143289344, %v11714_v36  ;;  %vm27151_vm15 = vcmp.lt.s32.totalorder %v18202_v25, 0  ;;  %vm27154_vm3 = vcmp.eq.f32.partialorder %v17999_v34, 1065353216  ;;  %v11718_v36 = vpop.eup %11717 }
 0x563   : > { %27149 = vst [vmem:[#allocation78_spill] sm:$0xff] %v19547_v19  ;;  %vm19557_vm5 = vmand %vm27151_vm15, %vm18072_vm13  ;;  %v8704_v33 = vsel %vm27154_vm3, %v18153_v40, %v8703_v2  ;;  %vm27155_vm8 = vcmp.eq.f32.partialorder %v18002_v27, 2139095040  ;;  %vm27156_vm0 = vcmp.eq.f32.partialorder %v18151_v10, 0  ;;  %vm27157_vm7 = vcmp.eq.f32.partialorder %v18202_v25, 0 }
 0x564   : > { %v8536_v32 = vsel %vm27155_vm8, %v8535_v16, %v8529_v49  ;;  %v8630_v37 = vsel %vm27156_vm0, %v18109_v57, %v8628_v61  ;;  %vm27158_vm4 = vcmp.lt.f32.partialorder %v17999_v34, 0  ;;  %v8707_v52 = vmul.f32 %v11716_v50, %v17999_v34 }
 0x565   : > { %vm19573_vm11 = vmand %vm27158_vm4, %vm27157_vm7  ;;  %v3131_v44 = vsub.f32 1.0, %v8704_v33  ;;  %vm27161_vm15 = vcmp.eq.f32.partialorder %v19084_v1, 2139095040  ;;  %v8632_v16 = vxor.u32 2147483648, %v8630_v37  ;;  %vm27162_vm7 = vcmp.eq.f32.partialorder %v18151_v10, 3212836864  ;;  %v11720_v43 = vpop.eup %11719 }
 0x566   : > { %v8541_v40 = vsel %vm27161_vm15, %v19279_v5, %v8536_v32  ;;  %vm8792_vm8 = vmor %vm19573_vm11, %vm19533_vm14  ;;  %v8639_v50 = vsel %vm27162_vm7, 1065353216, %v8637_v4  ;;  %11723 = vpow2.f32 %v8707_v52  ;;  %v8784_v2 = vsel %vm19507_vm9, 2143289344, %v11718_v36 }
 0x567   : > { %v8545_v56 = vsel %vm19420_vm12, 2143289344, %v8541_v40  ;;  %vm19596_vm15 = vmxor %vm27158_vm4, %vm8885_vm2  ;;  %v3217_v5 = vand.u32 4294901760, %v3131_v44  ;;  %v8633_v4 = vsel %vm19485_vm1, %v8632_v16, %v8630_v37  ;;  %vm27165_vm12 = vnez %v26855_v15 }
 0x568   : > { %v8547_v22 = vsel %vm19451_vm10, 1065353216, %v8545_v56  ;;  %vm27166_vm2 = vcmp.ne.f32.partialorder %v18202_v25, %v18202_v25  ;;  %vm27169_vm10 = vmmov %vm27154_vm3  ;;  %vm27170_vm1 = vcmp.eq.f32.partialorder %v18002_v27, 2139095040  ;;  %vm27171_vm9 = vcmp.eq.f32.partialorder %v18202_v25, 0 }
 0x569   : > { %vm19613_vm7 = vmor %vm27166_vm2, %vm27165_vm12  ;;  %v8548_v30 = vsel %vm27169_vm10, %v18155_v48, %v8547_v22  ;;  %v8640_v31 = vsel %vm27170_vm1, %v8639_v50, %v8633_v4  ;;  %v8786_v24 = vsel %vm27171_vm9, %v18109_v57, %v8784_v2  ;;  %v8793_v61 = vsel %vm8792_vm8, 2139095040, %v26868_v62 }
 0x56a   : > { %vm27172_vm4 = vcmp.eq.f32.partialorder %v18188_v53, 0  ;;  %vm27173_vm10 = vcmp.lt.f32.partialorder %v17999_v34, 0  ;;  %v19641_v33 = vpack.c.bf16 %v3217_v5, %v3213_v12  ;;  %v19643_v32 = vsub.f32 %v3131_v44, %v3217_v5  ;;  %v11722_v12 = vpop.eup %11721 }
 0x56b   : > { %vm19637_vm0 = vmand %vm27173_vm10, %vm27172_vm4  ;;  %vm27178_vm1 = vcmp.eq.f32.partialorder %v19116_v7, 2139095040  ;;  %v3128_v37 = vsub.f32 1.0, %v8548_v30  ;;  %vm27179_vm14 = vnez %v27134_v63  ;;  %v8788_v40 = vxor.u32 2147483648, %v8786_v24  ;;  %v27182_v7 = vld [vmem:[#allocation83_spill] sm:$0xff]  ;;  %v27219_v30 = vld [vmem:[#allocation81_spill] sm:$0xff] }
 0x56c   : > { %27176 = vst [vmem:[#allocation120_spill] sm:$0xff] %v19641_v33  ;;  %27177 = vst [vmem:[#allocation121_spill] sm:$0xff] %v19643_v32  ;;  %v8645_v3 = vsel %vm27178_vm1, %v19349_v42, %v8640_v31  ;;  %vm27180_vm8 = vnez %v26827_v47  ;;  %vm27181_vm4 = vcmp.lt.f32.partialorder %v18188_v53, 0  ;;  %vm8729_vm10 = vcmp.gt.f32.partialorder %v19309_v0, 1065353216  ;;  %5034 = vmatprep.subr.bf16.mxu1 %v19641_v33  ;;  %5226 = vmatprep.subr.bf16.mxu0 %v19641_v33 }
 0x56d   : > { %vm8896_vm11 = vmor %vm19637_vm0, %vm19596_vm15  ;;  %v8649_v52 = vsel %vm27179_vm14, 2143289344, %v8645_v3  ;;  %v19660_v42 = vand.u32 2147483647, %v27182_v7  ;;  %v3215_v44 = vand.u32 4294901760, %v3128_v37  ;;  %vm27183_vm1 = vcmp.eq.f32.partialorder %v18202_v25, 3212836864 }
 0x56e   : > { %vm8887_vm9 = vmand %vm27181_vm4, %vm27180_vm8  ;;  %v8651_v63 = vsel %vm19525_vm6, 1065353216, %v8649_v52  ;;  %v8795_v16 = vsel %vm27183_vm1, 1065353216, %v8793_v61  ;;  %vm27184_vm14 = vcmp.eq.f32.partialorder %v17999_v34, 0  ;;  %vm27185_vm4 = vcmp.eq.f32.partialorder %v18202_v25, 1065353216 }
 0x56f   : > { %vm19672_vm2 = vmor %vm27185_vm4, %vm27184_vm14  ;;  %v8888_v56 = vsel %vm8887_vm9, 2143289344, %v11720_v43  ;;  %v8652_v50 = vsel %vm27154_vm3, %v18151_v10, %v8651_v63  ;;  %v8789_v14 = vsel %vm19557_vm5, %v8788_v40, %v8786_v24  ;;  %vm27188_vm6 = vcmp.eq.f32.partialorder %v18188_v53, 0 }
 0x570   : > { %v8890_v5 = vsel %vm27188_vm6, %v18109_v57, %v8888_v56  ;;  %vm27189_vm1 = vcmp.lt.s32.totalorder %v18188_v53, 0  ;;  %v8897_v22 = vsel %vm8896_vm11, 2139095040, %v26868_v62  ;;  %v3130_v10 = vsub.f32 1.0, %v8652_v50 }
 0x571   : > { %vm8891_vm14 = vmand %vm27189_vm1, %vm18072_vm13  ;;  %v19694_v4 = vsub.f32 %v3128_v37, %v3215_v44  ;;  %vm27191_vm5 = vcmp.eq.f32.partialorder %v18002_v27, 2139095040  ;;  %v8892_v2 = vxor.u32 2147483648, %v8890_v5  ;;  %vm27192_vm3 = vcmp.lt.f32.partialorder %v17999_v34, 0  ;;  %v11724_v37 = vpop.eup %11723 }
 0x572   : > { %v8796_v60 = vsel %vm27191_vm5, %v8795_v16, %v8789_v14  ;;  %vm19702_vm9 = vmxor %vm27192_vm3, %vm8729_vm10  ;;  %vm27195_vm4 = vcmp.eq.f32.partialorder %v19167_v18, 2139095040  ;;  %vm27196_vm0 = vcmp.ne.f32.partialorder %v18188_v53, %v18188_v53  ;;  %vm8725_vm11 = vcmp.lt.f32.partialorder %v27078_v55, 0 }
 0x573   : > { %27190 = vst [vmem:[#allocation83_spill] sm:$0xff] %v19694_v4  ;;  %v8801_v1 = vsel %vm27195_vm4, %v19437_v59, %v8796_v60  ;;  %vm19714_vm15 = vmor %vm27196_vm0, %vm27165_vm12  ;;  %v8811_v24 = vmul.f32 %v11722_v12, %v17999_v34  ;;  %11725 = vlog2.f32 %v19660_v42  ;;  %v3219_v61 = vand.u32 4294901760, %v3130_v10 }
 0x574   : > { %v8805_v18 = vsel %vm19613_vm7, 2143289344, %v8801_v1  ;;  %v8893_v59 = vsel %vm8891_vm14, %v8892_v2, %v8890_v5  ;;  %vm27199_vm10 = vcmp.eq.f32.partialorder %v18188_v53, 3212836864  ;;  %vm27200_vm6 = vcmp.eq.f32.partialorder %v27078_v55, 0  ;;  %vm27201_vm1 = vmmov %vm27192_vm3 }
 0x575   : > { %v8899_v48 = vsel %vm27199_vm10, 1065353216, %v8897_v22  ;;  %vm19729_vm5 = vmand %vm27201_vm1, %vm27200_vm6  ;;  %v8807_v43 = vsel %vm19672_vm2, 1065353216, %v8805_v18  ;;  %vm27204_vm3 = vcmp.eq.f32.partialorder %v18002_v27, 2139095040  ;;  %vm8728_vm7 = vcmp.lt.s32.totalorder %v27078_v55, 0 }
 0x576   : > { %v8900_v49 = vsel %vm27204_vm3, %v8899_v48, %v8893_v59  ;;  %vm8740_vm14 = vmor %vm19729_vm5, %vm19702_vm9  ;;  %11727 = vpow2.f32 %v8811_v24  ;;  %v19742_v52 = vpack.c.bf16 %v3219_v61, %v3215_v44  ;;  %v19744_v40 = vsub.f32 %v3130_v10, %v3219_v61 }
 0x577   : > { %vm27207_vm4 = vcmp.eq.f32.partialorder %v17999_v34, 1065353216  ;;  %vm27208_vm2 = vcmp.eq.f32.partialorder %v19222_v39, 2139095040  ;;  %vm8731_vm0 = vmand %vm8725_vm11, %vm27180_vm8  ;;  %vm27209_vm10 = vcmp.eq.f32.partialorder %v17999_v34, 0  ;;  %vm27210_vm6 = vcmp.eq.f32.partialorder %v18188_v53, 1065353216 }
 0x578   : > { %27205 = vst [vmem:[#allocation122_spill] sm:$0xff] %v19742_v52  ;;  %27206 = vst [vmem:[#allocation123_spill] sm:$0xff] %v19744_v40  ;;  %v8808_v12 = vsel %vm27207_vm4, %v18202_v25, %v8807_v43  ;;  %v8905_v63 = vsel %vm27208_vm2, %v19543_v6, %v8900_v49  ;;  %v8732_v36 = vsel %vm8731_vm0, 2143289344, %v11724_v37  ;;  %vm8750_vm3 = vcmp.ne.f32.partialorder %v27078_v55, %v27078_v55  ;;  %v19921_v49 = vpop.permute.xlu1 %2772 }
 0x579   : > { %v8909_v16 = vsel %vm19714_vm15, 2143289344, %v8905_v63  ;;  %vm8910_vm1 = vmor %vm27210_vm6, %vm27209_vm10  ;;  %v3133_v44 = vsub.f32 1.0, %v8808_v12  ;;  %5036 = vmatpush1.bf16.msra.mxu1 %v19742_v52  ;;  %5228 = vmatpush1.bf16.msra.mxu0 %v19742_v52  ;;  %vm27211_vm4 = vcmp.eq.f32.partialorder %v27078_v55, 0  ;;  %v8741_v6 = vsel %vm8740_vm14, 2139095040, %v26868_v62 }
 0x57a   : > { %v8911_v25 = vsel %vm8910_vm1, 1065353216, %v8909_v16  ;;  %v8734_v39 = vsel %vm27211_vm4, %v18109_v57, %v8732_v36  ;;  %vm8833_vm15 = vcmp.gt.f32.partialorder %v19440_v23, 1065353216  ;;  %vm27212_vm2 = vcmp.eq.f32.partialorder %v17999_v34, 1065353216  ;;  %vm8735_vm10 = vmand %vm8728_vm7, %vm18072_vm13 }
 0x57b   : > { %v8912_v56 = vsel %vm27212_vm2, %v18188_v53, %v8911_v25  ;;  %v3221_v50 = vand.u32 4294901760, %v3133_v44  ;;  %vm8727_vm0 = vcmp.eq.f32.partialorder %v27078_v55, 1065353216  ;;  %v8736_v14 = vxor.u32 2147483648, %v8734_v39  ;;  %vm19791_vm5 = vmor %vm8750_vm3, %vm27165_vm12 }
 0x57c   : > { %v3135_v5 = vsub.f32 1.0, %v8912_v56  ;;  %vm8730_vm6 = vcmp.eq.f32.partialorder %v19309_v0, 2139095040  ;;  %vm8742_vm9 = vcmp.eq.f32.partialorder %v27078_v55, 3212836864  ;;  %vm8830_vm14 = vcmp.eq.f32.partialorder %v27115_v41, 0 }
 0x57d   : > { %v19796_v22 = vsub.f32 %v3133_v44, %v3221_v50  ;;  %v8737_v10 = vsel %vm8735_vm10, %v8736_v14, %v8734_v39  ;;  %v8743_v60 = vsel %vm8742_vm9, 1065353216, %v8741_v6  ;;  %vm27216_vm7 = vcmp.lt.f32.partialorder %v17999_v34, 0  ;;  %v11726_v59 = vpop.eup %11725 }
 0x57e   : > { %vm19800_vm1 = vmxor %vm27216_vm7, %vm8833_vm15  ;;  %v19805_v1 = vand.u32 2147483647, %v27219_v30  ;;  %v3225_v31 = vand.u32 4294901760, %v3135_v5  ;;  %vm27220_vm3 = vcmp.eq.f32.partialorder %v18002_v27, 2139095040  ;;  %v8748_v61 = vsel %vm8725_vm11, %v18089_v13, %v18055_v46 }
 0x57f   : > { %27215 = vst [vmem:[#allocation124_spill] sm:$0xff] %v19796_v22  ;;  %v8744_v24 = vsel %vm27220_vm3, %v8743_v60, %v8737_v10  ;;  %vm27221_vm4 = vcmp.eq.f32.partialorder %v17999_v34, 0  ;;  %vm8829_vm2 = vcmp.lt.f32.partialorder %v27115_v41, 0  ;;  %v19823_v48 = vadd.f32 1.0, %v19059_v8  ;;  %vm27226_vm11 = vmmov %vm27216_vm7 }
 0x580   : > { %vm19817_vm15 = vmor %vm8727_vm0, %vm27221_vm4  ;;  %v27225_v3 = vsub.f32 %v18023_v21, %v19035_v29  ;;  %v8749_v43 = vsel %vm8730_vm6, %v8748_v61, %v8744_v24  ;;  %11729 = vlog2.f32 %v19805_v1  ;;  %v19840_v8 = vpack.c.bf16 %v3225_v31, %v3221_v50  ;;  %v11728_v16 = vpop.eup %11727 }
 0x581   : > { %27224 = vst [vmem:[#allocation81_spill] sm:$0xff] %v19823_v48  ;;  %vm19835_vm0 = vmand %vm27226_vm11, %vm8830_vm14  ;;  %v19842_v12 = vsub.f32 %v3135_v5, %v3225_v31  ;;  %v8753_v63 = vsel %vm19791_vm5, 2143289344, %v8749_v43  ;;  %v8967_v0 = vmul.f32 %v11726_v59, %v17999_v34  ;;  %v19852_v44 = vadd.f32 1.0, %v19069_v20 }
 0x582   : > { %v2915_v37 = vmul.f32 %v18038_v51, %v27225_v3  ;;  %27229 = vst [vmem:[#allocation125_spill] sm:$0xff] %v19840_v8  ;;  %vm8844_vm10 = vmor %vm19835_vm0, %vm19800_vm1  ;;  %v27231_v36 = vsub.f32 %v18028_v11, %v19035_v29  ;;  %v27232_v39 = vsub.f32 %v18023_v21, %v19043_v45  ;;  %v8755_v56 = vsel %vm19817_vm15, 1065353216, %v8753_v63  ;;  %5038 = vmatprep.subr.bf16.mxu1 %v19840_v8 }
 0x583   : > { %27230 = vst [vmem:[#allocation126_spill] sm:$0xff] %v19842_v12  ;;  %vm8835_vm6 = vmand %vm8829_vm2, %vm27180_vm8  ;;  %5230 = vmatprep.subr.bf16.mxu0 %v19840_v8  ;;  %vm27233_vm9 = vcmp.eq.f32.partialorder %v17999_v34, 1065353216  ;;  %vm8832_vm5 = vcmp.lt.s32.totalorder %v27115_v41, 0  ;;  %11731 = vpow2.f32 %v8967_v0  ;;  %v27234_v50 = vsub.f32 %v18028_v11, %v19043_v45  ;;  %v27235_v45 = vld [vmem:[#allocation82_spill] sm:$0xff] }
 0x584   : > { %v2916_v25 = vmul.f32 %v18046_v58, %v27231_v36  ;;  %v2913_v6 = vmul.f32 %v18038_v51, %v27232_v39  ;;  %v8756_v29 = vsel %vm27233_vm9, %v27078_v55, %v8755_v56  ;;  %v8836_v20 = vsel %vm8835_vm6, 2143289344, %v11728_v16  ;;  %v27243_v16 = vld [vmem:[#allocation80_spill] sm:$0xff] }
 0x585   : > { %v2914_v14 = vmul.f32 %v18046_v58, %v27234_v50  ;;  %v8838_v5 = vsel %vm8830_vm14, %v18109_v57, %v8836_v20  ;;  %v8845_v55 = vsel %vm8844_vm10, 2139095040, %v26868_v62  ;;  %v3132_v53 = vsub.f32 1.0, %v8756_v29  ;;  %vm8839_vm14 = vmand %vm8832_vm5, %vm18072_vm13 }
 0x586   : > { %v2980_v10 = vmul.f32 %v18061_v26, %v2915_v37  ;;  %v8840_v60 = vxor.u32 2147483648, %v8838_v5  ;;  %vm8854_vm7 = vcmp.ne.f32.partialorder %v27115_v41, %v27115_v41  ;;  %v19891_v31 = vand.u32 2147483647, %v27235_v45 }
 0x587   : > { %vm8831_vm3 = vcmp.eq.f32.partialorder %v27115_v41, 1065353216  ;;  %vm8846_vm4 = vcmp.eq.f32.partialorder %v27115_v41, 3212836864  ;;  %v3223_v2 = vand.u32 4294901760, %v3132_v53  ;;  %vm8989_vm1 = vcmp.gt.f32.partialorder %v19660_v42, 1065353216  ;;  %vm19908_vm0 = vmor %vm8854_vm7, %vm27165_vm12 }
 0x588   : > { %vm8834_vm15 = vcmp.eq.f32.partialorder %v19440_v23, 2139095040  ;;  %v8841_v24 = vsel %vm8839_vm14, %v8840_v60, %v8838_v5  ;;  %v8847_v61 = vsel %vm8846_vm4, 1065353216, %v8845_v55  ;;  %11733 = vlog2.f32 %v19891_v31 }
 0x589   : > { %vm27236_vm11 = vcmp.eq.f32.partialorder %v18002_v27, 2139095040  ;;  %v8852_v59 = vsel %vm8829_vm2, %v18089_v13, %v18055_v46  ;;  %v19912_v37 = vsub.f32 %v3132_v53, %v3223_v2  ;;  %vm8986_vm10 = vcmp.eq.f32.partialorder %v27182_v7, 0 }
 0x58a   : > { %v8848_v18 = vsel %vm27236_vm11, %v8847_v61, %v8841_v24  ;;  %v19916_v23 = vmul.f32 %v18061_v26, %v2916_v25  ;;  %v19919_v43 = vmul.f32 %v18061_v26, %v2913_v6  ;;  %vm27240_vm2 = vcmp.lt.f32.partialorder %v17999_v34, 0  ;;  %v11730_v39 = vpop.eup %11729  ;;  %v19937_v6 = vpop.permute.xlu0 %2767 }
 0x58b   : > { %27239 = vst [vmem:[#allocation82_spill] sm:$0xff] %v19912_v37  ;;  %v8853_v63 = vsel %vm8834_vm15, %v8852_v59, %v8848_v18  ;;  %vm19925_vm6 = vmxor %vm27240_vm2, %vm8989_vm1  ;;  %v19930_v36 = vand.u32 2147483647, %v27243_v16  ;;  %v19932_v56 = vadd.f32 1.0, %v2980_v10  ;;  %v19935_v25 = vmul.f32 %v18061_v26, %v2914_v14  ;;  %v27252_v18 = vld [vmem:[#allocation87_spill] sm:$0xff] }
 0x58c   : > { %v8857_v29 = vsel %vm19908_vm0, 2143289344, %v8853_v63  ;;  %vm27245_vm9 = vcmp.eq.f32.partialorder %v17999_v34, 0  ;;  %vm8985_vm7 = vcmp.lt.f32.partialorder %v27182_v7, 0  ;;  %vm8988_vm14 = vcmp.lt.s32.totalorder %v27182_v7, 0  ;;  %vm27246_vm4 = vmmov %vm27240_vm2 }
 0x58d   : > { %27244 = vst [vmem:[#allocation80_spill] sm:$0xff] %v19932_v56  ;;  %vm8858_vm5 = vmor %vm8831_vm3, %vm27245_vm9  ;;  %v9071_v14 = vmul.f32 %v11730_v39, %v17999_v34  ;;  %11735 = vlog2.f32 %v19930_v36  ;;  %vm27249_vm3 = vcmp.eq.f32.partialorder %v17999_v34, 1065353216  ;;  %vm9010_vm11 = vcmp.ne.f32.partialorder %v27182_v7, %v27182_v7  ;;  %v11732_v10 = vpop.eup %11731 }
 0x58e   : > { %v8859_v20 = vsel %vm8858_vm5, 1065353216, %v8857_v29  ;;  %vm19951_vm1 = vmand %vm27246_vm4, %vm8986_vm10  ;;  %vm9093_vm2 = vcmp.gt.f32.partialorder %v19805_v1, 1065353216  ;;  %vm8987_vm9 = vcmp.eq.f32.partialorder %v27182_v7, 1065353216  ;;  %v19988_v59 = vand.u32 2147483647, %v27252_v18 }
 0x58f   : > { %v8860_v53 = vsel %vm27249_vm3, %v27115_v41, %v8859_v20  ;;  %vm9000_vm15 = vmor %vm19951_vm1, %vm19925_vm6  ;;  %11737 = vpow2.f32 %v9071_v14  ;;  %vm9002_vm1 = vcmp.eq.f32.partialorder %v27182_v7, 3212836864  ;;  %v9008_v20 = vsel %vm8985_vm7, %v18089_v13, %v18055_v46 }
 0x590   : > { %v3134_v24 = vsub.f32 1.0, %v8860_v53  ;;  %vm8991_vm0 = vmand %vm8985_vm7, %vm27180_vm8  ;;  %v9001_v0 = vsel %vm9000_vm15, 2139095040, %v26868_v62  ;;  %11739 = vlog2.f32 %v19988_v59  ;;  %vm27260_vm15 = vcmp.eq.f32.partialorder %v17999_v34, 0 }
 0x591   : > { %v8992_v41 = vsel %vm8991_vm0, 2143289344, %v11732_v10  ;;  %vm19983_vm5 = vmand %vm8988_vm14, %vm18072_vm13  ;;  %vm25433_vm14 = vcmp.eq.f32.partialorder %v27219_v30, 0  ;;  %vm9089_vm7 = vcmp.lt.f32.partialorder %v27219_v30, 0  ;;  %v9003_v55 = vsel %vm9002_vm1, 1065353216, %v9001_v0 }
 0x592   : > { %v3227_v3 = vand.u32 4294901760, %v3134_v24  ;;  %v8994_v63 = vsel %vm8986_vm10, %v18109_v57, %v8992_v41  ;;  %vm19999_vm4 = vmor %vm9010_vm11, %vm27165_vm12  ;;  %vm27255_vm10 = vcmp.lt.f32.partialorder %v17999_v34, 0  ;;  %v11734_v14 = vpop.eup %11733  ;;  %vm9114_vm1 = vcmp.ne.f32.partialorder %v27219_v30, %v27219_v30 }
 0x593   : > { %v8996_v29 = vxor.u32 2147483648, %v8994_v63  ;;  %vm20011_vm3 = vmxor %vm27255_vm10, %vm9093_vm2  ;;  %vm9092_vm2 = vcmp.lt.s32.totalorder %v27219_v30, 0  ;;  %vm8933_vm0 = vcmp.lt.f32.partialorder %v27235_v45, 0 }
 0x594   : > { %v20016_v53 = vpack.c.bf16 %v3227_v3, %v3223_v2  ;;  %v20018_v10 = vsub.f32 %v3134_v24, %v3227_v3  ;;  %vm20024_vm11 = vmor %vm8987_vm9, %vm27260_vm15  ;;  %v8915_v24 = vmul.f32 %v11734_v14, %v17999_v34  ;;  %vm27265_vm9 = vcmp.eq.f32.partialorder %v18002_v27, 2139095040  ;;  %v27266_v3 = vld [vmem:[#allocation85_spill] sm:$0xff] }
 0x595   : > { %v8997_v60 = vsel %vm19983_vm5, %v8996_v29, %v8994_v63  ;;  %vm20037_vm6 = vmand %vm27255_vm10, %vm25433_vm14  ;;  %v20054_v63 = vand.u32 2147483647, %v27266_v3  ;;  %vm27267_vm10 = vcmp.eq.f32.partialorder %v19660_v42, 2139095040  ;;  %vm25436_vm14 = vcmp.eq.f32.partialorder %v27235_v45, 0 }
 0x596   : > { %27258 = vst [vmem:[#allocation87_spill] sm:$0xff] %v20016_v53  ;;  %27259 = vst [vmem:[#allocation127_spill] sm:$0xff] %v20018_v10  ;;  %5040 = vmatpush1.bf16.msra.mxu1 %v20016_v53  ;;  %5232 = vmatpush1.bf16.msra.mxu0 %v20016_v53  ;;  %v9004_v61 = vsel %vm27265_vm9, %v9003_v55, %v8997_v60  ;;  %11741 = vpow2.f32 %v8915_v24  ;;  %v27301_v42 = vmov 0 }
 0x597   : > { %vm9104_vm5 = vmor %vm20037_vm6, %vm20011_vm3  ;;  %v9009_v0 = vsel %vm27267_vm10, %v9008_v20, %v9004_v61  ;;  %v11736_v60 = vpop.eup %11735  ;;  %v9112_v20 = vsel %vm9089_vm7, %v18089_v13, %v18055_v46  ;;  %11743 = vlog2.f32 %v20054_v63  ;;  %vm27278_vm6 = vcmp.eq.f32.partialorder %v17999_v34, 1065353216 }
 0x598   : > { %vm20062_vm9 = vmand %vm9089_vm7, %vm27180_vm8  ;;  %v9013_v29 = vsel %vm19999_vm4, 2143289344, %v9009_v0  ;;  %v9105_v14 = vsel %vm9104_vm5, 2139095040, %v26868_v62  ;;  %v9019_v50 = vmul.f32 %v11736_v60, %v17999_v34  ;;  %vm27279_vm3 = vcmp.eq.f32.partialorder %v17999_v34, 0 }
 0x599   : > { %vm20075_vm10 = vmand %vm9092_vm2, %vm18072_vm13  ;;  %v9015_v39 = vsel %vm20024_vm11, 1065353216, %v9013_v29  ;;  %vm27274_vm11 = vcmp.gt.f32.partialorder %v19891_v31, 1065353216  ;;  %vm27275_vm2 = vcmp.lt.f32.partialorder %v17999_v34, 0  ;;  %v11738_v2 = vpop.eup %11737  ;;  %vm27280_vm5 = vcmp.eq.f32.partialorder %v27219_v30, 1065353216 }
 0x59a   : > { %vm20098_vm4 = vmor %vm9114_vm1, %vm27165_vm12  ;;  %v9016_v61 = vsel %vm27278_vm6, %v27182_v7, %v9015_v39  ;;  %v20129_v60 = vsel %vm8933_vm0, %v18089_v13, %v18055_v46  ;;  %v9096_v7 = vsel %vm20062_vm9, 2143289344, %v11738_v2  ;;  %11745 = vpow2.f32 %v9019_v50  ;;  %v27288_v2 = vld [vmem:[#allocation86_spill] sm:$0xff]  ;;  %v11740_v53 = vpop.eup %11739 }
 0x59b   : > { %vm20107_vm15 = vmxor %vm27275_vm2, %vm27274_vm11  ;;  %vm8936_vm11 = vcmp.lt.s32.totalorder %v27235_v45, 0  ;;  %v3137_v29 = vsub.f32 1.0, %v9016_v61  ;;  %vm27287_vm7 = vcmp.eq.f32.partialorder %v27219_v30, 3212836864  ;;  %v20154_v61 = vand.u32 2147483647, %v27288_v2 }
 0x59c   : > { %vm20119_vm1 = vmor %vm27280_vm5, %vm27279_vm3  ;;  %v9107_v55 = vsel %vm27287_vm7, 1065353216, %v9105_v14  ;;  %v9175_v52 = vmul.f32 %v11740_v53, %v17999_v34  ;;  %v27296_v53 = vmov 0 }
 0x59d   : > { %vm27283_vm6 = vmmov %vm27275_vm2  ;;  %vm27286_vm2 = vcmp.eq.f32.partialorder %v27219_v30, 0  ;;  %v20156_v50 = vand.u32 4294901760, %v3137_v29  ;;  %11747 = vlog2.f32 %v20154_v61 }
 0x59e   : > { %vm20137_vm3 = vmand %vm27283_vm6, %vm25436_vm14  ;;  %v9098_v5 = vsel %vm27286_vm2, %v18109_v57, %v9096_v7  ;;  %vm9041_vm14 = vcmp.gt.f32.partialorder %v19930_v36, 1065353216  ;;  %vm27295_vm6 = vcmp.lt.f32.partialorder %v27243_v16, 0  ;;  %11749 = vpow2.f32 %v9175_v52 }
 0x59f   : > { %v9100_v8 = vxor.u32 2147483648, %v9098_v5  ;;  %vm20162_vm2 = vmand %vm8933_vm0, %vm27180_vm8  ;;  %v20183_v10 = vsub.f32 %v3137_v29, %v20156_v50  ;;  %vm27299_vm0 = vcmp.eq.f32.partialorder %v18002_v27, 2139095040 }
 0x5a0   : > { %vm20172_vm5 = vmand %vm8936_vm11, %vm18072_vm13 }
 0x5a1   : > { %v9101_v33 = vsel %vm20075_vm10, %v9100_v8, %v9098_v5  ;;  %27293 = vst [vmem:[#allocation85_spill] sm:$0xff] %v20183_v10  ;;  %vm27294_vm11 = vmor %vm20137_vm3, %vm20107_vm15  ;;  %vm27300_vm15 = vcmp.ne.f32.partialorder %v27235_v45, %v27235_v45 }
 0x5a2   : > { %v8949_v37 = vsel %vm27294_vm11, 2139095040, %v26868_v62  ;;  %vm20196_vm7 = vmand %vm27295_vm6, %vm27180_vm8  ;;  %v9108_v5 = vsel %vm27299_vm0, %v9107_v55, %v9101_v33  ;;  %v11742_v33 = vpop.eup %11741 }
 0x5a3   : > { %v27297_v53 = vsel %vm20196_vm7, 4294967295, %v27296_v53  ;;  %vm27298_vm10 = vmmov %vm27295_vm6  ;;  %vm27303_vm6 = vcmp.lt.f32.partialorder %v17999_v34, 0  ;;  %vm27308_vm7 = vcmp.eq.f32.partialorder %v27235_v45, 1065353216  ;;  %v11744_v55 = vpop.eup %11743  ;;  %v8940_v10 = vsel %vm20162_vm2, 2143289344, %v11742_v33 }
 0x5a4   : > { %v20204_v8 = vsel %vm27298_vm10, %v18089_v13, %v18055_v46  ;;  %vm20213_vm3 = vmor %vm27300_vm15, %vm27165_vm12  ;;  %vm27306_vm15 = vcmp.eq.f32.partialorder %v19805_v1, 2139095040  ;;  %v27314_v1 = vld [vmem:[#allocation84_spill] sm:$0xff]  ;;  %vm27329_vm2 = vcmp.eq.f32.partialorder %v17999_v34, 0 }
 0x5a5   : > { %v27302_v42 = vsel %vm20213_vm3, 4294967295, %v27301_v42  ;;  %vm20219_vm11 = vmxor %vm27303_vm6, %vm9041_vm14  ;;  %v9113_v29 = vsel %vm27306_vm15, %v9112_v20, %v9108_v5  ;;  %vm27307_vm3 = vcmp.eq.f32.partialorder %v17999_v34, 0  ;;  %vm27311_vm6 = vcmp.lt.s32.totalorder %v27243_v16, 0 }
 0x5a6   : > { %vm20233_vm14 = vmor %vm27308_vm7, %vm27307_vm3  ;;  %v20248_v20 = vand.u32 2147483647, %v27314_v1  ;;  %v9117_v5 = vsel %vm20098_vm4, 2143289344, %v9113_v29  ;;  %vm27315_vm7 = vcmp.eq.f32.partialorder %v27235_v45, 3212836864  ;;  %vm27316_vm3 = vcmp.eq.f32.partialorder %v27243_v16, 0 }
 0x5a7   : > { %vm20241_vm10 = vmand %vm27311_vm6, %vm18072_vm13  ;;  %v8951_v12 = vsel %vm27315_vm7, 1065353216, %v8949_v37  ;;  %vm27317_vm6 = vcmp.lt.f32.partialorder %v17999_v34, 0  ;;  %v9119_v24 = vsel %vm20119_vm1, 1065353216, %v9117_v5  ;;  %vm27320_vm4 = vcmp.eq.f32.partialorder %v27235_v45, 0 }
 0x5a8   : > { %vm20260_vm9 = vmand %vm27317_vm6, %vm27316_vm3  ;;  %v8942_v14 = vsel %vm27320_vm4, %v18109_v57, %v8940_v10  ;;  %v9279_v37 = vmul.f32 %v11744_v55, %v17999_v34  ;;  %11751 = vlog2.f32 %v20248_v20  ;;  %vm27321_vm3 = vcmp.eq.f32.partialorder %v17999_v34, 1065353216  ;;  %v11746_v55 = vpop.eup %11745 }
 0x5a9   : > { %v9120_v0 = vsel %vm27321_vm3, %v27219_v30, %v9119_v24  ;;  %v8944_v33 = vxor.u32 2147483648, %v8942_v14  ;;  %vm27322_vm1 = vcmp.ne.f32.partialorder %v27243_v16, %v27243_v16  ;;  %v27323_v10 = vmov 0 }
 0x5aa   : > { %vm20286_vm6 = vmor %vm27322_vm1, %vm27165_vm12  ;;  %vm27325_vm4 = vcmp.lt.f32.partialorder %v27252_v18, 0  ;;  %v3139_v5 = vsub.f32 1.0, %v9120_v0  ;;  %vm27330_vm7 = vcmp.eq.f32.partialorder %v27243_v16, 1065353216  ;;  %11753 = vpow2.f32 %v9279_v37 }
 0x5ab   : > { %v27324_v10 = vsel %vm20286_vm6, 4294967295, %v27323_v10  ;;  %vm20294_vm15 = vmand %vm27325_vm4, %vm27180_vm8  ;;  %vm27334_vm8 = vcmp.lt.f32.partialorder %v17999_v34, 0  ;;  %v8945_v0 = vsel %vm20172_vm5, %v8944_v33, %v8942_v14  ;;  %v11748_v14 = vpop.eup %11747  ;;  %vm27348_vm5 = vcmp.eq.f32.partialorder %v19891_v31, 2139095040 }
 0x5ac   : > { %vm27328_vm3 = vmmov %vm27325_vm4  ;;  %vm27333_vm4 = vcmp.gt.f32.partialorder %v19988_v59, 1065353216  ;;  %v3233_v7 = vand.u32 4294901760, %v3139_v5  ;;  %v11750_v48 = vpop.eup %11749 }
 0x5ad   : > { %v20302_v30 = vsel %vm27328_vm3, %v18089_v13, %v18055_v46  ;;  %vm20310_vm0 = vmor %vm27330_vm7, %vm27329_vm2  ;;  %vm27337_vm2 = vnez %v27297_v53  ;;  %vm27339_vm7 = vcmp.lt.s32.totalorder %v27252_v18, 0  ;;  %vm27342_vm3 = vcmp.eq.f32.partialorder %v18002_v27, 2139095040 }
 0x5ae   : > { %vm20318_vm6 = vmxor %vm27334_vm8, %vm27333_vm4  ;;  %v9044_v4 = vsel %vm27337_vm2, 2143289344, %v11746_v55  ;;  %vm9301_vm2 = vcmp.gt.f32.partialorder %v20054_v63, 1065353216  ;;  %v8952_v22 = vsel %vm27342_vm3, %v8951_v12, %v8945_v0  ;;  %v27350_v55 = vld [vmem:[#allocation91_spill] sm:$0xff]  ;;  %v20377_v31 = vpack.c.bf16 %v3233_v7, %v20156_v50 }
 0x5af   : > { %vm27338_vm8 = vmor %vm20260_vm9, %vm20219_vm11  ;;  %vm27343_vm9 = vcmp.eq.f32.partialorder %v27243_v16, 0  ;;  %vm27344_vm11 = vcmp.eq.f32.partialorder %v27252_v18, 0  ;;  %v8957_v33 = vsel %vm27348_vm5, %v20129_v60, %v8952_v22  ;;  %v20374_v0 = vand.u32 2147483647, %v27350_v55 }
 0x5b0   : > { %v9053_v32 = vsel %vm27338_vm8, 2139095040, %v26868_v62  ;;  %vm20338_vm4 = vmand %vm27339_vm7, %vm18072_vm13  ;;  %v9046_v53 = vsel %vm27343_vm9, %v18109_v57, %v9044_v4  ;;  %vm27345_vm8 = vcmp.lt.f32.partialorder %v17999_v34, 0  ;;  %27351 = vst [vmem:[#allocation86_spill] sm:$0xff] %v20377_v31  ;;  %v20379_v60 = vsub.f32 %v3139_v5, %v3233_v7  ;;  %5042 = vmatprep.subr.bf16.mxu1 %v20377_v31  ;;  %5234 = vmatprep.subr.bf16.mxu0 %v20377_v31 }
 0x5b1   : > { %vm20354_vm7 = vmand %vm27345_vm8, %vm27344_vm11  ;;  %v9048_v12 = vxor.u32 2147483648, %v9046_v53  ;;  %vm27349_vm11 = vcmp.lt.f32.partialorder %v27266_v3, 0  ;;  %vm27353_vm5 = vnez %v27302_v42  ;;  %vm27354_vm8 = vcmp.eq.f32.partialorder %v27243_v16, 3212836864 }
 0x5b2   : > { %vm9208_vm9 = vmor %vm20354_vm7, %vm20318_vm6  ;;  %v20371_v4 = vsel %vm27349_vm11, %v18089_v13, %v18055_v46  ;;  %27352 = vst [vmem:[#allocation84_spill] sm:$0xff] %v20379_v60  ;;  %v8961_v22 = vsel %vm27353_vm5, 2143289344, %v8957_v33  ;;  %v9055_v19 = vsel %vm27354_vm8, 1065353216, %v9053_v32  ;;  %vm27355_vm3 = vcmp.lt.f32.partialorder %v17999_v34, 0  ;;  %v11752_v40 = vpop.eup %11751 }
 0x5b3   : > { %vm20389_vm11 = vmxor %vm27355_vm3, %vm9301_vm2  ;;  %v8963_v50 = vsel %vm20233_vm14, 1065353216, %v8961_v22  ;;  %v9049_v5 = vsel %vm20241_vm10, %v9048_v12, %v9046_v53  ;;  %vm27358_vm5 = vcmp.ne.f32.partialorder %v27252_v18, %v27252_v18  ;;  %v9123_v42 = vmul.f32 %v11748_v14, %v17999_v34 }
 0x5b4   : > { %vm20402_vm8 = vmor %vm27358_vm5, %vm27165_vm12  ;;  %11755 = vlog2.f32 %v20374_v0  ;;  %vm27361_vm10 = vcmp.eq.f32.partialorder %v17999_v34, 1065353216  ;;  %vm27362_vm14 = vcmp.eq.f32.partialorder %v18002_v27, 2139095040  ;;  %v9200_v7 = vsel %vm20294_vm15, 2143289344, %v11750_v48  ;;  %v11754_v22 = vpop.eup %11753 }
 0x5b5   : > { %v8964_v39 = vsel %vm27361_vm10, %v27235_v45, %v8963_v50  ;;  %v9056_v52 = vsel %vm27362_vm14, %v9055_v19, %v9049_v5  ;;  %v9209_v53 = vsel %vm9208_vm9, 2139095040, %v26868_v62  ;;  %vm27363_vm3 = vcmp.eq.f32.partialorder %v27266_v3, 0 }
 0x5b6   : > { %vm27364_vm5 = vcmp.lt.f32.partialorder %v17999_v34, 0  ;;  %vm27367_vm10 = vcmp.eq.f32.partialorder %v19930_v36, 2139095040  ;;  %v3136_v48 = vsub.f32 1.0, %v8964_v39  ;;  %vm27368_vm15 = vcmp.eq.f32.partialorder %v27252_v18, 0 }
 0x5b7   : > { %vm20428_vm2 = vmand %vm27364_vm5, %vm27363_vm3  ;;  %v9061_v19 = vsel %vm27367_vm10, %v20204_v8, %v9056_v52  ;;  %v9202_v45 = vsel %vm27368_vm15, %v18109_v57, %v9200_v7  ;;  %11757 = vpow2.f32 %v9123_v42  ;;  %vm27369_vm7 = vnez %v27324_v10 }
 0x5b8   : > { %v9065_v29 = vsel %vm27369_vm7, 2143289344, %v9061_v19  ;;  %v9204_v41 = vxor.u32 2147483648, %v9202_v45  ;;  %vm27370_vm9 = vcmp.eq.f32.partialorder %v17999_v34, 0  ;;  %vm27371_vm14 = vcmp.eq.f32.partialorder %v27252_v18, 1065353216 }
 0x5b9   : > { %vm20448_vm3 = vmor %vm27371_vm14, %vm27370_vm9  ;;  %vm9322_vm10 = vcmp.ne.f32.partialorder %v27266_v3, %v27266_v3  ;;  %vm25451_vm15 = vcmp.lt.f32.partialorder %v27288_v2, 0  ;;  %v9067_v8 = vsel %vm20310_vm0, 1065353216, %v9065_v29  ;;  %v3231_v10 = vand.u32 4294901760, %v3136_v48 }
 0x5ba   : > { %vm27374_vm7 = vnez %v26827_v47  ;;  %vm27375_vm6 = vcmp.lt.f32.partialorder %v27266_v3, 0  ;;  %vm9145_vm9 = vcmp.gt.f32.partialorder %v20154_v61, 1065353216  ;;  %v9227_v12 = vmul.f32 %v11752_v40, %v17999_v34 }
 0x5bb   : > { %vm20462_vm1 = vmand %vm27375_vm6, %vm27374_vm7  ;;  %vm27378_vm14 = vcmp.eq.f32.partialorder %v17999_v34, 1065353216  ;;  %v9205_v24 = vsel %vm20338_vm4, %v9204_v41, %v9202_v45  ;;  %vm27379_vm0 = vcmp.eq.f32.partialorder %v27252_v18, 3212836864  ;;  %vm27380_vm6 = vcmp.lt.s32.totalorder %v27266_v3, 0 }
 0x5bc   : > { %v9068_v50 = vsel %vm27378_vm14, %v27243_v16, %v9067_v8  ;;  %v9211_v5 = vsel %vm27379_vm0, 1065353216, %v9209_v53  ;;  %vm20479_vm5 = vmand %vm27380_vm6, %vm18072_vm13  ;;  %v20489_v39 = vsub.f32 %v3136_v48, %v3231_v10  ;;  %vm27385_vm4 = vcmp.eq.f32.partialorder %v18002_v27, 2139095040 }
 0x5bd   : > { %vm27383_vm14 = vmor %vm20428_vm2, %vm20389_vm11  ;;  %v3138_v37 = vsub.f32 1.0, %v9068_v50  ;;  %v9212_v52 = vsel %vm27385_vm4, %v9211_v5, %v9205_v24  ;;  %v9304_v7 = vsel %vm20462_vm1, 2143289344, %v11754_v22  ;;  %vm27388_vm11 = vcmp.eq.f32.partialorder %v19988_v59, 2139095040  ;;  %v27406_v24 = vld [vmem:[#allocation89_spill] sm:$0xff] }
 0x5be   : > { %v9313_v16 = vsel %vm27383_vm14, 2139095040, %v26868_v62  ;;  %27384 = vst [vmem:[#allocation91_spill] sm:$0xff] %v20489_v39  ;;  %vm20500_vm0 = vmor %vm9322_vm10, %vm27165_vm12  ;;  %v9217_v56 = vsel %vm27388_vm11, %v20302_v30, %v9212_v52  ;;  %vm27389_vm2 = vcmp.eq.f32.partialorder %v27266_v3, 0  ;;  %vm27390_vm6 = vcmp.eq.f32.partialorder %v17999_v34, 0  ;;  %v11756_v41 = vpop.eup %11755 }
 0x5bf   : > { %v9306_v14 = vsel %vm27389_vm2, %v18109_v57, %v9304_v7  ;;  %vm27391_vm1 = vcmp.eq.f32.partialorder %v27266_v3, 1065353216  ;;  %vm9142_vm10 = vcmp.eq.f32.partialorder %v27288_v2, 0  ;;  %11759 = vpow2.f32 %v9227_v12 }
 0x5c0   : > { %vm20514_vm14 = vmor %vm27391_vm1, %vm27390_vm6  ;;  %v3235_v48 = vand.u32 4294901760, %v3138_v37  ;;  %v9221_v59 = vsel %vm20402_vm8, 2143289344, %v9217_v56  ;;  %v9308_v30 = vxor.u32 2147483648, %v9306_v14  ;;  %vm9144_vm4 = vcmp.lt.s32.totalorder %v27288_v2, 0 }
 0x5c1   : > { %vm27394_vm11 = vcmp.lt.f32.partialorder %v17999_v34, 0  ;;  %v9223_v40 = vsel %vm20448_vm3, 1065353216, %v9221_v59  ;;  %vm27397_vm6 = vcmp.eq.f32.partialorder %v27266_v3, 3212836864  ;;  %vm20538_vm8 = vmand %vm25451_vm15, %vm27374_vm7  ;;  %vm9249_vm1 = vcmp.gt.f32.partialorder %v20248_v20, 1065353216  ;;  %v11758_v42 = vpop.eup %11757 }
 0x5c2   : > { %vm20526_vm2 = vmxor %vm27394_vm11, %vm9145_vm9  ;;  %v9315_v29 = vsel %vm27397_vm6, 1065353216, %v9313_v16  ;;  %v20545_v8 = vpack.c.bf16 %v3235_v48, %v3231_v10  ;;  %v20547_v36 = vsub.f32 %v3138_v37, %v3235_v48  ;;  %vm27402_vm3 = vcmp.eq.f32.partialorder %v17999_v34, 1065353216 }
 0x5c3   : > { %v9224_v33 = vsel %vm27402_vm3, %v27252_v18, %v9223_v40  ;;  %v9309_v12 = vsel %vm20479_vm5, %v9308_v30, %v9306_v14  ;;  %vm20558_vm6 = vmand %vm27394_vm11, %vm9142_vm10  ;;  %vm27405_vm15 = vcmp.eq.f32.partialorder %v18002_v27, 2139095040  ;;  %v9383_v18 = vmul.f32 %v11756_v41, %v17999_v34 }
 0x5c4   : > { %27400 = vst [vmem:[#allocation128_spill] sm:$0xff] %v20545_v8  ;;  %27401 = vst [vmem:[#allocation129_spill] sm:$0xff] %v20547_v36  ;;  %v9316_v10 = vsel %vm27405_vm15, %v9315_v29, %v9309_v12  ;;  %v3141_v50 = vsub.f32 1.0, %v9224_v33  ;;  %v20570_v5 = vand.u32 2147483647, %v27406_v24  ;;  %5044 = vmatpush1.bf16.msra.mxu1 %v20545_v8  ;;  %5236 = vmatpush1.bf16.msra.mxu0 %v20545_v8  ;;  %vm27407_vm5 = vcmp.eq.f32.partialorder %v20054_v63, 2139095040 }
 0x5c5   : > { %v9321_v16 = vsel %vm27407_vm5, %v20371_v4, %v9316_v10  ;;  %vm20583_vm9 = vmand %vm9144_vm4, %vm18072_vm13  ;;  %vm9246_vm3 = vcmp.eq.f32.partialorder %v27314_v1, 0  ;;  %v9148_v63 = vsel %vm20538_vm8, 2143289344, %v11758_v42  ;;  %vm25452_vm5 = vcmp.lt.f32.partialorder %v27314_v1, 0  ;;  %v27425_v10 = vld [vmem:[#allocation90_spill] sm:$0xff] }
 0x5c6   : > { %v9325_v52 = vsel %vm20500_vm0, 2143289344, %v9321_v16  ;;  %v3237_v7 = vand.u32 4294901760, %v3141_v50  ;;  %vm20597_vm15 = vmxor %vm27394_vm11, %vm9249_vm1  ;;  %v9150_v53 = vsel %vm9142_vm10, %v18109_v57, %v9148_v63  ;;  %vm27413_vm4 = vcmp.ne.f32.partialorder %v27288_v2, %v27288_v2 }
 0x5c7   : > { %v9327_v56 = vsel %vm20514_vm14, 1065353216, %v9325_v52  ;;  %vm27412_vm0 = vmor %vm20558_vm6, %vm20526_vm2  ;;  %11761 = vpow2.f32 %v9383_v18  ;;  %vm27416_vm14 = vcmp.eq.f32.partialorder %v17999_v34, 1065353216  ;;  %v9152_v30 = vxor.u32 2147483648, %v9150_v53 }
 0x5c8   : > { %v9157_v14 = vsel %vm27412_vm0, 2139095040, %v26868_v62  ;;  %vm20617_vm8 = vmor %vm27413_vm4, %vm27165_vm12  ;;  %v9328_v19 = vsel %vm27416_vm14, %v27266_v3, %v9327_v56  ;;  %v20624_v59 = vsub.f32 %v3141_v50, %v3237_v7  ;;  %11763 = vlog2.f32 %v20570_v5 }
 0x5c9   : > { %vm27418_vm10 = vmmov %vm27394_vm11  ;;  %v3143_v40 = vsub.f32 1.0, %v9328_v19  ;;  %vm9158_vm1 = vcmp.eq.f32.partialorder %v27288_v2, 3212836864  ;;  %vm27421_vm6 = vcmp.lt.f32.partialorder %v27288_v2, 0  ;;  %v11760_v29 = vpop.eup %11759  ;;  %v9153_v32 = vsel %vm20583_vm9, %v9152_v30, %v9150_v53 }
 0x5ca   : > { %27417 = vst [vmem:[#allocation89_spill] sm:$0xff] %v20624_v59  ;;  %vm20630_vm2 = vmand %vm27418_vm10, %vm9246_vm3  ;;  %v9164_v3 = vsel %vm27421_vm6, %v18089_v13, %v18055_v46  ;;  %v9159_v41 = vsel %vm9158_vm1, 1065353216, %v9157_v14  ;;  %vm9270_vm14 = vcmp.ne.f32.partialorder %v27314_v1, %v27314_v1  ;;  %vm9405_vm10 = vcmp.gt.f32.partialorder %v20374_v0, 1065353216 }
 0x5cb   : > { %vm9251_vm4 = vmand %vm25452_vm5, %vm27374_vm7  ;;  %v3241_v33 = vand.u32 4294901760, %v3143_v40  ;;  %vm27422_vm6 = vcmp.eq.f32.partialorder %v18002_v27, 2139095040  ;;  %vm27423_vm0 = vcmp.eq.f32.partialorder %v17999_v34, 0  ;;  %vm27424_vm11 = vcmp.eq.f32.partialorder %v27288_v2, 1065353216 }
 0x5cc   : > { %v9160_v12 = vsel %vm27422_vm6, %v9159_v41, %v9153_v32  ;;  %vm9170_vm9 = vmor %vm27424_vm11, %vm27423_vm0  ;;  %v9252_v22 = vsel %vm9251_vm4, 2143289344, %v11760_v29  ;;  %v20661_v50 = vand.u32 2147483647, %v27425_v10  ;;  %vm27426_vm1 = vcmp.eq.f32.partialorder %v20154_v61, 2139095040 }
 0x5cd   : > { %v9165_v18 = vsel %vm27426_vm1, %v9164_v3, %v9160_v12  ;;  %v9254_v42 = vsel %vm9246_vm3, %v18109_v57, %v9252_v22  ;;  %vm27427_vm6 = vcmp.lt.s32.totalorder %v27314_v1, 0  ;;  %vm27430_vm11 = vmor %vm20630_vm2, %vm20597_vm15  ;;  %vm9402_vm0 = vcmp.eq.f32.partialorder %v27350_v55, 0  ;;  %v27445_v22 = vld [vmem:[#allocation88_spill] sm:$0xff] }
 0x5ce   : > { %vm20672_vm5 = vmand %vm27427_vm6, %vm18072_vm13  ;;  %v9261_v61 = vsel %vm27430_vm11, 2139095040, %v26868_v62  ;;  %v20683_v37 = vpack.c.bf16 %v3241_v33, %v3237_v7  ;;  %v20685_v52 = vsub.f32 %v3143_v40, %v3241_v33  ;;  %v9169_v63 = vsel %vm20617_vm8, 2143289344, %v9165_v18 }
 0x5cf   : > { %v9256_v56 = vxor.u32 2147483648, %v9254_v42  ;;  %vm27433_vm3 = vcmp.lt.f32.partialorder %v17999_v34, 0  ;;  %v9171_v4 = vsel %vm9170_vm9, 1065353216, %v9169_v63  ;;  %vm9262_vm15 = vcmp.eq.f32.partialorder %v27314_v1, 3212836864  ;;  %vm20703_vm2 = vmor %vm9270_vm14, %vm27165_vm12 }
 0x5d0   : > { %27431 = vst [vmem:[#allocation90_spill] sm:$0xff] %v20683_v37  ;;  %27432 = vst [vmem:[#allocation130_spill] sm:$0xff] %v20685_v52  ;;  %vm9401_vm8 = vcmp.lt.f32.partialorder %v27350_v55, 0  ;;  %11765 = vlog2.f32 %v20661_v50  ;;  %5046 = vmatprep.subr.bf16.mxu1 %v20683_v37  ;;  %5238 = vmatprep.subr.bf16.mxu0 %v20683_v37  ;;  %vm9247_vm9 = vcmp.eq.f32.partialorder %v27314_v1, 1065353216  ;;  %v9263_v19 = vsel %vm9262_vm15, 1065353216, %v9261_v61 }
 0x5d1   : > { %vm20693_vm4 = vmxor %vm27433_vm3, %vm9405_vm10  ;;  %vm27438_vm10 = vcmp.eq.f32.partialorder %v17999_v34, 1065353216  ;;  %v9257_v48 = vsel %vm20672_vm5, %v9256_v56, %v9254_v42  ;;  %vm9250_vm6 = vcmp.eq.f32.partialorder %v20248_v20, 2139095040  ;;  %vm27442_vm11 = vcmp.eq.f32.partialorder %v18002_v27, 2139095040  ;;  %v11762_v3 = vpop.eup %11761 }
 0x5d2   : > { %v9172_v14 = vsel %vm27438_vm10, %v27288_v2, %v9171_v4  ;;  %vm27439_vm14 = vmmov %vm27433_vm3  ;;  %v9264_v45 = vsel %vm27442_vm11, %v9263_v19, %v9257_v48  ;;  %vm27443_vm3 = vcmp.lt.f32.partialorder %v27314_v1, 0  ;;  %v2842_v29 = vsub.f32 %v18028_v11, %v19937_v6  ;;  %v11764_v20 = vpop.eup %11763 }
 0x5d3   : > { %vm20721_vm1 = vmand %vm27439_vm14, %vm9402_vm0  ;;  %v9268_v2 = vsel %vm27443_vm3, %v18089_v13, %v18055_v46  ;;  %v3140_v40 = vsub.f32 1.0, %v9172_v14  ;;  %vm9403_vm15 = vcmp.eq.f32.partialorder %v27350_v55, 1065353216  ;;  %vm9404_vm10 = vcmp.lt.s32.totalorder %v27350_v55, 0 }
 0x5d4   : > { %vm9416_vm5 = vmor %vm20721_vm1, %vm20693_vm4  ;;  %v9269_v32 = vsel %vm9250_vm6, %v9268_v2, %v9264_v45  ;;  %vm27444_vm4 = vcmp.eq.f32.partialorder %v17999_v34, 0  ;;  %v20751_v18 = vand.u32 2147483647, %v27445_v22  ;;  %v9487_v63 = vmul.f32 %v11764_v20, %v17999_v34 }
 0x5d5   : > { %vm9407_vm14 = vmand %vm9401_vm8, %vm27374_vm7  ;;  %v9273_v41 = vsel %vm20703_vm2, 2143289344, %v9269_v32  ;;  %v3239_v33 = vand.u32 4294901760, %v3140_v40  ;;  %v9417_v61 = vsel %vm9416_vm5, 2139095040, %v26868_v62  ;;  %vm27446_vm2 = vcmp.eq.f32.partialorder %v17999_v34, 1065353216 }
 0x5d6   : > { %vm9274_vm1 = vmor %vm9247_vm9, %vm27444_vm4  ;;  %v9408_v12 = vsel %vm9407_vm14, 2143289344, %v11762_v3  ;;  %vm9426_vm9 = vcmp.ne.f32.partialorder %v27350_v55, %v27350_v55  ;;  %vm9406_vm6 = vcmp.eq.f32.partialorder %v20374_v0, 2139095040  ;;  %vm9418_vm11 = vcmp.eq.f32.partialorder %v27350_v55, 3212836864 }
 0x5d7   : > { %v9275_v42 = vsel %vm9274_vm1, 1065353216, %v9273_v41  ;;  %v9410_v16 = vsel %vm9402_vm0, %v18109_v57, %v9408_v12  ;;  %v20761_v53 = vsub.f32 %v3140_v40, %v3239_v33  ;;  %vm9411_vm0 = vmand %vm9404_vm10, %vm18072_vm13  ;;  %11767 = vpow2.f32 %v9487_v63 }
 0x5d8   : > { %v9276_v56 = vsel %vm27446_vm2, %v27314_v1, %v9275_v42  ;;  %v9412_v4 = vxor.u32 2147483648, %v9410_v16  ;;  %v9419_v48 = vsel %vm9418_vm11, 1065353216, %v9417_v61  ;;  %vm9505_vm3 = vcmp.lt.f32.partialorder %v27406_v24, 0  ;;  %vm20781_vm10 = vmor %vm9426_vm9, %vm27165_vm12 }
 0x5d9   : > { %27447 = vst [vmem:[#allocation88_spill] sm:$0xff] %v20761_v53  ;;  %v3142_v7 = vsub.f32 1.0, %v9276_v56  ;;  %11769 = vlog2.f32 %v20751_v18  ;;  %vm27448_vm5 = vcmp.eq.f32.partialorder %v18002_v27, 2139095040  ;;  %v9424_v0 = vsel %vm9401_vm8, %v18089_v13, %v18055_v46  ;;  %vm9430_vm8 = vmor %vm9403_vm15, %vm27444_vm4 }
 0x5da   : > { %v9413_v14 = vsel %vm9411_vm0, %v9412_v4, %v9410_v16  ;;  %vm9509_vm14 = vcmp.gt.f32.partialorder %v20570_v5, 1065353216  ;;  %v11766_v45 = vpop.eup %11765  ;;  %v27451_v2 = vsub.f32 %v18023_v21, %v19921_v49  ;;  %vm25453_vm1 = vcmp.eq.f32.partialorder %v27406_v24, 0  ;;  %vm20806_vm9 = vmand %vm9505_vm3, %vm27374_vm7  ;;  %v27460_v4 = vld [vmem:[#allocation95_spill] sm:$0xff] }
 0x5db   : > { %v3243_v1 = vand.u32 4294901760, %v3142_v7  ;;  %v9420_v19 = vsel %vm27448_vm5, %v9419_v48, %v9413_v14  ;;  %vm9508_vm2 = vcmp.lt.s32.totalorder %v27406_v24, 0  ;;  %v9331_v42 = vmul.f32 %v11766_v45, %v17999_v34 }
 0x5dc   : > { %v2919_v40 = vmul.f32 %v18038_v51, %v27451_v2  ;;  %v9425_v3 = vsel %vm9406_vm6, %v9424_v0, %v9420_v19  ;;  %v20812_v16 = vadd.f32 1.0, %v19916_v23  ;;  %vm27457_vm15 = vcmp.lt.f32.partialorder %v17999_v34, 0  ;;  %vm20842_vm11 = vmand %vm9508_vm2, %vm18072_vm13 }
 0x5dd   : > { %v20796_v32 = vpack.c.bf16 %v3243_v1, %v3239_v33  ;;  %v20798_v20 = vsub.f32 %v3142_v7, %v3243_v1  ;;  %v9429_v41 = vsel %vm20781_vm10, 2143289344, %v9425_v3  ;;  %v27456_v33 = vsub.f32 %v18028_v11, %v19921_v49  ;;  %vm20822_vm6 = vmxor %vm27457_vm15, %vm9509_vm14 }
 0x5de   : > { %v9431_v63 = vsel %vm9430_vm8, 1065353216, %v9429_v41  ;;  %v20827_v7 = vand.u32 2147483647, %v27460_v4  ;;  %v27461_v23 = vsub.f32 %v18023_v21, %v19937_v6  ;;  %vm27462_vm0 = vcmp.eq.f32.partialorder %v17999_v34, 1065353216  ;;  %vm27465_vm14 = vmmov %vm27457_vm15 }
 0x5df   : > { %27452 = vst [vmem:[#allocation131_spill] sm:$0xff] %v20796_v32  ;;  %27453 = vst [vmem:[#allocation132_spill] sm:$0xff] %v20798_v20  ;;  %v2920_v61 = vmul.f32 %v18046_v58, %v27456_v33  ;;  %5048 = vmatpush1.bf16.msra.mxu1 %v20796_v32  ;;  %5240 = vmatpush1.bf16.msra.mxu0 %v20796_v32  ;;  %v9432_v49 = vsel %vm27462_vm0, %v27350_v55, %v9431_v63  ;;  %11771 = vpow2.f32 %v9331_v42 }
 0x5e0   : > { %v2917_v14 = vmul.f32 %v18038_v51, %v27461_v23  ;;  %vm9530_vm5 = vcmp.ne.f32.partialorder %v27406_v24, %v27406_v24  ;;  %v20849_v1 = vadd.f32 1.0, %v19919_v43  ;;  %vm9507_vm10 = vcmp.eq.f32.partialorder %v27406_v24, 1065353216  ;;  %vm20856_vm4 = vmand %vm27465_vm14, %vm25453_vm1 }
 0x5e1   : > { %v3145_v19 = vsub.f32 1.0, %v9432_v49  ;;  %11773 = vlog2.f32 %v20827_v7  ;;  %v20862_v0 = vadd.f32 1.0, %v19935_v25  ;;  %v20865_v30 = vmul.f32 %v18061_v26, %v2919_v40  ;;  %vm20883_vm15 = vmor %vm9530_vm5, %vm27165_vm12  ;;  %v11768_v40 = vpop.eup %11767 }
 0x5e2   : > { %v20871_v43 = vmul.f32 %v18046_v58, %v2842_v29  ;;  %vm9353_vm2 = vcmp.gt.f32.partialorder %v20661_v50, 1065353216  ;;  %v20879_v45 = vmul.f32 %v18061_v26, %v2920_v61  ;;  %v27470_v29 = vld [vmem:[#allocation93_spill] sm:$0xff]  ;;  %v20894_v3 = vmul.f32 %v18061_v26, %v2917_v14 }
 0x5e3   : > { %v20887_v6 = vand.u32 4294901760, %v3145_v19  ;;  %v20891_v2 = vand.u32 2147483647, %v27470_v29  ;;  %vm27471_vm5 = vcmp.eq.f32.partialorder %v17999_v34, 0  ;;  %vm25456_vm0 = vcmp.eq.f32.partialorder %v27425_v10, 0  ;;  %v11770_v42 = vpop.eup %11769 }
 0x5e4   : > { %vm20902_vm1 = vmor %vm9507_vm10, %vm27471_vm5  ;;  %v9512_v33 = vsel %vm20806_vm9, 2143289344, %v11768_v40  ;;  %v9528_v61 = vsel %vm9505_vm3, %v18089_v13, %v18055_v46  ;;  %vm27478_vm9 = vcmp.eq.f32.partialorder %v27406_v24, 0  ;;  %vm27486_vm8 = vcmp.lt.f32.partialorder %v27425_v10, 0 }
 0x5e5   : > { %v20914_v63 = vsub.f32 %v3145_v19, %v20887_v6  ;;  %vm27475_vm10 = vmmov %vm27465_vm14  ;;  %11775 = vlog2.f32 %v20891_v2  ;;  %v9514_v12 = vsel %vm27478_vm9, %v18109_v57, %v9512_v33  ;;  %v9435_v19 = vmul.f32 %v11770_v42, %v17999_v34  ;;  %v27487_v42 = vld [vmem:[#allocation94_spill] sm:$0xff] }
 0x5e6   : > { %vm20920_vm5 = vmxor %vm27475_vm10, %vm9353_vm2  ;;  %vm27480_vm2 = vcmp.lt.f32.partialorder %v27425_v10, 0  ;;  %v9516_v40 = vxor.u32 2147483648, %v9514_v12  ;;  %v9372_v55 = vsel %vm27486_vm8, %v18089_v13, %v18055_v46  ;;  %v20967_v33 = vand.u32 2147483647, %v27487_v42 }
 0x5e7   : > { %27474 = vst [vmem:[#allocation95_spill] sm:$0xff] %v20914_v63  ;;  %vm27479_vm3 = vmor %vm20856_vm4, %vm20822_vm6  ;;  %11777 = vpow2.f32 %v9435_v19  ;;  %vm27492_vm9 = vcmp.eq.f32.partialorder %v18002_v27, 2139095040  ;;  %vm27495_vm8 = vcmp.eq.f32.partialorder %v20570_v5, 2139095040 }
 0x5e8   : > { %v9521_v14 = vsel %vm27479_vm3, 2139095040, %v26868_v62  ;;  %vm20939_vm10 = vmand %vm27480_vm2, %vm27374_vm7  ;;  %vm9374_vm2 = vcmp.ne.f32.partialorder %v27425_v10, %v27425_v10  ;;  %v9517_v32 = vsel %vm20842_vm11, %v9516_v40, %v9514_v12  ;;  %vm27489_vm3 = vcmp.lt.s32.totalorder %v27425_v10, 0 }
 0x5e9   : > { %vm27483_vm6 = vmmov %vm27465_vm14  ;;  %vm27488_vm14 = vcmp.eq.f32.partialorder %v27406_v24, 3212836864  ;;  %v11772_v19 = vpop.eup %11771  ;;  %11779 = vlog2.f32 %v20967_v33 }
 0x5ea   : > { %vm20949_vm4 = vmand %vm27483_vm6, %vm25456_vm0  ;;  %v9523_v37 = vsel %vm27488_vm14, 1065353216, %v9521_v14  ;;  %vm9457_vm6 = vcmp.gt.f32.partialorder %v20751_v18, 1065353216  ;;  %v9356_v31 = vsel %vm20939_vm10, 2143289344, %v11772_v19  ;;  %vm27498_vm14 = vcmp.eq.f32.partialorder %v27425_v10, 1065353216  ;;  %v27506_v19 = vld [vmem:[#allocation92_spill] sm:$0xff] }
 0x5eb   : > { %vm20977_vm0 = vmand %vm27489_vm3, %vm18072_vm13  ;;  %v9524_v48 = vsel %vm27492_vm9, %v9523_v37, %v9517_v32  ;;  %v11774_v14 = vpop.eup %11773  ;;  %vm27503_vm10 = vcmp.lt.f32.partialorder %v17999_v34, 0  ;;  %v27539_v32 = vmov 0 }
 0x5ec   : > { %vm20987_vm11 = vmor %vm9374_vm2, %vm27165_vm12  ;;  %v9529_v40 = vsel %vm27495_vm8, %v9528_v61, %v9524_v48  ;;  %vm27497_vm2 = vcmp.eq.f32.partialorder %v17999_v34, 0  ;;  %vm27501_vm8 = vcmp.lt.f32.partialorder %v27445_v22, 0  ;;  %v9591_v56 = vmul.f32 %v11774_v14, %v17999_v34 }
 0x5ed   : > { %vm27496_vm9 = vmor %vm20949_vm4, %vm20920_vm5  ;;  %v21016_v5 = vsel %vm27501_vm8, %v18089_v13, %v18055_v46  ;;  %v9533_v61 = vsel %vm20883_vm15, 2143289344, %v9529_v40  ;;  %vm27502_vm5 = vcmp.eq.f32.partialorder %v27425_v10, 0  ;;  %v21033_v48 = vand.u32 2147483647, %v27506_v19 }
 0x5ee   : > { %v9365_v37 = vsel %vm27496_vm9, 2139095040, %v26868_v62  ;;  %vm21008_vm3 = vmor %vm27498_vm14, %vm27497_vm2  ;;  %v9358_v23 = vsel %vm27502_vm5, %v18109_v57, %v9356_v31  ;;  %v9535_v25 = vsel %vm20902_vm1, 1065353216, %v9533_v61  ;;  %vm9478_vm9 = vcmp.ne.f32.partialorder %v27445_v22, %v27445_v22 }
 0x5ef   : > { %vm21027_vm4 = vmxor %vm27503_vm10, %vm9457_vm6  ;;  %v9360_v40 = vxor.u32 2147483648, %v9358_v23  ;;  %vm27511_vm1 = vcmp.eq.f32.partialorder %v27425_v10, 3212836864  ;;  %vm27512_vm5 = vcmp.eq.f32.partialorder %v27445_v22, 0  ;;  %11781 = vpow2.f32 %v9591_v56  ;;  %v11776_v63 = vpop.eup %11775 }
 0x5f0   : > { %vm27507_vm15 = vmmov %vm27501_vm8  ;;  %vm27510_vm8 = vcmp.eq.f32.partialorder %v17999_v34, 1065353216  ;;  %v9367_v14 = vsel %vm27511_vm1, 1065353216, %v9365_v37  ;;  %11783 = vlog2.f32 %v21033_v48  ;;  %vm27516_vm6 = vcmp.lt.s32.totalorder %v27445_v22, 0 }
 0x5f1   : > { %vm21041_vm14 = vmand %vm27507_vm15, %vm27374_vm7  ;;  %v9536_v41 = vsel %vm27510_vm8, %v27406_v24, %v9535_v25  ;;  %v9361_v53 = vsel %vm20977_vm0, %v9360_v40, %v9358_v23  ;;  %v9695_v37 = vmul.f32 %v11776_v63, %v17999_v34  ;;  %vm27519_vm1 = vcmp.eq.f32.partialorder %v20661_v50, 2139095040  ;;  %v11778_v63 = vpop.eup %11777 }
 0x5f2   : > { %vm21058_vm15 = vmand %vm27503_vm10, %vm27512_vm5  ;;  %v3147_v20 = vsub.f32 1.0, %v9536_v41  ;;  %vm27515_vm5 = vcmp.eq.f32.partialorder %v18002_v27, 2139095040  ;;  %v27520_v56 = vmov 0  ;;  %vm27525_vm0 = vcmp.eq.f32.partialorder %v27445_v22, 1065353216 }
 0x5f3   : > { %v9368_v24 = vsel %vm27515_vm5, %v9367_v14, %v9361_v53  ;;  %vm21078_vm2 = vmand %vm27516_vm6, %vm18072_vm13  ;;  %vm27522_vm6 = vcmp.lt.f32.partialorder %v27460_v4, 0  ;;  %11785 = vpow2.f32 %v9695_v37  ;;  %v9460_v61 = vsel %vm21041_vm14, 2143289344, %v11778_v63  ;;  %v11780_v37 = vpop.eup %11779 }
 0x5f4   : > { %v3249_v23 = vand.u32 4294901760, %v3147_v20  ;;  %v9373_v53 = vsel %vm27519_vm1, %v9372_v55, %v9368_v24  ;;  %vm21092_vm5 = vmor %vm9478_vm9, %vm27165_vm12  ;;  %v21100_v25 = vsel %vm27522_vm6, %v18089_v13, %v18055_v46  ;;  %vm27524_vm1 = vcmp.eq.f32.partialorder %v17999_v34, 0 }
 0x5f5   : > { %v27521_v56 = vsel %vm21092_vm5, 4294967295, %v27520_v56  ;;  %v9377_v50 = vsel %vm20987_vm11, 2143289344, %v9373_v53  ;;  %vm27523_vm9 = vmor %vm21058_vm15, %vm21027_vm4  ;;  %vm27528_vm6 = vcmp.gt.f32.partialorder %v20827_v7, 1065353216  ;;  %vm9717_vm4 = vcmp.gt.f32.partialorder %v20891_v2, 1065353216 }
 0x5f6   : > { %v9469_v55 = vsel %vm27523_vm9, 2139095040, %v26868_v62  ;;  %vm21115_vm8 = vmor %vm27525_vm0, %vm27524_vm1  ;;  %v21130_v49 = vpack.c.bf16 %v3249_v23, %v20887_v6  ;;  %v21132_v41 = vsub.f32 %v3147_v20, %v3249_v23  ;;  %v9379_v14 = vsel %vm21008_vm3, 1065353216, %v9377_v50 }
 0x5f7   : > { %vm21123_vm11 = vmxor %vm27503_vm10, %vm27528_vm6  ;;  %vm27533_vm15 = vcmp.lt.f32.partialorder %v27460_v4, 0  ;;  %vm27536_vm0 = vcmp.eq.f32.partialorder %v17999_v34, 1065353216  ;;  %vm27537_vm9 = vcmp.eq.f32.partialorder %v27445_v22, 0  ;;  %vm27538_vm3 = vcmp.lt.s32.totalorder %v27460_v4, 0 }
 0x5f8   : > { %27531 = vst [vmem:[#allocation93_spill] sm:$0xff] %v21130_v49  ;;  %27532 = vst [vmem:[#allocation94_spill] sm:$0xff] %v21132_v41  ;;  %v9380_v20 = vsel %vm27536_vm0, %v27425_v10, %v9379_v14  ;;  %v9462_v6 = vsel %vm27537_vm9, %v18109_v57, %v9460_v61  ;;  %vm27541_vm1 = vcmp.eq.f32.partialorder %v27460_v4, 0  ;;  %vm27542_vm6 = vcmp.lt.f32.partialorder %v17999_v34, 0  ;;  %v27545_v10 = vld [vmem:[#allocation99_spill] sm:$0xff]  ;;  %5050 = vmatprep.subr.bf16.mxu1 %v21130_v49 }
 0x5f9   : > { %vm21142_vm10 = vmand %vm27533_vm15, %vm27374_vm7  ;;  %v21171_v23 = vand.u32 2147483647, %v27545_v10  ;;  %5242 = vmatprep.subr.bf16.mxu0 %v21130_v49  ;;  %v9464_v53 = vxor.u32 2147483648, %v9462_v6  ;;  %v3144_v63 = vsub.f32 1.0, %v9380_v20  ;;  %v9539_v50 = vmul.f32 %v11780_v37, %v17999_v34  ;;  %v11782_v41 = vpop.eup %11781 }
 0x5fa   : > { %vm21156_vm14 = vmand %vm27538_vm3, %vm18072_vm13  ;;  %vm27550_vm3 = vcmp.lt.f32.partialorder %v27470_v29, 0  ;;  %v27552_v49 = vmov 0  ;;  %vm27560_vm5 = vcmp.lt.f32.partialorder %v17999_v34, 0  ;;  %v11784_v12 = vpop.eup %11783 }
 0x5fb   : > { %v27540_v32 = vsel %vm21156_vm14, 4294967295, %v27539_v32  ;;  %vm21164_vm15 = vmand %vm27542_vm6, %vm27541_vm1  ;;  %vm27546_vm1 = vcmp.eq.f32.partialorder %v27445_v22, 3212836864  ;;  %v21197_v37 = vsel %vm27550_vm3, %v18089_v13, %v18055_v46  ;;  %11787 = vlog2.f32 %v21171_v23 }
 0x5fc   : > { %vm9624_vm9 = vmor %vm21164_vm15, %vm21123_vm11  ;;  %v9471_v14 = vsel %vm27546_vm1, 1065353216, %v9469_v55  ;;  %v9465_v55 = vsel %vm21078_vm2, %v9464_v53, %v9462_v6  ;;  %v3247_v20 = vand.u32 4294901760, %v3144_v63  ;;  %11789 = vpow2.f32 %v9539_v50 }
 0x5fd   : > { %vm27547_vm0 = vmmov %vm27542_vm6  ;;  %vm27554_vm6 = vcmp.eq.f32.partialorder %v18002_v27, 2139095040  ;;  %v9625_v6 = vsel %vm9624_vm9, 2139095040, %v26868_v62  ;;  %vm27555_vm2 = vcmp.eq.f32.partialorder %v17999_v34, 0  ;;  %vm27559_vm3 = vcmp.eq.f32.partialorder %v27470_v29, 0 }
 0x5fe   : > { %vm21189_vm14 = vmxor %vm27547_vm0, %vm9717_vm4  ;;  %vm27551_vm4 = vcmp.ne.f32.partialorder %v27460_v4, %v27460_v4  ;;  %v9472_v8 = vsel %vm27554_vm6, %v9471_v14, %v9465_v55  ;;  %vm25465_vm11 = vcmp.eq.f32.partialorder %v27487_v42, 0  ;;  %vm27563_vm15 = vcmp.eq.f32.partialorder %v20751_v18, 2139095040 }
 0x5ff   : > { %vm21207_vm0 = vmor %vm27551_vm4, %vm27165_vm12  ;;  %vm27556_vm4 = vcmp.eq.f32.partialorder %v27460_v4, 1065353216  ;;  %v9477_v31 = vsel %vm27563_vm15, %v21016_v5, %v9472_v8  ;;  %v21243_v14 = vsub.f32 %v3144_v63, %v3247_v20  ;;  %v9616_v55 = vsel %vm21142_vm10, 2143289344, %v11782_v41  ;;  %v27574_v8 = vld [vmem:[#allocation97_spill] sm:$0xff] }
 0x600   : > { %v27553_v49 = vsel %vm21207_vm0, 4294967295, %v27552_v49  ;;  %vm21226_vm1 = vmor %vm27556_vm4, %vm27555_vm2  ;;  %vm25466_vm0 = vcmp.lt.f32.partialorder %v27487_v42, 0  ;;  %vm27565_vm2 = vnez %v27521_v56  ;;  %vm27566_vm4 = vcmp.eq.f32.partialorder %v27460_v4, 0 }
 0x601   : > { %vm21234_vm6 = vmand %vm27560_vm5, %vm27559_vm3  ;;  %27564 = vst [vmem:[#allocation92_spill] sm:$0xff] %v21243_v14  ;;  %vm9561_vm3 = vcmp.gt.f32.partialorder %v20967_v33, 1065353216  ;;  %v9481_v52 = vsel %vm27565_vm2, 2143289344, %v9477_v31  ;;  %v9618_v18 = vsel %vm27566_vm4, %v18109_v57, %v9616_v55  ;;  %vm27567_vm10 = vcmp.lt.f32.partialorder %v27470_v29, 0  ;;  %v11786_v31 = vpop.eup %11785 }
 0x602   : > { %vm9728_vm5 = vmor %vm21234_vm6, %vm21189_vm14  ;;  %v9643_v41 = vmul.f32 %v11784_v12, %v17999_v34  ;;  %v9483_v56 = vsel %vm21115_vm8, 1065353216, %v9481_v52  ;;  %v9620_v24 = vxor.u32 2147483648, %v9618_v18  ;;  %vm27570_vm6 = vcmp.eq.f32.partialorder %v27460_v4, 3212836864 }
 0x603   : > { %vm21263_vm9 = vmand %vm27567_vm10, %vm27374_vm7  ;;  %v9627_v63 = vsel %vm27570_vm6, 1065353216, %v9625_v6  ;;  %vm27571_vm2 = vcmp.lt.s32.totalorder %v27470_v29, 0  ;;  %v21282_v50 = vand.u32 2147483647, %v27574_v8  ;;  %vm27575_vm10 = vcmp.eq.f32.partialorder %v17999_v34, 1065353216 }
 0x604   : > { %vm21277_vm4 = vmand %vm27571_vm2, %vm18072_vm13  ;;  %v9484_v52 = vsel %vm27575_vm10, %v27445_v22, %v9483_v56  ;;  %v9729_v40 = vsel %vm9728_vm5, 2139095040, %v26868_v62  ;;  %vm27576_vm8 = vcmp.lt.f32.partialorder %v17999_v34, 0  ;;  %11791 = vpow2.f32 %v9643_v41 }
 0x605   : > { %vm21292_vm6 = vmxor %vm27576_vm8, %vm9561_vm3  ;;  %vm9665_vm14 = vcmp.gt.f32.partialorder %v21033_v48, 1065353216  ;;  %v3146_v12 = vsub.f32 1.0, %v9484_v52  ;;  %vm27579_vm15 = vnez %v27540_v32  ;;  %v9720_v22 = vsel %vm21263_vm9, 2143289344, %v11786_v31  ;;  %v11788_v52 = vpop.eup %11787 }
 0x606   : > { %v9621_v55 = vsel %vm27579_vm15, %v9620_v24, %v9618_v18  ;;  %vm27580_vm5 = vcmp.ne.f32.partialorder %v27470_v29, %v27470_v29  ;;  %11793 = vlog2.f32 %v21282_v50  ;;  %vm27583_vm8 = vcmp.eq.f32.partialorder %v18002_v27, 2139095040 }
 0x607   : > { %vm21307_vm3 = vmor %vm27580_vm5, %vm27165_vm12  ;;  %v9628_v32 = vsel %vm27583_vm8, %v9627_v63, %v9621_v55  ;;  %vm27584_vm15 = vcmp.eq.f32.partialorder %v27470_v29, 0  ;;  %vm27585_vm9 = vcmp.lt.f32.partialorder %v17999_v34, 0  ;;  %v9580_v41 = vsel %vm25466_vm0, %v18089_v13, %v18055_v46 }
 0x608   : > { %v9722_v18 = vsel %vm27584_vm15, %v18109_v57, %v9720_v22  ;;  %vm21322_vm2 = vmand %vm27585_vm9, %vm25465_vm11  ;;  %v3251_v24 = vand.u32 4294901760, %v3146_v12  ;;  %vm27588_vm8 = vcmp.eq.f32.partialorder %v20827_v7, 2139095040  ;;  %vm9662_vm10 = vcmp.eq.f32.partialorder %v27506_v19, 0 }
 0x609   : > { %v9633_v63 = vsel %vm27588_vm8, %v21100_v25, %v9628_v32  ;;  %v9724_v31 = vxor.u32 2147483648, %v9722_v18  ;;  %vm9572_vm9 = vmor %vm21322_vm2, %vm21292_vm6  ;;  %vm27589_vm11 = vnez %v27553_v49  ;;  %vm27590_vm5 = vcmp.eq.f32.partialorder %v27470_v29, 3212836864  ;;  %v11790_v25 = vpop.eup %11789 }
 0x60a   : > { %v9637_v55 = vsel %vm27589_vm11, 2143289344, %v9633_v63  ;;  %v9731_v22 = vsel %vm27590_vm5, 1065353216, %v9729_v40  ;;  %vm9661_vm0 = vcmp.lt.f32.partialorder %v27506_v19, 0  ;;  %vm27591_vm15 = vcmp.lt.f32.partialorder %v17999_v34, 0 }
 0x60b   : > { %vm21351_vm12 = vmxor %vm27591_vm15, %vm9665_vm14  ;;  %v21355_v32 = vpack.c.bf16 %v3251_v24, %v3247_v20  ;;  %v21357_v49 = vsub.f32 %v3146_v12, %v3251_v24  ;;  %v9639_v40 = vsel %vm21226_vm1, 1065353216, %v9637_v55  ;;  %v9725_v63 = vsel %vm21277_vm4, %v9724_v31, %v9722_v18 }
 0x60c   : > { %vm27596_vm11 = vcmp.lt.f32.partialorder %v27487_v42, 0  ;;  %vm27597_vm15 = vcmp.eq.f32.partialorder %v17999_v34, 1065353216  ;;  %vm27598_vm8 = vcmp.eq.f32.partialorder %v18002_v27, 2139095040  ;;  %v9573_v53 = vsel %vm9572_vm9, 2139095040, %v26868_v62 }
 0x60d   : > { %27594 = vst [vmem:[#allocation99_spill] sm:$0xff] %v21355_v32  ;;  %27595 = vst [vmem:[#allocation97_spill] sm:$0xff] %v21357_v49  ;;  %v9640_v20 = vsel %vm27597_vm15, %v27460_v4, %v9639_v40  ;;  %v9732_v12 = vsel %vm27598_vm8, %v9731_v22, %v9725_v63  ;;  %vm27599_vm1 = vcmp.lt.f32.partialorder %v17999_v34, 0  ;;  %5052 = vmatpush1.bf16.msra.mxu1 %v21355_v32  ;;  %5244 = vmatpush1.bf16.msra.mxu0 %v21355_v32  ;;  %v27608_v22 = vld [vmem:[#allocation98_spill] sm:$0xff] }
 0x60e   : > { %vm9563_vm5 = vmand %vm27596_vm11, %vm27374_vm7  ;;  %vm27602_vm8 = vcmp.eq.f32.partialorder %v20891_v2, 2139095040  ;;  %v3149_v18 = vsub.f32 1.0, %v9640_v20  ;;  %vm27603_vm6 = vcmp.eq.f32.partialorder %v27487_v42, 0  ;;  %vm9686_vm9 = vcmp.ne.f32.partialorder %v27506_v19, %v27506_v19  ;;  %v11792_v40 = vpop.eup %11791 }
 0x60f   : > { %v9564_v24 = vsel %vm9563_vm5, 2143289344, %v11790_v25  ;;  %vm21383_vm4 = vmand %vm27599_vm1, %vm9662_vm10  ;;  %v9737_v4 = vsel %vm27602_vm8, %v21197_v37, %v9732_v12  ;;  %vm27604_vm11 = vcmp.eq.f32.partialorder %v17999_v34, 0  ;;  %vm27605_vm5 = vcmp.eq.f32.partialorder %v27470_v29, 1065353216 }
 0x610   : > { %v9566_v6 = vsel %vm27603_vm6, %v18109_v57, %v9564_v24  ;;  %vm9676_vm2 = vmor %vm21383_vm4, %vm21351_vm12  ;;  %v9741_v5 = vsel %vm21307_vm3, 2143289344, %v9737_v4  ;;  %vm9666_vm1 = vcmp.eq.f32.partialorder %v21033_v48, 2139095040  ;;  %v9799_v37 = vmul.f32 %v11788_v52, %v17999_v34  ;;  %v11794_v12 = vpop.eup %11793 }
 0x611   : > { %vm9742_vm15 = vmor %vm27605_vm5, %vm27604_vm11  ;;  %v9568_v2 = vxor.u32 2147483648, %v9566_v6  ;;  %vm9821_vm8 = vcmp.gt.f32.partialorder %v21171_v23, 1065353216  ;;  %v3253_v55 = vand.u32 4294901760, %v3149_v18  ;;  %vm27606_vm6 = vcmp.lt.s32.totalorder %v27487_v42, 0 }
 0x612   : > { %v9743_v31 = vsel %vm9742_vm15, 1065353216, %v9741_v5  ;;  %vm9567_vm14 = vmand %vm27606_vm6, %vm18072_vm13  ;;  %vm27607_vm3 = vcmp.eq.f32.partialorder %v27487_v42, 3212836864  ;;  %v21417_v25 = vand.u32 2147483647, %v27608_v22  ;;  %vm27609_vm11 = vcmp.eq.f32.partialorder %v17999_v34, 1065353216 }
 0x613   : > { %v9575_v56 = vsel %vm27607_vm3, 1065353216, %v9573_v53  ;;  %v9744_v52 = vsel %vm27609_vm11, %v27470_v29, %v9743_v31  ;;  %v9569_v63 = vsel %vm9567_vm14, %v9568_v2, %v9566_v6  ;;  %vm9667_vm5 = vmand %vm9661_vm0, %vm27374_vm7  ;;  %v9677_v20 = vsel %vm9676_vm2, 2139095040, %v26868_v62 }
 0x614   : > { %11795 = vpow2.f32 %v9799_v37  ;;  %v3151_v24 = vsub.f32 1.0, %v9744_v52  ;;  %v21432_v53 = vsub.f32 %v3149_v18, %v3253_v55  ;;  %vm27611_vm15 = vcmp.eq.f32.partialorder %v18002_v27, 2139095040 }
 0x615   : > { %v9576_v29 = vsel %vm27611_vm15, %v9575_v56, %v9569_v63  ;;  %vm27612_vm14 = vnez %v26855_v15  ;;  %vm27613_vm6 = vcmp.ne.f32.partialorder %v27487_v42, %v27487_v42  ;;  %v9668_v4 = vsel %vm9667_vm5, 2143289344, %v11792_v40 }
 0x616   : > { %27610 = vst [vmem:[#allocation98_spill] sm:$0xff] %v21432_v53  ;;  %vm9584_vm3 = vmor %vm27613_vm6, %vm27612_vm14  ;;  %vm27614_vm11 = vcmp.eq.f32.partialorder %v20967_v33, 2139095040  ;;  %vm27615_vm12 = vcmp.eq.f32.partialorder %v17999_v34, 0  ;;  %vm27616_vm4 = vcmp.eq.f32.partialorder %v27487_v42, 1065353216  ;;  %v9670_v61 = vsel %vm9662_vm10, %v18109_v57, %v9668_v4 }
 0x617   : > { %v9581_v7 = vsel %vm27614_vm11, %v9580_v41, %v9576_v29  ;;  %vm9586_vm2 = vmor %vm27616_vm4, %vm27615_vm12  ;;  %v9903_v18 = vmul.f32 %v11794_v12, %v17999_v34  ;;  %11797 = vlog2.f32 %v21417_v25  ;;  %v3257_v6 = vand.u32 4294901760, %v3151_v24 }
 0x618   : > { %v9585_v5 = vsel %vm9584_vm3, 2143289344, %v9581_v7  ;;  %vm27617_vm5 = vcmp.lt.s32.totalorder %v27506_v19, 0  ;;  %v9672_v33 = vxor.u32 2147483648, %v9670_v61  ;;  %vm9678_vm6 = vcmp.eq.f32.partialorder %v27506_v19, 3212836864  ;;  %vm21462_vm10 = vmor %vm9686_vm9, %vm27612_vm14 }
 0x619   : > { %vm9671_vm15 = vmand %vm27617_vm5, %vm18072_vm13  ;;  %v9587_v41 = vsel %vm9586_vm2, 1065353216, %v9585_v5  ;;  %v9679_v2 = vsel %vm9678_vm6, 1065353216, %v9677_v20  ;;  %vm9818_vm3 = vcmp.eq.f32.partialorder %v27545_v10, 0  ;;  %11799 = vpow2.f32 %v9903_v18 }
 0x61a   : > { %v21467_v31 = vpack.c.bf16 %v3257_v6, %v3253_v55  ;;  %v21469_v56 = vsub.f32 %v3151_v24, %v3257_v6  ;;  %vm27622_vm11 = vcmp.eq.f32.partialorder %v17999_v34, 1065353216  ;;  %v9673_v52 = vsel %vm9671_vm15, %v9672_v33, %v9670_v61  ;;  %v27636_v6 = vld [vmem:[#allocation96_spill] sm:$0xff] }
 0x61b   : > { %v9588_v40 = vsel %vm27622_vm11, %v27487_v42, %v9587_v41  ;;  %vm27623_vm12 = vcmp.lt.f32.partialorder %v17999_v34, 0  ;;  %vm27626_vm4 = vcmp.eq.f32.partialorder %v18002_v27, 2139095040  ;;  %v9684_v55 = vsel %vm9661_vm0, %v18089_v13, %v18055_v46 }
 0x61c   : > { %27620 = vst [vmem:[#allocation133_spill] sm:$0xff] %v21467_v31  ;;  %27621 = vst [vmem:[#allocation134_spill] sm:$0xff] %v21469_v56  ;;  %v9680_v20 = vsel %vm27626_vm4, %v9679_v2, %v9673_v52  ;;  %vm27627_vm2 = vcmp.eq.f32.partialorder %v17999_v34, 0  ;;  %vm27628_vm5 = vcmp.eq.f32.partialorder %v27506_v19, 1065353216  ;;  %v3148_v12 = vsub.f32 1.0, %v9588_v40  ;;  %5054 = vmatprep.subr.bf16.mxu1 %v21467_v31  ;;  %5246 = vmatprep.subr.bf16.mxu0 %v21467_v31 }
 0x61d   : > { %vm21478_vm9 = vmxor %vm27623_vm12, %vm9821_vm8  ;;  %vm25468_vm8 = vcmp.lt.f32.partialorder %v27545_v10, 0  ;;  %v21498_v24 = vadd.f32 1.0, %v20865_v30  ;;  %v21502_v29 = vmul.f32 %v18061_v26, %v20871_v43  ;;  %v9685_v4 = vsel %vm9666_vm1, %v9684_v55, %v9680_v20 }
 0x61e   : > { %vm21492_vm15 = vmor %vm27628_vm5, %vm27627_vm2  ;;  %vm9925_vm11 = vcmp.gt.f32.partialorder %v21282_v50, 1065353216  ;;  %v21518_v30 = vadd.f32 1.0, %v20879_v45  ;;  %v9689_v43 = vsel %vm21462_vm10, 2143289344, %v9685_v4  ;;  %v3255_v61 = vand.u32 4294901760, %v3148_v12  ;;  %v11796_v33 = vpop.eup %11795  ;;  %v27647_v45 = vld [vmem:[#allocation103_spill] sm:$0xff] }
 0x61f   : > { %vm27631_vm0 = vmmov %vm27623_vm12  ;;  %vm9820_vm12 = vcmp.lt.s32.totalorder %v27545_v10, 0  ;;  %v21528_v48 = vadd.f32 1.0, %v20894_v3  ;;  %v9691_v18 = vsel %vm21492_vm15, 1065353216, %v9689_v43  ;;  %vm9922_vm10 = vcmp.eq.f32.partialorder %v27574_v8, 0 }
 0x620   : > { %vm21512_vm6 = vmand %vm27631_vm0, %vm9818_vm3  ;;  %v21542_v5 = vand.u32 2147483647, %v27636_v6  ;;  %vm27637_vm2 = vcmp.eq.f32.partialorder %v17999_v34, 1065353216  ;;  %v21547_v41 = vsub.f32 %v3148_v12, %v3255_v61  ;;  %vm9819_vm5 = vcmp.eq.f32.partialorder %v27545_v10, 1065353216 }
 0x621   : > { %vm9832_vm1 = vmor %vm21512_vm6, %vm21478_vm9  ;;  %v9692_v3 = vsel %vm27637_vm2, %v27506_v19, %v9691_v18  ;;  %vm9921_vm15 = vcmp.lt.f32.partialorder %v27574_v8, 0  ;;  %v11798_v20 = vpop.eup %11797 }
 0x622   : > { %vm21536_vm4 = vmand %vm25468_vm8, %vm27374_vm7  ;;  %27638 = vst [vmem:[#allocation96_spill] sm:$0xff] %v21547_v41  ;;  %v3150_v37 = vsub.f32 1.0, %v9692_v3  ;;  %v9833_v52 = vsel %vm9832_vm1, 2139095040, %v26868_v62  ;;  %11801 = vlog2.f32 %v21542_v5  ;;  %v9747_v7 = vmul.f32 %v11798_v20, %v17999_v34 }
 0x623   : > { %vm21555_vm8 = vmxor %vm27631_vm0, %vm9925_vm11  ;;  %v9824_v40 = vsel %vm21536_vm4, 2143289344, %v11796_v33  ;;  %vm9822_vm11 = vcmp.eq.f32.partialorder %v21171_v23, 2139095040  ;;  %vm27643_vm4 = vcmp.lt.f32.partialorder %v27545_v10, 0  ;;  %v11800_v43 = vpop.eup %11799  ;;  %v21608_v33 = vand.u32 2147483647, %v27647_v45  ;;  %v21647_v23 = vpop.permute.xlu1 %2782 }
 0x624   : > { %vm21565_vm2 = vmand %vm9820_vm12, %vm18072_vm13  ;;  %v9826_v55 = vsel %vm9818_vm3, %v18109_v57, %v9824_v40  ;;  %vm9834_vm12 = vcmp.eq.f32.partialorder %v27545_v10, 3212836864  ;;  %v9840_v42 = vsel %vm27643_vm4, %v18089_v13, %v18055_v46  ;;  %v3259_v12 = vand.u32 4294901760, %v3150_v37 }
 0x625   : > { %vm27644_vm9 = vmmov %vm27631_vm0  ;;  %v9828_v4 = vxor.u32 2147483648, %v9826_v55  ;;  %vm9842_vm3 = vcmp.ne.f32.partialorder %v27545_v10, %v27545_v10  ;;  %v9835_v18 = vsel %vm9834_vm12, 1065353216, %v9833_v52  ;;  %vm9924_vm0 = vcmp.lt.s32.totalorder %v27574_v8, 0 }
 0x626   : > { %vm21589_vm6 = vmand %vm27644_vm9, %vm9922_vm10  ;;  %vm9946_vm9 = vcmp.ne.f32.partialorder %v27574_v8, %v27574_v8  ;;  %v21610_v3 = vpack.c.bf16 %v3259_v12, %v3255_v61  ;;  %v21612_v2 = vsub.f32 %v3150_v37, %v3259_v12  ;;  %11803 = vpow2.f32 %v9747_v7 }
 0x627   : > { %vm9936_vm1 = vmor %vm21589_vm6, %vm21555_vm8  ;;  %v9829_v40 = vsel %vm21565_vm2, %v9828_v4, %v9826_v55  ;;  %vm27650_vm8 = vcmp.eq.f32.partialorder %v18002_v27, 2139095040  ;;  %vm27653_vm2 = vcmp.eq.f32.partialorder %v17999_v34, 0  ;;  %11805 = vlog2.f32 %v21608_v33 }
 0x628   : > { %vm9927_vm4 = vmand %vm9921_vm15, %vm27374_vm7  ;;  %27648 = vst [vmem:[#allocation103_spill] sm:$0xff] %v21610_v3  ;;  %v9836_v20 = vsel %vm27650_vm8, %v9835_v18, %v9829_v40  ;;  %v9937_v37 = vsel %vm9936_vm1, 2139095040, %v26868_v62  ;;  %5056 = vmatpush1.bf16.msra.mxu1 %v21610_v3  ;;  %5248 = vmatpush1.bf16.msra.mxu0 %v21610_v3  ;;  %vm9938_vm1 = vcmp.eq.f32.partialorder %v27574_v8, 3212836864  ;;  %vm27656_vm8 = vcmp.eq.f32.partialorder %v17999_v34, 1065353216 }
 0x629   : > { %27649 = vst [vmem:[#allocation135_spill] sm:$0xff] %v21612_v2  ;;  %v9928_v52 = vsel %vm9927_vm4, 2143289344, %v11800_v43  ;;  %vm21620_vm12 = vmor %vm9842_vm3, %vm27612_vm14  ;;  %v9841_v19 = vsel %vm9822_vm11, %v9840_v42, %v9836_v20  ;;  %vm9923_vm3 = vcmp.eq.f32.partialorder %v27574_v8, 1065353216  ;;  %vm9765_vm4 = vcmp.lt.f32.partialorder %v27608_v22, 0 }
 0x62a   : > { %v9930_v61 = vsel %vm9922_vm10, %v18109_v57, %v9928_v52  ;;  %vm9846_vm6 = vmor %vm9819_vm5, %vm27653_vm2  ;;  %v9845_v12 = vsel %vm21620_vm12, 2143289344, %v9841_v19  ;;  %vm9926_vm10 = vcmp.eq.f32.partialorder %v21282_v50, 2139095040  ;;  %v9939_v7 = vsel %vm9938_vm1, 1065353216, %v9937_v37  ;;  %v27660_v37 = vld [vmem:[#allocation101_spill] sm:$0xff] }
 0x62b   : > { %v9932_v55 = vxor.u32 2147483648, %v9930_v61  ;;  %vm9931_vm11 = vmand %vm9924_vm0, %vm18072_vm13  ;;  %v9847_v42 = vsel %vm9846_vm6, 1065353216, %v9845_v12  ;;  %vm9769_vm0 = vcmp.gt.f32.partialorder %v21417_v25, 1065353216  ;;  %vm27657_vm12 = vcmp.eq.f32.partialorder %v18002_v27, 2139095040  ;;  %v21692_v12 = vpop.permute.xlu0 %2777 }
 0x62c   : > { %vm21654_vm5 = vmor %vm9946_vm9, %vm27612_vm14  ;;  %v9848_v18 = vsel %vm27656_vm8, %v27545_v10, %v9847_v42  ;;  %v9944_v52 = vsel %vm9921_vm15, %v18089_v13, %v18055_v46  ;;  %vm9768_vm6 = vcmp.lt.s32.totalorder %v27608_v22, 0  ;;  %v11802_v20 = vpop.eup %11801  ;;  %v21685_v19 = vand.u32 2147483647, %v27660_v37 }
 0x62d   : > { %v9933_v4 = vsel %vm9931_vm11, %v9932_v55, %v9930_v61  ;;  %vm9950_vm9 = vmor %vm9923_vm3, %vm27653_vm2  ;;  %v3153_v10 = vsub.f32 1.0, %v9848_v18  ;;  %vm9766_vm11 = vcmp.eq.f32.partialorder %v27608_v22, 0  ;;  %v21688_v55 = vadd.f32 1.0, %v21502_v29 }
 0x62e   : > { %v9940_v40 = vsel %vm27657_vm12, %v9939_v7, %v9933_v4  ;;  %vm21680_vm1 = vmand %vm9765_vm4, %vm27374_vm7  ;;  %v2847_v50 = vsub.f32 %v18023_v21, %v21647_v23  ;;  %vm27661_vm15 = vcmp.lt.f32.partialorder %v17999_v34, 0  ;;  %v9851_v7 = vmul.f32 %v11802_v20, %v17999_v34 }
 0x62f   : > { %v9945_v63 = vsel %vm9926_vm10, %v9944_v52, %v9940_v40  ;;  %vm21700_vm3 = vmxor %vm27661_vm15, %vm9769_vm0  ;;  %v3261_v18 = vand.u32 4294901760, %v3153_v10  ;;  %11807 = vlog2.f32 %v21685_v19 }
 0x630   : > { %v9949_v42 = vsel %vm21654_vm5, 2143289344, %v9945_v63  ;;  %vm21709_vm10 = vmand %vm9768_vm6, %vm18072_vm13  ;;  %vm9790_vm5 = vcmp.ne.f32.partialorder %v27608_v22, %v27608_v22  ;;  %11809 = vpow2.f32 %v9851_v7  ;;  %vm25474_vm6 = vcmp.lt.f32.partialorder %v27636_v6, 0  ;;  %v27676_v7 = vld [vmem:[#allocation102_spill] sm:$0xff] }
 0x631   : > { %v9951_v29 = vsel %vm9950_vm9, 1065353216, %v9949_v42  ;;  %vm27666_vm0 = vmmov %vm27656_vm8  ;;  %vm9767_vm8 = vcmp.eq.f32.partialorder %v27608_v22, 1065353216  ;;  %v21732_v43 = vsub.f32 %v3153_v10, %v3261_v18  ;;  %v21767_v63 = vand.u32 2147483647, %v27676_v7 }
 0x632   : > { %v9952_v52 = vsel %vm27666_vm0, %v27574_v8, %v9951_v29  ;;  %vm27667_vm12 = vmmov %vm27661_vm15  ;;  %v11804_v8 = vpop.eup %11803  ;;  %v21740_v29 = vmul.f32 %v18038_v51, %v2847_v50 }
 0x633   : > { %vm21726_vm2 = vmand %vm27667_vm12, %vm9766_vm11  ;;  %v3155_v42 = vsub.f32 1.0, %v9952_v52  ;;  %27670 = vst [vmem:[#allocation101_spill] sm:$0xff] %v21732_v43  ;;  %v11806_v4 = vpop.eup %11805  ;;  %v9772_v50 = vsel %vm21680_vm1, 2143289344, %v11804_v8  ;;  %vm27673_vm12 = vcmp.eq.f32.partialorder %v17999_v34, 0  ;;  %vm25476_vm1 = vcmp.eq.f32.partialorder %v27636_v6, 0 }
 0x634   : > { %vm9780_vm9 = vmor %vm21726_vm2, %vm21700_vm3  ;;  %vm9873_vm3 = vcmp.gt.f32.partialorder %v21542_v5, 1065353216  ;;  %v9774_v3 = vsel %vm9766_vm11, %v18109_v57, %v9772_v50  ;;  %v10007_v31 = vmul.f32 %v11806_v4, %v17999_v34  ;;  %11811 = vlog2.f32 %v21767_v63 }
 0x635   : > { %vm21750_vm0 = vmor %vm9790_vm5, %vm27612_vm14  ;;  %v3265_v52 = vand.u32 4294901760, %v3155_v42  ;;  %vm9872_vm5 = vcmp.lt.s32.totalorder %v27636_v6, 0  ;;  %v9781_v61 = vsel %vm9780_vm9, 2139095040, %v26868_v62  ;;  %v9776_v2 = vxor.u32 2147483648, %v9774_v3 }
 0x636   : > { %vm21761_vm2 = vmor %vm9767_vm8, %vm27673_vm12  ;;  %vm9782_vm12 = vcmp.eq.f32.partialorder %v27608_v22, 3212836864  ;;  %11813 = vpow2.f32 %v10007_v31 }
 0x637   : > { %vm21778_vm8 = vmand %vm25474_vm6, %vm27374_vm7  ;;  %v21783_v32 = vpack.c.bf16 %v3265_v52, %v3261_v18  ;;  %v21785_v43 = vsub.f32 %v3155_v42, %v3265_v52  ;;  %v9788_v18 = vsel %vm9765_vm4, %v18089_v13, %v18055_v46  ;;  %v27684_v42 = vmov 0 }
 0x638   : > { %vm27681_vm11 = vmmov %vm27661_vm15  ;;  %v9777_v4 = vsel %vm21709_vm10, %v9776_v2, %v9774_v3  ;;  %v9783_v52 = vsel %vm9782_vm12, 1065353216, %v9781_v61  ;;  %vm9871_vm4 = vcmp.eq.f32.partialorder %v27636_v6, 1065353216  ;;  %vm27689_vm15 = vcmp.eq.f32.partialorder %v18002_v27, 2139095040  ;;  %v27690_v3 = vld [vmem:[#allocation100_spill] sm:$0xff] }
 0x639   : > { %27679 = vst [vmem:[#allocation102_spill] sm:$0xff] %v21783_v32  ;;  %27680 = vst [vmem:[#allocation136_spill] sm:$0xff] %v21785_v43  ;;  %5058 = vmatprep.subr.bf16.mxu1 %v21783_v32  ;;  %5250 = vmatprep.subr.bf16.mxu0 %v21783_v32  ;;  %v9784_v31 = vsel %vm27689_vm15, %v9783_v52, %v9777_v4  ;;  %v21832_v2 = vand.u32 2147483647, %v27690_v3  ;;  %v11808_v40 = vpop.eup %11807  ;;  %vm27692_vm15 = vcmp.lt.f32.partialorder %v27636_v6, 0  ;;  %vm27705_vm12 = vcmp.eq.f32.partialorder %v17999_v34, 1065353216 }
 0x63a   : > { %vm21791_vm9 = vmxor %vm27681_vm11, %vm9873_vm3  ;;  %vm25479_vm3 = vcmp.lt.f32.partialorder %v27647_v45, 0  ;;  %v9892_v4 = vsel %vm27692_vm15, %v18089_v13, %v18055_v46  ;;  %v10111_v10 = vmul.f32 %v11808_v40, %v17999_v34 }
 0x63b   : > { %vm21803_vm6 = vmand %vm9872_vm5, %vm18072_vm13  ;;  %11815 = vlog2.f32 %v21832_v2 }
 0x63c   : > { %v27685_v42 = vsel %vm21803_vm6, 4294967295, %v27684_v42  ;;  %vm27686_vm5 = vmmov %vm27681_vm11  ;;  %vm27693_vm6 = vcmp.ne.f32.partialorder %v27636_v6, %v27636_v6  ;;  %11817 = vpow2.f32 %v10111_v10 }
 0x63d   : > { %vm21818_vm11 = vmand %vm27686_vm5, %vm25476_vm1  ;;  %vm27691_vm5 = vcmp.eq.f32.partialorder %v21417_v25, 2139095040  ;;  %v11810_v25 = vpop.eup %11809 }
 0x63e   : > { %v9789_v61 = vsel %vm27691_vm5, %v9788_v18, %v9784_v31  ;;  %vm21846_vm10 = vmor %vm27693_vm6, %vm27612_vm14  ;;  %vm27696_vm5 = vcmp.eq.f32.partialorder %v17999_v34, 0  ;;  %v9876_v41 = vsel %vm21778_vm8, 2143289344, %v11810_v25  ;;  %v27747_v31 = vld [vmem:[#allocation105_spill] sm:$0xff] }
 0x63f   : > { %v9793_v18 = vsel %vm21750_vm0, 2143289344, %v9789_v61  ;;  %vm21857_vm15 = vmor %vm9871_vm4, %vm27696_vm5  ;;  %vm27701_vm4 = vcmp.gt.f32.partialorder %v21608_v33, 1065353216  ;;  %vm27702_vm5 = vcmp.lt.f32.partialorder %v17999_v34, 0  ;;  %vm27712_vm0 = vcmp.lt.f32.partialorder %v17999_v34, 0 }
 0x640   : > { %vm21866_vm6 = vmand %vm25479_vm3, %vm27374_vm7  ;;  %v9795_v61 = vsel %vm21761_vm2, 1065353216, %v9793_v18  ;;  %vm27706_vm2 = vcmp.eq.f32.partialorder %v27636_v6, 0  ;;  %v27716_v18 = vld [vmem:[#allocation107_spill] sm:$0xff] }
 0x641   : > { %vm21881_vm3 = vmxor %vm27702_vm5, %vm27701_vm4  ;;  %v9796_v20 = vsel %vm27705_vm12, %v27608_v22, %v9795_v61  ;;  %v9878_v8 = vsel %vm27706_vm2, %v18109_v57, %v9876_v41  ;;  %vm27708_vm4 = vcmp.lt.s32.totalorder %v27647_v45, 0  ;;  %vm27711_vm2 = vcmp.eq.f32.partialorder %v27647_v45, 0  ;;  %v11812_v61 = vpop.eup %11811 }
 0x642   : > { %vm27707_vm8 = vmor %vm21818_vm11, %vm21791_vm9  ;;  %v9880_v22 = vxor.u32 2147483648, %v9878_v8  ;;  %v3152_v41 = vsub.f32 1.0, %v9796_v20  ;;  %vm27715_vm9 = vcmp.lt.f32.partialorder %v27647_v45, 0  ;;  %v21930_v10 = vand.u32 2147483647, %v27716_v18  ;;  %v11814_v59 = vpop.eup %11813 }
 0x643   : > { %v9885_v40 = vsel %vm27707_vm8, 2139095040, %v26868_v62  ;;  %vm21903_vm5 = vmand %vm27708_vm4, %vm18072_vm13  ;;  %v10048_v50 = vsel %vm27715_vm9, %v18089_v13, %v18055_v46  ;;  %vm27717_vm9 = vnez %v27685_v42  ;;  %vm27718_vm8 = vcmp.eq.f32.partialorder %v27636_v6, 3212836864 }
 0x644   : > { %vm21912_vm1 = vmand %vm27712_vm0, %vm27711_vm2  ;;  %v9881_v20 = vsel %vm27717_vm9, %v9880_v22, %v9878_v8  ;;  %v9887_v53 = vsel %vm27718_vm8, 1065353216, %v9885_v40  ;;  %v3263_v49 = vand.u32 4294901760, %v3152_v41  ;;  %vm27719_vm12 = vcmp.ne.f32.partialorder %v27647_v45, %v27647_v45 }
 0x645   : > { %vm21941_vm4 = vmor %vm27719_vm12, %vm27612_vm14  ;;  %vm27722_vm2 = vcmp.eq.f32.partialorder %v18002_v27, 2139095040  ;;  %vm27723_vm9 = vcmp.eq.f32.partialorder %v17999_v34, 0  ;;  %vm27724_vm8 = vcmp.eq.f32.partialorder %v27647_v45, 1065353216  ;;  %vm27727_vm12 = vcmp.lt.f32.partialorder %v27660_v37, 0 }
 0x646   : > { %v9888_v42 = vsel %vm27722_vm2, %v9887_v53, %v9881_v20  ;;  %vm21952_vm11 = vmor %vm27724_vm8, %vm27723_vm9  ;;  %v9955_v22 = vmul.f32 %v11812_v61, %v17999_v34  ;;  %11819 = vlog2.f32 %v21930_v10  ;;  %vm27731_vm9 = vcmp.eq.f32.partialorder %v21542_v5, 2139095040 }
 0x647   : > { %vm21960_vm14 = vmand %vm27727_vm12, %vm27374_vm7  ;;  %v9893_v20 = vsel %vm27731_vm9, %v9892_v4, %v9888_v42  ;;  %v21974_v36 = vsub.f32 %v3152_v41, %v3263_v49  ;;  %v10032_v39 = vsel %vm21866_vm6, 2143289344, %v11814_v59  ;;  %vm27733_vm8 = vcmp.gt.f32.partialorder %v21685_v19, 1065353216  ;;  %v11816_v41 = vpop.eup %11815 }
 0x648   : > { %vm27730_vm2 = vmmov %vm27727_vm12  ;;  %v9897_v5 = vsel %vm21846_vm10, 2143289344, %v9893_v20  ;;  %vm27737_vm9 = vcmp.eq.f32.partialorder %v27647_v45, 0  ;;  %11821 = vpow2.f32 %v9955_v22  ;;  %vm27746_vm10 = vcmp.eq.f32.partialorder %v17999_v34, 1065353216 }
 0x649   : > { %v21968_v53 = vsel %vm27730_vm2, %v18089_v13, %v18055_v46  ;;  %27732 = vst [vmem:[#allocation100_spill] sm:$0xff] %v21974_v36  ;;  %vm27734_vm12 = vmmov %vm27712_vm0  ;;  %v10034_v4 = vsel %vm27737_vm9, %v18109_v57, %v10032_v39  ;;  %v9899_v39 = vsel %vm21857_vm15, 1065353216, %v9897_v5  ;;  %vm27742_vm9 = vcmp.eq.f32.partialorder %v27660_v37, 0 }
 0x64a   : > { %vm21982_vm0 = vmxor %vm27734_vm12, %vm27733_vm8  ;;  %vm27739_vm8 = vcmp.lt.s32.totalorder %v27660_v37, 0  ;;  %v10036_v52 = vxor.u32 2147483648, %v10034_v4  ;;  %v9900_v43 = vsel %vm27746_vm10, %v27636_v6, %v9899_v39  ;;  %v22031_v61 = vand.u32 2147483647, %v27747_v31  ;;  %v11818_v39 = vpop.eup %11817 }
 0x64b   : > { %vm27738_vm6 = vmor %vm21912_vm1, %vm21881_vm3  ;;  %vm27743_vm1 = vcmp.lt.f32.partialorder %v17999_v34, 0  ;;  %v3154_v42 = vsub.f32 1.0, %v9900_v43  ;;  %vm27748_vm10 = vcmp.eq.f32.partialorder %v27647_v45, 3212836864  ;;  %vm27749_vm15 = vnez %v26855_v15  ;;  %v28408_v15 = vld [vmem:[#allocation124_spill] sm:$0xff] }
 0x64c   : > { %v10041_v59 = vsel %vm27738_vm6, 2139095040, %v26868_v62  ;;  %vm22003_vm12 = vmand %vm27739_vm8, %vm18072_vm13  ;;  %v10037_v22 = vsel %vm21903_vm5, %v10036_v52, %v10034_v4  ;;  %vm27750_vm8 = vcmp.ne.f32.partialorder %v27660_v37, %v27660_v37  ;;  %v27751_v20 = vmov 0 }
 0x64d   : > { %vm22014_vm3 = vmand %vm27743_vm1, %vm27742_vm9  ;;  %v10043_v6 = vsel %vm27748_vm10, 1065353216, %v10041_v59  ;;  %v10059_v5 = vmul.f32 %v11816_v41, %v17999_v34  ;;  %vm27753_vm9 = vcmp.eq.f32.partialorder %v18002_v27, 2139095040  ;;  %vm27754_vm5 = vcmp.eq.f32.partialorder %v17999_v34, 0 }
 0x64e   : > { %vm22042_vm2 = vmor %vm27750_vm8, %vm27749_vm15  ;;  %v10044_v43 = vsel %vm27753_vm9, %v10043_v6, %v10037_v22  ;;  %vm27755_vm1 = vcmp.eq.f32.partialorder %v27660_v37, 1065353216  ;;  %vm27758_vm8 = vcmp.lt.f32.partialorder %v27676_v7, 0  ;;  %11823 = vlog2.f32 %v22031_v61 }
 0x64f   : > { %v27752_v20 = vsel %vm22042_vm2, 4294967295, %v27751_v20  ;;  %vm22053_vm10 = vmor %vm27755_vm1, %vm27754_vm5  ;;  %v3267_v52 = vand.u32 4294901760, %v3154_v42  ;;  %vm27762_vm1 = vcmp.eq.f32.partialorder %v21608_v33, 2139095040  ;;  %v10136_v22 = vsel %vm21960_vm14, 2143289344, %v11818_v39 }
 0x650   : > { %vm22062_vm2 = vmand %vm27758_vm8, %vm27374_vm7  ;;  %v10049_v41 = vsel %vm27762_vm1, %v10048_v50, %v10044_v43  ;;  %vm27763_vm5 = vcmp.gt.f32.partialorder %v21767_v63, 1065353216  ;;  %11825 = vpow2.f32 %v10059_v5  ;;  %vm27769_vm1 = vcmp.lt.s32.totalorder %v27676_v7, 0  ;;  %v11820_v43 = vpop.eup %11819 }
 0x651   : > { %vm27761_vm9 = vmmov %vm27758_vm8  ;;  %vm27764_vm8 = vcmp.lt.f32.partialorder %v17999_v34, 0  ;;  %v10053_v36 = vsel %vm21941_vm4, 2143289344, %v10049_v41  ;;  %v22107_v14 = vpack.c.bf16 %v3267_v52, %v3263_v49  ;;  %v22109_v56 = vsub.f32 %v3154_v42, %v3267_v52 }
 0x652   : > { %v22070_v59 = vsel %vm27761_vm9, %v18089_v13, %v18055_v46  ;;  %vm22081_vm6 = vmxor %vm27764_vm8, %vm27763_vm5  ;;  %vm27767_vm9 = vcmp.eq.f32.partialorder %v27660_v37, 0  ;;  %v10055_v60 = vsel %vm21952_vm11, 1065353216, %v10053_v36  ;;  %v10215_v52 = vmul.f32 %v11820_v43, %v17999_v34  ;;  %v11822_v41 = vpop.eup %11821 }
 0x653   : > { %v10138_v33 = vsel %vm27767_vm9, %v18109_v57, %v10136_v22  ;;  %vm27768_vm14 = vmor %vm22014_vm3, %vm21982_vm0  ;;  %27772 = vst [vmem:[#allocation107_spill] sm:$0xff] %v22107_v14  ;;  %vm27773_vm0 = vcmp.eq.f32.partialorder %v27676_v7, 0  ;;  %5060 = vmatpush1.bf16.msra.mxu1 %v22107_v14  ;;  %5252 = vmatpush1.bf16.msra.mxu0 %v22107_v14  ;;  %v27785_v22 = vmov 0  ;;  %v9980_v43 = vsel %vm22062_vm2, 2143289344, %v11822_v41 }
 0x654   : > { %v10145_v50 = vsel %vm27768_vm14, 2139095040, %v26868_v62  ;;  %vm22100_vm5 = vmand %vm27769_vm1, %vm18072_vm13  ;;  %v10140_v5 = vxor.u32 2147483648, %v10138_v33  ;;  %vm27777_vm14 = vcmp.eq.f32.partialorder %v17999_v34, 1065353216  ;;  %11827 = vpow2.f32 %v10215_v52 }
 0x655   : > { %vm27774_vm3 = vmmov %vm27764_vm8  ;;  %v10056_v49 = vsel %vm27777_vm14, %v27647_v45, %v10055_v60  ;;  %vm27779_vm14 = vcmp.ne.f32.partialorder %v27676_v7, %v27676_v7  ;;  %vm27782_vm8 = vcmp.eq.f32.partialorder %v18002_v27, 2139095040 }
 0x656   : > { %vm22117_vm9 = vmand %vm27774_vm3, %vm27773_vm0  ;;  %v10141_v36 = vsel %vm22003_vm12, %v10140_v5, %v10138_v33  ;;  %vm27778_vm3 = vcmp.eq.f32.partialorder %v27660_v37, 3212836864  ;;  %v3157_v8 = vsub.f32 1.0, %v10056_v49  ;;  %vm27783_vm12 = vcmp.eq.f32.partialorder %v17999_v34, 0  ;;  %v27787_v33 = vld [vmem:[#allocation106_spill] sm:$0xff] }
 0x657   : > { %v10147_v45 = vsel %vm27778_vm3, 1065353216, %v10145_v50  ;;  %vm22143_vm1 = vmor %vm27779_vm14, %vm27749_vm15  ;;  %vm27784_vm3 = vcmp.eq.f32.partialorder %v27676_v7, 1065353216  ;;  %v22161_v50 = vand.u32 2147483647, %v27787_v33  ;;  %vm27788_vm0 = vcmp.eq.f32.partialorder %v21685_v19, 2139095040 }
 0x658   : > { %v10148_v32 = vsel %vm27782_vm8, %v10147_v45, %v10141_v36  ;;  %vm22154_vm4 = vmor %vm27784_vm3, %vm27783_vm12  ;;  %v3269_v5 = vand.u32 4294901760, %v3157_v8  ;;  %vm27789_vm8 = vcmp.gt.f32.partialorder %v21832_v2, 1065353216  ;;  %vm27790_vm12 = vcmp.lt.f32.partialorder %v17999_v34, 0  ;;  %v11824_v39 = vpop.eup %11823 }
 0x659   : > { %v27786_v22 = vsel %vm22154_vm4, 4294967295, %v27785_v22  ;;  %v10153_v60 = vsel %vm27788_vm0, %v21968_v53, %v10148_v32  ;;  %vm22172_vm3 = vmxor %vm27790_vm12, %vm27789_vm8  ;;  %vm10102_vm14 = vcmp.ne.f32.partialorder %v27690_v3, %v27690_v3  ;;  %vm27793_vm4 = vnez %v27752_v20 }
 0x65a   : > { %v10157_v19 = vsel %vm27793_vm4, 2143289344, %v10153_v60  ;;  %vm27794_vm0 = vcmp.eq.f32.partialorder %v27676_v7, 0  ;;  %vm27795_vm2 = vmor %vm22117_vm9, %vm22081_vm6  ;;  %vm27796_vm8 = vcmp.lt.f32.partialorder %v27690_v3, 0  ;;  %v22200_v45 = vsub.f32 %v3157_v8, %v3269_v5  ;;  %v11826_v52 = vpop.eup %11825 }
 0x65b   : > { %v9982_v53 = vsel %vm27794_vm0, %v18109_v57, %v9980_v43  ;;  %v9989_v4 = vsel %vm27795_vm2, 2139095040, %v26868_v62  ;;  %vm22194_vm12 = vmand %vm27796_vm8, %vm27374_vm7  ;;  %v10159_v20 = vsel %vm22053_vm10, 1065353216, %v10157_v19  ;;  %vm27799_vm6 = vcmp.eq.f32.partialorder %v27690_v3, 0 }
 0x65c   : > { %v9984_v41 = vxor.u32 2147483648, %v9982_v53  ;;  %vm27800_vm9 = vcmp.lt.f32.partialorder %v17999_v34, 0  ;;  %11829 = vlog2.f32 %v22161_v50  ;;  %vm27803_vm2 = vcmp.eq.f32.partialorder %v17999_v34, 1065353216 }
 0x65d   : > { %vm22207_vm0 = vmand %vm27800_vm9, %vm27799_vm6  ;;  %v10160_v25 = vsel %vm27803_vm2, %v27660_v37, %v10159_v20  ;;  %v10100_v8 = vsel %vm27796_vm8, %v18089_v13, %v18055_v46  ;;  %vm10233_vm6 = vcmp.lt.f32.partialorder %v27716_v18, 0  ;;  %vm10237_vm9 = vcmp.gt.f32.partialorder %v21930_v10, 1065353216 }
 0x65e   : > { %vm10092_vm10 = vmor %vm22207_vm0, %vm22172_vm3  ;;  %v3159_v32 = vsub.f32 1.0, %v10160_v25  ;;  %v9985_v60 = vsel %vm22100_vm5, %v9984_v41, %v9982_v53  ;;  %vm27804_vm2 = vcmp.eq.f32.partialorder %v27676_v7, 3212836864  ;;  %vm27805_vm4 = vcmp.lt.s32.totalorder %v27690_v3, 0 }
 0x65f   : > { %v9991_v37 = vsel %vm27804_vm2, 1065353216, %v9989_v4  ;;  %vm22233_vm11 = vmand %vm27805_vm4, %vm18072_vm13  ;;  %v10319_v19 = vmul.f32 %v11824_v39, %v17999_v34  ;;  %vm27808_vm8 = vcmp.eq.f32.partialorder %v18002_v27, 2139095040  ;;  %v10084_v40 = vsel %vm22194_vm12, 2143289344, %v11826_v52 }
 0x660   : > { %v9992_v20 = vsel %vm27808_vm8, %v9991_v37, %v9985_v60  ;;  %vm22247_vm5 = vmor %vm10102_vm14, %vm27749_vm15  ;;  %v3273_v4 = vand.u32 4294901760, %v3159_v32  ;;  %vm27811_vm8 = vcmp.eq.f32.partialorder %v21767_v63, 2139095040  ;;  %vm27812_vm12 = vcmp.eq.f32.partialorder %v27690_v3, 0 }
 0x661   : > { %v9997_v41 = vsel %vm27811_vm8, %v22070_v59, %v9992_v20  ;;  %v10086_v36 = vsel %vm27812_vm12, %v18109_v57, %v10084_v40  ;;  %v10093_v39 = vsel %vm10092_vm10, 2139095040, %v26868_v62  ;;  %vm27813_vm14 = vcmp.eq.f32.partialorder %v17999_v34, 0  ;;  %v11828_v40 = vpop.eup %11827 }
 0x662   : > { %vm27814_vm2 = vcmp.eq.f32.partialorder %v27690_v3, 1065353216  ;;  %v10001_v63 = vsel %vm22143_vm1, 2143289344, %v9997_v41  ;;  %v10088_v59 = vxor.u32 2147483648, %v10086_v36  ;;  %vm10236_vm8 = vcmp.lt.s32.totalorder %v27716_v18, 0  ;;  %vm22294_vm1 = vmand %vm10233_vm6, %vm27374_vm7 }
 0x663   : > { %vm22269_vm4 = vmor %vm27814_vm2, %vm27813_vm14  ;;  %vm27817_vm12 = vcmp.lt.f32.partialorder %v17999_v34, 0  ;;  %11831 = vpow2.f32 %v10319_v19  ;;  %v22284_v6 = vpack.c.bf16 %v3273_v4, %v3269_v5  ;;  %v22286_v52 = vsub.f32 %v3159_v32, %v3273_v4  ;;  %v27829_v19 = vld [vmem:[#allocation104_spill] sm:$0xff] }
 0x664   : > { %vm22280_vm3 = vmxor %vm27817_vm12, %vm10237_vm9  ;;  %vm27821_vm0 = vnez %v27786_v22  ;;  %vm27824_vm9 = vcmp.eq.f32.partialorder %v17999_v34, 1065353216  ;;  %v10089_v32 = vsel %vm22233_vm11, %v10088_v59, %v10086_v36  ;;  %vm27825_vm2 = vcmp.eq.f32.partialorder %v27690_v3, 3212836864 }
 0x665   : > { %27820 = vst [vmem:[#allocation105_spill] sm:$0xff] %v22284_v6  ;;  %v10003_v42 = vsel %vm27821_vm0, 1065353216, %v10001_v63  ;;  %v10095_v22 = vsel %vm27825_vm2, 1065353216, %v10093_v39  ;;  %vm27826_vm14 = vcmp.eq.f32.partialorder %v27716_v18, 0  ;;  %v22315_v20 = vand.u32 2147483647, %v27829_v19  ;;  %5062 = vmatprep.subr.bf16.mxu1 %v22284_v6  ;;  %5254 = vmatprep.subr.bf16.mxu0 %v22284_v6 }
 0x666   : > { %v10004_v5 = vsel %vm27824_vm9, %v27676_v7, %v10003_v42  ;;  %vm22310_vm0 = vmand %vm27817_vm12, %vm27826_vm14  ;;  %vm27830_vm11 = vcmp.eq.f32.partialorder %v18002_v27, 2139095040  ;;  %vm10258_vm14 = vcmp.ne.f32.partialorder %v27716_v18, %v27716_v18  ;;  %vm27831_vm12 = vcmp.eq.f32.partialorder %v21832_v2, 2139095040  ;;  %v11830_v36 = vpop.eup %11829 }
 0x667   : > { %v10096_v7 = vsel %vm27830_vm11, %v10095_v22, %v10089_v32  ;;  %v3156_v43 = vsub.f32 1.0, %v10004_v5  ;;  %vm10248_vm2 = vmor %vm22310_vm0, %vm22280_vm3  ;;  %vm25490_vm10 = vcmp.eq.f32.partialorder %v27747_v31, 0  ;;  %11833 = vlog2.f32 %v22315_v20 }
 0x668   : > { %v10101_v4 = vsel %vm27831_vm12, %v10100_v8, %v10096_v7  ;;  %vm22334_vm11 = vmand %vm10236_vm8, %vm18072_vm13  ;;  %v10240_v8 = vsel %vm22294_vm1, 2143289344, %v11828_v40  ;;  %v10256_v63 = vsel %vm10233_vm6, %v18089_v13, %v18055_v46  ;;  %vm27834_vm8 = vcmp.gt.f32.partialorder %v22031_v61, 1065353216 }
 0x669   : > { %v10105_v39 = vsel %vm22247_vm5, 2143289344, %v10101_v4  ;;  %v3271_v2 = vand.u32 4294901760, %v3156_v43  ;;  %vm27835_vm12 = vcmp.lt.f32.partialorder %v17999_v34, 0  ;;  %vm27838_vm5 = vcmp.eq.f32.partialorder %v27716_v18, 0  ;;  %vm22373_vm6 = vmor %vm10258_vm14, %vm27749_vm15 }
 0x66a   : > { %vm22353_vm9 = vmxor %vm27835_vm12, %vm27834_vm8  ;;  %v10107_v53 = vsel %vm22269_vm4, 1065353216, %v10105_v39  ;;  %v10242_v42 = vsel %vm27838_vm5, %v18109_v57, %v10240_v8  ;;  %v10249_v60 = vsel %vm10248_vm2, 2139095040, %v26868_v62  ;;  %v10163_v25 = vmul.f32 %v11830_v36, %v17999_v34 }
 0x66b   : > { %vm27841_vm4 = vcmp.eq.f32.partialorder %v17999_v34, 1065353216  ;;  %v22381_v22 = vsub.f32 %v3156_v43, %v3271_v2  ;;  %v10244_v49 = vxor.u32 2147483648, %v10242_v42  ;;  %vm10337_vm3 = vcmp.lt.f32.partialorder %v27747_v31, 0  ;;  %vm27842_vm1 = vmmov %vm27835_vm12 }
 0x66c   : > { %v10108_v32 = vsel %vm27841_vm4, %v27690_v3, %v10107_v53  ;;  %vm22388_vm0 = vmand %vm27842_vm1, %vm25490_vm10  ;;  %vm10340_vm14 = vcmp.lt.s32.totalorder %v27747_v31, 0  ;;  %11835 = vpow2.f32 %v10163_v25  ;;  %vm27845_vm12 = vcmp.eq.f32.partialorder %v27716_v18, 3212836864 }
 0x66d   : > { %v3158_v7 = vsub.f32 1.0, %v10108_v32  ;;  %vm10352_vm8 = vmor %vm22388_vm0, %vm22353_vm9  ;;  %v10245_v3 = vsel %vm22334_vm11, %v10244_v49, %v10242_v42  ;;  %v10251_v43 = vsel %vm27845_vm12, 1065353216, %v10249_v60  ;;  %vm27846_vm5 = vcmp.eq.f32.partialorder %v17999_v34, 0  ;;  %v11832_v36 = vpop.eup %11831 }
 0x66e   : > { %vm27847_vm4 = vcmp.eq.f32.partialorder %v27716_v18, 1065353216  ;;  %v22413_v4 = vand.u32 2147483647, %v19056_v9  ;;  %vm27850_vm11 = vcmp.eq.f32.partialorder %v18002_v27, 2139095040  ;;  %vm10343_vm12 = vmand %vm10337_vm3, %vm27374_vm7  ;;  %vm27851_vm10 = vcmp.eq.f32.partialorder %v21930_v10, 2139095040 }
 0x66f   : > { %vm22406_vm1 = vmor %vm27847_vm4, %vm27846_vm5  ;;  %v3275_v41 = vand.u32 4294901760, %v3158_v7  ;;  %v10252_v39 = vsel %vm27850_vm11, %v10251_v43, %v10245_v3  ;;  %vm10181_vm5 = vcmp.lt.f32.partialorder %v27787_v33, 0  ;;  %vm10185_vm4 = vcmp.gt.f32.partialorder %v22161_v50, 1065353216 }
 0x670   : > { %v10257_v8 = vsel %vm27851_vm10, %v10256_v63, %v10252_v39  ;;  %v10344_v53 = vsel %vm10343_vm12, 2143289344, %v11832_v36  ;;  %vm22429_vm2 = vmand %vm10340_vm14, %vm18072_vm13  ;;  %v10353_v60 = vsel %vm10352_vm8, 2139095040, %v26868_v62  ;;  %11837 = vlog2.f32 %v22413_v4 }
 0x671   : > { %v22440_v10 = vpack.c.bf16 %v3275_v41, %v3271_v2  ;;  %v22442_v63 = vsub.f32 %v3158_v7, %v3275_v41  ;;  %v10261_v25 = vsel %vm22373_vm6, 2143289344, %v10257_v8  ;;  %vm27855_vm10 = vcmp.eq.f32.partialorder %v27747_v31, 0  ;;  %v11834_v3 = vpop.eup %11833 }
 0x672   : > { %v10346_v32 = vsel %vm27855_vm10, %v18109_v57, %v10344_v53  ;;  %vm27856_vm14 = vcmp.ne.f32.partialorder %v27747_v31, %v27747_v31  ;;  %v27859_v2 = vsub.f32 %v18028_v11, %v21647_v23  ;;  %v10263_v5 = vsel %vm22406_vm1, 1065353216, %v10261_v25 }
 0x673   : > { %27854 = vst [vmem:[#allocation106_spill] sm:$0xff] %v22440_v10  ;;  %vm22454_vm9 = vmor %vm27856_vm14, %vm27749_vm15  ;;  %v10348_v37 = vxor.u32 2147483648, %v10346_v32  ;;  %vm27860_vm6 = vcmp.eq.f32.partialorder %v17999_v34, 0  ;;  %vm27861_vm0 = vcmp.eq.f32.partialorder %v27747_v31, 1065353216  ;;  %vm10182_vm11 = vcmp.eq.f32.partialorder %v27787_v33, 0  ;;  %5064 = vmatpush1.bf16.msra.mxu1 %v22440_v10  ;;  %5256 = vmatpush1.bf16.msra.mxu0 %v22440_v10 }
 0x674   : > { %v22462_v49 = vmul.f32 %v18046_v58, %v27859_v2  ;;  %vm22470_vm8 = vmor %vm27861_vm0, %vm27860_vm6  ;;  %vm27864_vm12 = vcmp.eq.f32.partialorder %v17999_v34, 1065353216  ;;  %vm10342_vm1 = vcmp.eq.f32.partialorder %v22031_v61, 2139095040  ;;  %vm10354_vm10 = vcmp.eq.f32.partialorder %v27747_v31, 3212836864 }
 0x675   : > { %v10264_v23 = vsel %vm27864_vm12, %v27716_v18, %v10263_v5  ;;  %vm10184_vm14 = vcmp.lt.s32.totalorder %v27787_v33, 0  ;;  %vm27865_vm6 = vcmp.lt.f32.partialorder %v17999_v34, 0  ;;  %v10349_v40 = vsel %vm22429_vm2, %v10348_v37, %v10346_v32  ;;  %vm22497_vm12 = vmand %vm10181_vm5, %vm27374_vm7 }
 0x676   : > { %vm22487_vm0 = vmxor %vm27865_vm6, %vm10185_vm4  ;;  %v10355_v36 = vsel %vm10354_vm10, 1065353216, %v10353_v60  ;;  %v3161_v41 = vsub.f32 1.0, %v10264_v23  ;;  %v10267_v61 = vmul.f32 %v11834_v3, %v17999_v34  ;;  %vm27870_vm4 = vcmp.eq.f32.partialorder %v18002_v27, 2139095040  ;;  %v11836_v32 = vpop.eup %11835 }
 0x677   : > { %v10356_v39 = vsel %vm27870_vm4, %v10355_v36, %v10349_v40  ;;  %v10360_v8 = vsel %vm10337_vm3, %v18089_v13, %v18055_v46  ;;  %vm27871_vm2 = vmmov %vm27865_vm6  ;;  %vm10206_vm6 = vcmp.ne.f32.partialorder %v27787_v33, %v27787_v33  ;;  %v22519_v42 = vand.u32 2147483647, %v19033_v17 }
 0x678   : > { %vm22512_vm10 = vmand %vm27871_vm2, %vm10182_vm11  ;;  %v10361_v60 = vsel %vm10342_vm1, %v10360_v8, %v10356_v39  ;;  %v3277_v25 = vand.u32 4294901760, %v3161_v41  ;;  %vm10183_vm4 = vcmp.eq.f32.partialorder %v27787_v33, 1065353216  ;;  %11839 = vpow2.f32 %v10267_v61 }
 0x679   : > { %vm10196_vm3 = vmor %vm22512_vm10, %vm22487_vm0  ;;  %v27874_v2 = vsub.f32 %v18023_v21, %v21692_v12  ;;  %v10365_v37 = vsel %vm22454_vm9, 2143289344, %v10361_v60  ;;  %vm25491_vm0 = vcmp.lt.f32.partialorder %v27829_v19, 0  ;;  %11841 = vlog2.f32 %v22519_v42 }
 0x67a   : > { %vm22536_vm1 = vmand %vm10184_vm14, %vm18072_vm13  ;;  %v10367_v21 = vsel %vm22470_vm8, 1065353216, %v10365_v37  ;;  %v22544_v23 = vsub.f32 %v3161_v41, %v3277_v25  ;;  %vm10289_vm14 = vcmp.gt.f32.partialorder %v22315_v20, 1065353216  ;;  %vm27879_vm2 = vcmp.eq.f32.partialorder %v17999_v34, 1065353216  ;;  %v11838_v41 = vpop.eup %11837 }
 0x67b   : > { %v2921_v5 = vmul.f32 %v18038_v51, %v27874_v2  ;;  %v10188_v51 = vsel %vm22497_vm12, 2143289344, %v11836_v32  ;;  %vm22553_vm9 = vmor %vm10206_vm6, %vm27749_vm15  ;;  %v10368_v7 = vsel %vm27879_vm2, %v27747_v31, %v10367_v21  ;;  %v10197_v40 = vsel %vm10196_vm3, 2139095040, %v26868_v62 }
 0x67c   : > { %v10190_v43 = vsel %vm10182_vm11, %v18109_v57, %v10188_v51  ;;  %vm27880_vm8 = vcmp.eq.f32.partialorder %v17999_v34, 0  ;;  %vm10288_vm10 = vcmp.lt.s32.totalorder %v27829_v19, 0  ;;  %v3163_v18 = vsub.f32 1.0, %v10368_v7  ;;  %vm22580_vm11 = vmand %vm25491_vm0, %vm27374_vm7 }
 0x67d   : > { %vm22569_vm12 = vmor %vm10183_vm4, %vm27880_vm8  ;;  %v10192_v31 = vxor.u32 2147483648, %v10190_v43  ;;  %vm25492_vm2 = vcmp.eq.f32.partialorder %v27829_v19, 0  ;;  %vm10198_vm4 = vcmp.eq.f32.partialorder %v27787_v33, 3212836864  ;;  %v10204_v39 = vsel %vm10181_vm5, %v18089_v13, %v18055_v46 }
 0x67e   : > { %vm27885_vm3 = vcmp.lt.f32.partialorder %v17999_v34, 0  ;;  %vm10310_vm6 = vcmp.ne.f32.partialorder %v27829_v19, %v27829_v19  ;;  %v10423_v53 = vmul.f32 %v11838_v41, %v17999_v34  ;;  %v3281_v60 = vand.u32 4294901760, %v3163_v18  ;;  %vm22604_vm5 = vmand %vm10288_vm10, %vm18072_vm13 }
 0x67f   : > { %vm22591_vm8 = vmxor %vm27885_vm3, %vm10289_vm14  ;;  %v10193_v32 = vsel %vm22536_vm1, %v10192_v31, %v10190_v43  ;;  %v10199_v2 = vsel %vm10198_vm4, 1065353216, %v10197_v40  ;;  %v22609_v21 = vand.u32 2147483647, %v19039_v35  ;;  %vm27890_vm14 = vcmp.eq.f32.partialorder %v18002_v27, 2139095040 }
 0x680   : > { %v10200_v51 = vsel %vm27890_vm14, %v10199_v2, %v10193_v32  ;;  %vm10287_vm3 = vcmp.eq.f32.partialorder %v27829_v19, 1065353216  ;;  %vm27891_vm1 = vcmp.lt.f32.partialorder %v17999_v34, 0  ;;  %11843 = vpow2.f32 %v10423_v53 }
 0x681   : > { %vm22618_vm4 = vmand %vm27891_vm1, %vm25492_vm2  ;;  %vm25493_vm10 = vcmp.lt.f32.partialorder %v19056_v9, 0  ;;  %v22623_v7 = vpack.c.bf16 %v3281_v60, %v3277_v25  ;;  %v22625_v43 = vsub.f32 %v3163_v18, %v3281_v60  ;;  %vm27895_vm0 = vcmp.eq.f32.partialorder %v22161_v50, 2139095040 }
 0x682   : > { %v10205_v40 = vsel %vm27895_vm0, %v10204_v39, %v10200_v51  ;;  %vm10300_vm14 = vmor %vm22618_vm4, %vm22591_vm8  ;;  %11845 = vlog2.f32 %v22609_v21  ;;  %v2988_v41 = vmul.f32 %v18061_v26, %v21740_v29  ;;  %v22638_v31 = vmul.f32 %v18061_v26, %v22462_v49  ;;  %v11840_v18 = vpop.eup %11839 }
 0x683   : > { %27894 = vst [vmem:[#allocation104_spill] sm:$0xff] %v22623_v7  ;;  %v10209_v25 = vsel %vm22553_vm9, 2143289344, %v10205_v40  ;;  %vm22647_vm0 = vmor %vm10310_vm6, %vm27749_vm15  ;;  %v27898_v29 = vsub.f32 %v18028_v11, %v21692_v12  ;;  %v22659_v59 = vmul.f32 %v18061_v26, %v2921_v5  ;;  %5066 = vmatprep.subr.bf16.mxu1 %v22623_v7  ;;  %5258 = vmatprep.subr.bf16.mxu0 %v22623_v7  ;;  %vm27899_vm9 = vcmp.eq.f32.partialorder %v17999_v34, 0  ;;  %v11842_v11 = vpop.eup %11841 }
 0x684   : > { %v10211_v39 = vsel %vm22569_vm12, 1065353216, %v10209_v25  ;;  %vm22669_vm6 = vmor %vm10287_vm3, %vm27899_vm9  ;;  %vm10444_vm1 = vcmp.lt.s32.totalorder %v19056_v9, 0  ;;  %vm27902_vm2 = vcmp.eq.f32.partialorder %v17999_v34, 1065353216  ;;  %v10292_v12 = vsel %vm22580_vm11, 2143289344, %v11840_v18 }
 0x685   : > { %v22656_v49 = vmul.f32 %v18046_v58, %v27898_v29  ;;  %v10212_v58 = vsel %vm27902_vm2, %v27787_v33, %v10211_v39  ;;  %v10301_v5 = vsel %vm10300_vm14, 2139095040, %v26868_v62  ;;  %vm25494_vm12 = vcmp.eq.f32.partialorder %v19056_v9, 0  ;;  %vm22690_vm3 = vmand %vm25493_vm10, %vm27374_vm7 }
 0x686   : > { %vm27905_vm2 = vcmp.eq.f32.partialorder %v27829_v19, 0  ;;  %v3160_v61 = vsub.f32 1.0, %v10212_v58  ;;  %vm27906_vm11 = vcmp.gt.f32.partialorder %v22413_v4, 1065353216  ;;  %vm27907_vm8 = vcmp.lt.f32.partialorder %v17999_v34, 0  ;;  %vm22716_vm9 = vmand %vm10444_vm1, %vm18072_vm13 }
 0x687   : > { %v10294_v33 = vsel %vm27905_vm2, %v18109_v57, %v10292_v12  ;;  %vm22701_vm4 = vmxor %vm27907_vm8, %vm27906_vm11  ;;  %v10527_v60 = vmul.f32 %v11842_v11, %v17999_v34  ;;  %v22707_v32 = vand.u32 2147483647, %v19030_v38  ;;  %v22709_v2 = vadd.f32 1.0, %v2988_v41 }
 0x688   : > { %v10296_v51 = vxor.u32 2147483648, %v10294_v33  ;;  %v27910_v3 = vmov 0  ;;  %vm10466_vm2 = vcmp.ne.f32.partialorder %v19056_v9, %v19056_v9  ;;  %vm10302_vm11 = vcmp.eq.f32.partialorder %v27829_v19, 3212836864  ;;  %vm27912_vm10 = vmmov %vm27907_vm8 }
 0x689   : > { %v27911_v3 = vsel %vm22716_vm9, 4294967295, %v27910_v3  ;;  %v3279_v40 = vand.u32 4294901760, %v3160_v61  ;;  %vm22728_vm14 = vmand %vm27912_vm10, %vm25494_vm12  ;;  %11847 = vpow2.f32 %v10527_v60  ;;  %v10303_v18 = vsel %vm10302_vm11, 1065353216, %v10301_v5 }
 0x68a   : > { %v10297_v25 = vsel %vm22604_vm5, %v10296_v51, %v10294_v33  ;;  %11849 = vlog2.f32 %v22707_v32  ;;  %vm27915_vm9 = vcmp.eq.f32.partialorder %v18002_v27, 2139095040  ;;  %vm27916_vm10 = vcmp.lt.f32.partialorder %v27829_v19, 0  ;;  %vm22750_vm5 = vmor %vm10466_vm2, %vm27749_vm15  ;;  %v11844_v58 = vpop.eup %11843 }
 0x68b   : > { %v10304_v29 = vsel %vm27915_vm9, %v10303_v18, %v10297_v25  ;;  %v10308_v39 = vsel %vm27916_vm10, %v18089_v13, %v18055_v46  ;;  %v22746_v37 = vsub.f32 %v3160_v61, %v3279_v40  ;;  %vm10549_vm11 = vcmp.gt.f32.partialorder %v22519_v42, 1065353216 }
 0x68c   : > { %vm27920_vm12 = vcmp.eq.f32.partialorder %v22315_v20, 2139095040  ;;  %vm27921_vm8 = vcmp.eq.f32.partialorder %v17999_v34, 0  ;;  %vm27922_vm10 = vcmp.eq.f32.partialorder %v19056_v9, 1065353216  ;;  %vm10548_vm2 = vcmp.lt.s32.totalorder %v19033_v17, 0  ;;  %v11846_v61 = vpop.eup %11845 }
 0x68d   : > { %27917 = vst [vmem:[#allocation137_spill] sm:$0xff] %v22746_v37  ;;  %v10309_v12 = vsel %vm27920_vm12, %v10308_v39, %v10304_v29  ;;  %vm22762_vm1 = vmor %vm27922_vm10, %vm27921_vm8  ;;  %v22768_v33 = vand.u32 2147483647, %v19852_v44  ;;  %v10448_v60 = vsel %vm22690_vm3, 2143289344, %v11844_v58  ;;  %vm25497_vm8 = vcmp.eq.f32.partialorder %v19033_v17, 0 }
 0x68e   : > { %v10313_v20 = vsel %vm22647_vm0, 2143289344, %v10309_v12  ;;  %vm27925_vm12 = vmor %vm22728_vm14, %vm22701_vm4  ;;  %vm27926_vm10 = vcmp.lt.f32.partialorder %v19033_v17, 0  ;;  %vm27929_vm0 = vcmp.eq.f32.partialorder %v19056_v9, 0  ;;  %vm27930_vm3 = vcmp.lt.f32.partialorder %v17999_v34, 0 }
 0x68f   : > { %v10457_v51 = vsel %vm27925_vm12, 2139095040, %v26868_v62  ;;  %vm22785_vm9 = vmand %vm27926_vm10, %vm27374_vm7  ;;  %v10315_v50 = vsel %vm22669_vm6, 1065353216, %v10313_v20  ;;  %v10450_v36 = vsel %vm27929_vm0, %v18109_v57, %v10448_v60  ;;  %v10371_v41 = vmul.f32 %v11846_v61, %v17999_v34 }
 0x690   : > { %vm22798_vm4 = vmxor %vm27930_vm3, %vm10549_vm11  ;;  %11851 = vlog2.f32 %v22768_v33  ;;  %vm27933_vm14 = vcmp.eq.f32.partialorder %v17999_v34, 1065353216  ;;  %v10452_v18 = vxor.u32 2147483648, %v10450_v36  ;;  %vm10458_vm6 = vcmp.eq.f32.partialorder %v19056_v9, 3212836864 }
 0x691   : > { %v10316_v53 = vsel %vm27933_vm14, %v27829_v19, %v10315_v50  ;;  %vm22812_vm12 = vmand %vm10548_vm2, %vm18072_vm13  ;;  %v27934_v29 = vmov 0  ;;  %vm10570_vm11 = vcmp.ne.f32.partialorder %v19033_v17, %v19033_v17  ;;  %vm27936_vm10 = vcmp.lt.f32.partialorder %v19056_v9, 0 }
 0x692   : > { %v27935_v29 = vsel %vm22812_vm12, 4294967295, %v27934_v29  ;;  %v3162_v39 = vsub.f32 1.0, %v10316_v53  ;;  %v10464_v19 = vsel %vm27936_vm10, %v18089_v13, %v18055_v46  ;;  %vm22827_vm14 = vmand %vm27930_vm3, %vm25497_vm8  ;;  %11853 = vpow2.f32 %v10371_v41 }
 0x693   : > { %vm27939_vm2 = vnez %v27911_v3  ;;  %v10459_v61 = vsel %vm10458_vm6, 1065353216, %v10457_v51  ;;  %vm25498_vm13 = vcmp.lt.f32.partialorder %v19039_v35, 0  ;;  %vm27940_vm3 = vcmp.eq.f32.partialorder %v18002_v27, 2139095040  ;;  %vm22844_vm8 = vmor %vm10570_vm11, %vm27749_vm15  ;;  %v11848_v50 = vpop.eup %11847 }
 0x694   : > { %v10453_v12 = vsel %vm27939_vm2, %v10452_v18, %v10450_v36  ;;  %v3283_v20 = vand.u32 4294901760, %v3162_v39  ;;  %v22850_v51 = vand.u32 2147483647, %v19096_v28  ;;  %vm27943_vm2 = vcmp.eq.f32.partialorder %v22413_v4, 2139095040  ;;  %v11850_v18 = vpop.eup %11849 }
 0x695   : > { %v10460_v60 = vsel %vm27940_vm3, %v10459_v61, %v10453_v12  ;;  %vm27944_vm12 = vcmp.lt.f32.partialorder %v19033_v17, 0  ;;  %vm27945_vm3 = vcmp.eq.f32.partialorder %v17999_v34, 0  ;;  %vm27946_vm11 = vcmp.eq.f32.partialorder %v19033_v17, 1065353216 }
 0x696   : > { %v10465_v36 = vsel %vm27943_vm2, %v10464_v19, %v10460_v60  ;;  %v10568_v41 = vsel %vm27944_vm12, %v18089_v13, %v18055_v46  ;;  %vm22862_vm0 = vmor %vm27946_vm11, %vm27945_vm3  ;;  %vm25499_vm6 = vcmp.eq.f32.partialorder %v19039_v35, 0  ;;  %vm10392_vm10 = vcmp.lt.s32.totalorder %v19039_v35, 0 }
 0x697   : > { %v22868_v4 = vpack.c.bf16 %v3283_v20, %v3279_v40  ;;  %v22870_v19 = vsub.f32 %v3162_v39, %v3283_v20  ;;  %v10469_v12 = vsel %vm22750_vm5, 2143289344, %v10465_v36  ;;  %v10552_v61 = vsel %vm22785_vm9, 2143289344, %v11848_v50  ;;  %vm22880_vm12 = vmand %vm25498_vm13, %vm27374_vm7 }
 0x698   : > { %v10471_v40 = vsel %vm22762_vm1, 1065353216, %v10469_v12  ;;  %vm27953_vm2 = vcmp.eq.f32.partialorder %v19033_v17, 0  ;;  %vm27954_vm5 = vmor %vm22827_vm14, %vm22798_vm4  ;;  %vm27955_vm9 = vcmp.gt.f32.partialorder %v22609_v21, 1065353216  ;;  %vm27956_vm3 = vcmp.lt.f32.partialorder %v17999_v34, 0 }
 0x699   : > { %27949 = vst [vmem:[#allocation138_spill] sm:$0xff] %v22868_v4  ;;  %27950 = vst [vmem:[#allocation139_spill] sm:$0xff] %v22870_v19  ;;  %v10554_v39 = vsel %vm27953_vm2, %v18109_v57, %v10552_v61  ;;  %v10561_v11 = vsel %vm27954_vm5, 2139095040, %v26868_v62  ;;  %v10475_v5 = vmul.f32 %v11850_v18, %v17999_v34  ;;  %5068 = vmatpush1.bf16.msra.mxu1 %v22868_v4  ;;  %5260 = vmatpush1.bf16.msra.mxu0 %v22868_v4 }
 0x69a   : > { %vm22899_vm11 = vmxor %vm27956_vm3, %vm27955_vm9  ;;  %vm27959_vm1 = vcmp.eq.f32.partialorder %v17999_v34, 1065353216  ;;  %v10556_v58 = vxor.u32 2147483648, %v10554_v39  ;;  %vm27960_vm4 = vnez %v26829_v54  ;;  %11855 = vlog2.f32 %v22850_v51  ;;  %v11852_v36 = vpop.eup %11851 }
 0x69b   : > { %v10472_v8 = vsel %vm27959_vm1, %v19056_v9, %v10471_v40  ;;  %vm22913_vm14 = vmand %vm10392_vm10, %vm27960_vm4  ;;  %11857 = vpow2.f32 %v10475_v5  ;;  %vm27966_vm1 = vnez %v27935_v29  ;;  %vm27967_vm13 = vcmp.eq.f32.partialorder %v19033_v17, 3212836864 }
 0x69c   : > { %v3165_v50 = vsub.f32 1.0, %v10472_v8  ;;  %vm27963_vm9 = vmmov %vm27956_vm3  ;;  %v10557_v18 = vsel %vm27966_vm1, %v10556_v58, %v10554_v39  ;;  %v10563_v12 = vsel %vm27967_vm13, 1065353216, %v10561_v11  ;;  %vm27968_vm10 = vcmp.eq.f32.partialorder %v18002_v27, 2139095040  ;;  %v27972_v11 = vld [vmem:[#allocation81_spill] sm:$0xff]  ;;  %v11854_v8 = vpop.eup %11853 }
 0x69d   : > { %vm22925_vm3 = vmand %vm27963_vm9, %vm25499_vm6  ;;  %v10564_v61 = vsel %vm27968_vm10, %v10563_v12, %v10557_v18  ;;  %vm27969_vm13 = vcmp.ne.f32.partialorder %v19039_v35, %v19039_v35  ;;  %v27970_v29 = vmov 0  ;;  %v10631_v39 = vmul.f32 %v11852_v36, %v17999_v34 }
 0x69e   : > { %v3285_v40 = vand.u32 4294901760, %v3165_v50  ;;  %vm22948_vm1 = vmor %vm27969_vm13, %vm27749_vm15  ;;  %v22954_v5 = vand.u32 2147483647, %v27972_v11  ;;  %vm27973_vm5 = vcmp.eq.f32.partialorder %v22519_v42, 2139095040  ;;  %vm27974_vm10 = vcmp.lt.f32.partialorder %v19039_v35, 0 }
 0x69f   : > { %v27971_v29 = vsel %vm22948_vm1, 4294967295, %v27970_v29  ;;  %v10569_v58 = vsel %vm27973_vm5, %v10568_v41, %v10564_v61  ;;  %v10412_v18 = vsel %vm27974_vm10, %v18089_v13, %v18055_v46  ;;  %vm27975_vm2 = vcmp.eq.f32.partialorder %v17999_v34, 0 }
 0x6a0   : > { %vm27976_vm13 = vcmp.eq.f32.partialorder %v19039_v35, 1065353216  ;;  %vm25501_vm6 = vcmp.eq.f32.partialorder %v19030_v38, 0  ;;  %vm10496_vm1 = vcmp.lt.s32.totalorder %v19030_v38, 0  ;;  %v10573_v42 = vsel %vm22844_vm8, 2143289344, %v10569_v58 }
 0x6a1   : > { %vm22966_vm9 = vmor %vm27976_vm13, %vm27975_vm2  ;;  %v22974_v41 = vsub.f32 %v3165_v50, %v3285_v40  ;;  %v10396_v36 = vsel %vm22880_vm12, 2143289344, %v11854_v8  ;;  %vm27979_vm2 = vcmp.lt.f32.partialorder %v19030_v38, 0  ;;  %v10575_v4 = vsel %vm22862_vm0, 1065353216, %v10573_v42  ;;  %v27996_v42 = vld [vmem:[#allocation118_spill] sm:$0xff] }
 0x6a2   : > { %vm22983_vm10 = vmand %vm27979_vm2, %vm27374_vm7  ;;  %vm27982_vm8 = vcmp.eq.f32.partialorder %v19039_v35, 0  ;;  %vm27984_vm13 = vcmp.gt.f32.partialorder %v22707_v32, 1065353216  ;;  %vm27985_vm2 = vcmp.lt.f32.partialorder %v17999_v34, 0  ;;  %11859 = vpow2.f32 %v10631_v39 }
 0x6a3   : > { %v10398_v3 = vsel %vm27982_vm8, %v18109_v57, %v10396_v36  ;;  %vm27983_vm12 = vmor %vm22925_vm3, %vm22899_vm11  ;;  %vm27988_vm0 = vcmp.eq.f32.partialorder %v17999_v34, 1065353216  ;;  %11861 = vlog2.f32 %v22954_v5  ;;  %vm27995_vm11 = vcmp.eq.f32.partialorder %v19039_v35, 3212836864 }
 0x6a4   : > { %v10405_v60 = vsel %vm27983_vm12, 2139095040, %v26868_v62  ;;  %vm23002_vm5 = vmxor %vm27985_vm2, %vm27984_vm13  ;;  %v10576_v53 = vsel %vm27988_vm0, %v19033_v17, %v10575_v4  ;;  %v10400_v8 = vxor.u32 2147483648, %v10398_v3  ;;  %v23044_v36 = vand.u32 2147483647, %v27996_v42 }
 0x6a5   : > { %vm23011_vm8 = vmand %vm10496_vm1, %vm27960_vm4  ;;  %v3167_v9 = vsub.f32 1.0, %v10576_v53  ;;  %vm27994_vm1 = vcmp.lt.f32.partialorder %v19030_v38, 0  ;;  %v10407_v58 = vsel %vm27995_vm11, 1065353216, %v10405_v60  ;;  %v11856_v53 = vpop.eup %11855  ;;  %vm10652_vm0 = vcmp.lt.s32.totalorder %v19852_v44, 0 }
 0x6a6   : > { %vm27991_vm12 = vmmov %vm27985_vm2  ;;  %v10516_v4 = vsel %vm27994_vm1, %v18089_v13, %v18055_v46  ;;  %v10401_v39 = vsel %vm22913_vm14, %v10400_v8, %v10398_v3  ;;  %vm27997_vm1 = vcmp.eq.f32.partialorder %v18002_v27, 2139095040  ;;  %vm27998_vm14 = vcmp.ne.f32.partialorder %v19030_v38, %v19030_v38  ;;  %v11858_v60 = vpop.eup %11857 }
 0x6a7   : > { %vm23023_vm13 = vmand %vm27991_vm12, %vm25501_vm6  ;;  %v3289_v7 = vand.u32 4294901760, %v3167_v9  ;;  %v10408_v20 = vsel %vm27997_vm1, %v10407_v58, %v10401_v39  ;;  %v27999_v3 = vmov 0  ;;  %vm28001_vm6 = vcmp.eq.f32.partialorder %v22609_v21, 2139095040 }
 0x6a8   : > { %vm23053_vm11 = vmor %vm27998_vm14, %vm27749_vm15  ;;  %v10413_v8 = vsel %vm28001_vm6, %v10412_v18, %v10408_v20  ;;  %vm28002_vm3 = vcmp.eq.f32.partialorder %v17999_v34, 0  ;;  %vm28003_vm1 = vcmp.eq.f32.partialorder %v19030_v38, 1065353216  ;;  %vm28006_vm14 = vcmp.lt.f32.partialorder %v19852_v44, 0 }
 0x6a9   : > { %v28000_v3 = vsel %vm23053_vm11, 4294967295, %v27999_v3  ;;  %vm23065_vm2 = vmor %vm28003_vm1, %vm28002_vm3  ;;  %v10735_v21 = vmul.f32 %v11856_v53, %v17999_v34  ;;  %11863 = vlog2.f32 %v23044_v36  ;;  %v23081_v18 = vpack.c.bf16 %v3289_v7, %v3285_v40 }
 0x6aa   : > { %vm23073_vm11 = vmand %vm28006_vm14, %vm27374_vm7  ;;  %v23083_v20 = vsub.f32 %v3167_v9, %v3289_v7  ;;  %vm28010_vm6 = vnez %v27971_v29  ;;  %v10500_v6 = vsel %vm22983_vm10, 2143289344, %v11858_v60  ;;  %vm28011_vm3 = vcmp.gt.f32.partialorder %v22768_v33, 1065353216 }
 0x6ab   : > { %28009 = vst [vmem:[#allocation81_spill] sm:$0xff] %v23081_v18  ;;  %v10417_v10 = vsel %vm28010_vm6, 2143289344, %v10413_v8  ;;  %vm28012_vm1 = vmmov %vm27991_vm12  ;;  %vm28015_vm12 = vcmp.eq.f32.partialorder %v19030_v38, 0  ;;  %11865 = vpow2.f32 %v10735_v21  ;;  %5070 = vmatprep.subr.bf16.mxu1 %v23081_v18  ;;  %5262 = vmatprep.subr.bf16.mxu0 %v23081_v18 }
 0x6ac   : > { %vm23093_vm14 = vmxor %vm28012_vm1, %vm28011_vm3  ;;  %v10419_v40 = vsel %vm22966_vm9, 1065353216, %v10417_v10  ;;  %v10502_v7 = vsel %vm28015_vm12, %v18109_v57, %v10500_v6  ;;  %vm28019_vm9 = vcmp.eq.f32.partialorder %v17999_v34, 1065353216  ;;  %v11860_v9 = vpop.eup %11859 }
 0x6ad   : > { %vm28016_vm10 = vmor %vm23023_vm13, %vm23002_vm5  ;;  %v10420_v6 = vsel %vm28019_vm9, %v19039_v35, %v10419_v40  ;;  %v10504_v10 = vxor.u32 2147483648, %v10502_v7  ;;  %vm28020_vm13 = vcmp.eq.f32.partialorder %v19852_v44, 0  ;;  %vm28026_vm5 = vcmp.ne.f32.partialorder %v19852_v44, %v19852_v44  ;;  %v11862_v8 = vpop.eup %11861 }
 0x6ae   : > { %v10509_v29 = vsel %vm28016_vm10, 2139095040, %v26868_v62  ;;  %vm23112_vm6 = vmand %vm10652_vm0, %vm27960_vm4  ;;  %v3164_v50 = vsub.f32 1.0, %v10420_v6  ;;  %vm28024_vm10 = vcmp.lt.f32.partialorder %v19852_v44, 0  ;;  %vm28029_vm9 = vcmp.eq.f32.partialorder %v18002_v27, 2139095040 }
 0x6af   : > { %vm28021_vm12 = vmmov %vm28012_vm1  ;;  %v10672_v35 = vsel %vm28024_vm10, %v18089_v13, %v18055_v46  ;;  %v10505_v17 = vsel %vm23011_vm8, %v10504_v10, %v10502_v7  ;;  %v10656_v40 = vsel %vm23073_vm11, 2143289344, %v11860_v9  ;;  %vm28030_vm8 = vcmp.eq.f32.partialorder %v17999_v34, 0 }
 0x6b0   : > { %vm23126_vm0 = vmand %vm28021_vm12, %vm28020_vm13  ;;  %vm28025_vm12 = vcmp.eq.f32.partialorder %v19030_v38, 3212836864  ;;  %vm10757_vm13 = vcmp.gt.f32.partialorder %v22850_v51, 1065353216  ;;  %v3287_v21 = vand.u32 4294901760, %v3164_v50  ;;  %vm28034_vm10 = vcmp.eq.f32.partialorder %v22707_v32, 2139095040 }
 0x6b1   : > { %vm10664_vm1 = vmor %vm23126_vm0, %vm23093_vm14  ;;  %v10511_v53 = vsel %vm28025_vm12, 1065353216, %v10509_v29  ;;  %vm28031_vm12 = vcmp.eq.f32.partialorder %v19852_v44, 1065353216  ;;  %v23169_v29 = vand.u32 2147483647, %v20862_v0  ;;  %vm28036_vm11 = vcmp.lt.f32.partialorder %v19096_v28, 0 }
 0x6b2   : > { %vm23150_vm3 = vmor %vm28026_vm5, %vm27749_vm15  ;;  %v10512_v25 = vsel %vm28029_vm9, %v10511_v53, %v10505_v17  ;;  %vm28035_vm9 = vcmp.eq.f32.partialorder %v19852_v44, 0  ;;  %v10665_v58 = vsel %vm10664_vm1, 2139095040, %v26868_v62  ;;  %v10579_v32 = vmul.f32 %v11862_v8, %v17999_v34 }
 0x6b3   : > { %vm23164_vm5 = vmor %vm28031_vm12, %vm28030_vm8  ;;  %v10517_v6 = vsel %vm28034_vm10, %v10516_v4, %v10512_v25  ;;  %v10658_v10 = vsel %vm28035_vm9, %v18109_v57, %v10656_v40  ;;  %vm28039_vm10 = vnez %v28000_v3  ;;  %v23193_v17 = vsub.f32 %v3164_v50, %v3287_v21  ;;  %v11864_v50 = vpop.eup %11863 }
 0x6b4   : > { %vm23186_vm8 = vmand %vm28036_vm11, %vm27374_vm7  ;;  %v10521_v4 = vsel %vm28039_vm10, 2143289344, %v10517_v6  ;;  %v10660_v12 = vxor.u32 2147483648, %v10658_v10  ;;  %vm28040_vm14 = vcmp.lt.f32.partialorder %v17999_v34, 0  ;;  %vm28043_vm1 = vcmp.lt.s32.totalorder %v19096_v28, 0 }
 0x6b5   : > { %vm23200_vm0 = vmxor %vm28040_vm14, %vm10757_vm13  ;;  %v10523_v53 = vsel %vm23065_vm2, 1065353216, %v10521_v4  ;;  %vm10778_vm10 = vcmp.ne.f32.partialorder %v19096_v28, %v19096_v28  ;;  %11867 = vpow2.f32 %v10579_v32  ;;  %vm28046_vm13 = vcmp.eq.f32.partialorder %v17999_v34, 1065353216 }
 0x6b6   : > { %vm23210_vm9 = vmand %vm28043_vm1, %vm27960_vm4  ;;  %v10524_v39 = vsel %vm28046_vm13, %v19030_v38, %v10523_v53  ;;  %v10661_v8 = vsel %vm23112_vm6, %v10660_v12, %v10658_v10  ;;  %vm28047_vm2 = vcmp.eq.f32.partialorder %v19852_v44, 3212836864  ;;  %vm28048_vm1 = vcmp.eq.f32.partialorder %v19096_v28, 0  ;;  %v11866_v10 = vpop.eup %11865 }
 0x6b7   : > { %v10667_v25 = vsel %vm28047_vm2, 1065353216, %v10665_v58  ;;  %vm28049_vm11 = vmmov %vm28040_vm14  ;;  %11869 = vlog2.f32 %v23169_v29  ;;  %v3166_v6 = vsub.f32 1.0, %v10524_v39  ;;  %vm28052_vm13 = vcmp.eq.f32.partialorder %v18002_v27, 2139095040 }
 0x6b8   : > { %vm23229_vm12 = vmand %vm28049_vm11, %vm28048_vm1  ;;  %v10668_v38 = vsel %vm28052_vm13, %v10667_v25, %v10661_v8  ;;  %v10683_v61 = vmul.f32 %v11864_v50, %v17999_v34  ;;  %vm28053_vm11 = vcmp.eq.f32.partialorder %v22768_v33, 2139095040  ;;  %vm28054_vm1 = vcmp.lt.f32.partialorder %v19096_v28, 0 }
 0x6b9   : > { %v10673_v58 = vsel %vm28053_vm11, %v10672_v35, %v10668_v38  ;;  %v10776_v32 = vsel %vm28054_vm1, %v18089_v13, %v18055_v46  ;;  %vm23253_vm13 = vmor %vm10778_vm10, %vm27749_vm15  ;;  %vm10600_vm14 = vcmp.lt.s32.totalorder %v27972_v11, 0  ;;  %vm10601_vm2 = vcmp.gt.f32.partialorder %v22954_v5, 1065353216 }
 0x6ba   : > { %v3291_v33 = vand.u32 4294901760, %v3166_v6  ;;  %v10677_v35 = vsel %vm23150_vm3, 2143289344, %v10673_v58  ;;  %v10760_v12 = vsel %vm23186_vm8, 2143289344, %v11866_v10  ;;  %vm28057_vm11 = vcmp.eq.f32.partialorder %v17999_v34, 0  ;;  %vm28062_vm3 = vmor %vm23229_vm12, %vm23200_vm0 }
 0x6bb   : > { %vm28058_vm1 = vcmp.eq.f32.partialorder %v19096_v28, 1065353216  ;;  %11871 = vpow2.f32 %v10683_v61  ;;  %v10679_v50 = vsel %vm23164_vm5, 1065353216, %v10677_v35  ;;  %vm28061_vm10 = vcmp.eq.f32.partialorder %v19096_v28, 0 }
 0x6bc   : > { %vm23267_vm6 = vmor %vm28058_vm1, %vm28057_vm11  ;;  %v10762_v60 = vsel %vm28061_vm10, %v18109_v57, %v10760_v12  ;;  %v10769_v9 = vsel %vm28062_vm3, 2139095040, %v26868_v62  ;;  %vm25506_vm8 = vcmp.eq.f32.partialorder %v27972_v11, 0  ;;  %vm28063_vm11 = vcmp.lt.f32.partialorder %v27972_v11, 0 }
 0x6bd   : > { %vm23287_vm1 = vmand %vm28063_vm11, %vm27374_vm7  ;;  %v23291_v39 = vpack.c.bf16 %v3291_v33, %v3287_v21  ;;  %v23293_v8 = vsub.f32 %v3166_v6, %v3291_v33  ;;  %vm28067_vm5 = vcmp.eq.f32.partialorder %v17999_v34, 1065353216  ;;  %v10764_v25 = vxor.u32 2147483648, %v10762_v60 }
 0x6be   : > { %v10680_v14 = vsel %vm28067_vm5, %v19852_v44, %v10679_v50  ;;  %vm28068_vm12 = vcmp.lt.f32.partialorder %v17999_v34, 0  ;;  %vm23311_vm3 = vmand %vm10600_vm14, %vm27960_vm4  ;;  %v23317_v44 = vand.u32 2147483647, %v20812_v16  ;;  %v23406_v40 = vand.u32 2147483647, %v20849_v1 }
 0x6bf   : > { %28066 = vst [vmem:[#allocation118_spill] sm:$0xff] %v23291_v39  ;;  %vm23302_vm0 = vmxor %vm28068_vm12, %vm10601_vm2  ;;  %v3169_v38 = vsub.f32 1.0, %v10680_v14  ;;  %5072 = vmatpush1.bf16.msra.mxu1 %v23291_v39  ;;  %5264 = vmatpush1.bf16.msra.mxu0 %v23291_v39  ;;  %v10765_v6 = vsel %vm23210_vm9, %v10764_v25, %v10762_v60  ;;  %vm28073_vm2 = vcmp.eq.f32.partialorder %v19096_v28, 3212836864  ;;  %vm28077_vm9 = vcmp.eq.f32.partialorder %v18002_v27, 2139095040  ;;  %v11868_v33 = vpop.eup %11867 }
 0x6c0   : > { %v10771_v61 = vsel %vm28073_vm2, 1065353216, %v10769_v9  ;;  %vm28074_vm5 = vmmov %vm28068_vm12  ;;  %11873 = vlog2.f32 %v23317_v44  ;;  %vm28081_vm2 = vcmp.lt.f32.partialorder %v17999_v34, 0  ;;  %v10604_v9 = vsel %vm23287_vm1, 2143289344, %v11868_v33 }
 0x6c1   : > { %vm23330_vm12 = vmand %vm28074_vm5, %vm25506_vm8  ;;  %v10772_v3 = vsel %vm28077_vm9, %v10771_v61, %v10765_v6  ;;  %v3293_v58 = vand.u32 4294901760, %v3169_v38  ;;  %vm28078_vm5 = vcmp.eq.f32.partialorder %v22850_v51, 2139095040  ;;  %vm10701_vm9 = vcmp.lt.f32.partialorder %v27996_v42, 0  ;;  %v11870_v60 = vpop.eup %11869 }
 0x6c2   : > { %v10777_v35 = vsel %vm28078_vm5, %v10776_v32, %v10772_v3  ;;  %vm28079_vm10 = vmmov %vm28063_vm11  ;;  %vm28080_vm11 = vcmp.gt.f32.partialorder %v23044_v36, 1065353216  ;;  %v10839_v53 = vmul.f32 %v11870_v60, %v17999_v34 }
 0x6c3   : > { %v10620_v12 = vsel %vm28079_vm10, %v18089_v13, %v18055_v46  ;;  %vm23357_vm14 = vmxor %vm28081_vm2, %vm28080_vm11  ;;  %v10781_v51 = vsel %vm23253_vm13, 2143289344, %v10777_v35  ;;  %v23363_v32 = vsub.f32 %v3169_v38, %v3293_v58  ;;  %vm28085_vm10 = vcmp.ne.f32.partialorder %v27972_v11, %v27972_v11 }
 0x6c4   : > { %vm23372_vm5 = vmor %vm28085_vm10, %vm27749_vm15  ;;  %vm10704_vm11 = vcmp.lt.s32.totalorder %v27996_v42, 0  ;;  %v10783_v4 = vsel %vm23267_vm6, 1065353216, %v10781_v51  ;;  %vm28088_vm13 = vcmp.eq.f32.partialorder %v27972_v11, 0  ;;  %vm28090_vm2 = vcmp.eq.f32.partialorder %v27996_v42, 0 }
 0x6c5   : > { %28084 = vst [vmem:[#allocation140_spill] sm:$0xff] %v23363_v32  ;;  %v10606_v25 = vsel %vm28088_vm13, %v18109_v57, %v10604_v9  ;;  %vm28089_vm1 = vmor %vm23330_vm12, %vm23302_vm0  ;;  %vm28091_vm10 = vcmp.lt.f32.partialorder %v17999_v34, 0  ;;  %vm28094_vm6 = vcmp.eq.f32.partialorder %v17999_v34, 1065353216  ;;  %v11872_v10 = vpop.eup %11871  ;;  %11875 = vpow2.f32 %v10839_v53 }
 0x6c6   : > { %v10613_v7 = vsel %vm28089_vm1, 2139095040, %v26868_v62  ;;  %vm23392_vm8 = vmand %vm28091_vm10, %vm28090_vm2  ;;  %v10784_v6 = vsel %vm28094_vm6, %v19096_v28, %v10783_v4  ;;  %v10608_v61 = vxor.u32 2147483648, %v10606_v25  ;;  %vm10726_vm1 = vcmp.ne.f32.partialorder %v27996_v42, %v27996_v42 }
 0x6c7   : > { %v3171_v3 = vsub.f32 1.0, %v10784_v6  ;;  %vm10707_vm13 = vmand %vm10701_vm9, %vm27374_vm7  ;;  %vm28095_vm10 = vcmp.eq.f32.partialorder %v27972_v11, 3212836864  ;;  %vm28096_vm6 = vcmp.eq.f32.partialorder %v17999_v34, 0  ;;  %vm28097_vm12 = vcmp.eq.f32.partialorder %v27972_v11, 1065353216 }
 0x6c8   : > { %v10609_v28 = vsel %vm23311_vm3, %v10608_v61, %v10606_v25  ;;  %v10615_v33 = vsel %vm28095_vm10, 1065353216, %v10613_v7  ;;  %vm23423_vm0 = vmor %vm28097_vm12, %vm28096_vm6  ;;  %v10708_v60 = vsel %vm10707_vm13, 2143289344, %v11872_v10  ;;  %11877 = vlog2.f32 %v23406_v40 }
 0x6c9   : > { %v3297_v51 = vand.u32 4294901760, %v3171_v3  ;;  %vm28100_vm2 = vcmp.eq.f32.partialorder %v18002_v27, 2139095040  ;;  %vm28101_vm3 = vcmp.eq.f32.partialorder %v27996_v42, 0  ;;  %vm10711_vm10 = vmand %vm10704_vm11, %vm27960_vm4  ;;  %vm28103_vm13 = vcmp.eq.f32.partialorder %v22954_v5, 2139095040 }
 0x6ca   : > { %v10616_v9 = vsel %vm28100_vm2, %v10615_v33, %v10609_v28  ;;  %v10710_v21 = vsel %vm28101_vm3, %v18109_v57, %v10708_v60  ;;  %vm28102_vm12 = vmor %vm23392_vm8, %vm23357_vm14  ;;  %v10724_v53 = vsel %vm10701_vm9, %v18089_v13, %v18055_v46  ;;  %vm10861_vm8 = vcmp.gt.f32.partialorder %v23169_v29, 1065353216  ;;  %v11874_v61 = vpop.eup %11873 }
 0x6cb   : > { %v10717_v4 = vsel %vm28102_vm12, 2139095040, %v26868_v62  ;;  %v10621_v25 = vsel %vm28103_vm13, %v10620_v12, %v10616_v9  ;;  %v10712_v7 = vxor.u32 2147483648, %v10710_v21  ;;  %vm23454_vm11 = vmor %vm10726_vm1, %vm27749_vm15  ;;  %v23459_v50 = vpack.c.bf16 %v3297_v51, %v3293_v58 }
 0x6cc   : > { %v23461_v5 = vsub.f32 %v3171_v3, %v3297_v51  ;;  %v10625_v12 = vsel %vm23372_vm5, 2143289344, %v10621_v25  ;;  %vm28107_vm14 = vmmov %vm28096_vm6  ;;  %vm28108_vm9 = vcmp.eq.f32.partialorder %v27996_v42, 1065353216  ;;  %vm10860_vm1 = vcmp.lt.s32.totalorder %v20862_v0, 0 }
 0x6cd   : > { %28106 = vst [vmem:[#allocation141_spill] sm:$0xff] %v23459_v50  ;;  %vm23469_vm2 = vmor %vm28108_vm9, %vm28107_vm14  ;;  %v10627_v58 = vsel %vm23423_vm0, 1065353216, %v10625_v12  ;;  %v10713_v10 = vsel %vm10711_vm10, %v10712_v7, %v10710_v21  ;;  %vm28111_vm6 = vcmp.eq.f32.partialorder %v27996_v42, 3212836864  ;;  %vm10858_vm5 = vcmp.eq.f32.partialorder %v20862_v0, 0  ;;  %5074 = vmatprep.subr.bf16.mxu1 %v23459_v50  ;;  %5266 = vmatprep.subr.bf16.mxu0 %v23459_v50 }
 0x6ce   : > { %v10719_v3 = vsel %vm28111_vm6, 1065353216, %v10717_v4  ;;  %vm28112_vm3 = vcmp.lt.f32.partialorder %v20862_v0, 0  ;;  %vm28115_vm0 = vcmp.eq.f32.partialorder %v17999_v34, 1065353216  ;;  %vm10706_vm10 = vcmp.eq.f32.partialorder %v23044_v36, 2139095040  ;;  %vm23508_vm6 = vmand %vm10860_vm1, %vm27960_vm4  ;;  %v28122_v36 = vld [vmem:[#allocation80_spill] sm:$0xff] }
 0x6cf   : > { %vm23483_vm12 = vmand %vm28112_vm3, %vm27374_vm7  ;;  %v10628_v28 = vsel %vm28115_vm0, %v27972_v11, %v10627_v58  ;;  %vm28116_vm13 = vcmp.eq.f32.partialorder %v18002_v27, 2139095040  ;;  %vm28117_vm14 = vcmp.lt.f32.partialorder %v17999_v34, 0  ;;  %v10943_v60 = vmul.f32 %v11874_v61, %v17999_v34 }
 0x6d0   : > { %v10720_v33 = vsel %vm28116_vm13, %v10719_v3, %v10713_v10  ;;  %vm23499_vm9 = vmxor %vm28117_vm14, %vm10861_vm8  ;;  %v3168_v9 = vsub.f32 1.0, %v10628_v28  ;;  %vm10882_vm3 = vcmp.ne.f32.partialorder %v20862_v0, %v20862_v0  ;;  %v23515_v21 = vand.u32 2147483647, %v28122_v36 }
 0x6d1   : > { %v10725_v51 = vsel %vm10706_vm10, %v10724_v53, %v10720_v33  ;;  %v23518_v4 = vadd.f32 1.0, %v22638_v31  ;;  %vm10859_vm8 = vcmp.eq.f32.partialorder %v20862_v0, 1065353216  ;;  %vm28123_vm1 = vmmov %vm28117_vm14  ;;  %11879 = vpow2.f32 %v10943_v60  ;;  %v11876_v31 = vpop.eup %11875 }
 0x6d2   : > { %v10729_v25 = vsel %vm23454_vm11, 2143289344, %v10725_v51  ;;  %vm23527_vm0 = vmand %vm28123_vm1, %vm10858_vm5  ;;  %v3295_v12 = vand.u32 4294901760, %v3168_v9  ;;  %vm25507_vm10 = vcmp.lt.f32.partialorder %v20812_v16, 0  ;;  %11881 = vlog2.f32 %v23515_v21  ;;  %v11878_v10 = vpop.eup %11877 }
 0x6d3   : > { %v10731_v53 = vsel %vm23469_vm2, 1065353216, %v10729_v25  ;;  %vm10872_vm11 = vmor %vm23527_vm0, %vm23499_vm9  ;;  %v2987_v38 = vmul.f32 %v18061_v26, %v22656_v49  ;;  %v23542_v61 = vadd.f32 1.0, %v22659_v59  ;;  %vm28126_vm2 = vcmp.eq.f32.partialorder %v17999_v34, 1065353216 }
 0x6d4   : > { %v10732_v6 = vsel %vm28126_vm2, %v27996_v42, %v10731_v53  ;;  %vm23552_vm13 = vmor %vm10882_vm3, %vm27749_vm15  ;;  %vm10965_vm14 = vcmp.gt.f32.partialorder %v23317_v44, 1065353216  ;;  %v23557_v49 = vsub.f32 %v3168_v9, %v3295_v12  ;;  %v10864_v59 = vsel %vm23483_vm12, 2143289344, %v11876_v31 }
 0x6d5   : > { %v3170_v26 = vsub.f32 1.0, %v10732_v6  ;;  %vm28129_vm1 = vcmp.eq.f32.partialorder %v17999_v34, 0  ;;  %vm10964_vm3 = vcmp.lt.s32.totalorder %v20812_v16, 0  ;;  %v10866_v3 = vsel %vm10858_vm5, %v18109_v57, %v10864_v59 }
 0x6d6   : > { %vm23565_vm2 = vmor %vm10859_vm8, %vm28129_vm1  ;;  %v10873_v14 = vsel %vm10872_vm11, 2139095040, %v26868_v62  ;;  %vm25508_vm12 = vcmp.eq.f32.partialorder %v20812_v16, 0  ;;  %v10787_v33 = vmul.f32 %v11878_v10, %v17999_v34  ;;  %v10868_v51 = vxor.u32 2147483648, %v10866_v3 }
 0x6d7   : > { %vm23584_vm8 = vmand %vm25507_vm10, %vm27374_vm7  ;;  %v3299_v60 = vand.u32 4294901760, %v3170_v26  ;;  %vm10874_vm1 = vcmp.eq.f32.partialorder %v20862_v0, 3212836864  ;;  %vm28134_vm9 = vcmp.lt.f32.partialorder %v17999_v34, 0  ;;  %vm10986_vm5 = vcmp.ne.f32.partialorder %v20812_v16, %v20812_v16 }
 0x6d8   : > { %vm23595_vm0 = vmxor %vm28134_vm9, %vm10965_vm14  ;;  %11883 = vpow2.f32 %v10787_v33  ;;  %v23609_v25 = vand.u32 2147483647, %v21688_v55  ;;  %v10869_v31 = vsel %vm23508_vm6, %v10868_v51, %v10866_v3  ;;  %v10875_v6 = vsel %vm10874_vm1, 1065353216, %v10873_v14 }
 0x6d9   : > { %vm23602_vm10 = vmand %vm10964_vm3, %vm27960_vm4  ;;  %v23611_v7 = vpack.c.bf16 %v3299_v60, %v3295_v12  ;;  %v23613_v53 = vsub.f32 %v3170_v26, %v3299_v60  ;;  %vm28145_vm11 = vcmp.lt.f32.partialorder %v20862_v0, 0  ;;  %v23637_v11 = vadd.f32 1.0, %v2987_v38 }
 0x6da   : > { %vm28141_vm14 = vmmov %vm28134_vm9  ;;  %vm28144_vm9 = vcmp.eq.f32.partialorder %v18002_v27, 2139095040  ;;  %v10880_v12 = vsel %vm28145_vm11, %v18089_v13, %v18055_v46  ;;  %11885 = vlog2.f32 %v23609_v25  ;;  %vm10809_vm6 = vcmp.gt.f32.partialorder %v23406_v40, 1065353216 }
 0x6db   : > { %28139 = vst [vmem:[#allocation80_spill] sm:$0xff] %v23611_v7  ;;  %28140 = vst [vmem:[#allocation142_spill] sm:$0xff] %v23613_v53  ;;  %v10876_v59 = vsel %vm28144_vm9, %v10875_v6, %v10869_v31  ;;  %5076 = vmatpush1.bf16.msra.mxu1 %v23611_v7  ;;  %5268 = vmatpush1.bf16.msra.mxu0 %v23611_v7  ;;  %v11880_v38 = vpop.eup %11879  ;;  %vm28150_vm11 = vcmp.eq.f32.partialorder %v20812_v16, 1065353216  ;;  %v23667_v33 = vand.u32 2147483647, %v21518_v30  ;;  %v28163_v35 = vmov 0 }
 0x6dc   : > { %vm23621_vm3 = vmand %vm28141_vm14, %vm25508_vm12  ;;  %vm28146_vm14 = vcmp.eq.f32.partialorder %v23169_v29, 2139095040  ;;  %v11882_v60 = vpop.eup %11881  ;;  %v10968_v51 = vsel %vm23584_vm8, 2143289344, %v11880_v38  ;;  %vm28158_vm8 = vcmp.eq.f32.partialorder %v20812_v16, 0  ;;  %v28215_v10 = vmov 0 }
 0x6dd   : > { %v10881_v26 = vsel %vm28146_vm14, %v10880_v12, %v10876_v59  ;;  %vm23649_vm9 = vmor %vm10986_vm5, %vm27749_vm15  ;;  %vm28149_vm14 = vcmp.eq.f32.partialorder %v17999_v34, 0  ;;  %vm10808_vm5 = vcmp.lt.s32.totalorder %v20849_v1, 0  ;;  %v10970_v28 = vsel %vm28158_vm8, %v18109_v57, %v10968_v51 }
 0x6de   : > { %v10885_v14 = vsel %vm23552_vm13, 2143289344, %v10881_v26  ;;  %vm23661_vm1 = vmor %vm28150_vm11, %vm28149_vm14  ;;  %vm28153_vm13 = vcmp.lt.f32.partialorder %v20812_v16, 0  ;;  %vm28154_vm14 = vcmp.lt.f32.partialorder %v20849_v1, 0  ;;  %v10972_v26 = vxor.u32 2147483648, %v10970_v28 }
 0x6df   : > { %v10887_v58 = vsel %vm23565_vm2, 1065353216, %v10885_v14  ;;  %v10984_v31 = vsel %vm28153_vm13, %v18089_v13, %v18055_v46  ;;  %vm23682_vm12 = vmand %vm28154_vm14, %vm27374_vm7  ;;  %vm28157_vm2 = vcmp.eq.f32.partialorder %v17999_v34, 1065353216  ;;  %vm28160_vm14 = vcmp.lt.f32.partialorder %v17999_v34, 0 }
 0x6e0   : > { %v10888_v42 = vsel %vm28157_vm2, %v20862_v0, %v10887_v58  ;;  %vm28159_vm13 = vmor %vm23621_vm3, %vm23595_vm0  ;;  %v10891_v0 = vmul.f32 %v11882_v60, %v17999_v34  ;;  %vm10830_vm0 = vcmp.ne.f32.partialorder %v20849_v1, %v20849_v1  ;;  %11887 = vlog2.f32 %v23667_v33 }
 0x6e1   : > { %v10977_v59 = vsel %vm28159_vm13, 2139095040, %v26868_v62  ;;  %vm23702_vm11 = vmxor %vm28160_vm14, %vm10809_vm6  ;;  %v3173_v38 = vsub.f32 1.0, %v10888_v42  ;;  %vm10807_vm3 = vcmp.eq.f32.partialorder %v20849_v1, 1065353216  ;;  %vm28165_vm8 = vcmp.eq.f32.partialorder %v20849_v1, 0 }
 0x6e2   : > { %vm23711_vm2 = vmand %vm10808_vm5, %vm27960_vm4  ;;  %11889 = vpow2.f32 %v10891_v0  ;;  %v10973_v14 = vsel %vm23602_vm10, %v10972_v26, %v10970_v28  ;;  %v11884_v51 = vpop.eup %11883  ;;  %v23749_v28 = vand.u32 2147483647, %v21528_v48  ;;  %vm28173_vm6 = vcmp.eq.f32.partialorder %v23317_v44, 2139095040 }
 0x6e3   : > { %v28164_v35 = vsel %vm23711_vm2, 4294967295, %v28163_v35  ;;  %vm28166_vm13 = vmmov %vm28160_vm14  ;;  %vm28169_vm2 = vcmp.eq.f32.partialorder %v20812_v16, 3212836864  ;;  %v3301_v58 = vand.u32 4294901760, %v3173_v38  ;;  %v10812_v26 = vsel %vm23682_vm12, 2143289344, %v11884_v51 }
 0x6e4   : > { %vm23724_vm14 = vmand %vm28166_vm13, %vm28165_vm8  ;;  %v10979_v60 = vsel %vm28169_vm2, 1065353216, %v10977_v59  ;;  %vm10909_vm8 = vcmp.lt.f32.partialorder %v28122_v36, 0  ;;  %vm28170_vm13 = vcmp.eq.f32.partialorder %v18002_v27, 2139095040  ;;  %vm10913_vm2 = vcmp.gt.f32.partialorder %v23515_v21, 1065353216 }
 0x6e5   : > { %v10980_v42 = vsel %vm28170_vm13, %v10979_v60, %v10973_v14  ;;  %vm23742_vm5 = vmor %vm10830_vm0, %vm27749_vm15  ;;  %v23753_v0 = vsub.f32 %v3173_v38, %v3301_v58  ;;  %vm28175_vm0 = vcmp.eq.f32.partialorder %v17999_v34, 0  ;;  %vm10912_vm10 = vcmp.lt.s32.totalorder %v28122_v36, 0  ;;  %v11886_v60 = vpop.eup %11885 }
 0x6e6   : > { %v10985_v59 = vsel %vm28173_vm6, %v10984_v31, %v10980_v42  ;;  %vm23761_vm13 = vmor %vm10807_vm3, %vm28175_vm0  ;;  %vm28178_vm6 = vcmp.eq.f32.partialorder %v20849_v1, 0  ;;  %11891 = vlog2.f32 %v23749_v28  ;;  %v11047_v42 = vmul.f32 %v11886_v60, %v17999_v34 }
 0x6e7   : > { %28174 = vst [vmem:[#allocation143_spill] sm:$0xff] %v23753_v0  ;;  %v10989_v44 = vsel %vm23649_vm9, 2143289344, %v10985_v59  ;;  %v10814_v31 = vsel %vm28178_vm6, %v18109_v57, %v10812_v26  ;;  %vm28179_vm12 = vmor %vm23724_vm14, %vm23702_vm11  ;;  %vm28182_vm9 = vcmp.lt.f32.partialorder %v20849_v1, 0  ;;  %vm28183_vm11 = vcmp.lt.f32.partialorder %v17999_v34, 0 }
 0x6e8   : > { %v10821_v6 = vsel %vm28179_vm12, 2139095040, %v26868_v62  ;;  %vm23781_vm3 = vmand %vm10909_vm8, %vm27374_vm7  ;;  %v10991_v3 = vsel %vm23661_vm1, 1065353216, %v10989_v44  ;;  %v10816_v51 = vxor.u32 2147483648, %v10814_v31  ;;  %v10828_v12 = vsel %vm28182_vm9, %v18089_v13, %v18055_v46 }
 0x6e9   : > { %vm23796_vm14 = vmxor %vm28183_vm11, %vm10913_vm2  ;;  %vm28186_vm0 = vcmp.eq.f32.partialorder %v17999_v34, 1065353216  ;;  %vm28189_vm9 = vnez %v28164_v35  ;;  %vm28190_vm11 = vcmp.eq.f32.partialorder %v20849_v1, 3212836864  ;;  %vm28192_vm1 = vcmp.lt.f32.partialorder %v17999_v34, 0 }
 0x6ea   : > { %v10992_v29 = vsel %vm28186_vm0, %v20812_v16, %v10991_v3  ;;  %vm23807_vm6 = vmand %vm10912_vm10, %vm27960_vm4  ;;  %v10817_v60 = vsel %vm28189_vm9, %v10816_v51, %v10814_v31  ;;  %v10823_v16 = vsel %vm28190_vm11, 1065353216, %v10821_v6  ;;  %vm28191_vm0 = vcmp.eq.f32.partialorder %v28122_v36, 0  ;;  %v11888_v31 = vpop.eup %11887 }
 0x6eb   : > { %v3175_v26 = vsub.f32 1.0, %v10992_v29  ;;  %vm23822_vm10 = vmand %vm28192_vm1, %vm28191_vm0  ;;  %11893 = vpow2.f32 %v11047_v42  ;;  %vm28195_vm12 = vcmp.eq.f32.partialorder %v18002_v27, 2139095040  ;;  %v10932_v35 = vsel %vm10909_vm8, %v18089_v13, %v18055_v46 }
 0x6ec   : > { %v10824_v3 = vsel %vm28195_vm12, %v10823_v16, %v10817_v60  ;;  %vm28196_vm12 = vcmp.eq.f32.partialorder %v23406_v40, 2139095040  ;;  %vm28197_vm0 = vcmp.ne.f32.partialorder %v28122_v36, %v28122_v36  ;;  %vm11069_vm8 = vcmp.gt.f32.partialorder %v23609_v25, 1065353216  ;;  %v11890_v60 = vpop.eup %11889 }
 0x6ed   : > { %v3305_v6 = vand.u32 4294901760, %v3175_v26  ;;  %v10829_v51 = vsel %vm28196_vm12, %v10828_v12, %v10824_v3  ;;  %vm23846_vm2 = vmor %vm28197_vm0, %vm27749_vm15  ;;  %v23852_v29 = vand.u32 2147483647, %v21498_v24  ;;  %vm28200_vm12 = vcmp.eq.f32.partialorder %v17999_v34, 0 }
 0x6ee   : > { %v10833_v16 = vsel %vm23742_vm5, 2143289344, %v10829_v51  ;;  %vm28201_vm11 = vcmp.eq.f32.partialorder %v28122_v36, 1065353216  ;;  %vm11068_vm1 = vcmp.lt.s32.totalorder %v21688_v55, 0  ;;  %v11151_v12 = vmul.f32 %v11888_v31, %v17999_v34 }
 0x6ef   : > { %vm23860_vm9 = vmor %vm28201_vm11, %vm28200_vm12  ;;  %v23867_v3 = vpack.c.bf16 %v3305_v6, %v3301_v58  ;;  %v23869_v7 = vsub.f32 %v3175_v26, %v3305_v6  ;;  %v10835_v9 = vsel %vm23761_vm13, 1065353216, %v10833_v16  ;;  %v10916_v51 = vsel %vm23781_vm3, 2143289344, %v11890_v60 }
 0x6f0   : > { %vm28206_vm5 = vcmp.lt.f32.partialorder %v21688_v55, 0  ;;  %vm28209_vm12 = vcmp.eq.f32.partialorder %v17999_v34, 1065353216  ;;  %vm28210_vm0 = vcmp.eq.f32.partialorder %v28122_v36, 0  ;;  %vm28211_vm13 = vmor %vm23822_vm10, %vm23796_vm14  ;;  %vm28212_vm3 = vcmp.lt.f32.partialorder %v17999_v34, 0  ;;  %v11892_v44 = vpop.eup %11891 }
 0x6f1   : > { %28204 = vst [vmem:[#allocation144_spill] sm:$0xff] %v23867_v3  ;;  %28205 = vst [vmem:[#allocation145_spill] sm:$0xff] %v23869_v7  ;;  %v10836_v58 = vsel %vm28209_vm12, %v20849_v1, %v10835_v9  ;;  %v10918_v14 = vsel %vm28210_vm0, %v18109_v57, %v10916_v51  ;;  %v10925_v38 = vsel %vm28211_vm13, 2139095040, %v26868_v62  ;;  %11895 = vpow2.f32 %v11151_v12  ;;  %5078 = vmatprep.subr.bf16.mxu1 %v23867_v3 }
 0x6f2   : > { %vm23879_vm11 = vmand %vm28206_vm5, %vm27374_vm7  ;;  %5270 = vmatprep.subr.bf16.mxu0 %v23867_v3  ;;  %v10920_v1 = vxor.u32 2147483648, %v10918_v14  ;;  %v3172_v31 = vsub.f32 1.0, %v10836_v58  ;;  %11897 = vlog2.f32 %v23852_v29  ;;  %vm11173_vm10 = vcmp.gt.f32.partialorder %v23667_v33, 1065353216 }
 0x6f3   : > { %vm23899_vm5 = vmxor %vm28212_vm3, %vm11069_vm8  ;;  %vm28217_vm8 = vcmp.eq.f32.partialorder %v21688_v55, 0  ;;  %v10995_v51 = vmul.f32 %v11892_v44, %v17999_v34  ;;  %v28225_v59 = vmov 0 }
 0x6f4   : > { %vm23909_vm14 = vmand %vm11068_vm1, %vm27960_vm4  ;;  %vm28221_vm1 = vcmp.lt.f32.partialorder %v21688_v55, 0  ;;  %v10921_v16 = vsel %vm23807_vm6, %v10920_v1, %v10918_v14  ;;  %v3303_v9 = vand.u32 4294901760, %v3172_v31  ;;  %vm28224_vm6 = vcmp.ne.f32.partialorder %v21688_v55, %v21688_v55 }
 0x6f5   : > { %v28216_v10 = vsel %vm23909_vm14, 4294967295, %v28215_v10  ;;  %vm28218_vm0 = vmmov %vm28212_vm3  ;;  %v11088_v60 = vsel %vm28221_vm1, %v18089_v13, %v18055_v46  ;;  %vm28222_vm14 = vcmp.eq.f32.partialorder %v28122_v36, 3212836864  ;;  %vm28223_vm1 = vcmp.eq.f32.partialorder %v18002_v27, 2139095040 }
 0x6f6   : > { %vm23920_vm12 = vmand %vm28218_vm0, %vm28217_vm8  ;;  %v10927_v12 = vsel %vm28222_vm14, 1065353216, %v10925_v38  ;;  %v23955_v14 = vand.u32 2147483647, %v23637_v11  ;;  %v11894_v38 = vpop.eup %11893  ;;  %vm28227_vm0 = vcmp.eq.f32.partialorder %v23515_v21, 2139095040  ;;  %v23959_v44 = vsub.f32 %v3172_v31, %v3303_v9 }
 0x6f7   : > { %v10928_v58 = vsel %vm28223_vm1, %v10927_v12, %v10921_v16  ;;  %vm23948_vm13 = vmor %vm28224_vm6, %vm27749_vm15  ;;  %vm28229_vm1 = vcmp.eq.f32.partialorder %v17999_v34, 0  ;;  %vm28230_vm6 = vcmp.eq.f32.partialorder %v21688_v55, 1065353216  ;;  %vm11172_vm14 = vcmp.lt.s32.totalorder %v21518_v30, 0 }
 0x6f8   : > { %v28226_v59 = vsel %vm23948_vm13, 4294967295, %v28225_v59  ;;  %v10933_v1 = vsel %vm28227_vm0, %v10932_v35, %v10928_v58  ;;  %28228 = vst [vmem:[#allocation146_spill] sm:$0xff] %v23959_v44  ;;  %vm23965_vm3 = vmor %vm28230_vm6, %vm28229_vm1  ;;  %vm28233_vm8 = vcmp.lt.f32.partialorder %v17999_v34, 0  ;;  %11899 = vpow2.f32 %v10995_v51 }
 0x6f9   : > { %vm23974_vm13 = vmxor %vm28233_vm8, %vm11173_vm10  ;;  %v10937_v21 = vsel %vm23846_vm2, 2143289344, %v10933_v1  ;;  %v11072_v35 = vsel %vm23879_vm11, 2143289344, %v11894_v38  ;;  %vm28236_vm0 = vcmp.lt.f32.partialorder %v21518_v30, 0  ;;  %11901 = vlog2.f32 %v23955_v14 }
 0x6fa   : > { %vm23986_vm1 = vmand %vm28236_vm0, %vm27374_vm7  ;;  %v10939_v42 = vsel %vm23860_vm9, 1065353216, %v10937_v21  ;;  %vm28239_vm2 = vcmp.eq.f32.partialorder %v21688_v55, 0  ;;  %vm28241_vm6 = vcmp.eq.f32.partialorder %v21518_v30, 0  ;;  %vm25514_vm9 = vcmp.lt.f32.partialorder %v21528_v48, 0 }
 0x6fb   : > { %v11074_v50 = vsel %vm28239_vm2, %v18109_v57, %v11072_v35  ;;  %vm28240_vm11 = vmor %vm23920_vm12, %vm23899_vm5  ;;  %vm28245_vm2 = vcmp.eq.f32.partialorder %v17999_v34, 1065353216  ;;  %vm28246_vm12 = vcmp.lt.f32.partialorder %v21518_v30, 0  ;;  %v11896_v1 = vpop.eup %11895 }
 0x6fc   : > { %v11081_v51 = vsel %vm28240_vm11, 2139095040, %v26868_v62  ;;  %vm28242_vm0 = vmmov %vm28233_vm8  ;;  %v10940_v40 = vsel %vm28245_vm2, %v28122_v36, %v10939_v42  ;;  %v11076_v38 = vxor.u32 2147483648, %v11074_v50  ;;  %v11192_v26 = vsel %vm28246_vm12, %v18089_v13, %v18055_v46 }
 0x6fd   : > { %vm24009_vm10 = vmand %vm28242_vm0, %vm28241_vm6  ;;  %v3174_v6 = vsub.f32 1.0, %v10940_v40  ;;  %vm11014_vm0 = vcmp.eq.f32.partialorder %v21528_v48, 0  ;;  %vm28249_vm12 = vnez %v28216_v10  ;;  %vm28250_vm11 = vcmp.eq.f32.partialorder %v21688_v55, 3212836864 }
 0x6fe   : > { %vm24031_vm6 = vmand %vm11172_vm14, %vm27960_vm4  ;;  %v11077_v21 = vsel %vm28249_vm12, %v11076_v38, %v11074_v50  ;;  %v11083_v35 = vsel %vm28250_vm11, 1065353216, %v11081_v51  ;;  %vm28251_vm14 = vcmp.ne.f32.partialorder %v21518_v30, %v21518_v30  ;;  %v24055_v40 = vsel %vm25514_vm9, %v18089_v13, %v18055_v46  ;;  %v11898_v50 = vpop.eup %11897 }
 0x6ff   : > { %vm24047_vm5 = vmor %vm28251_vm14, %vm27749_vm15  ;;  %v24058_v10 = vand.u32 2147483647, %v23518_v4  ;;  %v3307_v51 = vand.u32 4294901760, %v3174_v6  ;;  %vm28254_vm11 = vcmp.eq.f32.partialorder %v18002_v27, 2139095040  ;;  %v11176_v3 = vsel %vm23986_vm1, 2143289344, %v11896_v1 }
 0x700   : > { %v11084_v38 = vsel %vm28254_vm11, %v11083_v35, %v11077_v21  ;;  %vm28255_vm12 = vmor %vm24009_vm10, %vm23974_vm13  ;;  %vm28256_vm14 = vcmp.gt.f32.partialorder %v23749_v28, 1065353216  ;;  %vm28260_vm9 = vcmp.eq.f32.partialorder %v23609_v25, 2139095040  ;;  %vm28261_vm1 = vcmp.eq.f32.partialorder %v21518_v30, 0 }
 0x701   : > { %v11185_v39 = vsel %vm28255_vm12, 2139095040, %v26868_v62  ;;  %vm28257_vm2 = vmmov %vm28233_vm8  ;;  %v11089_v31 = vsel %vm28260_vm9, %v11088_v60, %v11084_v38  ;;  %v11178_v58 = vsel %vm28261_vm1, %v18109_v57, %v11176_v3  ;;  %vm28262_vm13 = vcmp.eq.f32.partialorder %v17999_v34, 0 }
 0x702   : > { %vm24074_vm8 = vmxor %vm28257_vm2, %vm28256_vm14  ;;  %vm28263_vm10 = vcmp.eq.f32.partialorder %v21518_v30, 1065353216  ;;  %v11099_v1 = vmul.f32 %v11898_v50, %v17999_v34  ;;  %11903 = vlog2.f32 %v24058_v10  ;;  %v24094_v21 = vpack.c.bf16 %v3307_v51, %v3303_v9 }
 0x703   : > { %vm24088_vm12 = vmor %vm28263_vm10, %vm28262_vm13  ;;  %v24096_v25 = vsub.f32 %v3174_v6, %v3307_v51  ;;  %vm28268_vm9 = vnez %v28226_v59  ;;  %v11180_v3 = vxor.u32 2147483648, %v11178_v58  ;;  %v11900_v59 = vpop.eup %11899  ;;  %vm28275_vm10 = vcmp.eq.f32.partialorder %v18002_v27, 2139095040 }
 0x704   : > { %28266 = vst [vmem:[#allocation147_spill] sm:$0xff] %v24094_v21  ;;  %v11093_v60 = vsel %vm28268_vm9, 2143289344, %v11089_v31  ;;  %vm28269_vm14 = vmmov %vm28257_vm2  ;;  %11905 = vpow2.f32 %v11099_v1  ;;  %5080 = vmatpush1.bf16.msra.mxu1 %v24094_v21  ;;  %5272 = vmatpush1.bf16.msra.mxu0 %v24094_v21  ;;  %vm28274_vm2 = vcmp.lt.f32.partialorder %v21528_v48, 0  ;;  %vm11118_vm9 = vcmp.eq.f32.partialorder %v21498_v24, 0  ;;  %v11902_v51 = vpop.eup %11901 }
 0x705   : > { %28267 = vst [vmem:[#allocation148_spill] sm:$0xff] %v24096_v25  ;;  %vm24105_vm1 = vmand %vm28269_vm14, %vm11014_vm0  ;;  %v11095_v9 = vsel %vm23965_vm3, 1065353216, %v11093_v60  ;;  %vm28272_vm14 = vcmp.eq.f32.partialorder %v17999_v34, 1065353216  ;;  %v11181_v6 = vsel %vm24031_vm6, %v11180_v3, %v11178_v58  ;;  %vm28273_vm3 = vcmp.eq.f32.partialorder %v21518_v30, 3212836864 }
 0x706   : > { %vm11028_vm13 = vmor %vm24105_vm1, %vm24074_vm8  ;;  %v11096_v16 = vsel %vm28272_vm14, %v21688_v55, %v11095_v9  ;;  %v11187_v50 = vsel %vm28273_vm3, 1065353216, %v11185_v39  ;;  %vm28276_vm6 = vcmp.lt.s32.totalorder %v21528_v48, 0  ;;  %vm11121_vm3 = vcmp.gt.f32.partialorder %v23852_v29, 1065353216 }
 0x707   : > { %vm11019_vm11 = vmand %vm28274_vm2, %vm27374_vm7  ;;  %v11188_v38 = vsel %vm28275_vm10, %v11187_v50, %v11181_v6  ;;  %v3177_v31 = vsub.f32 1.0, %v11096_v16  ;;  %vm28279_vm2 = vcmp.eq.f32.partialorder %v23667_v33, 2139095040  ;;  %v11029_v58 = vsel %vm11028_vm13, 2139095040, %v26868_v62 }
 0x708   : > { %v11020_v1 = vsel %vm11019_vm11, 2143289344, %v11900_v59  ;;  %vm24138_vm14 = vmand %vm28276_vm6, %vm27960_vm4  ;;  %v11193_v39 = vsel %vm28279_vm2, %v11192_v26, %v11188_v38  ;;  %vm28280_vm11 = vcmp.ne.f32.partialorder %v21528_v48, %v21528_v48  ;;  %v11255_v33 = vmul.f32 %v11902_v51, %v17999_v34 }
 0x709   : > { %v11022_v36 = vsel %vm11014_vm0, %v18109_v57, %v11020_v1  ;;  %vm24159_vm10 = vmor %vm28280_vm11, %vm27749_vm15  ;;  %v11197_v26 = vsel %vm24047_vm5, 2143289344, %v11193_v39  ;;  %v3309_v3 = vand.u32 4294901760, %v3177_v31  ;;  %vm28283_vm8 = vcmp.eq.f32.partialorder %v17999_v34, 0 }
 0x70a   : > { %v11024_v18 = vxor.u32 2147483648, %v11022_v36  ;;  %vm28284_vm0 = vcmp.eq.f32.partialorder %v21528_v48, 1065353216  ;;  %vm11120_vm13 = vcmp.lt.s32.totalorder %v21498_v24, 0  ;;  %v11199_v9 = vsel %vm24088_vm12, 1065353216, %v11197_v26 }
 0x70b   : > { %vm24171_vm1 = vmor %vm28284_vm0, %vm28283_vm8  ;;  %vm28287_vm2 = vcmp.lt.f32.partialorder %v21498_v24, 0  ;;  %11907 = vpow2.f32 %v11255_v33  ;;  %vm28291_vm12 = vcmp.eq.f32.partialorder %v17999_v34, 1065353216  ;;  %v24196_v16 = vsub.f32 %v3177_v31, %v3309_v3 }
 0x70c   : > { %vm24182_vm5 = vmand %vm28287_vm2, %vm27374_vm7  ;;  %v11200_v12 = vsel %vm28291_vm12, %v21518_v30, %v11199_v9  ;;  %v11025_v6 = vsel %vm24138_vm14, %v11024_v18, %v11022_v36  ;;  %vm28292_vm0 = vcmp.eq.f32.partialorder %v21528_v48, 3212836864  ;;  %vm28296_vm12 = vcmp.eq.f32.partialorder %v18002_v27, 2139095040  ;;  %v11904_v55 = vpop.eup %11903 }
 0x70d   : > { %vm28290_vm11 = vmmov %vm28287_vm2  ;;  %v11031_v50 = vsel %vm28292_vm0, 1065353216, %v11029_v58  ;;  %vm28293_vm2 = vcmp.lt.f32.partialorder %v17999_v34, 0  ;;  %v3179_v38 = vsub.f32 1.0, %v11200_v12  ;;  %v24221_v1 = vand.u32 2147483647, %v23542_v61 }
 0x70e   : > { %v24190_v59 = vsel %vm28290_vm11, %v18089_v13, %v18055_v46  ;;  %vm24206_vm11 = vmxor %vm28293_vm2, %vm11121_vm3  ;;  %v11032_v30 = vsel %vm28296_vm12, %v11031_v50, %v11025_v6  ;;  %vm28299_vm3 = vcmp.eq.f32.partialorder %v23749_v28, 2139095040  ;;  %vm11277_vm0 = vcmp.gt.f32.partialorder %v23955_v14, 1065353216  ;;  %v11906_v33 = vpop.eup %11905 }
 0x70f   : > { %vm24215_vm14 = vmand %vm11120_vm13, %vm27960_vm4  ;;  %v11037_v39 = vsel %vm28299_vm3, %v24055_v40, %v11032_v30  ;;  %v3313_v58 = vand.u32 4294901760, %v3179_v38  ;;  %v11359_v40 = vmul.f32 %v11904_v55, %v17999_v34  ;;  %11909 = vlog2.f32 %v24221_v1 }
 0x710   : > { %vm28300_vm12 = vmmov %vm28293_vm2  ;;  %v11041_v28 = vsel %vm24159_vm10, 2143289344, %v11037_v39  ;;  %vm28303_vm2 = vcmp.eq.f32.partialorder %v23637_v11, 0  ;;  %vm28307_vm3 = vcmp.lt.f32.partialorder %v23637_v11, 0  ;;  %v11124_v6 = vsel %vm24182_vm5, 2143289344, %v11906_v33 }
 0x711   : > { %vm24231_vm13 = vmand %vm28300_vm12, %vm11118_vm9  ;;  %v11043_v26 = vsel %vm24171_vm1, 1065353216, %v11041_v28  ;;  %v24263_v18 = vsel %vm28307_vm3, %v18089_v13, %v18055_v46  ;;  %v24268_v35 = vpack.c.bf16 %v3313_v58, %v3309_v3  ;;  %v24270_v9 = vsub.f32 %v3179_v38, %v3313_v58 }
 0x712   : > { %vm28304_vm8 = vmmov %vm28300_vm12  ;;  %vm25515_vm12 = vcmp.lt.f32.partialorder %v23518_v4, 0  ;;  %v11126_v3 = vsel %vm11118_vm9, %v18109_v57, %v11124_v6  ;;  %11911 = vpow2.f32 %v11359_v40  ;;  %vm28315_vm9 = vcmp.ne.f32.partialorder %v21498_v24, %v21498_v24 }
 0x713   : > { %vm24254_vm10 = vmand %vm28304_vm8, %vm28303_vm2  ;;  %28308 = vst [vmem:[#allocation149_spill] sm:$0xff] %v24268_v35  ;;  %vm28310_vm8 = vcmp.eq.f32.partialorder %v17999_v34, 1065353216  ;;  %vm28311_vm2 = vcmp.lt.f32.partialorder %v17999_v34, 0  ;;  %5082 = vmatprep.subr.bf16.mxu1 %v24268_v35  ;;  %5274 = vmatprep.subr.bf16.mxu0 %v24268_v35  ;;  %v11128_v38 = vxor.u32 2147483648, %v11126_v3  ;;  %vm28318_vm1 = vcmp.eq.f32.partialorder %v17999_v34, 0 }
 0x714   : > { %28309 = vst [vmem:[#allocation150_spill] sm:$0xff] %v24270_v9  ;;  %v11044_v12 = vsel %vm28310_vm8, %v21528_v48, %v11043_v26  ;;  %vm24281_vm3 = vmxor %vm28311_vm2, %vm11277_vm0  ;;  %vm28319_vm6 = vcmp.eq.f32.partialorder %v21498_v24, 1065353216  ;;  %v24328_v39 = vsel %vm25515_vm12, %v18089_v13, %v18055_v46  ;;  %v24331_v36 = vand.u32 2147483647, %v22709_v2 }
 0x715   : > { %vm28314_vm8 = vmor %vm24231_vm13, %vm24206_vm11  ;;  %v3176_v42 = vsub.f32 1.0, %v11044_v12  ;;  %vm11378_vm13 = vcmp.eq.f32.partialorder %v23518_v4, 0  ;;  %v11908_v58 = vpop.eup %11907  ;;  %v11129_v28 = vsel %vm24215_vm14, %v11128_v38, %v11126_v3  ;;  %vm25516_vm12 = vcmp.lt.f32.partialorder %v23542_v61, 0 }
 0x716   : > { %v11133_v48 = vsel %vm28314_vm8, 2139095040, %v26868_v62  ;;  %vm24305_vm0 = vmor %vm28315_vm9, %vm27749_vm15  ;;  %vm11381_vm8 = vcmp.gt.f32.partialorder %v24058_v10, 1065353216  ;;  %vm28325_vm11 = vcmp.eq.f32.partialorder %v18002_v27, 2139095040  ;;  %vm28327_vm14 = vcmp.lt.s32.totalorder %v23637_v11, 0 }
 0x717   : > { %vm24317_vm5 = vmor %vm28319_vm6, %vm28318_vm1  ;;  %v24321_v55 = vand.u32 4294901760, %v3176_v42  ;;  %vm28322_vm6 = vcmp.eq.f32.partialorder %v21498_v24, 3212836864  ;;  %vm28323_vm1 = vcmp.lt.f32.partialorder %v23637_v11, 0  ;;  %11913 = vlog2.f32 %v24331_v36 }
 0x718   : > { %v11135_v40 = vsel %vm28322_vm6, 1065353216, %v11133_v48  ;;  %vm11279_vm2 = vmand %vm28323_vm1, %vm27374_vm7  ;;  %vm11222_vm1 = vcmp.eq.f32.partialorder %v23542_v61, 0  ;;  %v24391_v48 = vsel %vm25516_vm12, %v18089_v13, %v18055_v46 }
 0x719   : > { %vm28324_vm9 = vmor %vm24254_vm10, %vm24281_vm3  ;;  %v11136_v31 = vsel %vm28325_vm11, %v11135_v40, %v11129_v28  ;;  %v24351_v26 = vsub.f32 %v3176_v42, %v24321_v55  ;;  %v11280_v12 = vsel %vm11279_vm2, 2143289344, %v11908_v58  ;;  %vm28330_vm10 = vcmp.eq.f32.partialorder %v23852_v29, 2139095040  ;;  %v11910_v42 = vpop.eup %11909  ;;  %v28337_v58 = vld [vmem:[#allocation108_spill] sm:$0xff]  ;;  %v28338_v40 = vld [vmem:[#allocation110_spill] sm:$0xff] }
 0x71a   : > { %v11289_v33 = vsel %vm28324_vm9, 2139095040, %v26868_v62  ;;  %vm24357_vm6 = vmand %vm28327_vm14, %vm27960_vm4  ;;  %v11141_v60 = vsel %vm28330_vm10, %v24190_v59, %v11136_v31  ;;  %vm28331_vm3 = vcmp.eq.f32.partialorder %v23637_v11, 0  ;;  %vm28332_vm11 = vcmp.lt.f32.partialorder %v17999_v34, 0 }
 0x71b   : > { %28326 = vst [vmem:[#allocation151_spill] sm:$0xff] %v24351_v26  ;;  %v11282_v50 = vsel %vm28331_vm3, %v18109_v57, %v11280_v12  ;;  %vm24372_vm2 = vmand %vm28332_vm11, %vm11378_vm13  ;;  %vm11225_vm14 = vcmp.gt.f32.partialorder %v24221_v1, 1065353216  ;;  %v11145_v29 = vsel %vm24305_vm0, 2143289344, %v11141_v60  ;;  %vm25517_vm9 = vcmp.lt.f32.partialorder %v22709_v2, 0 }
 0x71c   : > { %v11284_v59 = vxor.u32 2147483648, %v11282_v50  ;;  %vm28335_vm3 = vmmov %vm28332_vm11  ;;  %v11147_v38 = vsel %vm24317_vm5, 1065353216, %v11145_v29  ;;  %vm28336_vm0 = vcmp.eq.f32.partialorder %v23637_v11, 3212836864  ;;  %v3344_v28 = vand.u32 4294901760, %v28337_v58 }
 0x71d   : > { %vm11391_vm11 = vmxor %vm28335_vm3, %vm11381_vm8  ;;  %v11291_v51 = vsel %vm28336_vm0, 1065353216, %v11289_v33  ;;  %v3356_v31 = vand.u32 4294901760, %v28338_v40  ;;  %vm28339_vm8 = vcmp.eq.f32.partialorder %v17999_v34, 1065353216  ;;  %vm28340_vm5 = vcmp.ne.f32.partialorder %v23637_v11, %v23637_v11 }
 0x71e   : > { %vm11392_vm10 = vmor %vm24372_vm2, %vm11391_vm11  ;;  %v11148_v12 = vsel %vm28339_vm8, %v21498_v24, %v11147_v38  ;;  %v11285_v60 = vsel %vm24357_vm6, %v11284_v59, %v11282_v50  ;;  %vm11382_vm2 = vcmp.eq.f32.partialorder %v24058_v10, 2139095040  ;;  %v11203_v3 = vmul.f32 %v11910_v42, %v17999_v34  ;;  %v3185_v42 = vld [vmem:[%s12067_s17] sm:$0x3]  ;;  %v11912_v38 = vpop.eup %11911 }
 0x71f   : > { %vm24412_vm3 = vmor %vm28340_vm5, %vm27749_vm15  ;;  %v11393_v33 = vsel %vm11392_vm10, 2139095040, %v26868_v62  ;;  %vm11326_vm11 = vcmp.eq.f32.partialorder %v22709_v2, 0  ;;  %v3178_v24 = vsub.f32 1.0, %v11148_v12  ;;  %vm28343_vm6 = vcmp.eq.f32.partialorder %v18002_v27, 2139095040 }
 0x720   : > { %v11292_v6 = vsel %vm28343_vm6, %v11291_v51, %v11285_v60  ;;  %vm28344_vm0 = vcmp.eq.f32.partialorder %v17999_v34, 0  ;;  %vm28345_vm8 = vcmp.eq.f32.partialorder %v23637_v11, 1065353216  ;;  %v24435_v29 = vsel %vm25517_vm9, %v18089_v13, %v18055_v46 }
 0x721   : > { %vm24426_vm5 = vmor %vm28345_vm8, %vm28344_vm0  ;;  %v3345_v59 = vsub.f32 %v28337_v58, %v3344_v28  ;;  %vm28348_vm10 = vcmp.eq.f32.partialorder %v23955_v14, 2139095040  ;;  %vm28349_vm6 = vcmp.lt.f32.partialorder %v23518_v4, 0  ;;  %vm28350_vm8 = vcmp.eq.f32.partialorder %v23518_v4, 3212836864 }
 0x722   : > { %v11297_v51 = vsel %vm28348_vm10, %v24263_v18, %v11292_v6  ;;  %vm11383_vm0 = vmand %vm28349_vm6, %vm27374_vm7  ;;  %v11395_v12 = vsel %vm28350_vm8, 1065353216, %v11393_v33  ;;  %11915 = vpow2.f32 %v11203_v3  ;;  %vm11238_vm9 = vcmp.eq.f32.partialorder %v23542_v61, 3212836864 }
 0x723   : > { %v3357_v46 = vsub.f32 %v28338_v40, %v3356_v31  ;;  %v3315_v13 = vand.u32 4294901760, %v3178_v24  ;;  %v11301_v60 = vsel %vm24412_vm3, 2143289344, %v11297_v51  ;;  %v11384_v35 = vsel %vm11383_vm0, 2143289344, %v11912_v38  ;;  %v28357_v38 = vld [vmem:[#allocation76_spill] sm:$0xff] }
 0x724   : > { %vm28351_vm10 = vcmp.lt.s32.totalorder %v23518_v4, 0  ;;  %v3346_v18 = vand.u32 4294901760, %v3345_v59  ;;  %v11303_v33 = vsel %vm24426_vm5, 1065353216, %v11301_v60  ;;  %v11386_v3 = vsel %vm11378_vm13, %v18109_v57, %v11384_v35 }
 0x725   : > { %vm24456_vm12 = vmand %vm28351_vm10, %vm27960_vm4  ;;  %vm28354_vm3 = vcmp.lt.f32.partialorder %v17999_v34, 0  ;;  %v3358_v6 = vand.u32 4294901760, %v3357_v46  ;;  %v3190_v51 = vrot.slane %v3185_v42, %v28357_v38  ;;  %v24475_v59 = vpack.c.bf16 %v3315_v13, %v24321_v55  ;;  %v11914_v38 = vpop.eup %11913 }
 0x726   : > { %vm24469_vm6 = vmand %vm28354_vm3, %vm11222_vm1  ;;  %v24477_v50 = vsub.f32 %v3178_v24, %v3315_v13  ;;  %vm28360_vm5 = vcmp.eq.f32.partialorder %v17999_v34, 1065353216  ;;  %v11388_v60 = vxor.u32 2147483648, %v11386_v3  ;;  %vm11224_vm13 = vcmp.lt.s32.totalorder %v23542_v61, 0  ;;  %v28364_v24 = vld [vmem:[#allocation77_spill] sm:$0xff] }
 0x727   : > { %28358 = vst [vmem:[#allocation76_spill] sm:$0xff] %v24475_v59  ;;  %v11304_v35 = vsel %vm28360_vm5, %v23637_v11, %v11303_v33  ;;  %vm28361_vm0 = vmmov %vm28354_vm3  ;;  %vm11342_vm3 = vcmp.eq.f32.partialorder %v22709_v2, 3212836864  ;;  %v24496_v11 = vpack.c.bf16 %v3356_v31, %v3344_v28  ;;  %v3194_v13 = vrot.slane %v3185_v42, %v28364_v24  ;;  %5084 = vmatpush1.bf16.msra.mxu1 %v24475_v59  ;;  %v28366_v28 = vld [vmem:[#allocation111_spill] sm:$0xff] }
 0x728   : > { %28359 = vst [vmem:[#allocation152_spill] sm:$0xff] %v24477_v50  ;;  %vm24487_vm8 = vmxor %vm28361_vm0, %vm11225_vm14  ;;  %v3181_v55 = vsub.f32 1.0, %v11304_v35  ;;  %v24499_v33 = vand.u32 4294901760, %v3190_v51  ;;  %5276 = vmatpush1.bf16.msra.mxu0 %v24475_v59  ;;  %v11389_v35 = vsel %vm24456_vm12, %v11388_v60, %v11386_v3  ;;  %v11307_v30 = vmul.f32 %v11914_v38, %v17999_v34  ;;  %v28384_v59 = vld [vmem:[#allocation114_spill] sm:$0xff] }
 0x729   : > { %vm11236_vm10 = vmor %vm24469_vm6, %vm24487_vm8  ;;  %v24508_v46 = vpack.c.bf16 %v3358_v6, %v3346_v18  ;;  %v3350_v31 = vand.u32 4294901760, %v28366_v28  ;;  %vm28367_vm6 = vcmp.eq.f32.partialorder %v18002_v27, 2139095040  ;;  %vm28368_vm5 = vcmp.ne.f32.partialorder %v23518_v4, %v23518_v4 }
 0x72a   : > { %28365 = vst [vmem:[#allocation77_spill] sm:$0xff] %v24499_v33  ;;  %v11396_v42 = vsel %vm28367_vm6, %v11395_v12, %v11389_v35  ;;  %vm24518_vm0 = vmor %vm28368_vm5, %vm27749_vm15  ;;  %v3317_v3 = vand.u32 4294901760, %v3181_v55  ;;  %v11237_v60 = vsel %vm11236_vm10, 2139095040, %v26868_v62  ;;  %v24523_v38 = vand.u32 4294901760, %v3194_v13 }
 0x72b   : > { %v11401_v18 = vsel %vm11382_vm2, %v24328_v39, %v11396_v42  ;;  %vm28372_vm12 = vcmp.eq.f32.partialorder %v17999_v34, 0  ;;  %vm28373_vm8 = vcmp.eq.f32.partialorder %v23518_v4, 1065353216  ;;  %11917 = vpow2.f32 %v11307_v30 }
 0x72c   : > { %28371 = vst [vmem:[#allocation153_spill] sm:$0xff] %v24523_v38  ;;  %vm11406_vm6 = vmor %vm28373_vm8, %vm28372_vm12  ;;  %v24534_v12 = vsub.f32 %v3190_v51, %v24499_v33  ;;  %v3351_v6 = vsub.f32 %v28366_v28, %v3350_v31  ;;  %v11405_v24 = vsel %vm24518_vm0, 2143289344, %v11401_v18  ;;  %v24539_v35 = vsub.f32 %v3181_v55, %v3317_v3  ;;  %v28380_v51 = vld [vmem:[#allocation113_spill] sm:$0xff] }
 0x72d   : > { %vm11226_vm2 = vcmp.eq.f32.partialorder %v24221_v1, 2139095040  ;;  %vm28376_vm10 = vcmp.lt.f32.partialorder %v23542_v61, 0  ;;  %v24551_v39 = vsub.f32 %v3194_v13, %v24523_v38  ;;  %v3362_v30 = vand.u32 4294901760, %v28380_v51  ;;  %v11916_v13 = vpop.eup %11915 }
 0x72e   : > { %28374 = vst [vmem:[#allocation154_spill] sm:$0xff] %v24534_v12  ;;  %28375 = vst [vmem:[#allocation155_spill] sm:$0xff] %v24539_v35  ;;  %v11407_v42 = vsel %vm11406_vm6, 1065353216, %v11405_v24  ;;  %v11239_v55 = vsel %vm11238_vm9, 1065353216, %v11237_v60  ;;  %vm28381_vm0 = vcmp.lt.f32.partialorder %v17999_v34, 0  ;;  %v3368_v21 = vand.u32 4294901760, %v28384_v59 }
 0x72f   : > { %vm24546_vm5 = vmand %vm28376_vm10, %vm27374_vm7  ;;  %28379 = vst [vmem:[#allocation156_spill] sm:$0xff] %v24551_v39  ;;  %vm28385_vm8 = vcmp.eq.f32.partialorder %v17999_v34, 1065353216  ;;  %vm11328_vm6 = vcmp.lt.s32.totalorder %v22709_v2, 0  ;;  %vm28386_vm9 = vcmp.gt.f32.partialorder %v24331_v36, 1065353216  ;;  %v3327_v60 = vand.u32 4294901760, %v24551_v39 }
 0x730   : > { %vm24560_vm12 = vmand %vm28381_vm0, %vm11326_vm11  ;;  %v11408_v24 = vsel %vm28385_vm8, %v23518_v4, %v11407_v42  ;;  %v3352_v33 = vand.u32 4294901760, %v3351_v6  ;;  %v3363_v28 = vsub.f32 %v28380_v51, %v3362_v30  ;;  %v11228_v40 = vsel %vm24546_vm5, 2143289344, %v11916_v13 }
 0x731   : > { %vm28387_vm10 = vmmov %vm28381_vm0  ;;  %v3183_v18 = vsub.f32 1.0, %v11408_v24  ;;  %v28388_v4 = vand.u32 4294901760, %v24534_v12  ;;  %v3369_v58 = vsub.f32 %v28384_v59, %v3368_v21  ;;  %v11230_v6 = vsel %vm11222_vm1, %v18109_v57, %v11228_v40  ;;  %4069 = vmatprep.mubr.f32.mxu0 %v3327_v60 }
 0x732   : > { %vm11339_vm14 = vmxor %vm28387_vm10, %vm28386_vm9  ;;  %v3328_v24 = vsub.f32 %v24551_v39, %v3327_v60  ;;  %v3364_v10 = vand.u32 4294901760, %v3363_v28  ;;  %v11232_v14 = vxor.u32 2147483648, %v11230_v6  ;;  %vm11327_vm5 = vcmp.eq.f32.partialorder %v22709_v2, 1065353216  ;;  %v28389_v60 = vld [vmem:[#allocation116_spill] sm:$0xff] }
 0x733   : > { %vm11340_vm0 = vmor %vm24560_vm12, %vm11339_vm14  ;;  %v24583_v42 = vsub.f32 %v24534_v12, %v28388_v4  ;;  %v3321_v13 = vand.u32 4294901760, %v3183_v18  ;;  %vm11350_vm14 = vcmp.ne.f32.partialorder %v22709_v2, %v22709_v2  ;;  %v24595_v4 = vpack.c.bf16 %v3362_v30, %v3350_v31  ;;  %v28392_v30 = vld [vmem:[#allocation117_spill] sm:$0xff] }
 0x734   : > { %v11341_v51 = vsel %vm11340_vm0, 2139095040, %v26868_v62  ;;  %vm11231_vm1 = vmand %vm11224_vm13, %vm27960_vm4  ;;  %v3329_v62 = vand.u32 4294901760, %v3328_v24  ;;  %v24603_v28 = vpack.c.bf16 %v3364_v10, %v3352_v33  ;;  %v3380_v39 = vand.u32 4294901760, %v28389_v60 }
 0x735   : > { %v11343_v35 = vsel %vm11342_vm3, 1065353216, %v11341_v51  ;;  %v24606_v51 = vpack.c.bf16 %v3321_v13, %v3317_v3  ;;  %v24608_v59 = vsub.f32 %v3183_v18, %v3321_v13  ;;  %v11233_v31 = vsel %vm11231_vm1, %v11232_v14, %v11230_v6  ;;  %v28397_v6 = vld [vmem:[#allocation119_spill] sm:$0xff]  ;;  %v11918_v10 = vpop.eup %11917  ;;  %v28399_v13 = vld [vmem:[#allocation78_spill] sm:$0xff] }
 0x736   : > { %vm11330_vm3 = vcmp.eq.f32.partialorder %v24331_v36, 2139095040  ;;  %v3374_v50 = vand.u32 4294901760, %v28392_v30  ;;  %vm28393_vm13 = vcmp.eq.f32.partialorder %v18002_v27, 2139095040  ;;  %vm28394_vm12 = vcmp.ne.f32.partialorder %v23542_v61, %v23542_v61  ;;  %3330 = vmatprep.mubr.f32.mxu1 %v3329_v62  ;;  %v28400_v62 = vld [vmem:[#allocation121_spill] sm:$0xff] }
 0x737   : > { %28390 = vst [vmem:[#allocation157_spill] sm:$0xff] %v24606_v51  ;;  %28391 = vst [vmem:[#allocation158_spill] sm:$0xff] %v24608_v59  ;;  %v11240_v26 = vsel %vm28393_vm13, %v11239_v55, %v11233_v31  ;;  %v3370_v3 = vand.u32 4294901760, %v3369_v58  ;;  %v3381_v18 = vsub.f32 %v28389_v60, %v3380_v39  ;;  %v3386_v24 = vand.u32 4294901760, %v28397_v6  ;;  %5086 = vmatprep.subr.bf16.mxu1 %v24606_v51 }
 0x738   : > { %vm24619_vm8 = vmor %vm28394_vm12, %vm27749_vm15  ;;  %5278 = vmatprep.subr.bf16.mxu0 %v24606_v51  ;;  %v11245_v55 = vsel %vm11226_vm2, %v24391_v48, %v11240_v26  ;;  %vm28398_vm9 = vcmp.lt.f32.partialorder %v22709_v2, 0  ;;  %v3375_v58 = vsub.f32 %v28392_v30, %v3374_v50  ;;  %v3392_v14 = vand.u32 4294901760, %v28399_v13 }
 0x739   : > { %vm11331_vm10 = vmand %vm28398_vm9, %vm27374_vm7  ;;  %v3404_v31 = vand.u32 4294901760, %v28400_v62  ;;  %v11249_v40 = vsel %vm24619_vm8, 2143289344, %v11245_v55  ;;  %vm28401_vm0 = vcmp.eq.f32.partialorder %v17999_v34, 0  ;;  %vm28402_vm1 = vcmp.eq.f32.partialorder %v23542_v61, 1065353216 }
 0x73a   : > { %vm11250_vm13 = vmor %vm28402_vm1, %vm28401_vm0  ;;  %v11332_v1 = vsel %vm11331_vm10, 2143289344, %v11918_v10  ;;  %v3382_v26 = vand.u32 4294901760, %v3381_v18  ;;  %v3387_v47 = vsub.f32 %v28397_v6, %v3386_v24  ;;  %v24647_v30 = vpack.c.bf16 %v3380_v39, %v3368_v21 }
 0x73b   : > { %v11251_v48 = vsel %vm11250_vm13, 1065353216, %v11249_v40  ;;  %v11334_v51 = vsel %vm11326_vm11, %v18109_v57, %v11332_v1  ;;  %v3376_v60 = vand.u32 4294901760, %v3375_v58  ;;  %vm28403_vm7 = vcmp.eq.f32.partialorder %v17999_v34, 1065353216  ;;  %vm11335_vm2 = vmand %vm11328_vm6, %vm27960_vm4  ;;  %v28405_v1 = vld [vmem:[#allocation123_spill] sm:$0xff] }
 0x73c   : > { %v11252_v33 = vsel %vm28403_vm7, %v23542_v61, %v11251_v48  ;;  %v11336_v55 = vxor.u32 2147483648, %v11334_v51  ;;  %v3388_v59 = vand.u32 4294901760, %v3387_v47  ;;  %v24652_v9 = vpack.c.bf16 %v3386_v24, %v3374_v50  ;;  %v28404_v61 = vld [vmem:[#allocation83_spill] sm:$0xff]  ;;  %vm11352_vm4 = vmor %vm11350_vm14, %vm27749_vm15 }
 0x73d   : > { %v3180_v40 = vsub.f32 1.0, %v11252_v33  ;;  %v3393_v18 = vsub.f32 %v28399_v13, %v3392_v14  ;;  %v3405_v57 = vsub.f32 %v28400_v62, %v3404_v31  ;;  %v24660_v21 = vpack.c.bf16 %v3404_v31, %v3392_v14  ;;  %vm28407_vm6 = vmmov %vm28401_vm0 }
 0x73e   : > { %v11337_v39 = vsel %vm11335_vm2, %v11336_v55, %v11334_v51  ;;  %v24662_v10 = vpack.c.bf16 %v3382_v26, %v3370_v3  ;;  %v3398_v58 = vand.u32 4294901760, %v28404_v61  ;;  %v3410_v50 = vand.u32 4294901760, %v28405_v1  ;;  %vm11354_vm12 = vmor %vm11327_vm5, %vm28407_vm6  ;;  %v28409_v26 = vld [vmem:[#allocation126_spill] sm:$0xff] }
 0x73f   : > { %vm28406_vm11 = vcmp.eq.f32.partialorder %v18002_v27, 2139095040  ;;  %v24668_v24 = vpack.c.bf16 %v3388_v59, %v3376_v60  ;;  %v3394_v47 = vand.u32 4294901760, %v3393_v18  ;;  %v3406_v48 = vand.u32 4294901760, %v3405_v57  ;;  %vm28410_vm15 = vmmov %vm28403_vm7 }
 0x740   : > { %v11344_v54 = vsel %vm28406_vm11, %v11343_v35, %v11337_v39  ;;  %v3399_v51 = vsub.f32 %v28404_v61, %v3398_v58  ;;  %v3411_v3 = vsub.f32 %v28405_v1, %v3410_v50  ;;  %v24680_v27 = vpack.c.bf16 %v3410_v50, %v3398_v58  ;;  %v28412_v39 = vld [vmem:[#allocation82_spill] sm:$0xff]  ;;  %v28413_v50 = vld [vmem:[#allocation127_spill] sm:$0xff] }
 0x741   : > { %v11349_v33 = vsel %vm11330_vm3, %v24435_v29, %v11344_v54  ;;  %v3319_v36 = vand.u32 4294901760, %v3180_v40  ;;  %v24686_v29 = vpack.c.bf16 %v3406_v48, %v3394_v47  ;;  %v3416_v35 = vand.u32 4294901760, %v28408_v15 }
 0x742   : > { %v11353_v59 = vsel %vm11352_vm4, 2143289344, %v11349_v33  ;;  %v3400_v14 = vand.u32 4294901760, %v3399_v51  ;;  %v3412_v31 = vand.u32 4294901760, %v3411_v3  ;;  %v3428_v55 = vand.u32 4294901760, %v28409_v26 }
 0x743   : > { %v11355_v60 = vsel %vm11354_vm12, 1065353216, %v11353_v59  ;;  %v3417_v57 = vsub.f32 %v28408_v15, %v3416_v35  ;;  %v3422_v58 = vand.u32 4294901760, %v28412_v39  ;;  %v3434_v54 = vand.u32 4294901760, %v28413_v50  ;;  %v28415_v15 = vld [vmem:[#allocation85_spill] sm:$0xff] }
 0x744   : > { %v24693_v18 = vsel %vm28410_vm15, %v22709_v2, %v11355_v60  ;;  %v24699_v48 = vpack.c.bf16 %v3412_v31, %v3400_v14  ;;  %v3429_v33 = vsub.f32 %v28409_v26, %v3428_v55  ;;  %v24702_v51 = vpack.c.bf16 %v3428_v55, %v3416_v35  ;;  %v28416_v14 = vld [vmem:[#allocation84_spill] sm:$0xff]  ;;  %v28417_v35 = vld [vmem:[#allocation91_spill] sm:$0xff] }
 0x745   : > { %28411 = vst [vmem:[#allocation159_spill] sm:$0xff] %v24693_v18  ;;  %v25544_v47 = vsub.f32 1.0, %v24693_v18  ;;  %v3418_v3 = vand.u32 4294901760, %v3417_v57  ;;  %v3423_v59 = vsub.f32 %v28412_v39, %v3422_v58  ;;  %v3435_v34 = vsub.f32 %v28413_v50, %v3434_v54  ;;  %v28418_v57 = vld [vmem:[#allocation129_spill] sm:$0xff]  ;;  %v28428_v18 = vld [vmem:[#allocation94_spill] sm:$0xff] }
 0x746   : > { %v24706_v2 = vpack.c.bf16 %v3434_v54, %v3422_v58  ;;  %v3430_v6 = vand.u32 4294901760, %v3429_v33  ;;  %v3440_v1 = vand.u32 4294901760, %v28415_v15  ;;  %v3452_v31 = vand.u32 4294901760, %v28416_v14 }
 0x747   : > { %v24710_v60 = vand.u32 4294901760, %v25544_v47  ;;  %v3424_v61 = vand.u32 4294901760, %v3423_v59  ;;  %v3436_v26 = vand.u32 4294901760, %v3435_v34  ;;  %v3446_v55 = vand.u32 4294901760, %v28417_v35 }
 0x748   : > { %v3458_v62 = vand.u32 4294901760, %v28418_v57  ;;  %v24719_v58 = vsub.f32 %v3180_v40, %v3319_v36  ;;  %v24721_v54 = vpack.c.bf16 %v3430_v6, %v3418_v3  ;;  %v3441_v47 = vsub.f32 %v28415_v15, %v3440_v1  ;;  %v28421_v6 = vld [vmem:[#allocation89_spill] sm:$0xff] }
 0x749   : > { %28414 = vst [vmem:[#allocation160_spill] sm:$0xff] %v24710_v60  ;;  %v24717_v39 = vpack.c.bf16 %v24710_v60, %v3319_v36  ;;  %v24724_v33 = vpack.c.bf16 %v3436_v26, %v3424_v61  ;;  %v3453_v50 = vsub.f32 %v28416_v14, %v3452_v31  ;;  %v24727_v13 = vpack.c.bf16 %v3452_v31, %v3440_v1  ;;  %v28422_v26 = vld [vmem:[#allocation130_spill] sm:$0xff] }
 0x74a   : > { %28420 = vst [vmem:[#allocation162_spill] sm:$0xff] %v24719_v58  ;;  %v3447_v59 = vsub.f32 %v28417_v35, %v3446_v55  ;;  %v3442_v34 = vand.u32 4294901760, %v3441_v47  ;;  %v3459_v40 = vsub.f32 %v28418_v57, %v3458_v62  ;;  %v24733_v36 = vpack.c.bf16 %v3458_v62, %v3446_v55  ;;  %v28423_v35 = vld [vmem:[#allocation88_spill] sm:$0xff]  ;;  %v28425_v57 = vld [vmem:[#allocation95_spill] sm:$0xff] }
 0x74b   : > { %28419 = vst [vmem:[#allocation161_spill] sm:$0xff] %v24717_v39  ;;  %5088 = vmatpush1.bf16.msra.mxu1 %v24717_v39  ;;  %5280 = vmatpush1.bf16.msra.mxu0 %v24717_v39  ;;  %v3464_v3 = vand.u32 4294901760, %v28421_v6  ;;  %v3454_v61 = vand.u32 4294901760, %v3453_v50  ;;  %v3476_v31 = vand.u32 4294901760, %v28422_v26  ;;  %v3470_v14 = vand.u32 4294901760, %v28423_v35  ;;  %v28424_v47 = vld [vmem:[#allocation132_spill] sm:$0xff] }
 0x74c   : > { %5090 = vmatprep.subr.bf16.mxu1 %v24508_v46  ;;  %5282 = vmatprep.subr.bf16.mxu0 %v24496_v11  ;;  %v3448_v1 = vand.u32 4294901760, %v3447_v59  ;;  %v3460_v15 = vand.u32 4294901760, %v3459_v40  ;;  %v3482_v58 = vand.u32 4294901760, %v28424_v47  ;;  %v3488_v62 = vand.u32 4294901760, %v28425_v57 }
 0x74d   : > { %v3465_v39 = vsub.f32 %v28421_v6, %v3464_v3  ;;  %v28426_v55 = vand.u32 4294901760, %v24583_v42  ;;  %v28427_v46 = vand.u32 4294901760, %v24534_v12  ;;  %v24747_v11 = vpack.c.bf16 %v3454_v61, %v3442_v34 }
 0x74e   : > { %v3477_v50 = vsub.f32 %v28422_v26, %v3476_v31  ;;  %v24750_v59 = vpack.c.bf16 %v3476_v31, %v3464_v3  ;;  %v3500_v40 = vand.u32 4294901760, %v28428_v18  ;;  %v24755_v6 = vpack.c.bf16 %v3460_v15, %v3448_v1 }
 0x74f   : > { %3336 = vmatmul.mubr.f32.vlgmr.msra.gmra.mrb[0].mxu1 %v28426_v55  ;;  %4073 = vmatmul.mubr.f32.vlgmr.msra.gmra.mrb[0].mxu0 %v28427_v46  ;;  %v3466_v60 = vand.u32 4294901760, %v3465_v39  ;;  %v3471_v42 = vsub.f32 %v28423_v35, %v3470_v14  ;;  %v3483_v55 = vsub.f32 %v28424_v47, %v3482_v58  ;;  %v24761_v3 = vpack.c.bf16 %v3482_v58, %v3470_v14  ;;  %v28429_v39 = vld [vmem:[#allocation92_spill] sm:$0xff]  ;;  %v28430_v14 = vld [vmem:[#allocation97_spill] sm:$0xff] }
 0x750   : > { %5092 = vmatpush1.bf16.msra.mxu1 %v24603_v28  ;;  %5284 = vmatpush1.bf16.msra.mxu0 %v24595_v4  ;;  %v3478_v34 = vand.u32 4294901760, %v3477_v50  ;;  %v3489_v61 = vsub.f32 %v28425_v57, %v3488_v62  ;;  %v3501_v28 = vsub.f32 %v28428_v18, %v3500_v40  ;;  %v24765_v15 = vpack.c.bf16 %v3500_v40, %v3488_v62  ;;  %v28431_v40 = vld [vmem:[#allocation98_spill] sm:$0xff]  ;;  %v28434_v18 = vld [vmem:[#allocation135_spill] sm:$0xff] }
 0x751   : > { %5094 = vmatprep.subr.bf16.mxu1 %v24662_v10  ;;  %5286 = vmatprep.subr.bf16.mxu0 %v24647_v30  ;;  %v3472_v31 = vand.u32 4294901760, %v3471_v42  ;;  %v3484_v4 = vand.u32 4294901760, %v3483_v55  ;;  %v3494_v1 = vand.u32 4294901760, %v28429_v39  ;;  %v3506_v58 = vand.u32 4294901760, %v28430_v14  ;;  %v28432_v55 = vld [vmem:[#allocation134_spill] sm:$0xff] }
 0x752   : > { %3727 = vmatprep.mubr.f32.mxu1 %v24523_v38  ;;  %4336 = vmatprep.mubr.f32.mxu0 %v24523_v38  ;;  %v24770_v10 = vpack.c.bf16 %v3478_v34, %v3466_v60  ;;  %v3490_v30 = vand.u32 4294901760, %v3489_v61  ;;  %v3502_v46 = vand.u32 4294901760, %v3501_v28  ;;  %v3512_v42 = vand.u32 4294901760, %v28431_v40 }
 0x753   : > { %v24775_v50 = vpack.c.bf16 %v3484_v4, %v3472_v31  ;;  %v3495_v62 = vsub.f32 %v28429_v39, %v3494_v1  ;;  %v3524_v12 = vand.u32 4294901760, %v28432_v55  ;;  %v3507_v34 = vsub.f32 %v28430_v14, %v3506_v58 }
 0x754   : > { %5096 = vmatpush1.bf16.msra.mxu1 %v24668_v24  ;;  %5288 = vmatpush1.bf16.msra.mxu0 %v24652_v9  ;;  %v24782_v60 = vpack.c.bf16 %v3502_v46, %v3490_v30  ;;  %v24785_v61 = vpack.c.bf16 %v3506_v58, %v3494_v1  ;;  %v28433_v24 = vld [vmem:[#allocation96_spill] sm:$0xff]  ;;  %v3513_v31 = vsub.f32 %v28431_v40, %v3512_v42  ;;  %v28435_v30 = vld [vmem:[#allocation101_spill] sm:$0xff] }
 0x755   : > { %5098 = vmatprep.subr.bf16.mxu1 %v24686_v29  ;;  %5290 = vmatprep.subr.bf16.mxu0 %v24660_v21  ;;  %v3518_v9 = vand.u32 4294901760, %v28433_v24  ;;  %v3496_v28 = vand.u32 4294901760, %v3495_v62  ;;  %v3525_v4 = vsub.f32 %v28432_v55, %v3524_v12  ;;  %v24790_v38 = vpack.c.bf16 %v3524_v12, %v3512_v42  ;;  %v28436_v62 = vld [vmem:[#allocation136_spill] sm:$0xff] }
 0x756   : > { %v3508_v39 = vand.u32 4294901760, %v3507_v34  ;;  %v3530_v21 = vand.u32 4294901760, %v28434_v18  ;;  %v3536_v46 = vand.u32 4294901760, %v28435_v30  ;;  %v3514_v1 = vand.u32 4294901760, %v3513_v31  ;;  %v28437_v40 = vld [vmem:[#allocation100_spill] sm:$0xff] }
 0x757   : > { %v3519_v29 = vsub.f32 %v28433_v24, %v3518_v9  ;;  %v3526_v58 = vand.u32 4294901760, %v3525_v4  ;;  %v3548_v14 = vand.u32 4294901760, %v28436_v62  ;;  %v3542_v57 = vand.u32 4294901760, %v28437_v40 }
 0x758   : > { %5100 = vmatpush1.bf16.msra.mxu1 %v24699_v48  ;;  %5292 = vmatpush1.bf16.msra.mxu0 %v24680_v27  ;;  %v24801_v12 = vpack.c.bf16 %v3508_v39, %v3496_v28  ;;  %v3531_v34 = vsub.f32 %v28434_v18, %v3530_v21  ;;  %v24804_v24 = vpack.c.bf16 %v3530_v21, %v3518_v9  ;;  %v3560_v39 = vand.u32 4294901760, %v22200_v45 }
 0x759   : > { %5102 = vmatprep.subr.bf16.mxu1 %v24721_v54  ;;  %5294 = vmatprep.subr.bf16.mxu0 %v24702_v51  ;;  %v3520_v42 = vand.u32 4294901760, %v3519_v29  ;;  %v24806_v48 = vpack.c.bf16 %v3526_v58, %v3514_v1  ;;  %v3537_v27 = vsub.f32 %v28435_v30, %v3536_v46  ;;  %v3549_v31 = vsub.f32 %v28436_v62, %v3548_v14 }
 0x75a   : > { %v24810_v4 = vpack.c.bf16 %v3548_v14, %v3536_v46  ;;  %v3532_v55 = vand.u32 4294901760, %v3531_v34  ;;  %v3543_v54 = vsub.f32 %v28437_v40, %v3542_v57  ;;  %v3554_v51 = vand.u32 4294901760, %v22109_v56 }
 0x75b   : > { %v3538_v9 = vand.u32 4294901760, %v3537_v27  ;;  %v3550_v28 = vand.u32 4294901760, %v3549_v31  ;;  %v3572_v29 = vand.u32 4294901760, %v22286_v52  ;;  %v3566_v21 = vand.u32 4294901760, %v22381_v22 }
 0x75c   : > { %5104 = vmatpush1.bf16.msra.mxu1 %v24724_v33  ;;  %5296 = vmatpush1.bf16.msra.mxu0 %v24706_v2  ;;  %v24821_v14 = vpack.c.bf16 %v3532_v55, %v3520_v42  ;;  %v3544_v46 = vand.u32 4294901760, %v3543_v54  ;;  %v3555_v1 = vsub.f32 %v22109_v56, %v3554_v51  ;;  %v24824_v58 = vpack.c.bf16 %v3554_v51, %v3542_v57 }
 0x75d   : > { %5106 = vmatprep.subr.bf16.mxu1 %v24747_v11  ;;  %5298 = vmatprep.subr.bf16.mxu0 %v24727_v13  ;;  %v24826_v33 = vpack.c.bf16 %v3550_v28, %v3538_v9  ;;  %v3561_v2 = vsub.f32 %v22200_v45, %v3560_v39  ;;  %v3573_v34 = vsub.f32 %v22286_v52, %v3572_v29  ;;  %v3578_v13 = vand.u32 4294901760, %v22442_v63 }
 0x75e   : > { %v24830_v27 = vpack.c.bf16 %v3572_v29, %v3560_v39  ;;  %v3556_v31 = vand.u32 4294901760, %v3555_v1  ;;  %v3567_v11 = vsub.f32 %v22381_v22, %v3566_v21  ;;  %v3584_v55 = vand.u32 4294901760, %v22544_v23 }
 0x75f   : > { %v3562_v57 = vand.u32 4294901760, %v3561_v2  ;;  %v3574_v42 = vand.u32 4294901760, %v3573_v34  ;;  %v3596_v54 = vand.u32 4294901760, %v22625_v43  ;;  %v3590_v51 = vand.u32 4294901760, %v22746_v37 }
 0x760   : > { %5108 = vmatpush1.bf16.msra.mxu1 %v24755_v6  ;;  %5300 = vmatpush1.bf16.msra.mxu0 %v24733_v36  ;;  %v24841_v39 = vpack.c.bf16 %v3556_v31, %v3544_v46  ;;  %v3568_v9 = vand.u32 4294901760, %v3567_v11  ;;  %v3579_v28 = vsub.f32 %v22442_v63, %v3578_v13  ;;  %v24844_v29 = vpack.c.bf16 %v3578_v13, %v3566_v21 }
 0x761   : > { %5110 = vmatprep.subr.bf16.mxu1 %v24770_v10  ;;  %5302 = vmatprep.subr.bf16.mxu0 %v24750_v59  ;;  %v24846_v6 = vpack.c.bf16 %v3574_v42, %v3562_v57  ;;  %v3585_v36 = vsub.f32 %v22544_v23, %v3584_v55  ;;  %v3597_v1 = vsub.f32 %v22625_v43, %v3596_v54  ;;  %v3602_v59 = vand.u32 4294901760, %v22870_v19 }
 0x762   : > { %v24850_v2 = vpack.c.bf16 %v3596_v54, %v3584_v55  ;;  %v3580_v34 = vand.u32 4294901760, %v3579_v28  ;;  %v3591_v10 = vsub.f32 %v22746_v37, %v3590_v51  ;;  %v3608_v46 = vand.u32 4294901760, %v22974_v41  ;;  %v28473_v37 = vld [vmem:[#allocation148_spill] sm:$0xff] }
 0x763   : > { %v3586_v21 = vand.u32 4294901760, %v3585_v36  ;;  %v3598_v31 = vand.u32 4294901760, %v3597_v1  ;;  %v3620_v11 = vand.u32 4294901760, %v23083_v20  ;;  %v3614_v13 = vand.u32 4294901760, %v23193_v17 }
 0x764   : > { %5112 = vmatpush1.bf16.msra.mxu1 %v24775_v50  ;;  %5304 = vmatpush1.bf16.msra.mxu0 %v24761_v3  ;;  %v24861_v55 = vpack.c.bf16 %v3580_v34, %v3568_v9  ;;  %v3592_v57 = vand.u32 4294901760, %v3591_v10  ;;  %v3603_v42 = vsub.f32 %v22870_v19, %v3602_v59  ;;  %v24864_v54 = vpack.c.bf16 %v3602_v59, %v3590_v51 }
 0x765   : > { %5114 = vmatprep.subr.bf16.mxu1 %v24782_v60  ;;  %5306 = vmatprep.subr.bf16.mxu0 %v24765_v15  ;;  %v24866_v50 = vpack.c.bf16 %v3598_v31, %v3586_v21  ;;  %v3609_v3 = vsub.f32 %v22974_v41, %v3608_v46  ;;  %v3621_v28 = vsub.f32 %v23083_v20, %v3620_v11  ;;  %v3626_v15 = vand.u32 4294901760, %v23293_v8 }
 0x766   : > { %v24870_v36 = vpack.c.bf16 %v3620_v11, %v3608_v46  ;;  %v3604_v1 = vand.u32 4294901760, %v3603_v42  ;;  %v3615_v60 = vsub.f32 %v23193_v17, %v3614_v13  ;;  %v3632_v9 = vand.u32 4294901760, %v23363_v32 }
 0x767   : > { %v3610_v51 = vand.u32 4294901760, %v3609_v3  ;;  %v3622_v34 = vand.u32 4294901760, %v3621_v28  ;;  %v3644_v10 = vand.u32 4294901760, %v23461_v5  ;;  %v3638_v59 = vand.u32 4294901760, %v23557_v49 }
 0x768   : > { %5116 = vmatpush1.bf16.msra.mxu1 %v24801_v12  ;;  %5308 = vmatpush1.bf16.msra.mxu0 %v24785_v61  ;;  %v24881_v46 = vpack.c.bf16 %v3604_v1, %v3592_v57  ;;  %v3616_v21 = vand.u32 4294901760, %v3615_v60  ;;  %v3627_v31 = vsub.f32 %v23293_v8, %v3626_v15  ;;  %v24884_v11 = vpack.c.bf16 %v3626_v15, %v3614_v13 }
 0x769   : > { %5118 = vmatprep.subr.bf16.mxu1 %v24806_v48  ;;  %5310 = vmatprep.subr.bf16.mxu0 %v24790_v38  ;;  %v24886_v12 = vpack.c.bf16 %v3622_v34, %v3610_v51  ;;  %v3633_v61 = vsub.f32 %v23363_v32, %v3632_v9  ;;  %v3645_v42 = vsub.f32 %v23461_v5, %v3644_v10  ;;  %v3650_v38 = vand.u32 4294901760, %v23613_v53  ;;  %v28475_v32 = vld [vmem:[#allocation158_spill] sm:$0xff] }
 0x76a   : > { %v24890_v3 = vpack.c.bf16 %v3644_v10, %v3632_v9  ;;  %v3628_v28 = vand.u32 4294901760, %v3627_v31  ;;  %v3639_v48 = vsub.f32 %v23557_v49, %v3638_v59  ;;  %v3656_v57 = vand.u32 4294901760, %v23753_v0 }
 0x76b   : > { %v3634_v13 = vand.u32 4294901760, %v3633_v61  ;;  %v3646_v1 = vand.u32 4294901760, %v3645_v42  ;;  %v3668_v60 = vand.u32 4294901760, %v23869_v7  ;;  %v3662_v15 = vand.u32 4294901760, %v23959_v44 }
 0x76c   : > { %5120 = vmatpush1.bf16.msra.mxu1 %v24821_v14  ;;  %5312 = vmatpush1.bf16.msra.mxu0 %v24804_v24  ;;  %v24901_v9 = vpack.c.bf16 %v3628_v28, %v3616_v21  ;;  %v3640_v51 = vand.u32 4294901760, %v3639_v48  ;;  %v3651_v34 = vsub.f32 %v23613_v53, %v3650_v38  ;;  %v24904_v10 = vpack.c.bf16 %v3650_v38, %v3638_v59  ;;  %v28438_v48 = vld [vmem:[#allocation150_spill] sm:$0xff]  ;;  %v28445_v53 = vld [vmem:[#allocation159_spill] sm:$0xff] }
 0x76d   : > { %5122 = vmatprep.subr.bf16.mxu1 %v24826_v33  ;;  %5314 = vmatprep.subr.bf16.mxu0 %v24810_v4  ;;  %v24906_v14 = vpack.c.bf16 %v3646_v1, %v3634_v13  ;;  %v3657_v24 = vsub.f32 %v23753_v0, %v3656_v57  ;;  %v3669_v31 = vsub.f32 %v23869_v7, %v3668_v60  ;;  %v3674_v4 = vand.u32 4294901760, %v24096_v25  ;;  %v28439_v13 = vld [vmem:[#allocation151_spill] sm:$0xff]  ;;  %v28442_v0 = vld [vmem:[#allocation152_spill] sm:$0xff] }
 0x76e   : > { %v24910_v61 = vpack.c.bf16 %v3668_v60, %v3656_v57  ;;  %v3652_v42 = vand.u32 4294901760, %v3651_v34  ;;  %v3663_v33 = vsub.f32 %v23959_v44, %v3662_v15  ;;  %v3680_v21 = vand.u32 4294901760, %v24196_v16 }
 0x76f   : > { %v3658_v59 = vand.u32 4294901760, %v3657_v24  ;;  %v3670_v28 = vand.u32 4294901760, %v3669_v31  ;;  %v3692_v38 = vand.u32 4294901760, %v28438_v48  ;;  %v3686_v1 = vand.u32 4294901760, %v28439_v13 }
 0x770   : > { %5124 = vmatpush1.bf16.msra.mxu1 %v24841_v39  ;;  %5316 = vmatpush1.bf16.msra.mxu0 %v24824_v58  ;;  %v24921_v57 = vpack.c.bf16 %v3652_v42, %v3640_v51  ;;  %v3664_v60 = vand.u32 4294901760, %v3663_v33  ;;  %v3675_v34 = vsub.f32 %v24096_v25, %v3674_v4  ;;  %v24924_v44 = vpack.c.bf16 %v3674_v4, %v3662_v15  ;;  %v28443_v51 = vld [vmem:[#allocation155_spill] sm:$0xff]  ;;  %v28444_v33 = vld [vmem:[#allocation160_spill] sm:$0xff] }
 0x771   : > { %5126 = vmatprep.subr.bf16.mxu1 %v24846_v6  ;;  %5318 = vmatprep.subr.bf16.mxu0 %v24830_v27  ;;  %v24926_v39 = vpack.c.bf16 %v3670_v28, %v3658_v59  ;;  %v3681_v58 = vsub.f32 %v24196_v16, %v3680_v21  ;;  %v3693_v24 = vsub.f32 %v28438_v48, %v3692_v38  ;;  %v3698_v27 = vand.u32 4294901760, %v28442_v0 }
 0x772   : > { %28440 = vst [vmem:[#allocation130_spill] sm:$0xff] %v24924_v44  ;;  %v24930_v31 = vpack.c.bf16 %v3692_v38, %v3680_v21  ;;  %v3676_v7 = vand.u32 4294901760, %v3675_v34  ;;  %v3687_v6 = vsub.f32 %v28439_v13, %v3686_v1  ;;  %v3704_v42 = vand.u32 4294901760, %v28443_v51  ;;  %v28447_v21 = vld [vmem:[#allocation158_spill] sm:$0xff]  ;;  %v28478_v13 = vld [vmem:[#allocation108_spill] sm:$0xff] }
 0x773   : > { %v28446_v25 = vsub.f32 1.0, %v28445_v53  ;;  %v3682_v4 = vand.u32 4294901760, %v3681_v58  ;;  %v3694_v59 = vand.u32 4294901760, %v3693_v24  ;;  %v3716_v28 = vand.u32 4294901760, %v28447_v21  ;;  %v28448_v58 = vld [vmem:[#allocation162_spill] sm:$0xff] }
 0x774   : > { %28441 = vst [vmem:[#allocation88_spill] sm:$0xff] %v24930_v31  ;;  %5128 = vmatpush1.bf16.msra.mxu1 %v24861_v55  ;;  %5320 = vmatpush1.bf16.msra.mxu0 %v24844_v29  ;;  %v5143_v38 = vpack.c.bf16 %v3676_v7, %v3664_v60  ;;  %v3688_v34 = vand.u32 4294901760, %v3687_v6  ;;  %v3699_v31 = vsub.f32 %v28442_v0, %v3698_v27  ;;  %v3710_v24 = vand.u32 4294901760, %v28448_v58  ;;  %v28449_v6 = vld [vmem:[#allocation78_spill] sm:$0xff] }
 0x775   : > { %v24938_v15 = vsub.f32 %v28446_v25, %v28444_v33  ;;  %5130 = vmatprep.subr.bf16.mxu1 %v24866_v50  ;;  %5322 = vmatprep.subr.bf16.mxu0 %v24850_v2  ;;  %v5339_v44 = vpack.c.bf16 %v3698_v27, %v3686_v1  ;;  %v5145_v53 = vpack.c.bf16 %v3694_v59, %v3682_v4  ;;  %v28450_v27 = vld [vmem:[#allocation121_spill] sm:$0xff]  ;;  %v28452_v4 = vld [vmem:[#allocation123_spill] sm:$0xff]  ;;  %v28479_v0 = vld [vmem:[#allocation110_spill] sm:$0xff] }
 0x776   : > { %v3705_v25 = vsub.f32 %v28443_v51, %v3704_v42  ;;  %v3717_v55 = vsub.f32 %v28447_v21, %v3716_v28  ;;  %v5341_v33 = vpack.c.bf16 %v3716_v28, %v3704_v42  ;;  %v3700_v29 = vand.u32 4294901760, %v3699_v31  ;;  %v28453_v28 = vld [vmem:[#allocation124_spill] sm:$0xff]  ;;  %v28456_v21 = vld [vmem:[#allocation127_spill] sm:$0xff]  ;;  %v28461_v42 = vld [vmem:[#allocation89_spill] sm:$0xff] }
 0x777   : > { %v3722_v1 = vand.u32 4294901760, %v24938_v15  ;;  %v28464_v51 = vld [vmem:[#allocation92_spill] sm:$0xff] }
 0x778   : > { %5132 = vmatpush1.bf16.msra.mxu1 %v24881_v46  ;;  %5324 = vmatpush1.bf16.msra.mxu0 %v24864_v54  ;;  %v3706_v50 = vand.u32 4294901760, %v3705_v25  ;;  %v3718_v2 = vand.u32 4294901760, %v3717_v55  ;;  %v5147_v7 = vpack.c.bf16 %v3700_v29, %v3688_v34  ;;  %v3711_v46 = vsub.f32 %v28448_v58, %v3710_v24  ;;  %v28454_v54 = vld [vmem:[#allocation126_spill] sm:$0xff]  ;;  %v28462_v34 = vld [vmem:[#allocation95_spill] sm:$0xff] }
 0x779   : > { %5134 = vmatprep.subr.bf16.mxu1 %v24886_v12  ;;  %5326 = vmatprep.subr.bf16.mxu0 %v24870_v36  ;;  %v3723_v12 = vsub.f32 %v24938_v15, %v3722_v1  ;;  %v28463_v25 = vld [vmem:[#allocation94_spill] sm:$0xff] }
 0x77a   : > { %v5149_v60 = vpack.c.bf16 %v3718_v2, %v3706_v50  ;;  %v28466_v55 = vld [vmem:[#allocation98_spill] sm:$0xff]  ;;  %v28468_v50 = vld [vmem:[#allocation96_spill] sm:$0xff] }
 0x77b   : > { %v28467_v2 = vld [vmem:[#allocation134_spill] sm:$0xff]  ;;  %v28477_v59 = vld [vmem:[#allocation88_spill] sm:$0xff]  ;;  %v3724_v19 = vand.u32 4294901760, %v3723_v12  ;;  %v28493_v12 = vpack.c.bf16 %v28450_v27, %v28449_v6  ;;  %v28502_v6 = vld [vmem:[#allocation87_spill] sm:$0xff] }
 0x77c   : > { %5136 = vmatpush1.bf16.msra.mxu1 %v24901_v9  ;;  %5328 = vmatpush1.bf16.msra.mxu0 %v24884_v11  ;;  %v28465_v11 = vld [vmem:[#allocation97_spill] sm:$0xff]  ;;  %v28469_v36 = vld [vmem:[#allocation142_spill] sm:$0xff]  ;;  %v3712_v9 = vand.u32 4294901760, %v3711_v46  ;;  %v28492_v46 = vld [vmem:[#allocation79_spill] sm:$0xff] }
 0x77d   : > { %5138 = vmatprep.subr.bf16.mxu1 %v24906_v14  ;;  %5330 = vmatprep.subr.bf16.mxu0 %v24890_v3  ;;  %v28474_v14 = vld [vmem:[#allocation155_spill] sm:$0xff]  ;;  %v28476_v29 = vld [vmem:[#allocation130_spill] sm:$0xff]  ;;  %v5343_v3 = vpack.c.bf16 %v3722_v1, %v3710_v24  ;;  %v28503_v27 = vld [vmem:[#allocation84_spill] sm:$0xff] }
 0x77e   : > { %v5151_v31 = vpack.c.bf16 %v3724_v19, %v3712_v9  ;;  %v28486_v19 = vld [vmem:[#allocation112_spill] sm:$0xff]  ;;  %v28489_v24 = vld [vmem:[#allocation119_spill] sm:$0xff] }
 0x77f   : > { %v28494_v9 = vld [vmem:[#allocation120_spill] sm:$0xff] }
 0x780   : > { %5140 = vmatpush1.bf16.msra.mxu1 %v24921_v57  ;;  %5332 = vmatpush1.bf16.msra.mxu0 %v24904_v10  ;;  %v28471_v57 = vld [vmem:[#allocation145_spill] sm:$0xff]  ;;  %v28472_v10 = vld [vmem:[#allocation146_spill] sm:$0xff] }
 0x781   : > { %5142 = vmatprep.subr.bf16.mxu1 %v24926_v39  ;;  %5334 = vmatprep.subr.bf16.mxu0 %v24910_v61  ;;  %v5153_v39 = vpack.c.bf16 %v28479_v0, %v28478_v13  ;;  %v28487_v0 = vld [vmem:[#allocation115_spill] sm:$0xff]  ;;  %v28488_v13 = vld [vmem:[#allocation117_spill] sm:$0xff] }
 0x782   : > { %v5159_v1 = vpack.c.bf16 %v28489_v24, %v28488_v13  ;;  %v28513_v24 = vpack.c.bf16 %v28424_v47, %v28423_v35  ;;  %v28520_v35 = vld [vmem:[#allocation133_spill] sm:$0xff]  ;;  %v28521_v47 = vpack.c.bf16 %v28434_v18, %v28468_v50  ;;  %v28529_v50 = vpack.c.bf16 %v22442_v63, %v22381_v22 }
 0x783   : > { %v28528_v18 = vld [vmem:[#allocation105_spill] sm:$0xff]  ;;  %v28539_v63 = vpack.c.bf16 %v23293_v8, %v23193_v17  ;;  %v28548_v17 = vld [vmem:[#allocation144_spill] sm:$0xff]  ;;  %v28549_v8 = vpack.c.bf16 %v28473_v37, %v28472_v10  ;;  %v28559_v10 = vpack.c.bf16 %v24938_v15, %v28448_v58  ;;  %v3184_v58 = vld [vmem:[#allocation2] sm:$0x3] }
 0x784   : > { %5144 = vmatpush1.bf16.msra.mxu1 %v5143_v38  ;;  %5336 = vmatpush1.bf16.msra.mxu0 %v28476_v29  ;;  %v28480_v38 = vld [vmem:[#allocation109_spill] sm:$0xff]  ;;  %v28481_v29 = vld [vmem:[#allocation111_spill] sm:$0xff] }
 0x785   : > { %5146 = vmatprep.subr.bf16.mxu1 %v5145_v53  ;;  %5338 = vmatprep.subr.bf16.mxu0 %v28477_v59  ;;  %v28482_v53 = vld [vmem:[#allocation113_spill] sm:$0xff] }
 0x786   : > { %v5155_v61 = vpack.c.bf16 %v28482_v53, %v28481_v29  ;;  %v28483_v59 = vld [vmem:[#allocation77_spill] sm:$0xff]  ;;  %v28500_v53 = vld [vmem:[#allocation82_spill] sm:$0xff] }
 0x787   : > { %v28499_v29 = vld [vmem:[#allocation125_spill] sm:$0xff] }
 0x788   : > { %5148 = vmatpush1.bf16.msra.mxu1 %v5147_v7  ;;  %5340 = vmatpush1.bf16.msra.mxu0 %v5339_v44  ;;  %v28484_v44 = vld [vmem:[#allocation114_spill] sm:$0xff]  ;;  %v28485_v7 = vld [vmem:[#allocation116_spill] sm:$0xff]  ;;  %v28538_v22 = vld [vmem:[#allocation81_spill] sm:$0xff] }
 0x789   : > { %5150 = vmatprep.subr.bf16.mxu1 %v5149_v60  ;;  %5342 = vmatprep.subr.bf16.mxu0 %v5341_v33  ;;  %v5157_v33 = vpack.c.bf16 %v28485_v7, %v28484_v44  ;;  %v28490_v60 = vld [vmem:[#allocation156_spill] sm:$0xff]  ;;  %v28501_v44 = vpack.c.bf16 %v28456_v21, %v28500_v53  ;;  %v28504_v7 = vld [vmem:[#allocation85_spill] sm:$0xff]  ;;  %v28512_v21 = vld [vmem:[#allocation90_spill] sm:$0xff] }
 0x78a   : > { %v28554_v53 = vld [vmem:[#allocation151_spill] sm:$0xff]  ;;  %v28558_v37 = vld [vmem:[#allocation157_spill] sm:$0xff] }
 0x78c   : > { %5152 = vmatpush1.bf16.msra.mxu1 %v5151_v31  ;;  %5344 = vmatpush1.bf16.msra.mxu0 %v5343_v3  ;;  %v28491_v31 = vld [vmem:[#allocation153_spill] sm:$0xff]  ;;  %v28495_v3 = vld [vmem:[#allocation83_spill] sm:$0xff] }
 0x78d   : > { %5154 = vmatprep.subr.bf16.mxu1 %v5153_v39  ;;  %5346 = vmatprep.subr.bf16.mxu0 %v28480_v38  ;;  %v28496_v39 = vpack.c.bf16 %v28452_v4, %v28495_v3  ;;  %v28498_v38 = vpack.c.bf16 %v28454_v54, %v28453_v28  ;;  %v28506_v4 = vld [vmem:[#allocation86_spill] sm:$0xff]  ;;  %v28510_v28 = vld [vmem:[#allocation128_spill] sm:$0xff]  ;;  %v28511_v54 = vpack.c.bf16 %v28422_v26, %v28461_v42  ;;  %v28518_v26 = vld [vmem:[#allocation99_spill] sm:$0xff] }
 0x78e   : > { %v28519_v42 = vpack.c.bf16 %v28467_v2, %v28466_v55  ;;  %v28526_v55 = vld [vmem:[#allocation107_spill] sm:$0xff]  ;;  %v28527_v2 = vpack.c.bf16 %v22286_v52, %v22200_v45  ;;  %v28536_v45 = vld [vmem:[#allocation138_spill] sm:$0xff]  ;;  %v28537_v52 = vpack.c.bf16 %v23083_v20, %v22974_v41  ;;  %v28545_v41 = vld [vmem:[#allocation80_spill] sm:$0xff] }
 0x78f   : > { %3729 = vmatmul.mubr.f32.vlgmr.msra.gmra.mrb[0].mxu1 %v28483_v59  ;;  %4338 = vmatmul.mubr.f32.vlgmr.msra.gmra.mrb[0].mxu0 %v28483_v59  ;;  %v28546_v20 = vld [vmem:[#allocation143_spill] sm:$0xff] }
 0x790   : > { %5156 = vmatpush1.bf16.msra.mxu1 %v5155_v61  ;;  %5348 = vmatpush1.bf16.msra.mxu0 %v28486_v19  ;;  %v28497_v61 = vld [vmem:[#allocation122_spill] sm:$0xff]  ;;  %v28507_v19 = vld [vmem:[#allocation129_spill] sm:$0xff] }
 0x791   : > { %5158 = vmatprep.subr.bf16.mxu1 %v5157_v33  ;;  %5350 = vmatprep.subr.bf16.mxu0 %v28487_v0  ;;  %v28505_v33 = vpack.c.bf16 %v28503_v27, %v28504_v7  ;;  %v28508_v0 = vld [vmem:[#allocation91_spill] sm:$0xff]  ;;  %v11996_v27 = vmov 1966171168  }
 0x792   : > { %3929 = vmatprep.mubr.f32.mxu1 %v28490_v60  ;;  %4473 = vmatprep.mubr.f32.mxu0 %v28491_v31  ;;  %v28509_v13 = vpack.c.bf16 %v28507_v19, %v28508_v0  ;;  %v28515_v60 = vpack.c.bf16 %v28463_v25, %v28462_v34  ;;  %v28516_v31 = vld [vmem:[#allocation93_spill] sm:$0xff]  ;;  %v28522_v25 = vld [vmem:[#allocation103_spill] sm:$0xff]  ;;  %v28523_v34 = vpack.c.bf16 %v28436_v62, %v28435_v30  ;;  %v28530_v30 = vld [vmem:[#allocation106_spill] sm:$0xff]  ;;  %v4485_v7 = vunpack.c.l.s4 %v11996_v27 }
 0x793   : > { %v28531_v62 = vpack.c.bf16 %v22625_v43, %v22544_v23  ;;  %v28540_v23 = vld [vmem:[#allocation118_spill] sm:$0xff]  ;;  %v28541_v43 = vld [vmem:[#allocation140_spill] sm:$0xff] }
 0x794   : > { %5160 = vmatpush1.bf16.msra.mxu1 %v5159_v1  ;;  %5352 = vmatpush1.bf16.msra.mxu0 %v28492_v46  ;;  %v28514_v1 = vld [vmem:[#allocation131_spill] sm:$0xff]  ;;  %v28517_v46 = vpack.c.bf16 %v28465_v11, %v28464_v51  ;;  %v28524_v51 = vld [vmem:[#allocation102_spill] sm:$0xff]  ;;  %v28525_v11 = vpack.c.bf16 %v22109_v56, %v28437_v40  ;;  %v28532_v56 = vld [vmem:[#allocation104_spill] sm:$0xff]  ;;  %v28542_v3 = vpack.c.bf16 %v23461_v5, %v28541_v43 }
 0x795   : > { %5162 = vmatprep.subr.bf16.mxu1 %v28493_v12  ;;  %5354 = vmatprep.subr.bf16.mxu0 %v28494_v9  ;;  %v28533_v40 = vld [vmem:[#allocation139_spill] sm:$0xff]  ;;  %v28534_v12 = vld [vmem:[#allocation137_spill] sm:$0xff] }
 0x796   : > { %v28535_v9 = vpack.c.bf16 %v28533_v40, %v28534_v12  ;;  %v28550_v5 = vld [vmem:[#allocation147_spill] sm:$0xff] }
 0x798   : > { %5164 = vmatpush1.bf16.msra.mxu1 %v28496_v39  ;;  %5356 = vmatpush1.bf16.msra.mxu0 %v28497_v61  ;;  %v28543_v39 = vld [vmem:[#allocation141_spill] sm:$0xff]  ;;  %v28544_v61 = vpack.c.bf16 %v28469_v36, %v23557_v49  ;;  %v28553_v36 = vld [vmem:[#allocation152_spill] sm:$0xff] }
 0x799   : > { %5166 = vmatprep.subr.bf16.mxu1 %v28498_v38  ;;  %5358 = vmatprep.subr.bf16.mxu0 %v28499_v29  ;;  %v28547_v38 = vpack.c.bf16 %v28471_v57, %v28546_v20  ;;  %v28551_v29 = vpack.c.bf16 %v28438_v48, %v24196_v16  ;;  %v28552_v49 = vld [vmem:[#allocation149_spill] sm:$0xff]  ;;  %v28556_v57 = vld [vmem:[#allocation76_spill] sm:$0xff]  ;;  %v28561_v48 = vld [vmem:[#allocation154_spill] sm:$0xff] }
 0x79a   : > { %v28560_v16 = vld [vmem:[#allocation161_spill] sm:$0xff] }
 0x79c   : > { %5168 = vmatpush1.bf16.msra.mxu1 %v28501_v44  ;;  %5360 = vmatpush1.bf16.msra.mxu0 %v28502_v6  ;;  %v28555_v44 = vpack.c.bf16 %v28553_v36, %v28554_v53  ;;  %v28557_v6 = vpack.c.bf16 %v28475_v32, %v28474_v14 }
 0x79d   : > { %5170 = vmatprep.subr.bf16.mxu1 %v28505_v33  ;;  %5362 = vmatprep.subr.bf16.mxu0 %v28506_v4  ;;  %v4486_v33 = vunpack.c.0.s8 %v4485_v7 }
 0x7a0   : > { %5172 = vmatpush1.bf16.msra.mxu1 %v28509_v13  ;;  %5364 = vmatpush1.bf16.msra.mxu0 %v28510_v28  ;;  %v28562_v28 = vld [vmem:[#allocation75_spill] sm:$0xff] }
 0x7a1   : > { %5174 = vmatprep.subr.bf16.mxu1 %v28511_v54  ;;  %5366 = vmatprep.subr.bf16.mxu0 %v28512_v21  ;;  %v4489_v54 = vsub.s32 %v4486_v33, %v28562_v28 }
 0x7a4   : > { %5176 = vmatpush1.bf16.msra.mxu1 %v28513_v24  ;;  %5368 = vmatpush1.bf16.msra.mxu0 %v28514_v1  ;;  %v28563_v1 = vlaneseq }
 0x7a5   : > { %5178 = vmatprep.subr.bf16.mxu1 %v28515_v60  ;;  %5370 = vmatprep.subr.bf16.mxu0 %v28516_v31 }
 0x7a6   : > { %vm4502_vm14 = vcmp.lt.s32.totalorder %v28563_v1, 256 }
 0x7a8   : > { %5180 = vmatpush1.bf16.msra.mxu1 %v28517_v46  ;;  %5372 = vmatpush1.bf16.msra.mxu0 %v28518_v26 }
 0x7a9   : > { %5182 = vmatprep.subr.bf16.mxu1 %v28519_v42  ;;  %5374 = vmatprep.subr.bf16.mxu0 %v28520_v35 }
 0x7ac   : > { %5184 = vmatpush1.bf16.msra.mxu1 %v28521_v47  ;;  %5376 = vmatpush1.bf16.msra.mxu0 %v28522_v25 }
 0x7ad   : > { %5186 = vmatprep.subr.bf16.mxu1 %v28523_v34  ;;  %5378 = vmatprep.subr.bf16.mxu0 %v28524_v51 }
 0x7b0   : > { %5188 = vmatpush1.bf16.msra.mxu1 %v28525_v11  ;;  %5380 = vmatpush1.bf16.msra.mxu0 %v28526_v55 }
 0x7b1   : > { %5190 = vmatprep.subr.bf16.mxu1 %v28527_v2  ;;  %5382 = vmatprep.subr.bf16.mxu0 %v28528_v18 }
 0x7b4   : > { %5192 = vmatpush1.bf16.msra.mxu1 %v28529_v50  ;;  %5384 = vmatpush1.bf16.msra.mxu0 %v28530_v30 }
 0x7b5   : > { %5194 = vmatprep.subr.bf16.mxu1 %v28531_v62  ;;  %5386 = vmatprep.subr.bf16.mxu0 %v28532_v56 }
 0x7b8   : > { %5196 = vmatpush1.bf16.msra.mxu1 %v28535_v9  ;;  %5388 = vmatpush1.bf16.msra.mxu0 %v28536_v45 }
 0x7b9   : > { %5198 = vmatprep.subr.bf16.mxu1 %v28537_v52  ;;  %5390 = vmatprep.subr.bf16.mxu0 %v28538_v22 }
 0x7bc   : > { %5200 = vmatpush1.bf16.msra.mxu1 %v28539_v63  ;;  %5392 = vmatpush1.bf16.msra.mxu0 %v28540_v23 }
 0x7bd   : > { %5202 = vmatprep.subr.bf16.mxu1 %v28542_v3  ;;  %5394 = vmatprep.subr.bf16.mxu0 %v28543_v39 }
 0x7c0   : > { %5204 = vmatpush1.bf16.msra.mxu1 %v28544_v61  ;;  %5396 = vmatpush1.bf16.msra.mxu0 %v28545_v41 }
 0x7c1   : > { %5206 = vmatprep.subr.bf16.mxu1 %v28547_v38  ;;  %5398 = vmatprep.subr.bf16.mxu0 %v28548_v17 }
 0x7c4   : > { %5208 = vmatpush1.bf16.msra.mxu1 %v28549_v8  ;;  %5400 = vmatpush1.bf16.msra.mxu0 %v28550_v5 }
 0x7c5   : > { %5210 = vmatprep.subr.bf16.mxu1 %v28551_v29  ;;  %5402 = vmatprep.subr.bf16.mxu0 %v28552_v49 }
 0x7c8   : > { %5212 = vmatpush1.bf16.msra.mxu1 %v28555_v44  ;;  %5404 = vmatpush1.bf16.msra.mxu0 %v28556_v57 }
 0x7c9   : > { %5214 = vmatprep.subr.bf16.mxu1 %v28557_v6  ;;  %5406 = vmatprep.subr.bf16.mxu0 %v28558_v37 }
 0x7cc   : > { %5216 = vmatpush1.bf16.msra.mxu1 %v28559_v10  ;;  %5408 = vmatpush1.bf16.msra.mxu0 %v28560_v16 }
 0x7cf   : > { %3932 = vmatmul.mubr.f32.vlgmr.msra.gmra.mrb[0].mxu1 %v28561_v48  ;;  %4475 = vmatmul.mubr.f32.vlgmr.msra.gmra.mrb[0].mxu0 %v28483_v59 }
 0x8a2   : > { %v3933_v4 = vpop.f32.mrb[0].mxu1  ;;  %v4476_v19 = vpop.f32.mrb[0].mxu0 }
 0x8a3   : > { %v5419_v0 = vadd.f32 %v4476_v19, %v3933_v4  ;;  %v3935_v32 = vpop.f32.mrb[1].mxu1  ;;  %v4478_v14 = vpop.f32.mrb[1].mxu0 }
 0x8a4   : > { %v5420_v13 = vadd.f32 %v4478_v14, %v3935_v32 }
 0x8a6   : > { %v4483_v21 = vcombine.low %v5419_v0, %v5420_v13 }
 0x8a8   : > { %v4490_v15 = vrot.slane %v4483_v21, %v4489_v54 }
 0x8aa   : > { %v4497_v24 = vrot.slane %v4490_v15, %v4489_v54 }
 0x8ac   : > { %v4499_v60 = vadd.f32 %v4497_v24, %v3184_v58 }
 0x8ae   : > { %4504 = vst.msk [vmem:[#allocation2] sm:$0x3] %vm4502_vm14, %v4499_v60 }
 0x8af PF: > { %p25156_p1 = scmp.eq.s32.totalorder %s4621_s25, 1  ;;  %s11997_s14 = smov [#allocation6]  }
 0x8b0   : > { %s4526_s15 = sshll.u32 %s11997_s14, 4  ;;  %s4527_s15 = int_to_ptr.vmem [resolvable:$true] %s4526_s15 }
 0x8b1   : > { %s11931_s16 = scalar_lea.vmem %s4527_s15, 32  ;;  %s11937_s17 = scalar_lea.vmem %s4527_s15, 64 }
 0x8b2   : > { %p11932_p2 = scmp.ne.s32.totalorder %s4527_s15, %s11931_s16  ;;  %p11938_p5 = scmp.lt.s32.totalorder %s4527_s15, %s4527_s15 }
 0x8b3   : > { %p11939_p6 = scmp.lt.s32.totalorder %s11937_s17, %s11931_s16 }
 0x8b4   : > { %p11933_p3 = pnand %p11932_p2, %p25156_p1 }
 0x8b5   : > { %p11940_p7 = por %p11939_p6, %p11938_p5 }
 0x8b6   : > { %p11934_p4 = pneg %p11933_p3 }
 0x8b8   : > { %p11941_p8 = pnand %p11940_p7, %p11934_p4 }
 0x8ba   : > { %11944 = shalt.err (!%p11941_p8)
}
 0x8bb   : > { %s11945_s19 = scalar_lea.hbm %s25195_s5, 32 }
 0x8bc   : > { %p11946_p9 = scmp.ne.s32.totalorder %s25195_s5, %s11945_s19  ;;  %p11951_p12 = scmp.lt.u32.totalorder %s11945_s19, %s25195_s5 }
 0x8be   : > { %p11947_p10 = pnand %p11946_p9, %p25156_p1 }
 0x8c0   : > { %p11948_p11 = pneg %p11947_p10 }
 0x8c2   : > { %p11953_p13 = pnand %p11951_p12, %p11948_p11 }
 0x8c4   : > { %11956 = shalt.err (!%p11953_p13)
}
 0x8c5   : > { %11410 = dma.vmem_to_hbm [thread:$0]  (%p25156_p1), %s4527_s15, 32, %s25195_s5, [#allocation7]  }
 0x8c6 PF: > { %p11418_p0 = scmp.ge.s32.totalorder %s11985_s0, 2  ;;  %p11419_p2 = scmp.eq.s32.totalorder %s4622_s26, 1 }
 0x8c8   : > { %p11414_p3 = pnand %p11419_p2, %p11418_p0 }
 0x8ca   : > { %11972 = dma.done.wait (!%p11414_p3), [#allocation7], 32  }
 0x8cb   : > { %11974 = vsyncadd (!%p11414_p3), [#allocation7], 4294967264  ;;  %s24_s0 = sadd.s32 1, %s11985_s0   ;;  %s28565_s23 = smov %s11981_s24 }
 0x8cc   : > { %p21_p4 = scmp.ge.s32.totalorder %s24_s0, 4   ;;  %s28566_s24 = smov %s28568_s27 }
 0x8ce   :  { %23 = sbr.rel (!%p21_p4) target bundleno = 18 (0x12), region = 92 }
 0x8d5   :  { %4544 = vsyncpa [#allocation7], 1 }
 0x8d6   :  { %4546 = vsyncpa [#allocation7 + $0x1], 1 }

</bundles_post_ra>
